<compile_context>
chip_gen: v7x
topology: tpu7x:2x2x1
jax: 0.10.0
libtpu: 0.0.40
codegen_flags: <defaults>
</compile_context>

<pallas_src>
import functools

import jax
import jax.numpy as jnp
from jax.experimental import pallas as pl
from jax.experimental.pallas import tpu as pltpu


# ----------------------------------------------------------------------------
# Fused kernel
# ----------------------------------------------------------------------------
def _lstm_cell_step(pre_g, h, c, w_hh, H):
    """One LSTM cell step. pre_g: (B,4H) precomputed x@W_ih + b; h,c: (B,H)."""
    g = pre_g + jnp.dot(h, w_hh, preferred_element_type=jnp.float32)  # (B, 4H)
    sg = jax.nn.sigmoid(g)                 # whole 4H slab in one EUP pass
    g_gate = jnp.tanh(g[:, 2 * H:3 * H])
    i_gate = sg[:, 0 * H:1 * H]
    f_gate = sg[:, 1 * H:2 * H]
    o_gate = sg[:, 3 * H:4 * H]
    c_new = f_gate * c + i_gate * g_gate
    h_new = o_gate * jnp.tanh(c_new)
    return h_new, c_new


def _fused_model_kernel(x_ref, wih0_ref, wih_ref, whh_ref, b_ref,
                        w1_ref, b1_ref, w2_ref, b2_ref, o_ref,
                        *, T, B, H, L):
    # x_ref:    (T*B, Din)   time-major, flattened
    # wih0_ref: (Din, 4H)    layer-0 input weights (pre-transposed)
    # wih_ref:  (L-1, H, 4H) layers 1..L-1 input weights
    # whh_ref:  (L, H, 4H)   recurrent weights
    # b_ref:    (L, 1, 4H)   fused biases (b_ih + b_hh)
    # w1_ref:   (H, 2H), b1_ref: (1, 2H)   fc
    # w2_ref:   (2H, O), b2_ref: (1, O)    fc2
    # o_ref:    (B, O)

    def run_layer(pre_gates, w_hh, collect_seq):
        # pre_gates: (T*B, 4H); fresh zero h0/c0 per layer (matches Model.forward
        # re-zeroing h0/c0 for a new batch).
        h = jnp.zeros((B, H), jnp.float32)
        c = jnp.zeros((B, H), jnp.float32)
        hs = []
        for t in range(T):  # T is static -> fully unrolled serial chain
            h, c = _lstm_cell_step(pre_gates[t * B:(t + 1) * B, :], h, c, w_hh, H)
            if collect_seq:
                hs.append(h)
        return jnp.concatenate(hs, axis=0) if collect_seq else h

    # Layer 0: hoisted batched input projection (one (T*B,Din)x(Din,4H) matmul).
    pre = (jnp.dot(x_ref[...], wih0_ref[...], preferred_element_type=jnp.float32)
           + b_ref[0])
    h_seq = run_layer(pre, whh_ref[0], collect_seq=(L > 1))

    # Layers 1..L-1: input projection over the whole sequence, then serial loop.
    for l in range(1, L):
        pre = (jnp.dot(h_seq, wih_ref[l - 1], preferred_element_type=jnp.float32)
               + b_ref[l])
        h_seq = run_layer(pre, whh_ref[l], collect_seq=(l < L - 1))

    # h_seq is now (B, H): last layer's hidden state at t = T-1  (== out[:, -1, :]).
    hid = jnp.dot(h_seq, w1_ref[...], preferred_element_type=jnp.float32) + b1_ref[...]
    y = jnp.dot(hid, w2_ref[...], preferred_element_type=jnp.float32) + b2_ref[...]
    o_ref[...] = y.astype(o_ref.dtype)


def fused_model_call(x2d, params, *, T, B):
    H = params["whh_t"].shape[1]
    L = params["whh_t"].shape[0]
    O = params["w2_t"].shape[1]
    vmem = pl.BlockSpec(memory_space=pltpu.MemorySpace.VMEM)
    kernel = functools.partial(_fused_model_kernel, T=T, B=B, H=H, L=L)
    return pl.pallas_call(
        kernel,
        out_shape=jax.ShapeDtypeStruct((B, O), jnp.float32),
        in_specs=[vmem] * 9,
        out_specs=vmem,
    )(x2d, params["wih0_t"], params["wih_rest_t"], params["whh_t"], params["b"],
      params["w1_t"], params["b1"], params["w2_t"], params["b2"])


# ----------------------------------------------------------------------------
# Parameter construction (PyTorch-style uniform(-1/sqrt(H), 1/sqrt(H)) init),
# stored pre-transposed/stacked so the kernel does plain row-major matmuls.
# ----------------------------------------------------------------------------
def init_params(key, input_dim, hidden_dim, output_dim, num_layers):
    H = hidden_dim
    k_lstm = 1.0 / jnp.sqrt(H)
    wih0 = None
    wih_rest, whh_all, b_all = [], [], []
    for layer in range(num_layers):
        din = input_dim if layer == 0 else H
        key, k1, k2, k3, k4 = jax.random.split(key, 5)
        w_ih = jax.random.uniform(k1, (4 * H, din), jnp.float32, -k_lstm, k_lstm)
        w_hh = jax.random.uniform(k2, (4 * H, H), jnp.float32, -k_lstm, k_lstm)
        b_ih = jax.random.uniform(k3, (4 * H,), jnp.float32, -k_lstm, k_lstm)
        b_hh = jax.random.uniform(k4, (4 * H,), jnp.float32, -k_lstm, k_lstm)
        if layer == 0:
            wih0 = w_ih.T                               # [Din, 4H]
        else:
            wih_rest.append(w_ih.T)                     # [H, 4H]
        whh_all.append(w_hh.T)                          # [H, 4H]
        b_all.append((b_ih + b_hh)[None, :])            # [1, 4H]

    k_fc = 1.0 / jnp.sqrt(H)
    key, k1, k2 = jax.random.split(key, 3)
    w1 = jax.random.uniform(k1, (2 * H, H), jnp.float32, -k_fc, k_fc)
    b1 = jax.random.uniform(k2, (2 * H,), jnp.float32, -k_fc, k_fc)
    k_fc2 = 1.0 / jnp.sqrt(2 * H)
    key, k1, k2 = jax.random.split(key, 3)
    w2 = jax.random.uniform(k1, (output_dim, 2 * H), jnp.float32, -k_fc2, k_fc2)
    b2 = jax.random.uniform(k2, (output_dim,), jnp.float32, -k_fc2, k_fc2)

    return {
        "wih0_t": wih0,                                 # [Din, 4H]
        "wih_rest_t": jnp.stack(wih_rest, axis=0),      # [L-1, H, 4H]
        "whh_t": jnp.stack(whh_all, axis=0),            # [L, H, 4H]
        "b": jnp.stack(b_all, axis=0),                  # [L, 1, 4H]
        "w1_t": w1.T, "b1": b1[None, :],                # [H, 2H], [1, 2H]
        "w2_t": w2.T, "b2": b2[None, :],                # [2H, O], [1, O]
    }


# ----------------------------------------------------------------------------
# Forward pass matching Model.forward (fresh zero h0/c0, last-timestep readout).
# ----------------------------------------------------------------------------
@jax.jit
def model_forward(x, params):
    # x: [B, T, input_dim] (PyTorch batch_first) -> time-major flattened [T*B, Din]
    B, T, Din = x.shape
    x2d = jnp.transpose(x, (1, 0, 2)).reshape(T * B, Din).astype(jnp.float32)
    return fused_model_call(x2d, params, T=T, B=B)


# Pure-JAX reference for a correctness sanity check.
def reference_forward(x, params):
    B, T, _ = x.shape
    L, H = params["whh_t"].shape[0], params["whh_t"].shape[1]
    xs = jnp.transpose(x, (1, 0, 2)).astype(jnp.float32)   # [T, B, Din]
    for l in range(L):
        w_ih = params["wih0_t"] if l == 0 else params["wih_rest_t"][l - 1]
        w_hh = params["whh_t"][l]
        b = params["b"][l]
        h = jnp.zeros((B, H), jnp.float32)
        c = jnp.zeros((B, H), jnp.float32)
        outs = []
        for t in range(T):
            g = xs[t] @ w_ih + h @ w_hh + b
            i = jax.nn.sigmoid(g[:, :H])
            f = jax.nn.sigmoid(g[:, H:2 * H])
            gg = jnp.tanh(g[:, 2 * H:3 * H])
            o = jax.nn.sigmoid(g[:, 3 * H:])
            c = f * c + i * gg
            h = o * jnp.tanh(c)
            outs.append(h)
        xs = jnp.stack(outs, axis=0)
    last = xs[-1]
    hid = last @ params["w1_t"] + params["b1"]
    return hid @ params["w2_t"] + params["b2"]


if __name__ == "__main__":
    batch, seq = 2, 8
    input_dim, hidden_dim, output_dim, num_layers = 16, 32, 8, 10

    key = jax.random.PRNGKey(0)
    key, kx, kp = jax.random.split(key, 3)
    x = jax.random.normal(kx, (batch, seq, input_dim), jnp.float32)
    params = init_params(kp, input_dim, hidden_dim, output_dim, num_layers)

    out = model_forward(x, params)
    out = jax.block_until_ready(out)
    assert out.shape == (batch, output_dim), out.shape

    ref = jax.block_until_ready(reference_forward(x, params))
    assert jnp.allclose(out, ref, atol=2e-3, rtol=2e-3), (out, ref)

    print("KERNEL_OK")
</pallas_src>

<mosaic_0001>
module attributes {stable_mosaic.version = 11 : i64} {
  func.func @_fused_model_kernel(%arg0: memref<16x16xf32, #tpu.memory_space<vmem>>, %arg1: memref<16x128xf32, #tpu.memory_space<vmem>>, %arg2: memref<9x32x128xf32, #tpu.memory_space<vmem>>, %arg3: memref<10x32x128xf32, #tpu.memory_space<vmem>>, %arg4: memref<10x1x128xf32, #tpu.memory_space<vmem>>, %arg5: memref<32x64xf32, #tpu.memory_space<vmem>>, %arg6: memref<1x64xf32, #tpu.memory_space<vmem>>, %arg7: memref<64x8xf32, #tpu.memory_space<vmem>>, %arg8: memref<1x8xf32, #tpu.memory_space<vmem>>, %arg9: memref<2x8xf32, #tpu.memory_space<vmem>>) attributes {dimension_semantics = [], scalar_prefetch = 0 : i64, scratch_operands = 0 : i64, tpu.core_type = #tpu.core_type<tc>} {
    %c0 = arith.constant 0 : index
    %c0_0 = arith.constant 0 : index
    %0 = vector.load %arg0[%c0, %c0_0] : memref<16x16xf32, #tpu.memory_space<vmem>>, vector<16x16xf32>
    %c0_1 = arith.constant 0 : index
    %c0_2 = arith.constant 0 : index
    %1 = vector.load %arg1[%c0_1, %c0_2] : memref<16x128xf32, #tpu.memory_space<vmem>>, vector<16x128xf32>
    %cst = arith.constant dense<0.000000e+00> : vector<16x128xf32>
    %2 = tpu.matmul %0, %1, %cst {dimension_numbers = #tpu.dot_dimension_numbers<[1], [0], [0], [1], [0, 0, 1, 1], [], []>} : vector<16x16xf32>, vector<16x128xf32>, vector<16x128xf32> -> vector<16x128xf32>
    %c0_3 = arith.constant 0 : index
    %c0_4 = arith.constant 0 : index
    %c0_5 = arith.constant 0 : index
    %3 = vector.load %arg4[%c0_3, %c0_4, %c0_5] : memref<10x1x128xf32, #tpu.memory_space<vmem>>, vector<1x1x128xf32>
    %4 = vector.shape_cast %3 : vector<1x1x128xf32> to vector<1x128xf32>
    %5 = vector.broadcast %4 : vector<1x128xf32> to vector<16x128xf32>
    %6 = arith.addf %2, %5 : vector<16x128xf32>
    %c0_6 = arith.constant 0 : index
    %c0_7 = arith.constant 0 : index
    %c0_8 = arith.constant 0 : index
    %7 = vector.load %arg3[%c0_6, %c0_7, %c0_8] : memref<10x32x128xf32, #tpu.memory_space<vmem>>, vector<1x32x128xf32>
    %8 = vector.shape_cast %7 : vector<1x32x128xf32> to vector<32x128xf32>
    %cst_9 = arith.constant 0.000000e+00 : f32
    %9 = vector.broadcast %cst_9 : f32 to vector<2x32xf32>
    %cst_10 = arith.constant 0.000000e+00 : f32
    %10 = vector.broadcast %cst_10 : f32 to vector<2x32xf32>
    %11 = vector.extract_strided_slice %6 {offsets = [0, 0], sizes = [2, 128], strides = [1, 1]} : vector<16x128xf32> to vector<2x128xf32>
    %cst_11 = arith.constant dense<0.000000e+00> : vector<2x128xf32>
    %12 = tpu.matmul %9, %8, %cst_11 {dimension_numbers = #tpu.dot_dimension_numbers<[1], [0], [0], [1], [0, 0, 1, 1], [], []>} : vector<2x32xf32>, vector<32x128xf32>, vector<2x128xf32> -> vector<2x128xf32>
    %13 = arith.addf %11, %12 : vector<2x128xf32>
    %14 = arith.negf %13 : vector<2x128xf32>
    %15 = math.exp %14 : vector<2x128xf32>
    %cst_12 = arith.constant 1.000000e+00 : f32
    %16 = vector.broadcast %cst_12 : f32 to vector<2x128xf32>
    %17 = arith.addf %16, %15 : vector<2x128xf32>
    %18 = arith.divf %16, %17 : vector<2x128xf32>
    %19 = vector.extract_strided_slice %13 {offsets = [0, 64], sizes = [2, 32], strides = [1, 1]} : vector<2x128xf32> to vector<2x32xf32>
    %20 = math.tanh %19 : vector<2x32xf32>
    %21 = vector.extract_strided_slice %18 {offsets = [0, 0], sizes = [2, 32], strides = [1, 1]} : vector<2x128xf32> to vector<2x32xf32>
    %22 = vector.extract_strided_slice %18 {offsets = [0, 32], sizes = [2, 32], strides = [1, 1]} : vector<2x128xf32> to vector<2x32xf32>
    %23 = vector.extract_strided_slice %18 {offsets = [0, 96], sizes = [2, 32], strides = [1, 1]} : vector<2x128xf32> to vector<2x32xf32>
    %24 = arith.mulf %22, %10 : vector<2x32xf32>
    %25 = arith.mulf %21, %20 : vector<2x32xf32>
    %26 = arith.addf %24, %25 : vector<2x32xf32>
    %27 = math.tanh %26 : vector<2x32xf32>
    %28 = arith.mulf %23, %27 : vector<2x32xf32>
    %29 = vector.extract_strided_slice %6 {offsets = [2, 0], sizes = [2, 128], strides = [1, 1]} : vector<16x128xf32> to vector<2x128xf32>
    %cst_13 = arith.constant dense<0.000000e+00> : vector<2x128xf32>
    %30 = tpu.matmul %28, %8, %cst_13 {dimension_numbers = #tpu.dot_dimension_numbers<[1], [0], [0], [1], [0, 0, 1, 1], [], []>} : vector<2x32xf32>, vector<32x128xf32>, vector<2x128xf32> -> vector<2x128xf32>
    %31 = arith.addf %29, %30 : vector<2x128xf32>
    %32 = arith.negf %31 : vector<2x128xf32>
    %33 = math.exp %32 : vector<2x128xf32>
    %cst_14 = arith.constant 1.000000e+00 : f32
    %34 = vector.broadcast %cst_14 : f32 to vector<2x128xf32>
    %35 = arith.addf %34, %33 : vector<2x128xf32>
    %36 = arith.divf %34, %35 : vector<2x128xf32>
    %37 = vector.extract_strided_slice %31 {offsets = [0, 64], sizes = [2, 32], strides = [1, 1]} : vector<2x128xf32> to vector<2x32xf32>
    %38 = math.tanh %37 : vector<2x32xf32>
    %39 = vector.extract_strided_slice %36 {offsets = [0, 0], sizes = [2, 32], strides = [1, 1]} : vector<2x128xf32> to vector<2x32xf32>
    %40 = vector.extract_strided_slice %36 {offsets = [0, 32], sizes = [2, 32], strides = [1, 1]} : vector<2x128xf32> to vector<2x32xf32>
    %41 = vector.extract_strided_slice %36 {offsets = [0, 96], sizes = [2, 32], strides = [1, 1]} : vector<2x128xf32> to vector<2x32xf32>
    %42 = arith.mulf %40, %26 : vector<2x32xf32>
    %43 = arith.mulf %39, %38 : vector<2x32xf32>
    %44 = arith.addf %42, %43 : vector<2x32xf32>
    %45 = math.tanh %44 : vector<2x32xf32>
    %46 = arith.mulf %41, %45 : vector<2x32xf32>
    %47 = vector.extract_strided_slice %6 {offsets = [4, 0], sizes = [2, 128], strides = [1, 1]} : vector<16x128xf32> to vector<2x128xf32>
    %cst_15 = arith.constant dense<0.000000e+00> : vector<2x128xf32>
    %48 = tpu.matmul %46, %8, %cst_15 {dimension_numbers = #tpu.dot_dimension_numbers<[1], [0], [0], [1], [0, 0, 1, 1], [], []>} : vector<2x32xf32>, vector<32x128xf32>, vector<2x128xf32> -> vector<2x128xf32>
    %49 = arith.addf %47, %48 : vector<2x128xf32>
    %50 = arith.negf %49 : vector<2x128xf32>
    %51 = math.exp %50 : vector<2x128xf32>
    %cst_16 = arith.constant 1.000000e+00 : f32
    %52 = vector.broadcast %cst_16 : f32 to vector<2x128xf32>
    %53 = arith.addf %52, %51 : vector<2x128xf32>
    %54 = arith.divf %52, %53 : vector<2x128xf32>
    %55 = vector.extract_strided_slice %49 {offsets = [0, 64], sizes = [2, 32], strides = [1, 1]} : vector<2x128xf32> to vector<2x32xf32>
    %56 = math.tanh %55 : vector<2x32xf32>
    %57 = vector.extract_strided_slice %54 {offsets = [0, 0], sizes = [2, 32], strides = [1, 1]} : vector<2x128xf32> to vector<2x32xf32>
    %58 = vector.extract_strided_slice %54 {offsets = [0, 32], sizes = [2, 32], strides = [1, 1]} : vector<2x128xf32> to vector<2x32xf32>
    %59 = vector.extract_strided_slice %54 {offsets = [0, 96], sizes = [2, 32], strides = [1, 1]} : vector<2x128xf32> to vector<2x32xf32>
    %60 = arith.mulf %58, %44 : vector<2x32xf32>
    %61 = arith.mulf %57, %56 : vector<2x32xf32>
    %62 = arith.addf %60, %61 : vector<2x32xf32>
    %63 = math.tanh %62 : vector<2x32xf32>
    %64 = arith.mulf %59, %63 : vector<2x32xf32>
    %65 = vector.extract_strided_slice %6 {offsets = [6, 0], sizes = [2, 128], strides = [1, 1]} : vector<16x128xf32> to vector<2x128xf32>
    %cst_17 = arith.constant dense<0.000000e+00> : vector<2x128xf32>
    %66 = tpu.matmul %64, %8, %cst_17 {dimension_numbers = #tpu.dot_dimension_numbers<[1], [0], [0], [1], [0, 0, 1, 1], [], []>} : vector<2x32xf32>, vector<32x128xf32>, vector<2x128xf32> -> vector<2x128xf32>
    %67 = arith.addf %65, %66 : vector<2x128xf32>
    %68 = arith.negf %67 : vector<2x128xf32>
    %69 = math.exp %68 : vector<2x128xf32>
    %cst_18 = arith.constant 1.000000e+00 : f32
    %70 = vector.broadcast %cst_18 : f32 to vector<2x128xf32>
    %71 = arith.addf %70, %69 : vector<2x128xf32>
    %72 = arith.divf %70, %71 : vector<2x128xf32>
    %73 = vector.extract_strided_slice %67 {offsets = [0, 64], sizes = [2, 32], strides = [1, 1]} : vector<2x128xf32> to vector<2x32xf32>
    %74 = math.tanh %73 : vector<2x32xf32>
    %75 = vector.extract_strided_slice %72 {offsets = [0, 0], sizes = [2, 32], strides = [1, 1]} : vector<2x128xf32> to vector<2x32xf32>
    %76 = vector.extract_strided_slice %72 {offsets = [0, 32], sizes = [2, 32], strides = [1, 1]} : vector<2x128xf32> to vector<2x32xf32>
    %77 = vector.extract_strided_slice %72 {offsets = [0, 96], sizes = [2, 32], strides = [1, 1]} : vector<2x128xf32> to vector<2x32xf32>
    %78 = arith.mulf %76, %62 : vector<2x32xf32>
    %79 = arith.mulf %75, %74 : vector<2x32xf32>
    %80 = arith.addf %78, %79 : vector<2x32xf32>
    %81 = math.tanh %80 : vector<2x32xf32>
    %82 = arith.mulf %77, %81 : vector<2x32xf32>
    %83 = vector.extract_strided_slice %6 {offsets = [8, 0], sizes = [2, 128], strides = [1, 1]} : vector<16x128xf32> to vector<2x128xf32>
    %cst_19 = arith.constant dense<0.000000e+00> : vector<2x128xf32>
    %84 = tpu.matmul %82, %8, %cst_19 {dimension_numbers = #tpu.dot_dimension_numbers<[1], [0], [0], [1], [0, 0, 1, 1], [], []>} : vector<2x32xf32>, vector<32x128xf32>, vector<2x128xf32> -> vector<2x128xf32>
    %85 = arith.addf %83, %84 : vector<2x128xf32>
    %86 = arith.negf %85 : vector<2x128xf32>
    %87 = math.exp %86 : vector<2x128xf32>
    %cst_20 = arith.constant 1.000000e+00 : f32
    %88 = vector.broadcast %cst_20 : f32 to vector<2x128xf32>
    %89 = arith.addf %88, %87 : vector<2x128xf32>
    %90 = arith.divf %88, %89 : vector<2x128xf32>
    %91 = vector.extract_strided_slice %85 {offsets = [0, 64], sizes = [2, 32], strides = [1, 1]} : vector<2x128xf32> to vector<2x32xf32>
    %92 = math.tanh %91 : vector<2x32xf32>
    %93 = vector.extract_strided_slice %90 {offsets = [0, 0], sizes = [2, 32], strides = [1, 1]} : vector<2x128xf32> to vector<2x32xf32>
    %94 = vector.extract_strided_slice %90 {offsets = [0, 32], sizes = [2, 32], strides = [1, 1]} : vector<2x128xf32> to vector<2x32xf32>
    %95 = vector.extract_strided_slice %90 {offsets = [0, 96], sizes = [2, 32], strides = [1, 1]} : vector<2x128xf32> to vector<2x32xf32>
    %96 = arith.mulf %94, %80 : vector<2x32xf32>
    %97 = arith.mulf %93, %92 : vector<2x32xf32>
    %98 = arith.addf %96, %97 : vector<2x32xf32>
    %99 = math.tanh %98 : vector<2x32xf32>
    %100 = arith.mulf %95, %99 : vector<2x32xf32>
    %101 = vector.extract_strided_slice %6 {offsets = [10, 0], sizes = [2, 128], strides = [1, 1]} : vector<16x128xf32> to vector<2x128xf32>
    %cst_21 = arith.constant dense<0.000000e+00> : vector<2x128xf32>
    %102 = tpu.matmul %100, %8, %cst_21 {dimension_numbers = #tpu.dot_dimension_numbers<[1], [0], [0], [1], [0, 0, 1, 1], [], []>} : vector<2x32xf32>, vector<32x128xf32>, vector<2x128xf32> -> vector<2x128xf32>
    %103 = arith.addf %101, %102 : vector<2x128xf32>
    %104 = arith.negf %103 : vector<2x128xf32>
    %105 = math.exp %104 : vector<2x128xf32>
    %cst_22 = arith.constant 1.000000e+00 : f32
    %106 = vector.broadcast %cst_22 : f32 to vector<2x128xf32>
    %107 = arith.addf %106, %105 : vector<2x128xf32>
    %108 = arith.divf %106, %107 : vector<2x128xf32>
    %109 = vector.extract_strided_slice %103 {offsets = [0, 64], sizes = [2, 32], strides = [1, 1]} : vector<2x128xf32> to vector<2x32xf32>
    %110 = math.tanh %109 : vector<2x32xf32>
    %111 = vector.extract_strided_slice %108 {offsets = [0, 0], sizes = [2, 32], strides = [1, 1]} : vector<2x128xf32> to vector<2x32xf32>
    %112 = vector.extract_strided_slice %108 {offsets = [0, 32], sizes = [2, 32], strides = [1, 1]} : vector<2x128xf32> to vector<2x32xf32>
    %113 = vector.extract_strided_slice %108 {offsets = [0, 96], sizes = [2, 32], strides = [1, 1]} : vector<2x128xf32> to vector<2x32xf32>
    %114 = arith.mulf %112, %98 : vector<2x32xf32>
    %115 = arith.mulf %111, %110 : vector<2x32xf32>
    %116 = arith.addf %114, %115 : vector<2x32xf32>
    %117 = math.tanh %116 : vector<2x32xf32>
    %118 = arith.mulf %113, %117 : vector<2x32xf32>
    %119 = vector.extract_strided_slice %6 {offsets = [12, 0], sizes = [2, 128], strides = [1, 1]} : vector<16x128xf32> to vector<2x128xf32>
    %cst_23 = arith.constant dense<0.000000e+00> : vector<2x128xf32>
    %120 = tpu.matmul %118, %8, %cst_23 {dimension_numbers = #tpu.dot_dimension_numbers<[1], [0], [0], [1], [0, 0, 1, 1], [], []>} : vector<2x32xf32>, vector<32x128xf32>, vector<2x128xf32> -> vector<2x128xf32>
    %121 = arith.addf %119, %120 : vector<2x128xf32>
    %122 = arith.negf %121 : vector<2x128xf32>
    %123 = math.exp %122 : vector<2x128xf32>
    %cst_24 = arith.constant 1.000000e+00 : f32
    %124 = vector.broadcast %cst_24 : f32 to vector<2x128xf32>
    %125 = arith.addf %124, %123 : vector<2x128xf32>
    %126 = arith.divf %124, %125 : vector<2x128xf32>
    %127 = vector.extract_strided_slice %121 {offsets = [0, 64], sizes = [2, 32], strides = [1, 1]} : vector<2x128xf32> to vector<2x32xf32>
    %128 = math.tanh %127 : vector<2x32xf32>
    %129 = vector.extract_strided_slice %126 {offsets = [0, 0], sizes = [2, 32], strides = [1, 1]} : vector<2x128xf32> to vector<2x32xf32>
    %130 = vector.extract_strided_slice %126 {offsets = [0, 32], sizes = [2, 32], strides = [1, 1]} : vector<2x128xf32> to vector<2x32xf32>
    %131 = vector.extract_strided_slice %126 {offsets = [0, 96], sizes = [2, 32], strides = [1, 1]} : vector<2x128xf32> to vector<2x32xf32>
    %132 = arith.mulf %130, %116 : vector<2x32xf32>
    %133 = arith.mulf %129, %128 : vector<2x32xf32>
    %134 = arith.addf %132, %133 : vector<2x32xf32>
    %135 = math.tanh %134 : vector<2x32xf32>
    %136 = arith.mulf %131, %135 : vector<2x32xf32>
    %137 = vector.extract_strided_slice %6 {offsets = [14, 0], sizes = [2, 128], strides = [1, 1]} : vector<16x128xf32> to vector<2x128xf32>
    %cst_25 = arith.constant dense<0.000000e+00> : vector<2x128xf32>
    %138 = tpu.matmul %136, %8, %cst_25 {dimension_numbers = #tpu.dot_dimension_numbers<[1], [0], [0], [1], [0, 0, 1, 1], [], []>} : vector<2x32xf32>, vector<32x128xf32>, vector<2x128xf32> -> vector<2x128xf32>
    %139 = arith.addf %137, %138 : vector<2x128xf32>
    %140 = arith.negf %139 : vector<2x128xf32>
    %141 = math.exp %140 : vector<2x128xf32>
    %cst_26 = arith.constant 1.000000e+00 : f32
    %142 = vector.broadcast %cst_26 : f32 to vector<2x128xf32>
    %143 = arith.addf %142, %141 : vector<2x128xf32>
    %144 = arith.divf %142, %143 : vector<2x128xf32>
    %145 = vector.extract_strided_slice %139 {offsets = [0, 64], sizes = [2, 32], strides = [1, 1]} : vector<2x128xf32> to vector<2x32xf32>
    %146 = math.tanh %145 : vector<2x32xf32>
    %147 = vector.extract_strided_slice %144 {offsets = [0, 0], sizes = [2, 32], strides = [1, 1]} : vector<2x128xf32> to vector<2x32xf32>
    %148 = vector.extract_strided_slice %144 {offsets = [0, 32], sizes = [2, 32], strides = [1, 1]} : vector<2x128xf32> to vector<2x32xf32>
    %149 = vector.extract_strided_slice %144 {offsets = [0, 96], sizes = [2, 32], strides = [1, 1]} : vector<2x128xf32> to vector<2x32xf32>
    %150 = arith.mulf %148, %134 : vector<2x32xf32>
    %151 = arith.mulf %147, %146 : vector<2x32xf32>
    %152 = arith.addf %150, %151 : vector<2x32xf32>
    %153 = math.tanh %152 : vector<2x32xf32>
    %154 = arith.mulf %149, %153 : vector<2x32xf32>
    %155 = tpu.concatenate %28, %46, %64, %82, %100, %118, %136, %154 in 0 : vector<2x32xf32>, vector<2x32xf32>, vector<2x32xf32>, vector<2x32xf32>, vector<2x32xf32>, vector<2x32xf32>, vector<2x32xf32>, vector<2x32xf32> -> vector<16x32xf32>
    %c0_27 = arith.constant 0 : index
    %c0_28 = arith.constant 0 : index
    %c0_29 = arith.constant 0 : index
    %156 = vector.load %arg2[%c0_27, %c0_28, %c0_29] : memref<9x32x128xf32, #tpu.memory_space<vmem>>, vector<1x32x128xf32>
    %157 = vector.shape_cast %156 : vector<1x32x128xf32> to vector<32x128xf32>
    %cst_30 = arith.constant dense<0.000000e+00> : vector<16x128xf32>
    %158 = tpu.matmul %155, %157, %cst_30 {dimension_numbers = #tpu.dot_dimension_numbers<[1], [0], [0], [1], [0, 0, 1, 1], [], []>} : vector<16x32xf32>, vector<32x128xf32>, vector<16x128xf32> -> vector<16x128xf32>
    %c1 = arith.constant 1 : index
    %c0_31 = arith.constant 0 : index
    %c0_32 = arith.constant 0 : index
    %159 = vector.load %arg4[%c1, %c0_31, %c0_32] : memref<10x1x128xf32, #tpu.memory_space<vmem>>, vector<1x1x128xf32>
    %160 = vector.shape_cast %159 : vector<1x1x128xf32> to vector<1x128xf32>
    %161 = vector.broadcast %160 : vector<1x128xf32> to vector<16x128xf32>
    %162 = arith.addf %158, %161 : vector<16x128xf32>
    %c1_33 = arith.constant 1 : index
    %c0_34 = arith.constant 0 : index
    %c0_35 = arith.constant 0 : index
    %163 = vector.load %arg3[%c1_33, %c0_34, %c0_35] : memref<10x32x128xf32, #tpu.memory_space<vmem>>, vector<1x32x128xf32>
    %164 = vector.shape_cast %163 : vector<1x32x128xf32> to vector<32x128xf32>
    %cst_36 = arith.constant 0.000000e+00 : f32
    %165 = vector.broadcast %cst_36 : f32 to vector<2x32xf32>
    %cst_37 = arith.constant 0.000000e+00 : f32
    %166 = vector.broadcast %cst_37 : f32 to vector<2x32xf32>
    %167 = vector.extract_strided_slice %162 {offsets = [0, 0], sizes = [2, 128], strides = [1, 1]} : vector<16x128xf32> to vector<2x128xf32>
    %cst_38 = arith.constant dense<0.000000e+00> : vector<2x128xf32>
    %168 = tpu.matmul %165, %164, %cst_38 {dimension_numbers = #tpu.dot_dimension_numbers<[1], [0], [0], [1], [0, 0, 1, 1], [], []>} : vector<2x32xf32>, vector<32x128xf32>, vector<2x128xf32> -> vector<2x128xf32>
    %169 = arith.addf %167, %168 : vector<2x128xf32>
    %170 = arith.negf %169 : vector<2x128xf32>
    %171 = math.exp %170 : vector<2x128xf32>
    %cst_39 = arith.constant 1.000000e+00 : f32
    %172 = vector.broadcast %cst_39 : f32 to vector<2x128xf32>
    %173 = arith.addf %172, %171 : vector<2x128xf32>
    %174 = arith.divf %172, %173 : vector<2x128xf32>
    %175 = vector.extract_strided_slice %169 {offsets = [0, 64], sizes = [2, 32], strides = [1, 1]} : vector<2x128xf32> to vector<2x32xf32>
    %176 = math.tanh %175 : vector<2x32xf32>
    %177 = vector.extract_strided_slice %174 {offsets = [0, 0], sizes = [2, 32], strides = [1, 1]} : vector<2x128xf32> to vector<2x32xf32>
    %178 = vector.extract_strided_slice %174 {offsets = [0, 32], sizes = [2, 32], strides = [1, 1]} : vector<2x128xf32> to vector<2x32xf32>
    %179 = vector.extract_strided_slice %174 {offsets = [0, 96], sizes = [2, 32], strides = [1, 1]} : vector<2x128xf32> to vector<2x32xf32>
    %180 = arith.mulf %178, %166 : vector<2x32xf32>
    %181 = arith.mulf %177, %176 : vector<2x32xf32>
    %182 = arith.addf %180, %181 : vector<2x32xf32>
    %183 = math.tanh %182 : vector<2x32xf32>
    %184 = arith.mulf %179, %183 : vector<2x32xf32>
    %185 = vector.extract_strided_slice %162 {offsets = [2, 0], sizes = [2, 128], strides = [1, 1]} : vector<16x128xf32> to vector<2x128xf32>
    %cst_40 = arith.constant dense<0.000000e+00> : vector<2x128xf32>
    %186 = tpu.matmul %184, %164, %cst_40 {dimension_numbers = #tpu.dot_dimension_numbers<[1], [0], [0], [1], [0, 0, 1, 1], [], []>} : vector<2x32xf32>, vector<32x128xf32>, vector<2x128xf32> -> vector<2x128xf32>
    %187 = arith.addf %185, %186 : vector<2x128xf32>
    %188 = arith.negf %187 : vector<2x128xf32>
    %189 = math.exp %188 : vector<2x128xf32>
    %cst_41 = arith.constant 1.000000e+00 : f32
    %190 = vector.broadcast %cst_41 : f32 to vector<2x128xf32>
    %191 = arith.addf %190, %189 : vector<2x128xf32>
    %192 = arith.divf %190, %191 : vector<2x128xf32>
    %193 = vector.extract_strided_slice %187 {offsets = [0, 64], sizes = [2, 32], strides = [1, 1]} : vector<2x128xf32> to vector<2x32xf32>
    %194 = math.tanh %193 : vector<2x32xf32>
    %195 = vector.extract_strided_slice %192 {offsets = [0, 0], sizes = [2, 32], strides = [1, 1]} : vector<2x128xf32> to vector<2x32xf32>
    %196 = vector.extract_strided_slice %192 {offsets = [0, 32], sizes = [2, 32], strides = [1, 1]} : vector<2x128xf32> to vector<2x32xf32>
    %197 = vector.extract_strided_slice %192 {offsets = [0, 96], sizes = [2, 32], strides = [1, 1]} : vector<2x128xf32> to vector<2x32xf32>
    %198 = arith.mulf %196, %182 : vector<2x32xf32>
    %199 = arith.mulf %195, %194 : vector<2x32xf32>
    %200 = arith.addf %198, %199 : vector<2x32xf32>
    %201 = math.tanh %200 : vector<2x32xf32>
    %202 = arith.mulf %197, %201 : vector<2x32xf32>
    %203 = vector.extract_strided_slice %162 {offsets = [4, 0], sizes = [2, 128], strides = [1, 1]} : vector<16x128xf32> to vector<2x128xf32>
    %cst_42 = arith.constant dense<0.000000e+00> : vector<2x128xf32>
    %204 = tpu.matmul %202, %164, %cst_42 {dimension_numbers = #tpu.dot_dimension_numbers<[1], [0], [0], [1], [0, 0, 1, 1], [], []>} : vector<2x32xf32>, vector<32x128xf32>, vector<2x128xf32> -> vector<2x128xf32>
    %205 = arith.addf %203, %204 : vector<2x128xf32>
    %206 = arith.negf %205 : vector<2x128xf32>
    %207 = math.exp %206 : vector<2x128xf32>
    %cst_43 = arith.constant 1.000000e+00 : f32
    %208 = vector.broadcast %cst_43 : f32 to vector<2x128xf32>
    %209 = arith.addf %208, %207 : vector<2x128xf32>
    %210 = arith.divf %208, %209 : vector<2x128xf32>
    %211 = vector.extract_strided_slice %205 {offsets = [0, 64], sizes = [2, 32], strides = [1, 1]} : vector<2x128xf32> to vector<2x32xf32>
    %212 = math.tanh %211 : vector<2x32xf32>
    %213 = vector.extract_strided_slice %210 {offsets = [0, 0], sizes = [2, 32], strides = [1, 1]} : vector<2x128xf32> to vector<2x32xf32>
    %214 = vector.extract_strided_slice %210 {offsets = [0, 32], sizes = [2, 32], strides = [1, 1]} : vector<2x128xf32> to vector<2x32xf32>
    %215 = vector.extract_strided_slice %210 {offsets = [0, 96], sizes = [2, 32], strides = [1, 1]} : vector<2x128xf32> to vector<2x32xf32>
    %216 = arith.mulf %214, %200 : vector<2x32xf32>
    %217 = arith.mulf %213, %212 : vector<2x32xf32>
    %218 = arith.addf %216, %217 : vector<2x32xf32>
    %219 = math.tanh %218 : vector<2x32xf32>
    %220 = arith.mulf %215, %219 : vector<2x32xf32>
    %221 = vector.extract_strided_slice %162 {offsets = [6, 0], sizes = [2, 128], strides = [1, 1]} : vector<16x128xf32> to vector<2x128xf32>
    %cst_44 = arith.constant dense<0.000000e+00> : vector<2x128xf32>
    %222 = tpu.matmul %220, %164, %cst_44 {dimension_numbers = #tpu.dot_dimension_numbers<[1], [0], [0], [1], [0, 0, 1, 1], [], []>} : vector<2x32xf32>, vector<32x128xf32>, vector<2x128xf32> -> vector<2x128xf32>
    %223 = arith.addf %221, %222 : vector<2x128xf32>
    %224 = arith.negf %223 : vector<2x128xf32>
    %225 = math.exp %224 : vector<2x128xf32>
    %cst_45 = arith.constant 1.000000e+00 : f32
    %226 = vector.broadcast %cst_45 : f32 to vector<2x128xf32>
    %227 = arith.addf %226, %225 : vector<2x128xf32>
    %228 = arith.divf %226, %227 : vector<2x128xf32>
    %229 = vector.extract_strided_slice %223 {offsets = [0, 64], sizes = [2, 32], strides = [1, 1]} : vector<2x128xf32> to vector<2x32xf32>
    %230 = math.tanh %229 : vector<2x32xf32>
    %231 = vector.extract_strided_slice %228 {offsets = [0, 0], sizes = [2, 32], strides = [1, 1]} : vector<2x128xf32> to vector<2x32xf32>
    %232 = vector.extract_strided_slice %228 {offsets = [0, 32], sizes = [2, 32], strides = [1, 1]} : vector<2x128xf32> to vector<2x32xf32>
    %233 = vector.extract_strided_slice %228 {offsets = [0, 96], sizes = [2, 32], strides = [1, 1]} : vector<2x128xf32> to vector<2x32xf32>
    %234 = arith.mulf %232, %218 : vector<2x32xf32>
    %235 = arith.mulf %231, %230 : vector<2x32xf32>
    %236 = arith.addf %234, %235 : vector<2x32xf32>
    %237 = math.tanh %236 : vector<2x32xf32>
    %238 = arith.mulf %233, %237 : vector<2x32xf32>
    %239 = vector.extract_strided_slice %162 {offsets = [8, 0], sizes = [2, 128], strides = [1, 1]} : vector<16x128xf32> to vector<2x128xf32>
    %cst_46 = arith.constant dense<0.000000e+00> : vector<2x128xf32>
    %240 = tpu.matmul %238, %164, %cst_46 {dimension_numbers = #tpu.dot_dimension_numbers<[1], [0], [0], [1], [0, 0, 1, 1], [], []>} : vector<2x32xf32>, vector<32x128xf32>, vector<2x128xf32> -> vector<2x128xf32>
    %241 = arith.addf %239, %240 : vector<2x128xf32>
    %242 = arith.negf %241 : vector<2x128xf32>
    %243 = math.exp %242 : vector<2x128xf32>
    %cst_47 = arith.constant 1.000000e+00 : f32
    %244 = vector.broadcast %cst_47 : f32 to vector<2x128xf32>
    %245 = arith.addf %244, %243 : vector<2x128xf32>
    %246 = arith.divf %244, %245 : vector<2x128xf32>
    %247 = vector.extract_strided_slice %241 {offsets = [0, 64], sizes = [2, 32], strides = [1, 1]} : vector<2x128xf32> to vector<2x32xf32>
    %248 = math.tanh %247 : vector<2x32xf32>
    %249 = vector.extract_strided_slice %246 {offsets = [0, 0], sizes = [2, 32], strides = [1, 1]} : vector<2x128xf32> to vector<2x32xf32>
    %250 = vector.extract_strided_slice %246 {offsets = [0, 32], sizes = [2, 32], strides = [1, 1]} : vector<2x128xf32> to vector<2x32xf32>
    %251 = vector.extract_strided_slice %246 {offsets = [0, 96], sizes = [2, 32], strides = [1, 1]} : vector<2x128xf32> to vector<2x32xf32>
    %252 = arith.mulf %250, %236 : vector<2x32xf32>
    %253 = arith.mulf %249, %248 : vector<2x32xf32>
    %254 = arith.addf %252, %253 : vector<2x32xf32>
    %255 = math.tanh %254 : vector<2x32xf32>
    %256 = arith.mulf %251, %255 : vector<2x32xf32>
    %257 = vector.extract_strided_slice %162 {offsets = [10, 0], sizes = [2, 128], strides = [1, 1]} : vector<16x128xf32> to vector<2x128xf32>
    %cst_48 = arith.constant dense<0.000000e+00> : vector<2x128xf32>
    %258 = tpu.matmul %256, %164, %cst_48 {dimension_numbers = #tpu.dot_dimension_numbers<[1], [0], [0], [1], [0, 0, 1, 1], [], []>} : vector<2x32xf32>, vector<32x128xf32>, vector<2x128xf32> -> vector<2x128xf32>
    %259 = arith.addf %257, %258 : vector<2x128xf32>
    %260 = arith.negf %259 : vector<2x128xf32>
    %261 = math.exp %260 : vector<2x128xf32>
    %cst_49 = arith.constant 1.000000e+00 : f32
    %262 = vector.broadcast %cst_49 : f32 to vector<2x128xf32>
    %263 = arith.addf %262, %261 : vector<2x128xf32>
    %264 = arith.divf %262, %263 : vector<2x128xf32>
    %265 = vector.extract_strided_slice %259 {offsets = [0, 64], sizes = [2, 32], strides = [1, 1]} : vector<2x128xf32> to vector<2x32xf32>
    %266 = math.tanh %265 : vector<2x32xf32>
    %267 = vector.extract_strided_slice %264 {offsets = [0, 0], sizes = [2, 32], strides = [1, 1]} : vector<2x128xf32> to vector<2x32xf32>
    %268 = vector.extract_strided_slice %264 {offsets = [0, 32], sizes = [2, 32], strides = [1, 1]} : vector<2x128xf32> to vector<2x32xf32>
    %269 = vector.extract_strided_slice %264 {offsets = [0, 96], sizes = [2, 32], strides = [1, 1]} : vector<2x128xf32> to vector<2x32xf32>
    %270 = arith.mulf %268, %254 : vector<2x32xf32>
    %271 = arith.mulf %267, %266 : vector<2x32xf32>
    %272 = arith.addf %270, %271 : vector<2x32xf32>
    %273 = math.tanh %272 : vector<2x32xf32>
    %274 = arith.mulf %269, %273 : vector<2x32xf32>
    %275 = vector.extract_strided_slice %162 {offsets = [12, 0], sizes = [2, 128], strides = [1, 1]} : vector<16x128xf32> to vector<2x128xf32>
    %cst_50 = arith.constant dense<0.000000e+00> : vector<2x128xf32>
    %276 = tpu.matmul %274, %164, %cst_50 {dimension_numbers = #tpu.dot_dimension_numbers<[1], [0], [0], [1], [0, 0, 1, 1], [], []>} : vector<2x32xf32>, vector<32x128xf32>, vector<2x128xf32> -> vector<2x128xf32>
    %277 = arith.addf %275, %276 : vector<2x128xf32>
    %278 = arith.negf %277 : vector<2x128xf32>
    %279 = math.exp %278 : vector<2x128xf32>
    %cst_51 = arith.constant 1.000000e+00 : f32
    %280 = vector.broadcast %cst_51 : f32 to vector<2x128xf32>
    %281 = arith.addf %280, %279 : vector<2x128xf32>
    %282 = arith.divf %280, %281 : vector<2x128xf32>
    %283 = vector.extract_strided_slice %277 {offsets = [0, 64], sizes = [2, 32], strides = [1, 1]} : vector<2x128xf32> to vector<2x32xf32>
    %284 = math.tanh %283 : vector<2x32xf32>
    %285 = vector.extract_strided_slice %282 {offsets = [0, 0], sizes = [2, 32], strides = [1, 1]} : vector<2x128xf32> to vector<2x32xf32>
    %286 = vector.extract_strided_slice %282 {offsets = [0, 32], sizes = [2, 32], strides = [1, 1]} : vector<2x128xf32> to vector<2x32xf32>
    %287 = vector.extract_strided_slice %282 {offsets = [0, 96], sizes = [2, 32], strides = [1, 1]} : vector<2x128xf32> to vector<2x32xf32>
    %288 = arith.mulf %286, %272 : vector<2x32xf32>
    %289 = arith.mulf %285, %284 : vector<2x32xf32>
    %290 = arith.addf %288, %289 : vector<2x32xf32>
    %291 = math.tanh %290 : vector<2x32xf32>
    %292 = arith.mulf %287, %291 : vector<2x32xf32>
    %293 = vector.extract_strided_slice %162 {offsets = [14, 0], sizes = [2, 128], strides = [1, 1]} : vector<16x128xf32> to vector<2x128xf32>
    %cst_52 = arith.constant dense<0.000000e+00> : vector<2x128xf32>
    %294 = tpu.matmul %292, %164, %cst_52 {dimension_numbers = #tpu.dot_dimension_numbers<[1], [0], [0], [1], [0, 0, 1, 1], [], []>} : vector<2x32xf32>, vector<32x128xf32>, vector<2x128xf32> -> vector<2x128xf32>
    %295 = arith.addf %293, %294 : vector<2x128xf32>
    %296 = arith.negf %295 : vector<2x128xf32>
    %297 = math.exp %296 : vector<2x128xf32>
    %cst_53 = arith.constant 1.000000e+00 : f32
    %298 = vector.broadcast %cst_53 : f32 to vector<2x128xf32>
    %299 = arith.addf %298, %297 : vector<2x128xf32>
    %300 = arith.divf %298, %299 : vector<2x128xf32>
    %301 = vector.extract_strided_slice %295 {offsets = [0, 64], sizes = [2, 32], strides = [1, 1]} : vector<2x128xf32> to vector<2x32xf32>
    %302 = math.tanh %301 : vector<2x32xf32>
    %303 = vector.extract_strided_slice %300 {offsets = [0, 0], sizes = [2, 32], strides = [1, 1]} : vector<2x128xf32> to vector<2x32xf32>
    %304 = vector.extract_strided_slice %300 {offsets = [0, 32], sizes = [2, 32], strides = [1, 1]} : vector<2x128xf32> to vector<2x32xf32>
    %305 = vector.extract_strided_slice %300 {offsets = [0, 96], sizes = [2, 32], strides = [1, 1]} : vector<2x128xf32> to vector<2x32xf32>
    %306 = arith.mulf %304, %290 : vector<2x32xf32>
    %307 = arith.mulf %303, %302 : vector<2x32xf32>
    %308 = arith.addf %306, %307 : vector<2x32xf32>
    %309 = math.tanh %308 : vector<2x32xf32>
    %310 = arith.mulf %305, %309 : vector<2x32xf32>
    %311 = tpu.concatenate %184, %202, %220, %238, %256, %274, %292, %310 in 0 : vector<2x32xf32>, vector<2x32xf32>, vector<2x32xf32>, vector<2x32xf32>, vector<2x32xf32>, vector<2x32xf32>, vector<2x32xf32>, vector<2x32xf32> -> vector<16x32xf32>
    %c1_54 = arith.constant 1 : index
    %c0_55 = arith.constant 0 : index
    %c0_56 = arith.constant 0 : index
    %312 = vector.load %arg2[%c1_54, %c0_55, %c0_56] : memref<9x32x128xf32, #tpu.memory_space<vmem>>, vector<1x32x128xf32>
    %313 = vector.shape_cast %312 : vector<1x32x128xf32> to vector<32x128xf32>
    %cst_57 = arith.constant dense<0.000000e+00> : vector<16x128xf32>
    %314 = tpu.matmul %311, %313, %cst_57 {dimension_numbers = #tpu.dot_dimension_numbers<[1], [0], [0], [1], [0, 0, 1, 1], [], []>} : vector<16x32xf32>, vector<32x128xf32>, vector<16x128xf32> -> vector<16x128xf32>
    %c2 = arith.constant 2 : index
    %c0_58 = arith.constant 0 : index
    %c0_59 = arith.constant 0 : index
    %315 = vector.load %arg4[%c2, %c0_58, %c0_59] : memref<10x1x128xf32, #tpu.memory_space<vmem>>, vector<1x1x128xf32>
    %316 = vector.shape_cast %315 : vector<1x1x128xf32> to vector<1x128xf32>
    %317 = vector.broadcast %316 : vector<1x128xf32> to vector<16x128xf32>
    %318 = arith.addf %314, %317 : vector<16x128xf32>
    %c2_60 = arith.constant 2 : index
    %c0_61 = arith.constant 0 : index
    %c0_62 = arith.constant 0 : index
    %319 = vector.load %arg3[%c2_60, %c0_61, %c0_62] : memref<10x32x128xf32, #tpu.memory_space<vmem>>, vector<1x32x128xf32>
    %320 = vector.shape_cast %319 : vector<1x32x128xf32> to vector<32x128xf32>
    %cst_63 = arith.constant 0.000000e+00 : f32
    %321 = vector.broadcast %cst_63 : f32 to vector<2x32xf32>
    %cst_64 = arith.constant 0.000000e+00 : f32
    %322 = vector.broadcast %cst_64 : f32 to vector<2x32xf32>
    %323 = vector.extract_strided_slice %318 {offsets = [0, 0], sizes = [2, 128], strides = [1, 1]} : vector<16x128xf32> to vector<2x128xf32>
    %cst_65 = arith.constant dense<0.000000e+00> : vector<2x128xf32>
    %324 = tpu.matmul %321, %320, %cst_65 {dimension_numbers = #tpu.dot_dimension_numbers<[1], [0], [0], [1], [0, 0, 1, 1], [], []>} : vector<2x32xf32>, vector<32x128xf32>, vector<2x128xf32> -> vector<2x128xf32>
    %325 = arith.addf %323, %324 : vector<2x128xf32>
    %326 = arith.negf %325 : vector<2x128xf32>
    %327 = math.exp %326 : vector<2x128xf32>
    %cst_66 = arith.constant 1.000000e+00 : f32
    %328 = vector.broadcast %cst_66 : f32 to vector<2x128xf32>
    %329 = arith.addf %328, %327 : vector<2x128xf32>
    %330 = arith.divf %328, %329 : vector<2x128xf32>
    %331 = vector.extract_strided_slice %325 {offsets = [0, 64], sizes = [2, 32], strides = [1, 1]} : vector<2x128xf32> to vector<2x32xf32>
    %332 = math.tanh %331 : vector<2x32xf32>
    %333 = vector.extract_strided_slice %330 {offsets = [0, 0], sizes = [2, 32], strides = [1, 1]} : vector<2x128xf32> to vector<2x32xf32>
    %334 = vector.extract_strided_slice %330 {offsets = [0, 32], sizes = [2, 32], strides = [1, 1]} : vector<2x128xf32> to vector<2x32xf32>
    %335 = vector.extract_strided_slice %330 {offsets = [0, 96], sizes = [2, 32], strides = [1, 1]} : vector<2x128xf32> to vector<2x32xf32>
    %336 = arith.mulf %334, %322 : vector<2x32xf32>
    %337 = arith.mulf %333, %332 : vector<2x32xf32>
    %338 = arith.addf %336, %337 : vector<2x32xf32>
    %339 = math.tanh %338 : vector<2x32xf32>
    %340 = arith.mulf %335, %339 : vector<2x32xf32>
    %341 = vector.extract_strided_slice %318 {offsets = [2, 0], sizes = [2, 128], strides = [1, 1]} : vector<16x128xf32> to vector<2x128xf32>
    %cst_67 = arith.constant dense<0.000000e+00> : vector<2x128xf32>
    %342 = tpu.matmul %340, %320, %cst_67 {dimension_numbers = #tpu.dot_dimension_numbers<[1], [0], [0], [1], [0, 0, 1, 1], [], []>} : vector<2x32xf32>, vector<32x128xf32>, vector<2x128xf32> -> vector<2x128xf32>
    %343 = arith.addf %341, %342 : vector<2x128xf32>
    %344 = arith.negf %343 : vector<2x128xf32>
    %345 = math.exp %344 : vector<2x128xf32>
    %cst_68 = arith.constant 1.000000e+00 : f32
    %346 = vector.broadcast %cst_68 : f32 to vector<2x128xf32>
    %347 = arith.addf %346, %345 : vector<2x128xf32>
    %348 = arith.divf %346, %347 : vector<2x128xf32>
    %349 = vector.extract_strided_slice %343 {offsets = [0, 64], sizes = [2, 32], strides = [1, 1]} : vector<2x128xf32> to vector<2x32xf32>
    %350 = math.tanh %349 : vector<2x32xf32>
    %351 = vector.extract_strided_slice %348 {offsets = [0, 0], sizes = [2, 32], strides = [1, 1]} : vector<2x128xf32> to vector<2x32xf32>
    %352 = vector.extract_strided_slice %348 {offsets = [0, 32], sizes = [2, 32], strides = [1, 1]} : vector<2x128xf32> to vector<2x32xf32>
    %353 = vector.extract_strided_slice %348 {offsets = [0, 96], sizes = [2, 32], strides = [1, 1]} : vector<2x128xf32> to vector<2x32xf32>
    %354 = arith.mulf %352, %338 : vector<2x32xf32>
    %355 = arith.mulf %351, %350 : vector<2x32xf32>
    %356 = arith.addf %354, %355 : vector<2x32xf32>
    %357 = math.tanh %356 : vector<2x32xf32>
    %358 = arith.mulf %353, %357 : vector<2x32xf32>
    %359 = vector.extract_strided_slice %318 {offsets = [4, 0], sizes = [2, 128], strides = [1, 1]} : vector<16x128xf32> to vector<2x128xf32>
    %cst_69 = arith.constant dense<0.000000e+00> : vector<2x128xf32>
    %360 = tpu.matmul %358, %320, %cst_69 {dimension_numbers = #tpu.dot_dimension_numbers<[1], [0], [0], [1], [0, 0, 1, 1], [], []>} : vector<2x32xf32>, vector<32x128xf32>, vector<2x128xf32> -> vector<2x128xf32>
    %361 = arith.addf %359, %360 : vector<2x128xf32>
    %362 = arith.negf %361 : vector<2x128xf32>
    %363 = math.exp %362 : vector<2x128xf32>
    %cst_70 = arith.constant 1.000000e+00 : f32
    %364 = vector.broadcast %cst_70 : f32 to vector<2x128xf32>
    %365 = arith.addf %364, %363 : vector<2x128xf32>
    %366 = arith.divf %364, %365 : vector<2x128xf32>
    %367 = vector.extract_strided_slice %361 {offsets = [0, 64], sizes = [2, 32], strides = [1, 1]} : vector<2x128xf32> to vector<2x32xf32>
    %368 = math.tanh %367 : vector<2x32xf32>
    %369 = vector.extract_strided_slice %366 {offsets = [0, 0], sizes = [2, 32], strides = [1, 1]} : vector<2x128xf32> to vector<2x32xf32>
    %370 = vector.extract_strided_slice %366 {offsets = [0, 32], sizes = [2, 32], strides = [1, 1]} : vector<2x128xf32> to vector<2x32xf32>
    %371 = vector.extract_strided_slice %366 {offsets = [0, 96], sizes = [2, 32], strides = [1, 1]} : vector<2x128xf32> to vector<2x32xf32>
    %372 = arith.mulf %370, %356 : vector<2x32xf32>
    %373 = arith.mulf %369, %368 : vector<2x32xf32>
    %374 = arith.addf %372, %373 : vector<2x32xf32>
    %375 = math.tanh %374 : vector<2x32xf32>
    %376 = arith.mulf %371, %375 : vector<2x32xf32>
    %377 = vector.extract_strided_slice %318 {offsets = [6, 0], sizes = [2, 128], strides = [1, 1]} : vector<16x128xf32> to vector<2x128xf32>
    %cst_71 = arith.constant dense<0.000000e+00> : vector<2x128xf32>
    %378 = tpu.matmul %376, %320, %cst_71 {dimension_numbers = #tpu.dot_dimension_numbers<[1], [0], [0], [1], [0, 0, 1, 1], [], []>} : vector<2x32xf32>, vector<32x128xf32>, vector<2x128xf32> -> vector<2x128xf32>
    %379 = arith.addf %377, %378 : vector<2x128xf32>
    %380 = arith.negf %379 : vector<2x128xf32>
    %381 = math.exp %380 : vector<2x128xf32>
    %cst_72 = arith.constant 1.000000e+00 : f32
    %382 = vector.broadcast %cst_72 : f32 to vector<2x128xf32>
    %383 = arith.addf %382, %381 : vector<2x128xf32>
    %384 = arith.divf %382, %383 : vector<2x128xf32>
    %385 = vector.extract_strided_slice %379 {offsets = [0, 64], sizes = [2, 32], strides = [1, 1]} : vector<2x128xf32> to vector<2x32xf32>
    %386 = math.tanh %385 : vector<2x32xf32>
    %387 = vector.extract_strided_slice %384 {offsets = [0, 0], sizes = [2, 32], strides = [1, 1]} : vector<2x128xf32> to vector<2x32xf32>
    %388 = vector.extract_strided_slice %384 {offsets = [0, 32], sizes = [2, 32], strides = [1, 1]} : vector<2x128xf32> to vector<2x32xf32>
    %389 = vector.extract_strided_slice %384 {offsets = [0, 96], sizes = [2, 32], strides = [1, 1]} : vector<2x128xf32> to vector<2x32xf32>
    %390 = arith.mulf %388, %374 : vector<2x32xf32>
    %391 = arith.mulf %387, %386 : vector<2x32xf32>
    %392 = arith.addf %390, %391 : vector<2x32xf32>
    %393 = math.tanh %392 : vector<2x32xf32>
    %394 = arith.mulf %389, %393 : vector<2x32xf32>
    %395 = vector.extract_strided_slice %318 {offsets = [8, 0], sizes = [2, 128], strides = [1, 1]} : vector<16x128xf32> to vector<2x128xf32>
    %cst_73 = arith.constant dense<0.000000e+00> : vector<2x128xf32>
    %396 = tpu.matmul %394, %320, %cst_73 {dimension_numbers = #tpu.dot_dimension_numbers<[1], [0], [0], [1], [0, 0, 1, 1], [], []>} : vector<2x32xf32>, vector<32x128xf32>, vector<2x128xf32> -> vector<2x128xf32>
    %397 = arith.addf %395, %396 : vector<2x128xf32>
    %398 = arith.negf %397 : vector<2x128xf32>
    %399 = math.exp %398 : vector<2x128xf32>
    %cst_74 = arith.constant 1.000000e+00 : f32
    %400 = vector.broadcast %cst_74 : f32 to vector<2x128xf32>
    %401 = arith.addf %400, %399 : vector<2x128xf32>
    %402 = arith.divf %400, %401 : vector<2x128xf32>
    %403 = vector.extract_strided_slice %397 {offsets = [0, 64], sizes = [2, 32], strides = [1, 1]} : vector<2x128xf32> to vector<2x32xf32>
    %404 = math.tanh %403 : vector<2x32xf32>
    %405 = vector.extract_strided_slice %402 {offsets = [0, 0], sizes = [2, 32], strides = [1, 1]} : vector<2x128xf32> to vector<2x32xf32>
    %406 = vector.extract_strided_slice %402 {offsets = [0, 32], sizes = [2, 32], strides = [1, 1]} : vector<2x128xf32> to vector<2x32xf32>
    %407 = vector.extract_strided_slice %402 {offsets = [0, 96], sizes = [2, 32], strides = [1, 1]} : vector<2x128xf32> to vector<2x32xf32>
    %408 = arith.mulf %406, %392 : vector<2x32xf32>
    %409 = arith.mulf %405, %404 : vector<2x32xf32>
    %410 = arith.addf %408, %409 : vector<2x32xf32>
    %411 = math.tanh %410 : vector<2x32xf32>
    %412 = arith.mulf %407, %411 : vector<2x32xf32>
    %413 = vector.extract_strided_slice %318 {offsets = [10, 0], sizes = [2, 128], strides = [1, 1]} : vector<16x128xf32> to vector<2x128xf32>
    %cst_75 = arith.constant dense<0.000000e+00> : vector<2x128xf32>
    %414 = tpu.matmul %412, %320, %cst_75 {dimension_numbers = #tpu.dot_dimension_numbers<[1], [0], [0], [1], [0, 0, 1, 1], [], []>} : vector<2x32xf32>, vector<32x128xf32>, vector<2x128xf32> -> vector<2x128xf32>
    %415 = arith.addf %413, %414 : vector<2x128xf32>
    %416 = arith.negf %415 : vector<2x128xf32>
    %417 = math.exp %416 : vector<2x128xf32>
    %cst_76 = arith.constant 1.000000e+00 : f32
    %418 = vector.broadcast %cst_76 : f32 to vector<2x128xf32>
    %419 = arith.addf %418, %417 : vector<2x128xf32>
    %420 = arith.divf %418, %419 : vector<2x128xf32>
    %421 = vector.extract_strided_slice %415 {offsets = [0, 64], sizes = [2, 32], strides = [1, 1]} : vector<2x128xf32> to vector<2x32xf32>
    %422 = math.tanh %421 : vector<2x32xf32>
    %423 = vector.extract_strided_slice %420 {offsets = [0, 0], sizes = [2, 32], strides = [1, 1]} : vector<2x128xf32> to vector<2x32xf32>
    %424 = vector.extract_strided_slice %420 {offsets = [0, 32], sizes = [2, 32], strides = [1, 1]} : vector<2x128xf32> to vector<2x32xf32>
    %425 = vector.extract_strided_slice %420 {offsets = [0, 96], sizes = [2, 32], strides = [1, 1]} : vector<2x128xf32> to vector<2x32xf32>
    %426 = arith.mulf %424, %410 : vector<2x32xf32>
    %427 = arith.mulf %423, %422 : vector<2x32xf32>
    %428 = arith.addf %426, %427 : vector<2x32xf32>
    %429 = math.tanh %428 : vector<2x32xf32>
    %430 = arith.mulf %425, %429 : vector<2x32xf32>
    %431 = vector.extract_strided_slice %318 {offsets = [12, 0], sizes = [2, 128], strides = [1, 1]} : vector<16x128xf32> to vector<2x128xf32>
    %cst_77 = arith.constant dense<0.000000e+00> : vector<2x128xf32>
    %432 = tpu.matmul %430, %320, %cst_77 {dimension_numbers = #tpu.dot_dimension_numbers<[1], [0], [0], [1], [0, 0, 1, 1], [], []>} : vector<2x32xf32>, vector<32x128xf32>, vector<2x128xf32> -> vector<2x128xf32>
    %433 = arith.addf %431, %432 : vector<2x128xf32>
    %434 = arith.negf %433 : vector<2x128xf32>
    %435 = math.exp %434 : vector<2x128xf32>
    %cst_78 = arith.constant 1.000000e+00 : f32
    %436 = vector.broadcast %cst_78 : f32 to vector<2x128xf32>
    %437 = arith.addf %436, %435 : vector<2x128xf32>
    %438 = arith.divf %436, %437 : vector<2x128xf32>
    %439 = vector.extract_strided_slice %433 {offsets = [0, 64], sizes = [2, 32], strides = [1, 1]} : vector<2x128xf32> to vector<2x32xf32>
    %440 = math.tanh %439 : vector<2x32xf32>
    %441 = vector.extract_strided_slice %438 {offsets = [0, 0], sizes = [2, 32], strides = [1, 1]} : vector<2x128xf32> to vector<2x32xf32>
    %442 = vector.extract_strided_slice %438 {offsets = [0, 32], sizes = [2, 32], strides = [1, 1]} : vector<2x128xf32> to vector<2x32xf32>
    %443 = vector.extract_strided_slice %438 {offsets = [0, 96], sizes = [2, 32], strides = [1, 1]} : vector<2x128xf32> to vector<2x32xf32>
    %444 = arith.mulf %442, %428 : vector<2x32xf32>
    %445 = arith.mulf %441, %440 : vector<2x32xf32>
    %446 = arith.addf %444, %445 : vector<2x32xf32>
    %447 = math.tanh %446 : vector<2x32xf32>
    %448 = arith.mulf %443, %447 : vector<2x32xf32>
    %449 = vector.extract_strided_slice %318 {offsets = [14, 0], sizes = [2, 128], strides = [1, 1]} : vector<16x128xf32> to vector<2x128xf32>
    %cst_79 = arith.constant dense<0.000000e+00> : vector<2x128xf32>
    %450 = tpu.matmul %448, %320, %cst_79 {dimension_numbers = #tpu.dot_dimension_numbers<[1], [0], [0], [1], [0, 0, 1, 1], [], []>} : vector<2x32xf32>, vector<32x128xf32>, vector<2x128xf32> -> vector<2x128xf32>
    %451 = arith.addf %449, %450 : vector<2x128xf32>
    %452 = arith.negf %451 : vector<2x128xf32>
    %453 = math.exp %452 : vector<2x128xf32>
    %cst_80 = arith.constant 1.000000e+00 : f32
    %454 = vector.broadcast %cst_80 : f32 to vector<2x128xf32>
    %455 = arith.addf %454, %453 : vector<2x128xf32>
    %456 = arith.divf %454, %455 : vector<2x128xf32>
    %457 = vector.extract_strided_slice %451 {offsets = [0, 64], sizes = [2, 32], strides = [1, 1]} : vector<2x128xf32> to vector<2x32xf32>
    %458 = math.tanh %457 : vector<2x32xf32>
    %459 = vector.extract_strided_slice %456 {offsets = [0, 0], sizes = [2, 32], strides = [1, 1]} : vector<2x128xf32> to vector<2x32xf32>
    %460 = vector.extract_strided_slice %456 {offsets = [0, 32], sizes = [2, 32], strides = [1, 1]} : vector<2x128xf32> to vector<2x32xf32>
    %461 = vector.extract_strided_slice %456 {offsets = [0, 96], sizes = [2, 32], strides = [1, 1]} : vector<2x128xf32> to vector<2x32xf32>
    %462 = arith.mulf %460, %446 : vector<2x32xf32>
    %463 = arith.mulf %459, %458 : vector<2x32xf32>
    %464 = arith.addf %462, %463 : vector<2x32xf32>
    %465 = math.tanh %464 : vector<2x32xf32>
    %466 = arith.mulf %461, %465 : vector<2x32xf32>
    %467 = tpu.concatenate %340, %358, %376, %394, %412, %430, %448, %466 in 0 : vector<2x32xf32>, vector<2x32xf32>, vector<2x32xf32>, vector<2x32xf32>, vector<2x32xf32>, vector<2x32xf32>, vector<2x32xf32>, vector<2x32xf32> -> vector<16x32xf32>
    %c2_81 = arith.constant 2 : index
    %c0_82 = arith.constant 0 : index
    %c0_83 = arith.constant 0 : index
    %468 = vector.load %arg2[%c2_81, %c0_82, %c0_83] : memref<9x32x128xf32, #tpu.memory_space<vmem>>, vector<1x32x128xf32>
    %469 = vector.shape_cast %468 : vector<1x32x128xf32> to vector<32x128xf32>
    %cst_84 = arith.constant dense<0.000000e+00> : vector<16x128xf32>
    %470 = tpu.matmul %467, %469, %cst_84 {dimension_numbers = #tpu.dot_dimension_numbers<[1], [0], [0], [1], [0, 0, 1, 1], [], []>} : vector<16x32xf32>, vector<32x128xf32>, vector<16x128xf32> -> vector<16x128xf32>
    %c3 = arith.constant 3 : index
    %c0_85 = arith.constant 0 : index
    %c0_86 = arith.constant 0 : index
    %471 = vector.load %arg4[%c3, %c0_85, %c0_86] : memref<10x1x128xf32, #tpu.memory_space<vmem>>, vector<1x1x128xf32>
    %472 = vector.shape_cast %471 : vector<1x1x128xf32> to vector<1x128xf32>
    %473 = vector.broadcast %472 : vector<1x128xf32> to vector<16x128xf32>
    %474 = arith.addf %470, %473 : vector<16x128xf32>
    %c3_87 = arith.constant 3 : index
    %c0_88 = arith.constant 0 : index
    %c0_89 = arith.constant 0 : index
    %475 = vector.load %arg3[%c3_87, %c0_88, %c0_89] : memref<10x32x128xf32, #tpu.memory_space<vmem>>, vector<1x32x128xf32>
    %476 = vector.shape_cast %475 : vector<1x32x128xf32> to vector<32x128xf32>
    %cst_90 = arith.constant 0.000000e+00 : f32
    %477 = vector.broadcast %cst_90 : f32 to vector<2x32xf32>
    %cst_91 = arith.constant 0.000000e+00 : f32
    %478 = vector.broadcast %cst_91 : f32 to vector<2x32xf32>
    %479 = vector.extract_strided_slice %474 {offsets = [0, 0], sizes = [2, 128], strides = [1, 1]} : vector<16x128xf32> to vector<2x128xf32>
    %cst_92 = arith.constant dense<0.000000e+00> : vector<2x128xf32>
    %480 = tpu.matmul %477, %476, %cst_92 {dimension_numbers = #tpu.dot_dimension_numbers<[1], [0], [0], [1], [0, 0, 1, 1], [], []>} : vector<2x32xf32>, vector<32x128xf32>, vector<2x128xf32> -> vector<2x128xf32>
    %481 = arith.addf %479, %480 : vector<2x128xf32>
    %482 = arith.negf %481 : vector<2x128xf32>
    %483 = math.exp %482 : vector<2x128xf32>
    %cst_93 = arith.constant 1.000000e+00 : f32
    %484 = vector.broadcast %cst_93 : f32 to vector<2x128xf32>
    %485 = arith.addf %484, %483 : vector<2x128xf32>
    %486 = arith.divf %484, %485 : vector<2x128xf32>
    %487 = vector.extract_strided_slice %481 {offsets = [0, 64], sizes = [2, 32], strides = [1, 1]} : vector<2x128xf32> to vector<2x32xf32>
    %488 = math.tanh %487 : vector<2x32xf32>
    %489 = vector.extract_strided_slice %486 {offsets = [0, 0], sizes = [2, 32], strides = [1, 1]} : vector<2x128xf32> to vector<2x32xf32>
    %490 = vector.extract_strided_slice %486 {offsets = [0, 32], sizes = [2, 32], strides = [1, 1]} : vector<2x128xf32> to vector<2x32xf32>
    %491 = vector.extract_strided_slice %486 {offsets = [0, 96], sizes = [2, 32], strides = [1, 1]} : vector<2x128xf32> to vector<2x32xf32>
    %492 = arith.mulf %490, %478 : vector<2x32xf32>
    %493 = arith.mulf %489, %488 : vector<2x32xf32>
    %494 = arith.addf %492, %493 : vector<2x32xf32>
    %495 = math.tanh %494 : vector<2x32xf32>
    %496 = arith.mulf %491, %495 : vector<2x32xf32>
    %497 = vector.extract_strided_slice %474 {offsets = [2, 0], sizes = [2, 128], strides = [1, 1]} : vector<16x128xf32> to vector<2x128xf32>
    %cst_94 = arith.constant dense<0.000000e+00> : vector<2x128xf32>
    %498 = tpu.matmul %496, %476, %cst_94 {dimension_numbers = #tpu.dot_dimension_numbers<[1], [0], [0], [1], [0, 0, 1, 1], [], []>} : vector<2x32xf32>, vector<32x128xf32>, vector<2x128xf32> -> vector<2x128xf32>
    %499 = arith.addf %497, %498 : vector<2x128xf32>
    %500 = arith.negf %499 : vector<2x128xf32>
    %501 = math.exp %500 : vector<2x128xf32>
    %cst_95 = arith.constant 1.000000e+00 : f32
    %502 = vector.broadcast %cst_95 : f32 to vector<2x128xf32>
    %503 = arith.addf %502, %501 : vector<2x128xf32>
    %504 = arith.divf %502, %503 : vector<2x128xf32>
    %505 = vector.extract_strided_slice %499 {offsets = [0, 64], sizes = [2, 32], strides = [1, 1]} : vector<2x128xf32> to vector<2x32xf32>
    %506 = math.tanh %505 : vector<2x32xf32>
    %507 = vector.extract_strided_slice %504 {offsets = [0, 0], sizes = [2, 32], strides = [1, 1]} : vector<2x128xf32> to vector<2x32xf32>
    %508 = vector.extract_strided_slice %504 {offsets = [0, 32], sizes = [2, 32], strides = [1, 1]} : vector<2x128xf32> to vector<2x32xf32>
    %509 = vector.extract_strided_slice %504 {offsets = [0, 96], sizes = [2, 32], strides = [1, 1]} : vector<2x128xf32> to vector<2x32xf32>
    %510 = arith.mulf %508, %494 : vector<2x32xf32>
    %511 = arith.mulf %507, %506 : vector<2x32xf32>
    %512 = arith.addf %510, %511 : vector<2x32xf32>
    %513 = math.tanh %512 : vector<2x32xf32>
    %514 = arith.mulf %509, %513 : vector<2x32xf32>
    %515 = vector.extract_strided_slice %474 {offsets = [4, 0], sizes = [2, 128], strides = [1, 1]} : vector<16x128xf32> to vector<2x128xf32>
    %cst_96 = arith.constant dense<0.000000e+00> : vector<2x128xf32>
    %516 = tpu.matmul %514, %476, %cst_96 {dimension_numbers = #tpu.dot_dimension_numbers<[1], [0], [0], [1], [0, 0, 1, 1], [], []>} : vector<2x32xf32>, vector<32x128xf32>, vector<2x128xf32> -> vector<2x128xf32>
    %517 = arith.addf %515, %516 : vector<2x128xf32>
    %518 = arith.negf %517 : vector<2x128xf32>
    %519 = math.exp %518 : vector<2x128xf32>
    %cst_97 = arith.constant 1.000000e+00 : f32
    %520 = vector.broadcast %cst_97 : f32 to vector<2x128xf32>
    %521 = arith.addf %520, %519 : vector<2x128xf32>
    %522 = arith.divf %520, %521 : vector<2x128xf32>
    %523 = vector.extract_strided_slice %517 {offsets = [0, 64], sizes = [2, 32], strides = [1, 1]} : vector<2x128xf32> to vector<2x32xf32>
    %524 = math.tanh %523 : vector<2x32xf32>
    %525 = vector.extract_strided_slice %522 {offsets = [0, 0], sizes = [2, 32], strides = [1, 1]} : vector<2x128xf32> to vector<2x32xf32>
    %526 = vector.extract_strided_slice %522 {offsets = [0, 32], sizes = [2, 32], strides = [1, 1]} : vector<2x128xf32> to vector<2x32xf32>
    %527 = vector.extract_strided_slice %522 {offsets = [0, 96], sizes = [2, 32], strides = [1, 1]} : vector<2x128xf32> to vector<2x32xf32>
    %528 = arith.mulf %526, %512 : vector<2x32xf32>
    %529 = arith.mulf %525, %524 : vector<2x32xf32>
    %530 = arith.addf %528, %529 : vector<2x32xf32>
    %531 = math.tanh %530 : vector<2x32xf32>
    %532 = arith.mulf %527, %531 : vector<2x32xf32>
    %533 = vector.extract_strided_slice %474 {offsets = [6, 0], sizes = [2, 128], strides = [1, 1]} : vector<16x128xf32> to vector<2x128xf32>
    %cst_98 = arith.constant dense<0.000000e+00> : vector<2x128xf32>
    %534 = tpu.matmul %532, %476, %cst_98 {dimension_numbers = #tpu.dot_dimension_numbers<[1], [0], [0], [1], [0, 0, 1, 1], [], []>} : vector<2x32xf32>, vector<32x128xf32>, vector<2x128xf32> -> vector<2x128xf32>
    %535 = arith.addf %533, %534 : vector<2x128xf32>
    %536 = arith.negf %535 : vector<2x128xf32>
    %537 = math.exp %536 : vector<2x128xf32>
    %cst_99 = arith.constant 1.000000e+00 : f32
    %538 = vector.broadcast %cst_99 : f32 to vector<2x128xf32>
    %539 = arith.addf %538, %537 : vector<2x128xf32>
    %540 = arith.divf %538, %539 : vector<2x128xf32>
    %541 = vector.extract_strided_slice %535 {offsets = [0, 64], sizes = [2, 32], strides = [1, 1]} : vector<2x128xf32> to vector<2x32xf32>
    %542 = math.tanh %541 : vector<2x32xf32>
    %543 = vector.extract_strided_slice %540 {offsets = [0, 0], sizes = [2, 32], strides = [1, 1]} : vector<2x128xf32> to vector<2x32xf32>
    %544 = vector.extract_strided_slice %540 {offsets = [0, 32], sizes = [2, 32], strides = [1, 1]} : vector<2x128xf32> to vector<2x32xf32>
    %545 = vector.extract_strided_slice %540 {offsets = [0, 96], sizes = [2, 32], strides = [1, 1]} : vector<2x128xf32> to vector<2x32xf32>
    %546 = arith.mulf %544, %530 : vector<2x32xf32>
    %547 = arith.mulf %543, %542 : vector<2x32xf32>
    %548 = arith.addf %546, %547 : vector<2x32xf32>
    %549 = math.tanh %548 : vector<2x32xf32>
    %550 = arith.mulf %545, %549 : vector<2x32xf32>
    %551 = vector.extract_strided_slice %474 {offsets = [8, 0], sizes = [2, 128], strides = [1, 1]} : vector<16x128xf32> to vector<2x128xf32>
    %cst_100 = arith.constant dense<0.000000e+00> : vector<2x128xf32>
    %552 = tpu.matmul %550, %476, %cst_100 {dimension_numbers = #tpu.dot_dimension_numbers<[1], [0], [0], [1], [0, 0, 1, 1], [], []>} : vector<2x32xf32>, vector<32x128xf32>, vector<2x128xf32> -> vector<2x128xf32>
    %553 = arith.addf %551, %552 : vector<2x128xf32>
    %554 = arith.negf %553 : vector<2x128xf32>
    %555 = math.exp %554 : vector<2x128xf32>
    %cst_101 = arith.constant 1.000000e+00 : f32
    %556 = vector.broadcast %cst_101 : f32 to vector<2x128xf32>
    %557 = arith.addf %556, %555 : vector<2x128xf32>
    %558 = arith.divf %556, %557 : vector<2x128xf32>
    %559 = vector.extract_strided_slice %553 {offsets = [0, 64], sizes = [2, 32], strides = [1, 1]} : vector<2x128xf32> to vector<2x32xf32>
    %560 = math.tanh %559 : vector<2x32xf32>
    %561 = vector.extract_strided_slice %558 {offsets = [0, 0], sizes = [2, 32], strides = [1, 1]} : vector<2x128xf32> to vector<2x32xf32>
    %562 = vector.extract_strided_slice %558 {offsets = [0, 32], sizes = [2, 32], strides = [1, 1]} : vector<2x128xf32> to vector<2x32xf32>
    %563 = vector.extract_strided_slice %558 {offsets = [0, 96], sizes = [2, 32], strides = [1, 1]} : vector<2x128xf32> to vector<2x32xf32>
    %564 = arith.mulf %562, %548 : vector<2x32xf32>
    %565 = arith.mulf %561, %560 : vector<2x32xf32>
    %566 = arith.addf %564, %565 : vector<2x32xf32>
    %567 = math.tanh %566 : vector<2x32xf32>
    %568 = arith.mulf %563, %567 : vector<2x32xf32>
    %569 = vector.extract_strided_slice %474 {offsets = [10, 0], sizes = [2, 128], strides = [1, 1]} : vector<16x128xf32> to vector<2x128xf32>
    %cst_102 = arith.constant dense<0.000000e+00> : vector<2x128xf32>
    %570 = tpu.matmul %568, %476, %cst_102 {dimension_numbers = #tpu.dot_dimension_numbers<[1], [0], [0], [1], [0, 0, 1, 1], [], []>} : vector<2x32xf32>, vector<32x128xf32>, vector<2x128xf32> -> vector<2x128xf32>
    %571 = arith.addf %569, %570 : vector<2x128xf32>
    %572 = arith.negf %571 : vector<2x128xf32>
    %573 = math.exp %572 : vector<2x128xf32>
    %cst_103 = arith.constant 1.000000e+00 : f32
    %574 = vector.broadcast %cst_103 : f32 to vector<2x128xf32>
    %575 = arith.addf %574, %573 : vector<2x128xf32>
    %576 = arith.divf %574, %575 : vector<2x128xf32>
    %577 = vector.extract_strided_slice %571 {offsets = [0, 64], sizes = [2, 32], strides = [1, 1]} : vector<2x128xf32> to vector<2x32xf32>
    %578 = math.tanh %577 : vector<2x32xf32>
    %579 = vector.extract_strided_slice %576 {offsets = [0, 0], sizes = [2, 32], strides = [1, 1]} : vector<2x128xf32> to vector<2x32xf32>
    %580 = vector.extract_strided_slice %576 {offsets = [0, 32], sizes = [2, 32], strides = [1, 1]} : vector<2x128xf32> to vector<2x32xf32>
    %581 = vector.extract_strided_slice %576 {offsets = [0, 96], sizes = [2, 32], strides = [1, 1]} : vector<2x128xf32> to vector<2x32xf32>
    %582 = arith.mulf %580, %566 : vector<2x32xf32>
    %583 = arith.mulf %579, %578 : vector<2x32xf32>
    %584 = arith.addf %582, %583 : vector<2x32xf32>
    %585 = math.tanh %584 : vector<2x32xf32>
    %586 = arith.mulf %581, %585 : vector<2x32xf32>
    %587 = vector.extract_strided_slice %474 {offsets = [12, 0], sizes = [2, 128], strides = [1, 1]} : vector<16x128xf32> to vector<2x128xf32>
    %cst_104 = arith.constant dense<0.000000e+00> : vector<2x128xf32>
    %588 = tpu.matmul %586, %476, %cst_104 {dimension_numbers = #tpu.dot_dimension_numbers<[1], [0], [0], [1], [0, 0, 1, 1], [], []>} : vector<2x32xf32>, vector<32x128xf32>, vector<2x128xf32> -> vector<2x128xf32>
    %589 = arith.addf %587, %588 : vector<2x128xf32>
    %590 = arith.negf %589 : vector<2x128xf32>
    %591 = math.exp %590 : vector<2x128xf32>
    %cst_105 = arith.constant 1.000000e+00 : f32
    %592 = vector.broadcast %cst_105 : f32 to vector<2x128xf32>
    %593 = arith.addf %592, %591 : vector<2x128xf32>
    %594 = arith.divf %592, %593 : vector<2x128xf32>
    %595 = vector.extract_strided_slice %589 {offsets = [0, 64], sizes = [2, 32], strides = [1, 1]} : vector<2x128xf32> to vector<2x32xf32>
    %596 = math.tanh %595 : vector<2x32xf32>
    %597 = vector.extract_strided_slice %594 {offsets = [0, 0], sizes = [2, 32], strides = [1, 1]} : vector<2x128xf32> to vector<2x32xf32>
    %598 = vector.extract_strided_slice %594 {offsets = [0, 32], sizes = [2, 32], strides = [1, 1]} : vector<2x128xf32> to vector<2x32xf32>
    %599 = vector.extract_strided_slice %594 {offsets = [0, 96], sizes = [2, 32], strides = [1, 1]} : vector<2x128xf32> to vector<2x32xf32>
    %600 = arith.mulf %598, %584 : vector<2x32xf32>
    %601 = arith.mulf %597, %596 : vector<2x32xf32>
    %602 = arith.addf %600, %601 : vector<2x32xf32>
    %603 = math.tanh %602 : vector<2x32xf32>
    %604 = arith.mulf %599, %603 : vector<2x32xf32>
    %605 = vector.extract_strided_slice %474 {offsets = [14, 0], sizes = [2, 128], strides = [1, 1]} : vector<16x128xf32> to vector<2x128xf32>
    %cst_106 = arith.constant dense<0.000000e+00> : vector<2x128xf32>
    %606 = tpu.matmul %604, %476, %cst_106 {dimension_numbers = #tpu.dot_dimension_numbers<[1], [0], [0], [1], [0, 0, 1, 1], [], []>} : vector<2x32xf32>, vector<32x128xf32>, vector<2x128xf32> -> vector<2x128xf32>
    %607 = arith.addf %605, %606 : vector<2x128xf32>
    %608 = arith.negf %607 : vector<2x128xf32>
    %609 = math.exp %608 : vector<2x128xf32>
    %cst_107 = arith.constant 1.000000e+00 : f32
    %610 = vector.broadcast %cst_107 : f32 to vector<2x128xf32>
    %611 = arith.addf %610, %609 : vector<2x128xf32>
    %612 = arith.divf %610, %611 : vector<2x128xf32>
    %613 = vector.extract_strided_slice %607 {offsets = [0, 64], sizes = [2, 32], strides = [1, 1]} : vector<2x128xf32> to vector<2x32xf32>
    %614 = math.tanh %613 : vector<2x32xf32>
    %615 = vector.extract_strided_slice %612 {offsets = [0, 0], sizes = [2, 32], strides = [1, 1]} : vector<2x128xf32> to vector<2x32xf32>
    %616 = vector.extract_strided_slice %612 {offsets = [0, 32], sizes = [2, 32], strides = [1, 1]} : vector<2x128xf32> to vector<2x32xf32>
    %617 = vector.extract_strided_slice %612 {offsets = [0, 96], sizes = [2, 32], strides = [1, 1]} : vector<2x128xf32> to vector<2x32xf32>
    %618 = arith.mulf %616, %602 : vector<2x32xf32>
    %619 = arith.mulf %615, %614 : vector<2x32xf32>
    %620 = arith.addf %618, %619 : vector<2x32xf32>
    %621 = math.tanh %620 : vector<2x32xf32>
    %622 = arith.mulf %617, %621 : vector<2x32xf32>
    %623 = tpu.concatenate %496, %514, %532, %550, %568, %586, %604, %622 in 0 : vector<2x32xf32>, vector<2x32xf32>, vector<2x32xf32>, vector<2x32xf32>, vector<2x32xf32>, vector<2x32xf32>, vector<2x32xf32>, vector<2x32xf32> -> vector<16x32xf32>
    %c3_108 = arith.constant 3 : index
    %c0_109 = arith.constant 0 : index
    %c0_110 = arith.constant 0 : index
    %624 = vector.load %arg2[%c3_108, %c0_109, %c0_110] : memref<9x32x128xf32, #tpu.memory_space<vmem>>, vector<1x32x128xf32>
    %625 = vector.shape_cast %624 : vector<1x32x128xf32> to vector<32x128xf32>
    %cst_111 = arith.constant dense<0.000000e+00> : vector<16x128xf32>
    %626 = tpu.matmul %623, %625, %cst_111 {dimension_numbers = #tpu.dot_dimension_numbers<[1], [0], [0], [1], [0, 0, 1, 1], [], []>} : vector<16x32xf32>, vector<32x128xf32>, vector<16x128xf32> -> vector<16x128xf32>
    %c4 = arith.constant 4 : index
    %c0_112 = arith.constant 0 : index
    %c0_113 = arith.constant 0 : index
    %627 = vector.load %arg4[%c4, %c0_112, %c0_113] : memref<10x1x128xf32, #tpu.memory_space<vmem>>, vector<1x1x128xf32>
    %628 = vector.shape_cast %627 : vector<1x1x128xf32> to vector<1x128xf32>
    %629 = vector.broadcast %628 : vector<1x128xf32> to vector<16x128xf32>
    %630 = arith.addf %626, %629 : vector<16x128xf32>
    %c4_114 = arith.constant 4 : index
    %c0_115 = arith.constant 0 : index
    %c0_116 = arith.constant 0 : index
    %631 = vector.load %arg3[%c4_114, %c0_115, %c0_116] : memref<10x32x128xf32, #tpu.memory_space<vmem>>, vector<1x32x128xf32>
    %632 = vector.shape_cast %631 : vector<1x32x128xf32> to vector<32x128xf32>
    %cst_117 = arith.constant 0.000000e+00 : f32
    %633 = vector.broadcast %cst_117 : f32 to vector<2x32xf32>
    %cst_118 = arith.constant 0.000000e+00 : f32
    %634 = vector.broadcast %cst_118 : f32 to vector<2x32xf32>
    %635 = vector.extract_strided_slice %630 {offsets = [0, 0], sizes = [2, 128], strides = [1, 1]} : vector<16x128xf32> to vector<2x128xf32>
    %cst_119 = arith.constant dense<0.000000e+00> : vector<2x128xf32>
    %636 = tpu.matmul %633, %632, %cst_119 {dimension_numbers = #tpu.dot_dimension_numbers<[1], [0], [0], [1], [0, 0, 1, 1], [], []>} : vector<2x32xf32>, vector<32x128xf32>, vector<2x128xf32> -> vector<2x128xf32>
    %637 = arith.addf %635, %636 : vector<2x128xf32>
    %638 = arith.negf %637 : vector<2x128xf32>
    %639 = math.exp %638 : vector<2x128xf32>
    %cst_120 = arith.constant 1.000000e+00 : f32
    %640 = vector.broadcast %cst_120 : f32 to vector<2x128xf32>
    %641 = arith.addf %640, %639 : vector<2x128xf32>
    %642 = arith.divf %640, %641 : vector<2x128xf32>
    %643 = vector.extract_strided_slice %637 {offsets = [0, 64], sizes = [2, 32], strides = [1, 1]} : vector<2x128xf32> to vector<2x32xf32>
    %644 = math.tanh %643 : vector<2x32xf32>
    %645 = vector.extract_strided_slice %642 {offsets = [0, 0], sizes = [2, 32], strides = [1, 1]} : vector<2x128xf32> to vector<2x32xf32>
    %646 = vector.extract_strided_slice %642 {offsets = [0, 32], sizes = [2, 32], strides = [1, 1]} : vector<2x128xf32> to vector<2x32xf32>
    %647 = vector.extract_strided_slice %642 {offsets = [0, 96], sizes = [2, 32], strides = [1, 1]} : vector<2x128xf32> to vector<2x32xf32>
    %648 = arith.mulf %646, %634 : vector<2x32xf32>
    %649 = arith.mulf %645, %644 : vector<2x32xf32>
    %650 = arith.addf %648, %649 : vector<2x32xf32>
    %651 = math.tanh %650 : vector<2x32xf32>
    %652 = arith.mulf %647, %651 : vector<2x32xf32>
    %653 = vector.extract_strided_slice %630 {offsets = [2, 0], sizes = [2, 128], strides = [1, 1]} : vector<16x128xf32> to vector<2x128xf32>
    %cst_121 = arith.constant dense<0.000000e+00> : vector<2x128xf32>
    %654 = tpu.matmul %652, %632, %cst_121 {dimension_numbers = #tpu.dot_dimension_numbers<[1], [0], [0], [1], [0, 0, 1, 1], [], []>} : vector<2x32xf32>, vector<32x128xf32>, vector<2x128xf32> -> vector<2x128xf32>
    %655 = arith.addf %653, %654 : vector<2x128xf32>
    %656 = arith.negf %655 : vector<2x128xf32>
    %657 = math.exp %656 : vector<2x128xf32>
    %cst_122 = arith.constant 1.000000e+00 : f32
    %658 = vector.broadcast %cst_122 : f32 to vector<2x128xf32>
    %659 = arith.addf %658, %657 : vector<2x128xf32>
    %660 = arith.divf %658, %659 : vector<2x128xf32>
    %661 = vector.extract_strided_slice %655 {offsets = [0, 64], sizes = [2, 32], strides = [1, 1]} : vector<2x128xf32> to vector<2x32xf32>
    %662 = math.tanh %661 : vector<2x32xf32>
    %663 = vector.extract_strided_slice %660 {offsets = [0, 0], sizes = [2, 32], strides = [1, 1]} : vector<2x128xf32> to vector<2x32xf32>
    %664 = vector.extract_strided_slice %660 {offsets = [0, 32], sizes = [2, 32], strides = [1, 1]} : vector<2x128xf32> to vector<2x32xf32>
    %665 = vector.extract_strided_slice %660 {offsets = [0, 96], sizes = [2, 32], strides = [1, 1]} : vector<2x128xf32> to vector<2x32xf32>
    %666 = arith.mulf %664, %650 : vector<2x32xf32>
    %667 = arith.mulf %663, %662 : vector<2x32xf32>
    %668 = arith.addf %666, %667 : vector<2x32xf32>
    %669 = math.tanh %668 : vector<2x32xf32>
    %670 = arith.mulf %665, %669 : vector<2x32xf32>
    %671 = vector.extract_strided_slice %630 {offsets = [4, 0], sizes = [2, 128], strides = [1, 1]} : vector<16x128xf32> to vector<2x128xf32>
    %cst_123 = arith.constant dense<0.000000e+00> : vector<2x128xf32>
    %672 = tpu.matmul %670, %632, %cst_123 {dimension_numbers = #tpu.dot_dimension_numbers<[1], [0], [0], [1], [0, 0, 1, 1], [], []>} : vector<2x32xf32>, vector<32x128xf32>, vector<2x128xf32> -> vector<2x128xf32>
    %673 = arith.addf %671, %672 : vector<2x128xf32>
    %674 = arith.negf %673 : vector<2x128xf32>
    %675 = math.exp %674 : vector<2x128xf32>
    %cst_124 = arith.constant 1.000000e+00 : f32
    %676 = vector.broadcast %cst_124 : f32 to vector<2x128xf32>
    %677 = arith.addf %676, %675 : vector<2x128xf32>
    %678 = arith.divf %676, %677 : vector<2x128xf32>
    %679 = vector.extract_strided_slice %673 {offsets = [0, 64], sizes = [2, 32], strides = [1, 1]} : vector<2x128xf32> to vector<2x32xf32>
    %680 = math.tanh %679 : vector<2x32xf32>
    %681 = vector.extract_strided_slice %678 {offsets = [0, 0], sizes = [2, 32], strides = [1, 1]} : vector<2x128xf32> to vector<2x32xf32>
    %682 = vector.extract_strided_slice %678 {offsets = [0, 32], sizes = [2, 32], strides = [1, 1]} : vector<2x128xf32> to vector<2x32xf32>
    %683 = vector.extract_strided_slice %678 {offsets = [0, 96], sizes = [2, 32], strides = [1, 1]} : vector<2x128xf32> to vector<2x32xf32>
    %684 = arith.mulf %682, %668 : vector<2x32xf32>
    %685 = arith.mulf %681, %680 : vector<2x32xf32>
    %686 = arith.addf %684, %685 : vector<2x32xf32>
    %687 = math.tanh %686 : vector<2x32xf32>
    %688 = arith.mulf %683, %687 : vector<2x32xf32>
    %689 = vector.extract_strided_slice %630 {offsets = [6, 0], sizes = [2, 128], strides = [1, 1]} : vector<16x128xf32> to vector<2x128xf32>
    %cst_125 = arith.constant dense<0.000000e+00> : vector<2x128xf32>
    %690 = tpu.matmul %688, %632, %cst_125 {dimension_numbers = #tpu.dot_dimension_numbers<[1], [0], [0], [1], [0, 0, 1, 1], [], []>} : vector<2x32xf32>, vector<32x128xf32>, vector<2x128xf32> -> vector<2x128xf32>
    %691 = arith.addf %689, %690 : vector<2x128xf32>
    %692 = arith.negf %691 : vector<2x128xf32>
    %693 = math.exp %692 : vector<2x128xf32>
    %cst_126 = arith.constant 1.000000e+00 : f32
    %694 = vector.broadcast %cst_126 : f32 to vector<2x128xf32>
    %695 = arith.addf %694, %693 : vector<2x128xf32>
    %696 = arith.divf %694, %695 : vector<2x128xf32>
    %697 = vector.extract_strided_slice %691 {offsets = [0, 64], sizes = [2, 32], strides = [1, 1]} : vector<2x128xf32> to vector<2x32xf32>
    %698 = math.tanh %697 : vector<2x32xf32>
    %699 = vector.extract_strided_slice %696 {offsets = [0, 0], sizes = [2, 32], strides = [1, 1]} : vector<2x128xf32> to vector<2x32xf32>
    %700 = vector.extract_strided_slice %696 {offsets = [0, 32], sizes = [2, 32], strides = [1, 1]} : vector<2x128xf32> to vector<2x32xf32>
    %701 = vector.extract_strided_slice %696 {offsets = [0, 96], sizes = [2, 32], strides = [1, 1]} : vector<2x128xf32> to vector<2x32xf32>
    %702 = arith.mulf %700, %686 : vector<2x32xf32>
    %703 = arith.mulf %699, %698 : vector<2x32xf32>
    %704 = arith.addf %702, %703 : vector<2x32xf32>
    %705 = math.tanh %704 : vector<2x32xf32>
    %706 = arith.mulf %701, %705 : vector<2x32xf32>
    %707 = vector.extract_strided_slice %630 {offsets = [8, 0], sizes = [2, 128], strides = [1, 1]} : vector<16x128xf32> to vector<2x128xf32>
    %cst_127 = arith.constant dense<0.000000e+00> : vector<2x128xf32>
    %708 = tpu.matmul %706, %632, %cst_127 {dimension_numbers = #tpu.dot_dimension_numbers<[1], [0], [0], [1], [0, 0, 1, 1], [], []>} : vector<2x32xf32>, vector<32x128xf32>, vector<2x128xf32> -> vector<2x128xf32>
    %709 = arith.addf %707, %708 : vector<2x128xf32>
    %710 = arith.negf %709 : vector<2x128xf32>
    %711 = math.exp %710 : vector<2x128xf32>
    %cst_128 = arith.constant 1.000000e+00 : f32
    %712 = vector.broadcast %cst_128 : f32 to vector<2x128xf32>
    %713 = arith.addf %712, %711 : vector<2x128xf32>
    %714 = arith.divf %712, %713 : vector<2x128xf32>
    %715 = vector.extract_strided_slice %709 {offsets = [0, 64], sizes = [2, 32], strides = [1, 1]} : vector<2x128xf32> to vector<2x32xf32>
    %716 = math.tanh %715 : vector<2x32xf32>
    %717 = vector.extract_strided_slice %714 {offsets = [0, 0], sizes = [2, 32], strides = [1, 1]} : vector<2x128xf32> to vector<2x32xf32>
    %718 = vector.extract_strided_slice %714 {offsets = [0, 32], sizes = [2, 32], strides = [1, 1]} : vector<2x128xf32> to vector<2x32xf32>
    %719 = vector.extract_strided_slice %714 {offsets = [0, 96], sizes = [2, 32], strides = [1, 1]} : vector<2x128xf32> to vector<2x32xf32>
    %720 = arith.mulf %718, %704 : vector<2x32xf32>
    %721 = arith.mulf %717, %716 : vector<2x32xf32>
    %722 = arith.addf %720, %721 : vector<2x32xf32>
    %723 = math.tanh %722 : vector<2x32xf32>
    %724 = arith.mulf %719, %723 : vector<2x32xf32>
    %725 = vector.extract_strided_slice %630 {offsets = [10, 0], sizes = [2, 128], strides = [1, 1]} : vector<16x128xf32> to vector<2x128xf32>
    %cst_129 = arith.constant dense<0.000000e+00> : vector<2x128xf32>
    %726 = tpu.matmul %724, %632, %cst_129 {dimension_numbers = #tpu.dot_dimension_numbers<[1], [0], [0], [1], [0, 0, 1, 1], [], []>} : vector<2x32xf32>, vector<32x128xf32>, vector<2x128xf32> -> vector<2x128xf32>
    %727 = arith.addf %725, %726 : vector<2x128xf32>
    %728 = arith.negf %727 : vector<2x128xf32>
    %729 = math.exp %728 : vector<2x128xf32>
    %cst_130 = arith.constant 1.000000e+00 : f32
    %730 = vector.broadcast %cst_130 : f32 to vector<2x128xf32>
    %731 = arith.addf %730, %729 : vector<2x128xf32>
    %732 = arith.divf %730, %731 : vector<2x128xf32>
    %733 = vector.extract_strided_slice %727 {offsets = [0, 64], sizes = [2, 32], strides = [1, 1]} : vector<2x128xf32> to vector<2x32xf32>
    %734 = math.tanh %733 : vector<2x32xf32>
    %735 = vector.extract_strided_slice %732 {offsets = [0, 0], sizes = [2, 32], strides = [1, 1]} : vector<2x128xf32> to vector<2x32xf32>
    %736 = vector.extract_strided_slice %732 {offsets = [0, 32], sizes = [2, 32], strides = [1, 1]} : vector<2x128xf32> to vector<2x32xf32>
    %737 = vector.extract_strided_slice %732 {offsets = [0, 96], sizes = [2, 32], strides = [1, 1]} : vector<2x128xf32> to vector<2x32xf32>
    %738 = arith.mulf %736, %722 : vector<2x32xf32>
    %739 = arith.mulf %735, %734 : vector<2x32xf32>
    %740 = arith.addf %738, %739 : vector<2x32xf32>
    %741 = math.tanh %740 : vector<2x32xf32>
    %742 = arith.mulf %737, %741 : vector<2x32xf32>
    %743 = vector.extract_strided_slice %630 {offsets = [12, 0], sizes = [2, 128], strides = [1, 1]} : vector<16x128xf32> to vector<2x128xf32>
    %cst_131 = arith.constant dense<0.000000e+00> : vector<2x128xf32>
    %744 = tpu.matmul %742, %632, %cst_131 {dimension_numbers = #tpu.dot_dimension_numbers<[1], [0], [0], [1], [0, 0, 1, 1], [], []>} : vector<2x32xf32>, vector<32x128xf32>, vector<2x128xf32> -> vector<2x128xf32>
    %745 = arith.addf %743, %744 : vector<2x128xf32>
    %746 = arith.negf %745 : vector<2x128xf32>
    %747 = math.exp %746 : vector<2x128xf32>
    %cst_132 = arith.constant 1.000000e+00 : f32
    %748 = vector.broadcast %cst_132 : f32 to vector<2x128xf32>
    %749 = arith.addf %748, %747 : vector<2x128xf32>
    %750 = arith.divf %748, %749 : vector<2x128xf32>
    %751 = vector.extract_strided_slice %745 {offsets = [0, 64], sizes = [2, 32], strides = [1, 1]} : vector<2x128xf32> to vector<2x32xf32>
    %752 = math.tanh %751 : vector<2x32xf32>
    %753 = vector.extract_strided_slice %750 {offsets = [0, 0], sizes = [2, 32], strides = [1, 1]} : vector<2x128xf32> to vector<2x32xf32>
    %754 = vector.extract_strided_slice %750 {offsets = [0, 32], sizes = [2, 32], strides = [1, 1]} : vector<2x128xf32> to vector<2x32xf32>
    %755 = vector.extract_strided_slice %750 {offsets = [0, 96], sizes = [2, 32], strides = [1, 1]} : vector<2x128xf32> to vector<2x32xf32>
    %756 = arith.mulf %754, %740 : vector<2x32xf32>
    %757 = arith.mulf %753, %752 : vector<2x32xf32>
    %758 = arith.addf %756, %757 : vector<2x32xf32>
    %759 = math.tanh %758 : vector<2x32xf32>
    %760 = arith.mulf %755, %759 : vector<2x32xf32>
    %761 = vector.extract_strided_slice %630 {offsets = [14, 0], sizes = [2, 128], strides = [1, 1]} : vector<16x128xf32> to vector<2x128xf32>
    %cst_133 = arith.constant dense<0.000000e+00> : vector<2x128xf32>
    %762 = tpu.matmul %760, %632, %cst_133 {dimension_numbers = #tpu.dot_dimension_numbers<[1], [0], [0], [1], [0, 0, 1, 1], [], []>} : vector<2x32xf32>, vector<32x128xf32>, vector<2x128xf32> -> vector<2x128xf32>
    %763 = arith.addf %761, %762 : vector<2x128xf32>
    %764 = arith.negf %763 : vector<2x128xf32>
    %765 = math.exp %764 : vector<2x128xf32>
    %cst_134 = arith.constant 1.000000e+00 : f32
    %766 = vector.broadcast %cst_134 : f32 to vector<2x128xf32>
    %767 = arith.addf %766, %765 : vector<2x128xf32>
    %768 = arith.divf %766, %767 : vector<2x128xf32>
    %769 = vector.extract_strided_slice %763 {offsets = [0, 64], sizes = [2, 32], strides = [1, 1]} : vector<2x128xf32> to vector<2x32xf32>
    %770 = math.tanh %769 : vector<2x32xf32>
    %771 = vector.extract_strided_slice %768 {offsets = [0, 0], sizes = [2, 32], strides = [1, 1]} : vector<2x128xf32> to vector<2x32xf32>
    %772 = vector.extract_strided_slice %768 {offsets = [0, 32], sizes = [2, 32], strides = [1, 1]} : vector<2x128xf32> to vector<2x32xf32>
    %773 = vector.extract_strided_slice %768 {offsets = [0, 96], sizes = [2, 32], strides = [1, 1]} : vector<2x128xf32> to vector<2x32xf32>
    %774 = arith.mulf %772, %758 : vector<2x32xf32>
    %775 = arith.mulf %771, %770 : vector<2x32xf32>
    %776 = arith.addf %774, %775 : vector<2x32xf32>
    %777 = math.tanh %776 : vector<2x32xf32>
    %778 = arith.mulf %773, %777 : vector<2x32xf32>
    %779 = tpu.concatenate %652, %670, %688, %706, %724, %742, %760, %778 in 0 : vector<2x32xf32>, vector<2x32xf32>, vector<2x32xf32>, vector<2x32xf32>, vector<2x32xf32>, vector<2x32xf32>, vector<2x32xf32>, vector<2x32xf32> -> vector<16x32xf32>
    %c4_135 = arith.constant 4 : index
    %c0_136 = arith.constant 0 : index
    %c0_137 = arith.constant 0 : index
    %780 = vector.load %arg2[%c4_135, %c0_136, %c0_137] : memref<9x32x128xf32, #tpu.memory_space<vmem>>, vector<1x32x128xf32>
    %781 = vector.shape_cast %780 : vector<1x32x128xf32> to vector<32x128xf32>
    %cst_138 = arith.constant dense<0.000000e+00> : vector<16x128xf32>
    %782 = tpu.matmul %779, %781, %cst_138 {dimension_numbers = #tpu.dot_dimension_numbers<[1], [0], [0], [1], [0, 0, 1, 1], [], []>} : vector<16x32xf32>, vector<32x128xf32>, vector<16x128xf32> -> vector<16x128xf32>
    %c5 = arith.constant 5 : index
    %c0_139 = arith.constant 0 : index
    %c0_140 = arith.constant 0 : index
    %783 = vector.load %arg4[%c5, %c0_139, %c0_140] : memref<10x1x128xf32, #tpu.memory_space<vmem>>, vector<1x1x128xf32>
    %784 = vector.shape_cast %783 : vector<1x1x128xf32> to vector<1x128xf32>
    %785 = vector.broadcast %784 : vector<1x128xf32> to vector<16x128xf32>
    %786 = arith.addf %782, %785 : vector<16x128xf32>
    %c5_141 = arith.constant 5 : index
    %c0_142 = arith.constant 0 : index
    %c0_143 = arith.constant 0 : index
    %787 = vector.load %arg3[%c5_141, %c0_142, %c0_143] : memref<10x32x128xf32, #tpu.memory_space<vmem>>, vector<1x32x128xf32>
    %788 = vector.shape_cast %787 : vector<1x32x128xf32> to vector<32x128xf32>
    %cst_144 = arith.constant 0.000000e+00 : f32
    %789 = vector.broadcast %cst_144 : f32 to vector<2x32xf32>
    %cst_145 = arith.constant 0.000000e+00 : f32
    %790 = vector.broadcast %cst_145 : f32 to vector<2x32xf32>
    %791 = vector.extract_strided_slice %786 {offsets = [0, 0], sizes = [2, 128], strides = [1, 1]} : vector<16x128xf32> to vector<2x128xf32>
    %cst_146 = arith.constant dense<0.000000e+00> : vector<2x128xf32>
    %792 = tpu.matmul %789, %788, %cst_146 {dimension_numbers = #tpu.dot_dimension_numbers<[1], [0], [0], [1], [0, 0, 1, 1], [], []>} : vector<2x32xf32>, vector<32x128xf32>, vector<2x128xf32> -> vector<2x128xf32>
    %793 = arith.addf %791, %792 : vector<2x128xf32>
    %794 = arith.negf %793 : vector<2x128xf32>
    %795 = math.exp %794 : vector<2x128xf32>
    %cst_147 = arith.constant 1.000000e+00 : f32
    %796 = vector.broadcast %cst_147 : f32 to vector<2x128xf32>
    %797 = arith.addf %796, %795 : vector<2x128xf32>
    %798 = arith.divf %796, %797 : vector<2x128xf32>
    %799 = vector.extract_strided_slice %793 {offsets = [0, 64], sizes = [2, 32], strides = [1, 1]} : vector<2x128xf32> to vector<2x32xf32>
    %800 = math.tanh %799 : vector<2x32xf32>
    %801 = vector.extract_strided_slice %798 {offsets = [0, 0], sizes = [2, 32], strides = [1, 1]} : vector<2x128xf32> to vector<2x32xf32>
    %802 = vector.extract_strided_slice %798 {offsets = [0, 32], sizes = [2, 32], strides = [1, 1]} : vector<2x128xf32> to vector<2x32xf32>
    %803 = vector.extract_strided_slice %798 {offsets = [0, 96], sizes = [2, 32], strides = [1, 1]} : vector<2x128xf32> to vector<2x32xf32>
    %804 = arith.mulf %802, %790 : vector<2x32xf32>
    %805 = arith.mulf %801, %800 : vector<2x32xf32>
    %806 = arith.addf %804, %805 : vector<2x32xf32>
    %807 = math.tanh %806 : vector<2x32xf32>
    %808 = arith.mulf %803, %807 : vector<2x32xf32>
    %809 = vector.extract_strided_slice %786 {offsets = [2, 0], sizes = [2, 128], strides = [1, 1]} : vector<16x128xf32> to vector<2x128xf32>
    %cst_148 = arith.constant dense<0.000000e+00> : vector<2x128xf32>
    %810 = tpu.matmul %808, %788, %cst_148 {dimension_numbers = #tpu.dot_dimension_numbers<[1], [0], [0], [1], [0, 0, 1, 1], [], []>} : vector<2x32xf32>, vector<32x128xf32>, vector<2x128xf32> -> vector<2x128xf32>
    %811 = arith.addf %809, %810 : vector<2x128xf32>
    %812 = arith.negf %811 : vector<2x128xf32>
    %813 = math.exp %812 : vector<2x128xf32>
    %cst_149 = arith.constant 1.000000e+00 : f32
    %814 = vector.broadcast %cst_149 : f32 to vector<2x128xf32>
    %815 = arith.addf %814, %813 : vector<2x128xf32>
    %816 = arith.divf %814, %815 : vector<2x128xf32>
    %817 = vector.extract_strided_slice %811 {offsets = [0, 64], sizes = [2, 32], strides = [1, 1]} : vector<2x128xf32> to vector<2x32xf32>
    %818 = math.tanh %817 : vector<2x32xf32>
    %819 = vector.extract_strided_slice %816 {offsets = [0, 0], sizes = [2, 32], strides = [1, 1]} : vector<2x128xf32> to vector<2x32xf32>
    %820 = vector.extract_strided_slice %816 {offsets = [0, 32], sizes = [2, 32], strides = [1, 1]} : vector<2x128xf32> to vector<2x32xf32>
    %821 = vector.extract_strided_slice %816 {offsets = [0, 96], sizes = [2, 32], strides = [1, 1]} : vector<2x128xf32> to vector<2x32xf32>
    %822 = arith.mulf %820, %806 : vector<2x32xf32>
    %823 = arith.mulf %819, %818 : vector<2x32xf32>
    %824 = arith.addf %822, %823 : vector<2x32xf32>
    %825 = math.tanh %824 : vector<2x32xf32>
    %826 = arith.mulf %821, %825 : vector<2x32xf32>
    %827 = vector.extract_strided_slice %786 {offsets = [4, 0], sizes = [2, 128], strides = [1, 1]} : vector<16x128xf32> to vector<2x128xf32>
    %cst_150 = arith.constant dense<0.000000e+00> : vector<2x128xf32>
    %828 = tpu.matmul %826, %788, %cst_150 {dimension_numbers = #tpu.dot_dimension_numbers<[1], [0], [0], [1], [0, 0, 1, 1], [], []>} : vector<2x32xf32>, vector<32x128xf32>, vector<2x128xf32> -> vector<2x128xf32>
    %829 = arith.addf %827, %828 : vector<2x128xf32>
    %830 = arith.negf %829 : vector<2x128xf32>
    %831 = math.exp %830 : vector<2x128xf32>
    %cst_151 = arith.constant 1.000000e+00 : f32
    %832 = vector.broadcast %cst_151 : f32 to vector<2x128xf32>
    %833 = arith.addf %832, %831 : vector<2x128xf32>
    %834 = arith.divf %832, %833 : vector<2x128xf32>
    %835 = vector.extract_strided_slice %829 {offsets = [0, 64], sizes = [2, 32], strides = [1, 1]} : vector<2x128xf32> to vector<2x32xf32>
    %836 = math.tanh %835 : vector<2x32xf32>
    %837 = vector.extract_strided_slice %834 {offsets = [0, 0], sizes = [2, 32], strides = [1, 1]} : vector<2x128xf32> to vector<2x32xf32>
    %838 = vector.extract_strided_slice %834 {offsets = [0, 32], sizes = [2, 32], strides = [1, 1]} : vector<2x128xf32> to vector<2x32xf32>
    %839 = vector.extract_strided_slice %834 {offsets = [0, 96], sizes = [2, 32], strides = [1, 1]} : vector<2x128xf32> to vector<2x32xf32>
    %840 = arith.mulf %838, %824 : vector<2x32xf32>
    %841 = arith.mulf %837, %836 : vector<2x32xf32>
    %842 = arith.addf %840, %841 : vector<2x32xf32>
    %843 = math.tanh %842 : vector<2x32xf32>
    %844 = arith.mulf %839, %843 : vector<2x32xf32>
    %845 = vector.extract_strided_slice %786 {offsets = [6, 0], sizes = [2, 128], strides = [1, 1]} : vector<16x128xf32> to vector<2x128xf32>
    %cst_152 = arith.constant dense<0.000000e+00> : vector<2x128xf32>
    %846 = tpu.matmul %844, %788, %cst_152 {dimension_numbers = #tpu.dot_dimension_numbers<[1], [0], [0], [1], [0, 0, 1, 1], [], []>} : vector<2x32xf32>, vector<32x128xf32>, vector<2x128xf32> -> vector<2x128xf32>
    %847 = arith.addf %845, %846 : vector<2x128xf32>
    %848 = arith.negf %847 : vector<2x128xf32>
    %849 = math.exp %848 : vector<2x128xf32>
    %cst_153 = arith.constant 1.000000e+00 : f32
    %850 = vector.broadcast %cst_153 : f32 to vector<2x128xf32>
    %851 = arith.addf %850, %849 : vector<2x128xf32>
    %852 = arith.divf %850, %851 : vector<2x128xf32>
    %853 = vector.extract_strided_slice %847 {offsets = [0, 64], sizes = [2, 32], strides = [1, 1]} : vector<2x128xf32> to vector<2x32xf32>
    %854 = math.tanh %853 : vector<2x32xf32>
    %855 = vector.extract_strided_slice %852 {offsets = [0, 0], sizes = [2, 32], strides = [1, 1]} : vector<2x128xf32> to vector<2x32xf32>
    %856 = vector.extract_strided_slice %852 {offsets = [0, 32], sizes = [2, 32], strides = [1, 1]} : vector<2x128xf32> to vector<2x32xf32>
    %857 = vector.extract_strided_slice %852 {offsets = [0, 96], sizes = [2, 32], strides = [1, 1]} : vector<2x128xf32> to vector<2x32xf32>
    %858 = arith.mulf %856, %842 : vector<2x32xf32>
    %859 = arith.mulf %855, %854 : vector<2x32xf32>
    %860 = arith.addf %858, %859 : vector<2x32xf32>
    %861 = math.tanh %860 : vector<2x32xf32>
    %862 = arith.mulf %857, %861 : vector<2x32xf32>
    %863 = vector.extract_strided_slice %786 {offsets = [8, 0], sizes = [2, 128], strides = [1, 1]} : vector<16x128xf32> to vector<2x128xf32>
    %cst_154 = arith.constant dense<0.000000e+00> : vector<2x128xf32>
    %864 = tpu.matmul %862, %788, %cst_154 {dimension_numbers = #tpu.dot_dimension_numbers<[1], [0], [0], [1], [0, 0, 1, 1], [], []>} : vector<2x32xf32>, vector<32x128xf32>, vector<2x128xf32> -> vector<2x128xf32>
    %865 = arith.addf %863, %864 : vector<2x128xf32>
    %866 = arith.negf %865 : vector<2x128xf32>
    %867 = math.exp %866 : vector<2x128xf32>
    %cst_155 = arith.constant 1.000000e+00 : f32
    %868 = vector.broadcast %cst_155 : f32 to vector<2x128xf32>
    %869 = arith.addf %868, %867 : vector<2x128xf32>
    %870 = arith.divf %868, %869 : vector<2x128xf32>
    %871 = vector.extract_strided_slice %865 {offsets = [0, 64], sizes = [2, 32], strides = [1, 1]} : vector<2x128xf32> to vector<2x32xf32>
    %872 = math.tanh %871 : vector<2x32xf32>
    %873 = vector.extract_strided_slice %870 {offsets = [0, 0], sizes = [2, 32], strides = [1, 1]} : vector<2x128xf32> to vector<2x32xf32>
    %874 = vector.extract_strided_slice %870 {offsets = [0, 32], sizes = [2, 32], strides = [1, 1]} : vector<2x128xf32> to vector<2x32xf32>
    %875 = vector.extract_strided_slice %870 {offsets = [0, 96], sizes = [2, 32], strides = [1, 1]} : vector<2x128xf32> to vector<2x32xf32>
    %876 = arith.mulf %874, %860 : vector<2x32xf32>
    %877 = arith.mulf %873, %872 : vector<2x32xf32>
    %878 = arith.addf %876, %877 : vector<2x32xf32>
    %879 = math.tanh %878 : vector<2x32xf32>
    %880 = arith.mulf %875, %879 : vector<2x32xf32>
    %881 = vector.extract_strided_slice %786 {offsets = [10, 0], sizes = [2, 128], strides = [1, 1]} : vector<16x128xf32> to vector<2x128xf32>
    %cst_156 = arith.constant dense<0.000000e+00> : vector<2x128xf32>
    %882 = tpu.matmul %880, %788, %cst_156 {dimension_numbers = #tpu.dot_dimension_numbers<[1], [0], [0], [1], [0, 0, 1, 1], [], []>} : vector<2x32xf32>, vector<32x128xf32>, vector<2x128xf32> -> vector<2x128xf32>
    %883 = arith.addf %881, %882 : vector<2x128xf32>
    %884 = arith.negf %883 : vector<2x128xf32>
    %885 = math.exp %884 : vector<2x128xf32>
    %cst_157 = arith.constant 1.000000e+00 : f32
    %886 = vector.broadcast %cst_157 : f32 to vector<2x128xf32>
    %887 = arith.addf %886, %885 : vector<2x128xf32>
    %888 = arith.divf %886, %887 : vector<2x128xf32>
    %889 = vector.extract_strided_slice %883 {offsets = [0, 64], sizes = [2, 32], strides = [1, 1]} : vector<2x128xf32> to vector<2x32xf32>
    %890 = math.tanh %889 : vector<2x32xf32>
    %891 = vector.extract_strided_slice %888 {offsets = [0, 0], sizes = [2, 32], strides = [1, 1]} : vector<2x128xf32> to vector<2x32xf32>
    %892 = vector.extract_strided_slice %888 {offsets = [0, 32], sizes = [2, 32], strides = [1, 1]} : vector<2x128xf32> to vector<2x32xf32>
    %893 = vector.extract_strided_slice %888 {offsets = [0, 96], sizes = [2, 32], strides = [1, 1]} : vector<2x128xf32> to vector<2x32xf32>
    %894 = arith.mulf %892, %878 : vector<2x32xf32>
    %895 = arith.mulf %891, %890 : vector<2x32xf32>
    %896 = arith.addf %894, %895 : vector<2x32xf32>
    %897 = math.tanh %896 : vector<2x32xf32>
    %898 = arith.mulf %893, %897 : vector<2x32xf32>
    %899 = vector.extract_strided_slice %786 {offsets = [12, 0], sizes = [2, 128], strides = [1, 1]} : vector<16x128xf32> to vector<2x128xf32>
    %cst_158 = arith.constant dense<0.000000e+00> : vector<2x128xf32>
    %900 = tpu.matmul %898, %788, %cst_158 {dimension_numbers = #tpu.dot_dimension_numbers<[1], [0], [0], [1], [0, 0, 1, 1], [], []>} : vector<2x32xf32>, vector<32x128xf32>, vector<2x128xf32> -> vector<2x128xf32>
    %901 = arith.addf %899, %900 : vector<2x128xf32>
    %902 = arith.negf %901 : vector<2x128xf32>
    %903 = math.exp %902 : vector<2x128xf32>
    %cst_159 = arith.constant 1.000000e+00 : f32
    %904 = vector.broadcast %cst_159 : f32 to vector<2x128xf32>
    %905 = arith.addf %904, %903 : vector<2x128xf32>
    %906 = arith.divf %904, %905 : vector<2x128xf32>
    %907 = vector.extract_strided_slice %901 {offsets = [0, 64], sizes = [2, 32], strides = [1, 1]} : vector<2x128xf32> to vector<2x32xf32>
    %908 = math.tanh %907 : vector<2x32xf32>
    %909 = vector.extract_strided_slice %906 {offsets = [0, 0], sizes = [2, 32], strides = [1, 1]} : vector<2x128xf32> to vector<2x32xf32>
    %910 = vector.extract_strided_slice %906 {offsets = [0, 32], sizes = [2, 32], strides = [1, 1]} : vector<2x128xf32> to vector<2x32xf32>
    %911 = vector.extract_strided_slice %906 {offsets = [0, 96], sizes = [2, 32], strides = [1, 1]} : vector<2x128xf32> to vector<2x32xf32>
    %912 = arith.mulf %910, %896 : vector<2x32xf32>
    %913 = arith.mulf %909, %908 : vector<2x32xf32>
    %914 = arith.addf %912, %913 : vector<2x32xf32>
    %915 = math.tanh %914 : vector<2x32xf32>
    %916 = arith.mulf %911, %915 : vector<2x32xf32>
    %917 = vector.extract_strided_slice %786 {offsets = [14, 0], sizes = [2, 128], strides = [1, 1]} : vector<16x128xf32> to vector<2x128xf32>
    %cst_160 = arith.constant dense<0.000000e+00> : vector<2x128xf32>
    %918 = tpu.matmul %916, %788, %cst_160 {dimension_numbers = #tpu.dot_dimension_numbers<[1], [0], [0], [1], [0, 0, 1, 1], [], []>} : vector<2x32xf32>, vector<32x128xf32>, vector<2x128xf32> -> vector<2x128xf32>
    %919 = arith.addf %917, %918 : vector<2x128xf32>
    %920 = arith.negf %919 : vector<2x128xf32>
    %921 = math.exp %920 : vector<2x128xf32>
    %cst_161 = arith.constant 1.000000e+00 : f32
    %922 = vector.broadcast %cst_161 : f32 to vector<2x128xf32>
    %923 = arith.addf %922, %921 : vector<2x128xf32>
    %924 = arith.divf %922, %923 : vector<2x128xf32>
    %925 = vector.extract_strided_slice %919 {offsets = [0, 64], sizes = [2, 32], strides = [1, 1]} : vector<2x128xf32> to vector<2x32xf32>
    %926 = math.tanh %925 : vector<2x32xf32>
    %927 = vector.extract_strided_slice %924 {offsets = [0, 0], sizes = [2, 32], strides = [1, 1]} : vector<2x128xf32> to vector<2x32xf32>
    %928 = vector.extract_strided_slice %924 {offsets = [0, 32], sizes = [2, 32], strides = [1, 1]} : vector<2x128xf32> to vector<2x32xf32>
    %929 = vector.extract_strided_slice %924 {offsets = [0, 96], sizes = [2, 32], strides = [1, 1]} : vector<2x128xf32> to vector<2x32xf32>
    %930 = arith.mulf %928, %914 : vector<2x32xf32>
    %931 = arith.mulf %927, %926 : vector<2x32xf32>
    %932 = arith.addf %930, %931 : vector<2x32xf32>
    %933 = math.tanh %932 : vector<2x32xf32>
    %934 = arith.mulf %929, %933 : vector<2x32xf32>
    %935 = tpu.concatenate %808, %826, %844, %862, %880, %898, %916, %934 in 0 : vector<2x32xf32>, vector<2x32xf32>, vector<2x32xf32>, vector<2x32xf32>, vector<2x32xf32>, vector<2x32xf32>, vector<2x32xf32>, vector<2x32xf32> -> vector<16x32xf32>
    %c5_162 = arith.constant 5 : index
    %c0_163 = arith.constant 0 : index
    %c0_164 = arith.constant 0 : index
    %936 = vector.load %arg2[%c5_162, %c0_163, %c0_164] : memref<9x32x128xf32, #tpu.memory_space<vmem>>, vector<1x32x128xf32>
    %937 = vector.shape_cast %936 : vector<1x32x128xf32> to vector<32x128xf32>
    %cst_165 = arith.constant dense<0.000000e+00> : vector<16x128xf32>
    %938 = tpu.matmul %935, %937, %cst_165 {dimension_numbers = #tpu.dot_dimension_numbers<[1], [0], [0], [1], [0, 0, 1, 1], [], []>} : vector<16x32xf32>, vector<32x128xf32>, vector<16x128xf32> -> vector<16x128xf32>
    %c6 = arith.constant 6 : index
    %c0_166 = arith.constant 0 : index
    %c0_167 = arith.constant 0 : index
    %939 = vector.load %arg4[%c6, %c0_166, %c0_167] : memref<10x1x128xf32, #tpu.memory_space<vmem>>, vector<1x1x128xf32>
    %940 = vector.shape_cast %939 : vector<1x1x128xf32> to vector<1x128xf32>
    %941 = vector.broadcast %940 : vector<1x128xf32> to vector<16x128xf32>
    %942 = arith.addf %938, %941 : vector<16x128xf32>
    %c6_168 = arith.constant 6 : index
    %c0_169 = arith.constant 0 : index
    %c0_170 = arith.constant 0 : index
    %943 = vector.load %arg3[%c6_168, %c0_169, %c0_170] : memref<10x32x128xf32, #tpu.memory_space<vmem>>, vector<1x32x128xf32>
    %944 = vector.shape_cast %943 : vector<1x32x128xf32> to vector<32x128xf32>
    %cst_171 = arith.constant 0.000000e+00 : f32
    %945 = vector.broadcast %cst_171 : f32 to vector<2x32xf32>
    %cst_172 = arith.constant 0.000000e+00 : f32
    %946 = vector.broadcast %cst_172 : f32 to vector<2x32xf32>
    %947 = vector.extract_strided_slice %942 {offsets = [0, 0], sizes = [2, 128], strides = [1, 1]} : vector<16x128xf32> to vector<2x128xf32>
    %cst_173 = arith.constant dense<0.000000e+00> : vector<2x128xf32>
    %948 = tpu.matmul %945, %944, %cst_173 {dimension_numbers = #tpu.dot_dimension_numbers<[1], [0], [0], [1], [0, 0, 1, 1], [], []>} : vector<2x32xf32>, vector<32x128xf32>, vector<2x128xf32> -> vector<2x128xf32>
    %949 = arith.addf %947, %948 : vector<2x128xf32>
    %950 = arith.negf %949 : vector<2x128xf32>
    %951 = math.exp %950 : vector<2x128xf32>
    %cst_174 = arith.constant 1.000000e+00 : f32
    %952 = vector.broadcast %cst_174 : f32 to vector<2x128xf32>
    %953 = arith.addf %952, %951 : vector<2x128xf32>
    %954 = arith.divf %952, %953 : vector<2x128xf32>
    %955 = vector.extract_strided_slice %949 {offsets = [0, 64], sizes = [2, 32], strides = [1, 1]} : vector<2x128xf32> to vector<2x32xf32>
    %956 = math.tanh %955 : vector<2x32xf32>
    %957 = vector.extract_strided_slice %954 {offsets = [0, 0], sizes = [2, 32], strides = [1, 1]} : vector<2x128xf32> to vector<2x32xf32>
    %958 = vector.extract_strided_slice %954 {offsets = [0, 32], sizes = [2, 32], strides = [1, 1]} : vector<2x128xf32> to vector<2x32xf32>
    %959 = vector.extract_strided_slice %954 {offsets = [0, 96], sizes = [2, 32], strides = [1, 1]} : vector<2x128xf32> to vector<2x32xf32>
    %960 = arith.mulf %958, %946 : vector<2x32xf32>
    %961 = arith.mulf %957, %956 : vector<2x32xf32>
    %962 = arith.addf %960, %961 : vector<2x32xf32>
    %963 = math.tanh %962 : vector<2x32xf32>
    %964 = arith.mulf %959, %963 : vector<2x32xf32>
    %965 = vector.extract_strided_slice %942 {offsets = [2, 0], sizes = [2, 128], strides = [1, 1]} : vector<16x128xf32> to vector<2x128xf32>
    %cst_175 = arith.constant dense<0.000000e+00> : vector<2x128xf32>
    %966 = tpu.matmul %964, %944, %cst_175 {dimension_numbers = #tpu.dot_dimension_numbers<[1], [0], [0], [1], [0, 0, 1, 1], [], []>} : vector<2x32xf32>, vector<32x128xf32>, vector<2x128xf32> -> vector<2x128xf32>
    %967 = arith.addf %965, %966 : vector<2x128xf32>
    %968 = arith.negf %967 : vector<2x128xf32>
    %969 = math.exp %968 : vector<2x128xf32>
    %cst_176 = arith.constant 1.000000e+00 : f32
    %970 = vector.broadcast %cst_176 : f32 to vector<2x128xf32>
    %971 = arith.addf %970, %969 : vector<2x128xf32>
    %972 = arith.divf %970, %971 : vector<2x128xf32>
    %973 = vector.extract_strided_slice %967 {offsets = [0, 64], sizes = [2, 32], strides = [1, 1]} : vector<2x128xf32> to vector<2x32xf32>
    %974 = math.tanh %973 : vector<2x32xf32>
    %975 = vector.extract_strided_slice %972 {offsets = [0, 0], sizes = [2, 32], strides = [1, 1]} : vector<2x128xf32> to vector<2x32xf32>
    %976 = vector.extract_strided_slice %972 {offsets = [0, 32], sizes = [2, 32], strides = [1, 1]} : vector<2x128xf32> to vector<2x32xf32>
    %977 = vector.extract_strided_slice %972 {offsets = [0, 96], sizes = [2, 32], strides = [1, 1]} : vector<2x128xf32> to vector<2x32xf32>
    %978 = arith.mulf %976, %962 : vector<2x32xf32>
    %979 = arith.mulf %975, %974 : vector<2x32xf32>
    %980 = arith.addf %978, %979 : vector<2x32xf32>
    %981 = math.tanh %980 : vector<2x32xf32>
    %982 = arith.mulf %977, %981 : vector<2x32xf32>
    %983 = vector.extract_strided_slice %942 {offsets = [4, 0], sizes = [2, 128], strides = [1, 1]} : vector<16x128xf32> to vector<2x128xf32>
    %cst_177 = arith.constant dense<0.000000e+00> : vector<2x128xf32>
    %984 = tpu.matmul %982, %944, %cst_177 {dimension_numbers = #tpu.dot_dimension_numbers<[1], [0], [0], [1], [0, 0, 1, 1], [], []>} : vector<2x32xf32>, vector<32x128xf32>, vector<2x128xf32> -> vector<2x128xf32>
    %985 = arith.addf %983, %984 : vector<2x128xf32>
    %986 = arith.negf %985 : vector<2x128xf32>
    %987 = math.exp %986 : vector<2x128xf32>
    %cst_178 = arith.constant 1.000000e+00 : f32
    %988 = vector.broadcast %cst_178 : f32 to vector<2x128xf32>
    %989 = arith.addf %988, %987 : vector<2x128xf32>
    %990 = arith.divf %988, %989 : vector<2x128xf32>
    %991 = vector.extract_strided_slice %985 {offsets = [0, 64], sizes = [2, 32], strides = [1, 1]} : vector<2x128xf32> to vector<2x32xf32>
    %992 = math.tanh %991 : vector<2x32xf32>
    %993 = vector.extract_strided_slice %990 {offsets = [0, 0], sizes = [2, 32], strides = [1, 1]} : vector<2x128xf32> to vector<2x32xf32>
    %994 = vector.extract_strided_slice %990 {offsets = [0, 32], sizes = [2, 32], strides = [1, 1]} : vector<2x128xf32> to vector<2x32xf32>
    %995 = vector.extract_strided_slice %990 {offsets = [0, 96], sizes = [2, 32], strides = [1, 1]} : vector<2x128xf32> to vector<2x32xf32>
    %996 = arith.mulf %994, %980 : vector<2x32xf32>
    %997 = arith.mulf %993, %992 : vector<2x32xf32>
    %998 = arith.addf %996, %997 : vector<2x32xf32>
    %999 = math.tanh %998 : vector<2x32xf32>
    %1000 = arith.mulf %995, %999 : vector<2x32xf32>
    %1001 = vector.extract_strided_slice %942 {offsets = [6, 0], sizes = [2, 128], strides = [1, 1]} : vector<16x128xf32> to vector<2x128xf32>
    %cst_179 = arith.constant dense<0.000000e+00> : vector<2x128xf32>
    %1002 = tpu.matmul %1000, %944, %cst_179 {dimension_numbers = #tpu.dot_dimension_numbers<[1], [0], [0], [1], [0, 0, 1, 1], [], []>} : vector<2x32xf32>, vector<32x128xf32>, vector<2x128xf32> -> vector<2x128xf32>
    %1003 = arith.addf %1001, %1002 : vector<2x128xf32>
    %1004 = arith.negf %1003 : vector<2x128xf32>
    %1005 = math.exp %1004 : vector<2x128xf32>
    %cst_180 = arith.constant 1.000000e+00 : f32
    %1006 = vector.broadcast %cst_180 : f32 to vector<2x128xf32>
    %1007 = arith.addf %1006, %1005 : vector<2x128xf32>
    %1008 = arith.divf %1006, %1007 : vector<2x128xf32>
    %1009 = vector.extract_strided_slice %1003 {offsets = [0, 64], sizes = [2, 32], strides = [1, 1]} : vector<2x128xf32> to vector<2x32xf32>
    %1010 = math.tanh %1009 : vector<2x32xf32>
    %1011 = vector.extract_strided_slice %1008 {offsets = [0, 0], sizes = [2, 32], strides = [1, 1]} : vector<2x128xf32> to vector<2x32xf32>
    %1012 = vector.extract_strided_slice %1008 {offsets = [0, 32], sizes = [2, 32], strides = [1, 1]} : vector<2x128xf32> to vector<2x32xf32>
    %1013 = vector.extract_strided_slice %1008 {offsets = [0, 96], sizes = [2, 32], strides = [1, 1]} : vector<2x128xf32> to vector<2x32xf32>
    %1014 = arith.mulf %1012, %998 : vector<2x32xf32>
    %1015 = arith.mulf %1011, %1010 : vector<2x32xf32>
    %1016 = arith.addf %1014, %1015 : vector<2x32xf32>
    %1017 = math.tanh %1016 : vector<2x32xf32>
    %1018 = arith.mulf %1013, %1017 : vector<2x32xf32>
    %1019 = vector.extract_strided_slice %942 {offsets = [8, 0], sizes = [2, 128], strides = [1, 1]} : vector<16x128xf32> to vector<2x128xf32>
    %cst_181 = arith.constant dense<0.000000e+00> : vector<2x128xf32>
    %1020 = tpu.matmul %1018, %944, %cst_181 {dimension_numbers = #tpu.dot_dimension_numbers<[1], [0], [0], [1], [0, 0, 1, 1], [], []>} : vector<2x32xf32>, vector<32x128xf32>, vector<2x128xf32> -> vector<2x128xf32>
    %1021 = arith.addf %1019, %1020 : vector<2x128xf32>
    %1022 = arith.negf %1021 : vector<2x128xf32>
    %1023 = math.exp %1022 : vector<2x128xf32>
    %cst_182 = arith.constant 1.000000e+00 : f32
    %1024 = vector.broadcast %cst_182 : f32 to vector<2x128xf32>
    %1025 = arith.addf %1024, %1023 : vector<2x128xf32>
    %1026 = arith.divf %1024, %1025 : vector<2x128xf32>
    %1027 = vector.extract_strided_slice %1021 {offsets = [0, 64], sizes = [2, 32], strides = [1, 1]} : vector<2x128xf32> to vector<2x32xf32>
    %1028 = math.tanh %1027 : vector<2x32xf32>
    %1029 = vector.extract_strided_slice %1026 {offsets = [0, 0], sizes = [2, 32], strides = [1, 1]} : vector<2x128xf32> to vector<2x32xf32>
    %1030 = vector.extract_strided_slice %1026 {offsets = [0, 32], sizes = [2, 32], strides = [1, 1]} : vector<2x128xf32> to vector<2x32xf32>
    %1031 = vector.extract_strided_slice %1026 {offsets = [0, 96], sizes = [2, 32], strides = [1, 1]} : vector<2x128xf32> to vector<2x32xf32>
    %1032 = arith.mulf %1030, %1016 : vector<2x32xf32>
    %1033 = arith.mulf %1029, %1028 : vector<2x32xf32>
    %1034 = arith.addf %1032, %1033 : vector<2x32xf32>
    %1035 = math.tanh %1034 : vector<2x32xf32>
    %1036 = arith.mulf %1031, %1035 : vector<2x32xf32>
    %1037 = vector.extract_strided_slice %942 {offsets = [10, 0], sizes = [2, 128], strides = [1, 1]} : vector<16x128xf32> to vector<2x128xf32>
    %cst_183 = arith.constant dense<0.000000e+00> : vector<2x128xf32>
    %1038 = tpu.matmul %1036, %944, %cst_183 {dimension_numbers = #tpu.dot_dimension_numbers<[1], [0], [0], [1], [0, 0, 1, 1], [], []>} : vector<2x32xf32>, vector<32x128xf32>, vector<2x128xf32> -> vector<2x128xf32>
    %1039 = arith.addf %1037, %1038 : vector<2x128xf32>
    %1040 = arith.negf %1039 : vector<2x128xf32>
    %1041 = math.exp %1040 : vector<2x128xf32>
    %cst_184 = arith.constant 1.000000e+00 : f32
    %1042 = vector.broadcast %cst_184 : f32 to vector<2x128xf32>
    %1043 = arith.addf %1042, %1041 : vector<2x128xf32>
    %1044 = arith.divf %1042, %1043 : vector<2x128xf32>
    %1045 = vector.extract_strided_slice %1039 {offsets = [0, 64], sizes = [2, 32], strides = [1, 1]} : vector<2x128xf32> to vector<2x32xf32>
    %1046 = math.tanh %1045 : vector<2x32xf32>
    %1047 = vector.extract_strided_slice %1044 {offsets = [0, 0], sizes = [2, 32], strides = [1, 1]} : vector<2x128xf32> to vector<2x32xf32>
    %1048 = vector.extract_strided_slice %1044 {offsets = [0, 32], sizes = [2, 32], strides = [1, 1]} : vector<2x128xf32> to vector<2x32xf32>
    %1049 = vector.extract_strided_slice %1044 {offsets = [0, 96], sizes = [2, 32], strides = [1, 1]} : vector<2x128xf32> to vector<2x32xf32>
    %1050 = arith.mulf %1048, %1034 : vector<2x32xf32>
    %1051 = arith.mulf %1047, %1046 : vector<2x32xf32>
    %1052 = arith.addf %1050, %1051 : vector<2x32xf32>
    %1053 = math.tanh %1052 : vector<2x32xf32>
    %1054 = arith.mulf %1049, %1053 : vector<2x32xf32>
    %1055 = vector.extract_strided_slice %942 {offsets = [12, 0], sizes = [2, 128], strides = [1, 1]} : vector<16x128xf32> to vector<2x128xf32>
    %cst_185 = arith.constant dense<0.000000e+00> : vector<2x128xf32>
    %1056 = tpu.matmul %1054, %944, %cst_185 {dimension_numbers = #tpu.dot_dimension_numbers<[1], [0], [0], [1], [0, 0, 1, 1], [], []>} : vector<2x32xf32>, vector<32x128xf32>, vector<2x128xf32> -> vector<2x128xf32>
    %1057 = arith.addf %1055, %1056 : vector<2x128xf32>
    %1058 = arith.negf %1057 : vector<2x128xf32>
    %1059 = math.exp %1058 : vector<2x128xf32>
    %cst_186 = arith.constant 1.000000e+00 : f32
    %1060 = vector.broadcast %cst_186 : f32 to vector<2x128xf32>
    %1061 = arith.addf %1060, %1059 : vector<2x128xf32>
    %1062 = arith.divf %1060, %1061 : vector<2x128xf32>
    %1063 = vector.extract_strided_slice %1057 {offsets = [0, 64], sizes = [2, 32], strides = [1, 1]} : vector<2x128xf32> to vector<2x32xf32>
    %1064 = math.tanh %1063 : vector<2x32xf32>
    %1065 = vector.extract_strided_slice %1062 {offsets = [0, 0], sizes = [2, 32], strides = [1, 1]} : vector<2x128xf32> to vector<2x32xf32>
    %1066 = vector.extract_strided_slice %1062 {offsets = [0, 32], sizes = [2, 32], strides = [1, 1]} : vector<2x128xf32> to vector<2x32xf32>
    %1067 = vector.extract_strided_slice %1062 {offsets = [0, 96], sizes = [2, 32], strides = [1, 1]} : vector<2x128xf32> to vector<2x32xf32>
    %1068 = arith.mulf %1066, %1052 : vector<2x32xf32>
    %1069 = arith.mulf %1065, %1064 : vector<2x32xf32>
    %1070 = arith.addf %1068, %1069 : vector<2x32xf32>
    %1071 = math.tanh %1070 : vector<2x32xf32>
    %1072 = arith.mulf %1067, %1071 : vector<2x32xf32>
    %1073 = vector.extract_strided_slice %942 {offsets = [14, 0], sizes = [2, 128], strides = [1, 1]} : vector<16x128xf32> to vector<2x128xf32>
    %cst_187 = arith.constant dense<0.000000e+00> : vector<2x128xf32>
    %1074 = tpu.matmul %1072, %944, %cst_187 {dimension_numbers = #tpu.dot_dimension_numbers<[1], [0], [0], [1], [0, 0, 1, 1], [], []>} : vector<2x32xf32>, vector<32x128xf32>, vector<2x128xf32> -> vector<2x128xf32>
    %1075 = arith.addf %1073, %1074 : vector<2x128xf32>
    %1076 = arith.negf %1075 : vector<2x128xf32>
    %1077 = math.exp %1076 : vector<2x128xf32>
    %cst_188 = arith.constant 1.000000e+00 : f32
    %1078 = vector.broadcast %cst_188 : f32 to vector<2x128xf32>
    %1079 = arith.addf %1078, %1077 : vector<2x128xf32>
    %1080 = arith.divf %1078, %1079 : vector<2x128xf32>
    %1081 = vector.extract_strided_slice %1075 {offsets = [0, 64], sizes = [2, 32], strides = [1, 1]} : vector<2x128xf32> to vector<2x32xf32>
    %1082 = math.tanh %1081 : vector<2x32xf32>
    %1083 = vector.extract_strided_slice %1080 {offsets = [0, 0], sizes = [2, 32], strides = [1, 1]} : vector<2x128xf32> to vector<2x32xf32>
    %1084 = vector.extract_strided_slice %1080 {offsets = [0, 32], sizes = [2, 32], strides = [1, 1]} : vector<2x128xf32> to vector<2x32xf32>
    %1085 = vector.extract_strided_slice %1080 {offsets = [0, 96], sizes = [2, 32], strides = [1, 1]} : vector<2x128xf32> to vector<2x32xf32>
    %1086 = arith.mulf %1084, %1070 : vector<2x32xf32>
    %1087 = arith.mulf %1083, %1082 : vector<2x32xf32>
    %1088 = arith.addf %1086, %1087 : vector<2x32xf32>
    %1089 = math.tanh %1088 : vector<2x32xf32>
    %1090 = arith.mulf %1085, %1089 : vector<2x32xf32>
    %1091 = tpu.concatenate %964, %982, %1000, %1018, %1036, %1054, %1072, %1090 in 0 : vector<2x32xf32>, vector<2x32xf32>, vector<2x32xf32>, vector<2x32xf32>, vector<2x32xf32>, vector<2x32xf32>, vector<2x32xf32>, vector<2x32xf32> -> vector<16x32xf32>
    %c6_189 = arith.constant 6 : index
    %c0_190 = arith.constant 0 : index
    %c0_191 = arith.constant 0 : index
    %1092 = vector.load %arg2[%c6_189, %c0_190, %c0_191] : memref<9x32x128xf32, #tpu.memory_space<vmem>>, vector<1x32x128xf32>
    %1093 = vector.shape_cast %1092 : vector<1x32x128xf32> to vector<32x128xf32>
    %cst_192 = arith.constant dense<0.000000e+00> : vector<16x128xf32>
    %1094 = tpu.matmul %1091, %1093, %cst_192 {dimension_numbers = #tpu.dot_dimension_numbers<[1], [0], [0], [1], [0, 0, 1, 1], [], []>} : vector<16x32xf32>, vector<32x128xf32>, vector<16x128xf32> -> vector<16x128xf32>
    %c7 = arith.constant 7 : index
    %c0_193 = arith.constant 0 : index
    %c0_194 = arith.constant 0 : index
    %1095 = vector.load %arg4[%c7, %c0_193, %c0_194] : memref<10x1x128xf32, #tpu.memory_space<vmem>>, vector<1x1x128xf32>
    %1096 = vector.shape_cast %1095 : vector<1x1x128xf32> to vector<1x128xf32>
    %1097 = vector.broadcast %1096 : vector<1x128xf32> to vector<16x128xf32>
    %1098 = arith.addf %1094, %1097 : vector<16x128xf32>
    %c7_195 = arith.constant 7 : index
    %c0_196 = arith.constant 0 : index
    %c0_197 = arith.constant 0 : index
    %1099 = vector.load %arg3[%c7_195, %c0_196, %c0_197] : memref<10x32x128xf32, #tpu.memory_space<vmem>>, vector<1x32x128xf32>
    %1100 = vector.shape_cast %1099 : vector<1x32x128xf32> to vector<32x128xf32>
    %cst_198 = arith.constant 0.000000e+00 : f32
    %1101 = vector.broadcast %cst_198 : f32 to vector<2x32xf32>
    %cst_199 = arith.constant 0.000000e+00 : f32
    %1102 = vector.broadcast %cst_199 : f32 to vector<2x32xf32>
    %1103 = vector.extract_strided_slice %1098 {offsets = [0, 0], sizes = [2, 128], strides = [1, 1]} : vector<16x128xf32> to vector<2x128xf32>
    %cst_200 = arith.constant dense<0.000000e+00> : vector<2x128xf32>
    %1104 = tpu.matmul %1101, %1100, %cst_200 {dimension_numbers = #tpu.dot_dimension_numbers<[1], [0], [0], [1], [0, 0, 1, 1], [], []>} : vector<2x32xf32>, vector<32x128xf32>, vector<2x128xf32> -> vector<2x128xf32>
    %1105 = arith.addf %1103, %1104 : vector<2x128xf32>
    %1106 = arith.negf %1105 : vector<2x128xf32>
    %1107 = math.exp %1106 : vector<2x128xf32>
    %cst_201 = arith.constant 1.000000e+00 : f32
    %1108 = vector.broadcast %cst_201 : f32 to vector<2x128xf32>
    %1109 = arith.addf %1108, %1107 : vector<2x128xf32>
    %1110 = arith.divf %1108, %1109 : vector<2x128xf32>
    %1111 = vector.extract_strided_slice %1105 {offsets = [0, 64], sizes = [2, 32], strides = [1, 1]} : vector<2x128xf32> to vector<2x32xf32>
    %1112 = math.tanh %1111 : vector<2x32xf32>
    %1113 = vector.extract_strided_slice %1110 {offsets = [0, 0], sizes = [2, 32], strides = [1, 1]} : vector<2x128xf32> to vector<2x32xf32>
    %1114 = vector.extract_strided_slice %1110 {offsets = [0, 32], sizes = [2, 32], strides = [1, 1]} : vector<2x128xf32> to vector<2x32xf32>
    %1115 = vector.extract_strided_slice %1110 {offsets = [0, 96], sizes = [2, 32], strides = [1, 1]} : vector<2x128xf32> to vector<2x32xf32>
    %1116 = arith.mulf %1114, %1102 : vector<2x32xf32>
    %1117 = arith.mulf %1113, %1112 : vector<2x32xf32>
    %1118 = arith.addf %1116, %1117 : vector<2x32xf32>
    %1119 = math.tanh %1118 : vector<2x32xf32>
    %1120 = arith.mulf %1115, %1119 : vector<2x32xf32>
    %1121 = vector.extract_strided_slice %1098 {offsets = [2, 0], sizes = [2, 128], strides = [1, 1]} : vector<16x128xf32> to vector<2x128xf32>
    %cst_202 = arith.constant dense<0.000000e+00> : vector<2x128xf32>
    %1122 = tpu.matmul %1120, %1100, %cst_202 {dimension_numbers = #tpu.dot_dimension_numbers<[1], [0], [0], [1], [0, 0, 1, 1], [], []>} : vector<2x32xf32>, vector<32x128xf32>, vector<2x128xf32> -> vector<2x128xf32>
    %1123 = arith.addf %1121, %1122 : vector<2x128xf32>
    %1124 = arith.negf %1123 : vector<2x128xf32>
    %1125 = math.exp %1124 : vector<2x128xf32>
    %cst_203 = arith.constant 1.000000e+00 : f32
    %1126 = vector.broadcast %cst_203 : f32 to vector<2x128xf32>
    %1127 = arith.addf %1126, %1125 : vector<2x128xf32>
    %1128 = arith.divf %1126, %1127 : vector<2x128xf32>
    %1129 = vector.extract_strided_slice %1123 {offsets = [0, 64], sizes = [2, 32], strides = [1, 1]} : vector<2x128xf32> to vector<2x32xf32>
    %1130 = math.tanh %1129 : vector<2x32xf32>
    %1131 = vector.extract_strided_slice %1128 {offsets = [0, 0], sizes = [2, 32], strides = [1, 1]} : vector<2x128xf32> to vector<2x32xf32>
    %1132 = vector.extract_strided_slice %1128 {offsets = [0, 32], sizes = [2, 32], strides = [1, 1]} : vector<2x128xf32> to vector<2x32xf32>
    %1133 = vector.extract_strided_slice %1128 {offsets = [0, 96], sizes = [2, 32], strides = [1, 1]} : vector<2x128xf32> to vector<2x32xf32>
    %1134 = arith.mulf %1132, %1118 : vector<2x32xf32>
    %1135 = arith.mulf %1131, %1130 : vector<2x32xf32>
    %1136 = arith.addf %1134, %1135 : vector<2x32xf32>
    %1137 = math.tanh %1136 : vector<2x32xf32>
    %1138 = arith.mulf %1133, %1137 : vector<2x32xf32>
    %1139 = vector.extract_strided_slice %1098 {offsets = [4, 0], sizes = [2, 128], strides = [1, 1]} : vector<16x128xf32> to vector<2x128xf32>
    %cst_204 = arith.constant dense<0.000000e+00> : vector<2x128xf32>
    %1140 = tpu.matmul %1138, %1100, %cst_204 {dimension_numbers = #tpu.dot_dimension_numbers<[1], [0], [0], [1], [0, 0, 1, 1], [], []>} : vector<2x32xf32>, vector<32x128xf32>, vector<2x128xf32> -> vector<2x128xf32>
    %1141 = arith.addf %1139, %1140 : vector<2x128xf32>
    %1142 = arith.negf %1141 : vector<2x128xf32>
    %1143 = math.exp %1142 : vector<2x128xf32>
    %cst_205 = arith.constant 1.000000e+00 : f32
    %1144 = vector.broadcast %cst_205 : f32 to vector<2x128xf32>
    %1145 = arith.addf %1144, %1143 : vector<2x128xf32>
    %1146 = arith.divf %1144, %1145 : vector<2x128xf32>
    %1147 = vector.extract_strided_slice %1141 {offsets = [0, 64], sizes = [2, 32], strides = [1, 1]} : vector<2x128xf32> to vector<2x32xf32>
    %1148 = math.tanh %1147 : vector<2x32xf32>
    %1149 = vector.extract_strided_slice %1146 {offsets = [0, 0], sizes = [2, 32], strides = [1, 1]} : vector<2x128xf32> to vector<2x32xf32>
    %1150 = vector.extract_strided_slice %1146 {offsets = [0, 32], sizes = [2, 32], strides = [1, 1]} : vector<2x128xf32> to vector<2x32xf32>
    %1151 = vector.extract_strided_slice %1146 {offsets = [0, 96], sizes = [2, 32], strides = [1, 1]} : vector<2x128xf32> to vector<2x32xf32>
    %1152 = arith.mulf %1150, %1136 : vector<2x32xf32>
    %1153 = arith.mulf %1149, %1148 : vector<2x32xf32>
    %1154 = arith.addf %1152, %1153 : vector<2x32xf32>
    %1155 = math.tanh %1154 : vector<2x32xf32>
    %1156 = arith.mulf %1151, %1155 : vector<2x32xf32>
    %1157 = vector.extract_strided_slice %1098 {offsets = [6, 0], sizes = [2, 128], strides = [1, 1]} : vector<16x128xf32> to vector<2x128xf32>
    %cst_206 = arith.constant dense<0.000000e+00> : vector<2x128xf32>
    %1158 = tpu.matmul %1156, %1100, %cst_206 {dimension_numbers = #tpu.dot_dimension_numbers<[1], [0], [0], [1], [0, 0, 1, 1], [], []>} : vector<2x32xf32>, vector<32x128xf32>, vector<2x128xf32> -> vector<2x128xf32>
    %1159 = arith.addf %1157, %1158 : vector<2x128xf32>
    %1160 = arith.negf %1159 : vector<2x128xf32>
    %1161 = math.exp %1160 : vector<2x128xf32>
    %cst_207 = arith.constant 1.000000e+00 : f32
    %1162 = vector.broadcast %cst_207 : f32 to vector<2x128xf32>
    %1163 = arith.addf %1162, %1161 : vector<2x128xf32>
    %1164 = arith.divf %1162, %1163 : vector<2x128xf32>
    %1165 = vector.extract_strided_slice %1159 {offsets = [0, 64], sizes = [2, 32], strides = [1, 1]} : vector<2x128xf32> to vector<2x32xf32>
    %1166 = math.tanh %1165 : vector<2x32xf32>
    %1167 = vector.extract_strided_slice %1164 {offsets = [0, 0], sizes = [2, 32], strides = [1, 1]} : vector<2x128xf32> to vector<2x32xf32>
    %1168 = vector.extract_strided_slice %1164 {offsets = [0, 32], sizes = [2, 32], strides = [1, 1]} : vector<2x128xf32> to vector<2x32xf32>
    %1169 = vector.extract_strided_slice %1164 {offsets = [0, 96], sizes = [2, 32], strides = [1, 1]} : vector<2x128xf32> to vector<2x32xf32>
    %1170 = arith.mulf %1168, %1154 : vector<2x32xf32>
    %1171 = arith.mulf %1167, %1166 : vector<2x32xf32>
    %1172 = arith.addf %1170, %1171 : vector<2x32xf32>
    %1173 = math.tanh %1172 : vector<2x32xf32>
    %1174 = arith.mulf %1169, %1173 : vector<2x32xf32>
    %1175 = vector.extract_strided_slice %1098 {offsets = [8, 0], sizes = [2, 128], strides = [1, 1]} : vector<16x128xf32> to vector<2x128xf32>
    %cst_208 = arith.constant dense<0.000000e+00> : vector<2x128xf32>
    %1176 = tpu.matmul %1174, %1100, %cst_208 {dimension_numbers = #tpu.dot_dimension_numbers<[1], [0], [0], [1], [0, 0, 1, 1], [], []>} : vector<2x32xf32>, vector<32x128xf32>, vector<2x128xf32> -> vector<2x128xf32>
    %1177 = arith.addf %1175, %1176 : vector<2x128xf32>
    %1178 = arith.negf %1177 : vector<2x128xf32>
    %1179 = math.exp %1178 : vector<2x128xf32>
    %cst_209 = arith.constant 1.000000e+00 : f32
    %1180 = vector.broadcast %cst_209 : f32 to vector<2x128xf32>
    %1181 = arith.addf %1180, %1179 : vector<2x128xf32>
    %1182 = arith.divf %1180, %1181 : vector<2x128xf32>
    %1183 = vector.extract_strided_slice %1177 {offsets = [0, 64], sizes = [2, 32], strides = [1, 1]} : vector<2x128xf32> to vector<2x32xf32>
    %1184 = math.tanh %1183 : vector<2x32xf32>
    %1185 = vector.extract_strided_slice %1182 {offsets = [0, 0], sizes = [2, 32], strides = [1, 1]} : vector<2x128xf32> to vector<2x32xf32>
    %1186 = vector.extract_strided_slice %1182 {offsets = [0, 32], sizes = [2, 32], strides = [1, 1]} : vector<2x128xf32> to vector<2x32xf32>
    %1187 = vector.extract_strided_slice %1182 {offsets = [0, 96], sizes = [2, 32], strides = [1, 1]} : vector<2x128xf32> to vector<2x32xf32>
    %1188 = arith.mulf %1186, %1172 : vector<2x32xf32>
    %1189 = arith.mulf %1185, %1184 : vector<2x32xf32>
    %1190 = arith.addf %1188, %1189 : vector<2x32xf32>
    %1191 = math.tanh %1190 : vector<2x32xf32>
    %1192 = arith.mulf %1187, %1191 : vector<2x32xf32>
    %1193 = vector.extract_strided_slice %1098 {offsets = [10, 0], sizes = [2, 128], strides = [1, 1]} : vector<16x128xf32> to vector<2x128xf32>
    %cst_210 = arith.constant dense<0.000000e+00> : vector<2x128xf32>
    %1194 = tpu.matmul %1192, %1100, %cst_210 {dimension_numbers = #tpu.dot_dimension_numbers<[1], [0], [0], [1], [0, 0, 1, 1], [], []>} : vector<2x32xf32>, vector<32x128xf32>, vector<2x128xf32> -> vector<2x128xf32>
    %1195 = arith.addf %1193, %1194 : vector<2x128xf32>
    %1196 = arith.negf %1195 : vector<2x128xf32>
    %1197 = math.exp %1196 : vector<2x128xf32>
    %cst_211 = arith.constant 1.000000e+00 : f32
    %1198 = vector.broadcast %cst_211 : f32 to vector<2x128xf32>
    %1199 = arith.addf %1198, %1197 : vector<2x128xf32>
    %1200 = arith.divf %1198, %1199 : vector<2x128xf32>
    %1201 = vector.extract_strided_slice %1195 {offsets = [0, 64], sizes = [2, 32], strides = [1, 1]} : vector<2x128xf32> to vector<2x32xf32>
    %1202 = math.tanh %1201 : vector<2x32xf32>
    %1203 = vector.extract_strided_slice %1200 {offsets = [0, 0], sizes = [2, 32], strides = [1, 1]} : vector<2x128xf32> to vector<2x32xf32>
    %1204 = vector.extract_strided_slice %1200 {offsets = [0, 32], sizes = [2, 32], strides = [1, 1]} : vector<2x128xf32> to vector<2x32xf32>
    %1205 = vector.extract_strided_slice %1200 {offsets = [0, 96], sizes = [2, 32], strides = [1, 1]} : vector<2x128xf32> to vector<2x32xf32>
    %1206 = arith.mulf %1204, %1190 : vector<2x32xf32>
    %1207 = arith.mulf %1203, %1202 : vector<2x32xf32>
    %1208 = arith.addf %1206, %1207 : vector<2x32xf32>
    %1209 = math.tanh %1208 : vector<2x32xf32>
    %1210 = arith.mulf %1205, %1209 : vector<2x32xf32>
    %1211 = vector.extract_strided_slice %1098 {offsets = [12, 0], sizes = [2, 128], strides = [1, 1]} : vector<16x128xf32> to vector<2x128xf32>
    %cst_212 = arith.constant dense<0.000000e+00> : vector<2x128xf32>
    %1212 = tpu.matmul %1210, %1100, %cst_212 {dimension_numbers = #tpu.dot_dimension_numbers<[1], [0], [0], [1], [0, 0, 1, 1], [], []>} : vector<2x32xf32>, vector<32x128xf32>, vector<2x128xf32> -> vector<2x128xf32>
    %1213 = arith.addf %1211, %1212 : vector<2x128xf32>
    %1214 = arith.negf %1213 : vector<2x128xf32>
    %1215 = math.exp %1214 : vector<2x128xf32>
    %cst_213 = arith.constant 1.000000e+00 : f32
    %1216 = vector.broadcast %cst_213 : f32 to vector<2x128xf32>
    %1217 = arith.addf %1216, %1215 : vector<2x128xf32>
    %1218 = arith.divf %1216, %1217 : vector<2x128xf32>
    %1219 = vector.extract_strided_slice %1213 {offsets = [0, 64], sizes = [2, 32], strides = [1, 1]} : vector<2x128xf32> to vector<2x32xf32>
    %1220 = math.tanh %1219 : vector<2x32xf32>
    %1221 = vector.extract_strided_slice %1218 {offsets = [0, 0], sizes = [2, 32], strides = [1, 1]} : vector<2x128xf32> to vector<2x32xf32>
    %1222 = vector.extract_strided_slice %1218 {offsets = [0, 32], sizes = [2, 32], strides = [1, 1]} : vector<2x128xf32> to vector<2x32xf32>
    %1223 = vector.extract_strided_slice %1218 {offsets = [0, 96], sizes = [2, 32], strides = [1, 1]} : vector<2x128xf32> to vector<2x32xf32>
    %1224 = arith.mulf %1222, %1208 : vector<2x32xf32>
    %1225 = arith.mulf %1221, %1220 : vector<2x32xf32>
    %1226 = arith.addf %1224, %1225 : vector<2x32xf32>
    %1227 = math.tanh %1226 : vector<2x32xf32>
    %1228 = arith.mulf %1223, %1227 : vector<2x32xf32>
    %1229 = vector.extract_strided_slice %1098 {offsets = [14, 0], sizes = [2, 128], strides = [1, 1]} : vector<16x128xf32> to vector<2x128xf32>
    %cst_214 = arith.constant dense<0.000000e+00> : vector<2x128xf32>
    %1230 = tpu.matmul %1228, %1100, %cst_214 {dimension_numbers = #tpu.dot_dimension_numbers<[1], [0], [0], [1], [0, 0, 1, 1], [], []>} : vector<2x32xf32>, vector<32x128xf32>, vector<2x128xf32> -> vector<2x128xf32>
    %1231 = arith.addf %1229, %1230 : vector<2x128xf32>
    %1232 = arith.negf %1231 : vector<2x128xf32>
    %1233 = math.exp %1232 : vector<2x128xf32>
    %cst_215 = arith.constant 1.000000e+00 : f32
    %1234 = vector.broadcast %cst_215 : f32 to vector<2x128xf32>
    %1235 = arith.addf %1234, %1233 : vector<2x128xf32>
    %1236 = arith.divf %1234, %1235 : vector<2x128xf32>
    %1237 = vector.extract_strided_slice %1231 {offsets = [0, 64], sizes = [2, 32], strides = [1, 1]} : vector<2x128xf32> to vector<2x32xf32>
    %1238 = math.tanh %1237 : vector<2x32xf32>
    %1239 = vector.extract_strided_slice %1236 {offsets = [0, 0], sizes = [2, 32], strides = [1, 1]} : vector<2x128xf32> to vector<2x32xf32>
    %1240 = vector.extract_strided_slice %1236 {offsets = [0, 32], sizes = [2, 32], strides = [1, 1]} : vector<2x128xf32> to vector<2x32xf32>
    %1241 = vector.extract_strided_slice %1236 {offsets = [0, 96], sizes = [2, 32], strides = [1, 1]} : vector<2x128xf32> to vector<2x32xf32>
    %1242 = arith.mulf %1240, %1226 : vector<2x32xf32>
    %1243 = arith.mulf %1239, %1238 : vector<2x32xf32>
    %1244 = arith.addf %1242, %1243 : vector<2x32xf32>
    %1245 = math.tanh %1244 : vector<2x32xf32>
    %1246 = arith.mulf %1241, %1245 : vector<2x32xf32>
    %1247 = tpu.concatenate %1120, %1138, %1156, %1174, %1192, %1210, %1228, %1246 in 0 : vector<2x32xf32>, vector<2x32xf32>, vector<2x32xf32>, vector<2x32xf32>, vector<2x32xf32>, vector<2x32xf32>, vector<2x32xf32>, vector<2x32xf32> -> vector<16x32xf32>
    %c7_216 = arith.constant 7 : index
    %c0_217 = arith.constant 0 : index
    %c0_218 = arith.constant 0 : index
    %1248 = vector.load %arg2[%c7_216, %c0_217, %c0_218] : memref<9x32x128xf32, #tpu.memory_space<vmem>>, vector<1x32x128xf32>
    %1249 = vector.shape_cast %1248 : vector<1x32x128xf32> to vector<32x128xf32>
    %cst_219 = arith.constant dense<0.000000e+00> : vector<16x128xf32>
    %1250 = tpu.matmul %1247, %1249, %cst_219 {dimension_numbers = #tpu.dot_dimension_numbers<[1], [0], [0], [1], [0, 0, 1, 1], [], []>} : vector<16x32xf32>, vector<32x128xf32>, vector<16x128xf32> -> vector<16x128xf32>
    %c8 = arith.constant 8 : index
    %c0_220 = arith.constant 0 : index
    %c0_221 = arith.constant 0 : index
    %1251 = vector.load %arg4[%c8, %c0_220, %c0_221] : memref<10x1x128xf32, #tpu.memory_space<vmem>>, vector<1x1x128xf32>
    %1252 = vector.shape_cast %1251 : vector<1x1x128xf32> to vector<1x128xf32>
    %1253 = vector.broadcast %1252 : vector<1x128xf32> to vector<16x128xf32>
    %1254 = arith.addf %1250, %1253 : vector<16x128xf32>
    %c8_222 = arith.constant 8 : index
    %c0_223 = arith.constant 0 : index
    %c0_224 = arith.constant 0 : index
    %1255 = vector.load %arg3[%c8_222, %c0_223, %c0_224] : memref<10x32x128xf32, #tpu.memory_space<vmem>>, vector<1x32x128xf32>
    %1256 = vector.shape_cast %1255 : vector<1x32x128xf32> to vector<32x128xf32>
    %cst_225 = arith.constant 0.000000e+00 : f32
    %1257 = vector.broadcast %cst_225 : f32 to vector<2x32xf32>
    %cst_226 = arith.constant 0.000000e+00 : f32
    %1258 = vector.broadcast %cst_226 : f32 to vector<2x32xf32>
    %1259 = vector.extract_strided_slice %1254 {offsets = [0, 0], sizes = [2, 128], strides = [1, 1]} : vector<16x128xf32> to vector<2x128xf32>
    %cst_227 = arith.constant dense<0.000000e+00> : vector<2x128xf32>
    %1260 = tpu.matmul %1257, %1256, %cst_227 {dimension_numbers = #tpu.dot_dimension_numbers<[1], [0], [0], [1], [0, 0, 1, 1], [], []>} : vector<2x32xf32>, vector<32x128xf32>, vector<2x128xf32> -> vector<2x128xf32>
    %1261 = arith.addf %1259, %1260 : vector<2x128xf32>
    %1262 = arith.negf %1261 : vector<2x128xf32>
    %1263 = math.exp %1262 : vector<2x128xf32>
    %cst_228 = arith.constant 1.000000e+00 : f32
    %1264 = vector.broadcast %cst_228 : f32 to vector<2x128xf32>
    %1265 = arith.addf %1264, %1263 : vector<2x128xf32>
    %1266 = arith.divf %1264, %1265 : vector<2x128xf32>
    %1267 = vector.extract_strided_slice %1261 {offsets = [0, 64], sizes = [2, 32], strides = [1, 1]} : vector<2x128xf32> to vector<2x32xf32>
    %1268 = math.tanh %1267 : vector<2x32xf32>
    %1269 = vector.extract_strided_slice %1266 {offsets = [0, 0], sizes = [2, 32], strides = [1, 1]} : vector<2x128xf32> to vector<2x32xf32>
    %1270 = vector.extract_strided_slice %1266 {offsets = [0, 32], sizes = [2, 32], strides = [1, 1]} : vector<2x128xf32> to vector<2x32xf32>
    %1271 = vector.extract_strided_slice %1266 {offsets = [0, 96], sizes = [2, 32], strides = [1, 1]} : vector<2x128xf32> to vector<2x32xf32>
    %1272 = arith.mulf %1270, %1258 : vector<2x32xf32>
    %1273 = arith.mulf %1269, %1268 : vector<2x32xf32>
    %1274 = arith.addf %1272, %1273 : vector<2x32xf32>
    %1275 = math.tanh %1274 : vector<2x32xf32>
    %1276 = arith.mulf %1271, %1275 : vector<2x32xf32>
    %1277 = vector.extract_strided_slice %1254 {offsets = [2, 0], sizes = [2, 128], strides = [1, 1]} : vector<16x128xf32> to vector<2x128xf32>
    %cst_229 = arith.constant dense<0.000000e+00> : vector<2x128xf32>
    %1278 = tpu.matmul %1276, %1256, %cst_229 {dimension_numbers = #tpu.dot_dimension_numbers<[1], [0], [0], [1], [0, 0, 1, 1], [], []>} : vector<2x32xf32>, vector<32x128xf32>, vector<2x128xf32> -> vector<2x128xf32>
    %1279 = arith.addf %1277, %1278 : vector<2x128xf32>
    %1280 = arith.negf %1279 : vector<2x128xf32>
    %1281 = math.exp %1280 : vector<2x128xf32>
    %cst_230 = arith.constant 1.000000e+00 : f32
    %1282 = vector.broadcast %cst_230 : f32 to vector<2x128xf32>
    %1283 = arith.addf %1282, %1281 : vector<2x128xf32>
    %1284 = arith.divf %1282, %1283 : vector<2x128xf32>
    %1285 = vector.extract_strided_slice %1279 {offsets = [0, 64], sizes = [2, 32], strides = [1, 1]} : vector<2x128xf32> to vector<2x32xf32>
    %1286 = math.tanh %1285 : vector<2x32xf32>
    %1287 = vector.extract_strided_slice %1284 {offsets = [0, 0], sizes = [2, 32], strides = [1, 1]} : vector<2x128xf32> to vector<2x32xf32>
    %1288 = vector.extract_strided_slice %1284 {offsets = [0, 32], sizes = [2, 32], strides = [1, 1]} : vector<2x128xf32> to vector<2x32xf32>
    %1289 = vector.extract_strided_slice %1284 {offsets = [0, 96], sizes = [2, 32], strides = [1, 1]} : vector<2x128xf32> to vector<2x32xf32>
    %1290 = arith.mulf %1288, %1274 : vector<2x32xf32>
    %1291 = arith.mulf %1287, %1286 : vector<2x32xf32>
    %1292 = arith.addf %1290, %1291 : vector<2x32xf32>
    %1293 = math.tanh %1292 : vector<2x32xf32>
    %1294 = arith.mulf %1289, %1293 : vector<2x32xf32>
    %1295 = vector.extract_strided_slice %1254 {offsets = [4, 0], sizes = [2, 128], strides = [1, 1]} : vector<16x128xf32> to vector<2x128xf32>
    %cst_231 = arith.constant dense<0.000000e+00> : vector<2x128xf32>
    %1296 = tpu.matmul %1294, %1256, %cst_231 {dimension_numbers = #tpu.dot_dimension_numbers<[1], [0], [0], [1], [0, 0, 1, 1], [], []>} : vector<2x32xf32>, vector<32x128xf32>, vector<2x128xf32> -> vector<2x128xf32>
    %1297 = arith.addf %1295, %1296 : vector<2x128xf32>
    %1298 = arith.negf %1297 : vector<2x128xf32>
    %1299 = math.exp %1298 : vector<2x128xf32>
    %cst_232 = arith.constant 1.000000e+00 : f32
    %1300 = vector.broadcast %cst_232 : f32 to vector<2x128xf32>
    %1301 = arith.addf %1300, %1299 : vector<2x128xf32>
    %1302 = arith.divf %1300, %1301 : vector<2x128xf32>
    %1303 = vector.extract_strided_slice %1297 {offsets = [0, 64], sizes = [2, 32], strides = [1, 1]} : vector<2x128xf32> to vector<2x32xf32>
    %1304 = math.tanh %1303 : vector<2x32xf32>
    %1305 = vector.extract_strided_slice %1302 {offsets = [0, 0], sizes = [2, 32], strides = [1, 1]} : vector<2x128xf32> to vector<2x32xf32>
    %1306 = vector.extract_strided_slice %1302 {offsets = [0, 32], sizes = [2, 32], strides = [1, 1]} : vector<2x128xf32> to vector<2x32xf32>
    %1307 = vector.extract_strided_slice %1302 {offsets = [0, 96], sizes = [2, 32], strides = [1, 1]} : vector<2x128xf32> to vector<2x32xf32>
    %1308 = arith.mulf %1306, %1292 : vector<2x32xf32>
    %1309 = arith.mulf %1305, %1304 : vector<2x32xf32>
    %1310 = arith.addf %1308, %1309 : vector<2x32xf32>
    %1311 = math.tanh %1310 : vector<2x32xf32>
    %1312 = arith.mulf %1307, %1311 : vector<2x32xf32>
    %1313 = vector.extract_strided_slice %1254 {offsets = [6, 0], sizes = [2, 128], strides = [1, 1]} : vector<16x128xf32> to vector<2x128xf32>
    %cst_233 = arith.constant dense<0.000000e+00> : vector<2x128xf32>
    %1314 = tpu.matmul %1312, %1256, %cst_233 {dimension_numbers = #tpu.dot_dimension_numbers<[1], [0], [0], [1], [0, 0, 1, 1], [], []>} : vector<2x32xf32>, vector<32x128xf32>, vector<2x128xf32> -> vector<2x128xf32>
    %1315 = arith.addf %1313, %1314 : vector<2x128xf32>
    %1316 = arith.negf %1315 : vector<2x128xf32>
    %1317 = math.exp %1316 : vector<2x128xf32>
    %cst_234 = arith.constant 1.000000e+00 : f32
    %1318 = vector.broadcast %cst_234 : f32 to vector<2x128xf32>
    %1319 = arith.addf %1318, %1317 : vector<2x128xf32>
    %1320 = arith.divf %1318, %1319 : vector<2x128xf32>
    %1321 = vector.extract_strided_slice %1315 {offsets = [0, 64], sizes = [2, 32], strides = [1, 1]} : vector<2x128xf32> to vector<2x32xf32>
    %1322 = math.tanh %1321 : vector<2x32xf32>
    %1323 = vector.extract_strided_slice %1320 {offsets = [0, 0], sizes = [2, 32], strides = [1, 1]} : vector<2x128xf32> to vector<2x32xf32>
    %1324 = vector.extract_strided_slice %1320 {offsets = [0, 32], sizes = [2, 32], strides = [1, 1]} : vector<2x128xf32> to vector<2x32xf32>
    %1325 = vector.extract_strided_slice %1320 {offsets = [0, 96], sizes = [2, 32], strides = [1, 1]} : vector<2x128xf32> to vector<2x32xf32>
    %1326 = arith.mulf %1324, %1310 : vector<2x32xf32>
    %1327 = arith.mulf %1323, %1322 : vector<2x32xf32>
    %1328 = arith.addf %1326, %1327 : vector<2x32xf32>
    %1329 = math.tanh %1328 : vector<2x32xf32>
    %1330 = arith.mulf %1325, %1329 : vector<2x32xf32>
    %1331 = vector.extract_strided_slice %1254 {offsets = [8, 0], sizes = [2, 128], strides = [1, 1]} : vector<16x128xf32> to vector<2x128xf32>
    %cst_235 = arith.constant dense<0.000000e+00> : vector<2x128xf32>
    %1332 = tpu.matmul %1330, %1256, %cst_235 {dimension_numbers = #tpu.dot_dimension_numbers<[1], [0], [0], [1], [0, 0, 1, 1], [], []>} : vector<2x32xf32>, vector<32x128xf32>, vector<2x128xf32> -> vector<2x128xf32>
    %1333 = arith.addf %1331, %1332 : vector<2x128xf32>
    %1334 = arith.negf %1333 : vector<2x128xf32>
    %1335 = math.exp %1334 : vector<2x128xf32>
    %cst_236 = arith.constant 1.000000e+00 : f32
    %1336 = vector.broadcast %cst_236 : f32 to vector<2x128xf32>
    %1337 = arith.addf %1336, %1335 : vector<2x128xf32>
    %1338 = arith.divf %1336, %1337 : vector<2x128xf32>
    %1339 = vector.extract_strided_slice %1333 {offsets = [0, 64], sizes = [2, 32], strides = [1, 1]} : vector<2x128xf32> to vector<2x32xf32>
    %1340 = math.tanh %1339 : vector<2x32xf32>
    %1341 = vector.extract_strided_slice %1338 {offsets = [0, 0], sizes = [2, 32], strides = [1, 1]} : vector<2x128xf32> to vector<2x32xf32>
    %1342 = vector.extract_strided_slice %1338 {offsets = [0, 32], sizes = [2, 32], strides = [1, 1]} : vector<2x128xf32> to vector<2x32xf32>
    %1343 = vector.extract_strided_slice %1338 {offsets = [0, 96], sizes = [2, 32], strides = [1, 1]} : vector<2x128xf32> to vector<2x32xf32>
    %1344 = arith.mulf %1342, %1328 : vector<2x32xf32>
    %1345 = arith.mulf %1341, %1340 : vector<2x32xf32>
    %1346 = arith.addf %1344, %1345 : vector<2x32xf32>
    %1347 = math.tanh %1346 : vector<2x32xf32>
    %1348 = arith.mulf %1343, %1347 : vector<2x32xf32>
    %1349 = vector.extract_strided_slice %1254 {offsets = [10, 0], sizes = [2, 128], strides = [1, 1]} : vector<16x128xf32> to vector<2x128xf32>
    %cst_237 = arith.constant dense<0.000000e+00> : vector<2x128xf32>
    %1350 = tpu.matmul %1348, %1256, %cst_237 {dimension_numbers = #tpu.dot_dimension_numbers<[1], [0], [0], [1], [0, 0, 1, 1], [], []>} : vector<2x32xf32>, vector<32x128xf32>, vector<2x128xf32> -> vector<2x128xf32>
    %1351 = arith.addf %1349, %1350 : vector<2x128xf32>
    %1352 = arith.negf %1351 : vector<2x128xf32>
    %1353 = math.exp %1352 : vector<2x128xf32>
    %cst_238 = arith.constant 1.000000e+00 : f32
    %1354 = vector.broadcast %cst_238 : f32 to vector<2x128xf32>
    %1355 = arith.addf %1354, %1353 : vector<2x128xf32>
    %1356 = arith.divf %1354, %1355 : vector<2x128xf32>
    %1357 = vector.extract_strided_slice %1351 {offsets = [0, 64], sizes = [2, 32], strides = [1, 1]} : vector<2x128xf32> to vector<2x32xf32>
    %1358 = math.tanh %1357 : vector<2x32xf32>
    %1359 = vector.extract_strided_slice %1356 {offsets = [0, 0], sizes = [2, 32], strides = [1, 1]} : vector<2x128xf32> to vector<2x32xf32>
    %1360 = vector.extract_strided_slice %1356 {offsets = [0, 32], sizes = [2, 32], strides = [1, 1]} : vector<2x128xf32> to vector<2x32xf32>
    %1361 = vector.extract_strided_slice %1356 {offsets = [0, 96], sizes = [2, 32], strides = [1, 1]} : vector<2x128xf32> to vector<2x32xf32>
    %1362 = arith.mulf %1360, %1346 : vector<2x32xf32>
    %1363 = arith.mulf %1359, %1358 : vector<2x32xf32>
    %1364 = arith.addf %1362, %1363 : vector<2x32xf32>
    %1365 = math.tanh %1364 : vector<2x32xf32>
    %1366 = arith.mulf %1361, %1365 : vector<2x32xf32>
    %1367 = vector.extract_strided_slice %1254 {offsets = [12, 0], sizes = [2, 128], strides = [1, 1]} : vector<16x128xf32> to vector<2x128xf32>
    %cst_239 = arith.constant dense<0.000000e+00> : vector<2x128xf32>
    %1368 = tpu.matmul %1366, %1256, %cst_239 {dimension_numbers = #tpu.dot_dimension_numbers<[1], [0], [0], [1], [0, 0, 1, 1], [], []>} : vector<2x32xf32>, vector<32x128xf32>, vector<2x128xf32> -> vector<2x128xf32>
    %1369 = arith.addf %1367, %1368 : vector<2x128xf32>
    %1370 = arith.negf %1369 : vector<2x128xf32>
    %1371 = math.exp %1370 : vector<2x128xf32>
    %cst_240 = arith.constant 1.000000e+00 : f32
    %1372 = vector.broadcast %cst_240 : f32 to vector<2x128xf32>
    %1373 = arith.addf %1372, %1371 : vector<2x128xf32>
    %1374 = arith.divf %1372, %1373 : vector<2x128xf32>
    %1375 = vector.extract_strided_slice %1369 {offsets = [0, 64], sizes = [2, 32], strides = [1, 1]} : vector<2x128xf32> to vector<2x32xf32>
    %1376 = math.tanh %1375 : vector<2x32xf32>
    %1377 = vector.extract_strided_slice %1374 {offsets = [0, 0], sizes = [2, 32], strides = [1, 1]} : vector<2x128xf32> to vector<2x32xf32>
    %1378 = vector.extract_strided_slice %1374 {offsets = [0, 32], sizes = [2, 32], strides = [1, 1]} : vector<2x128xf32> to vector<2x32xf32>
    %1379 = vector.extract_strided_slice %1374 {offsets = [0, 96], sizes = [2, 32], strides = [1, 1]} : vector<2x128xf32> to vector<2x32xf32>
    %1380 = arith.mulf %1378, %1364 : vector<2x32xf32>
    %1381 = arith.mulf %1377, %1376 : vector<2x32xf32>
    %1382 = arith.addf %1380, %1381 : vector<2x32xf32>
    %1383 = math.tanh %1382 : vector<2x32xf32>
    %1384 = arith.mulf %1379, %1383 : vector<2x32xf32>
    %1385 = vector.extract_strided_slice %1254 {offsets = [14, 0], sizes = [2, 128], strides = [1, 1]} : vector<16x128xf32> to vector<2x128xf32>
    %cst_241 = arith.constant dense<0.000000e+00> : vector<2x128xf32>
    %1386 = tpu.matmul %1384, %1256, %cst_241 {dimension_numbers = #tpu.dot_dimension_numbers<[1], [0], [0], [1], [0, 0, 1, 1], [], []>} : vector<2x32xf32>, vector<32x128xf32>, vector<2x128xf32> -> vector<2x128xf32>
    %1387 = arith.addf %1385, %1386 : vector<2x128xf32>
    %1388 = arith.negf %1387 : vector<2x128xf32>
    %1389 = math.exp %1388 : vector<2x128xf32>
    %cst_242 = arith.constant 1.000000e+00 : f32
    %1390 = vector.broadcast %cst_242 : f32 to vector<2x128xf32>
    %1391 = arith.addf %1390, %1389 : vector<2x128xf32>
    %1392 = arith.divf %1390, %1391 : vector<2x128xf32>
    %1393 = vector.extract_strided_slice %1387 {offsets = [0, 64], sizes = [2, 32], strides = [1, 1]} : vector<2x128xf32> to vector<2x32xf32>
    %1394 = math.tanh %1393 : vector<2x32xf32>
    %1395 = vector.extract_strided_slice %1392 {offsets = [0, 0], sizes = [2, 32], strides = [1, 1]} : vector<2x128xf32> to vector<2x32xf32>
    %1396 = vector.extract_strided_slice %1392 {offsets = [0, 32], sizes = [2, 32], strides = [1, 1]} : vector<2x128xf32> to vector<2x32xf32>
    %1397 = vector.extract_strided_slice %1392 {offsets = [0, 96], sizes = [2, 32], strides = [1, 1]} : vector<2x128xf32> to vector<2x32xf32>
    %1398 = arith.mulf %1396, %1382 : vector<2x32xf32>
    %1399 = arith.mulf %1395, %1394 : vector<2x32xf32>
    %1400 = arith.addf %1398, %1399 : vector<2x32xf32>
    %1401 = math.tanh %1400 : vector<2x32xf32>
    %1402 = arith.mulf %1397, %1401 : vector<2x32xf32>
    %1403 = tpu.concatenate %1276, %1294, %1312, %1330, %1348, %1366, %1384, %1402 in 0 : vector<2x32xf32>, vector<2x32xf32>, vector<2x32xf32>, vector<2x32xf32>, vector<2x32xf32>, vector<2x32xf32>, vector<2x32xf32>, vector<2x32xf32> -> vector<16x32xf32>
    %c8_243 = arith.constant 8 : index
    %c0_244 = arith.constant 0 : index
    %c0_245 = arith.constant 0 : index
    %1404 = vector.load %arg2[%c8_243, %c0_244, %c0_245] : memref<9x32x128xf32, #tpu.memory_space<vmem>>, vector<1x32x128xf32>
    %1405 = vector.shape_cast %1404 : vector<1x32x128xf32> to vector<32x128xf32>
    %cst_246 = arith.constant dense<0.000000e+00> : vector<16x128xf32>
    %1406 = tpu.matmul %1403, %1405, %cst_246 {dimension_numbers = #tpu.dot_dimension_numbers<[1], [0], [0], [1], [0, 0, 1, 1], [], []>} : vector<16x32xf32>, vector<32x128xf32>, vector<16x128xf32> -> vector<16x128xf32>
    %c9 = arith.constant 9 : index
    %c0_247 = arith.constant 0 : index
    %c0_248 = arith.constant 0 : index
    %1407 = vector.load %arg4[%c9, %c0_247, %c0_248] : memref<10x1x128xf32, #tpu.memory_space<vmem>>, vector<1x1x128xf32>
    %1408 = vector.shape_cast %1407 : vector<1x1x128xf32> to vector<1x128xf32>
    %1409 = vector.broadcast %1408 : vector<1x128xf32> to vector<16x128xf32>
    %1410 = arith.addf %1406, %1409 : vector<16x128xf32>
    %c9_249 = arith.constant 9 : index
    %c0_250 = arith.constant 0 : index
    %c0_251 = arith.constant 0 : index
    %1411 = vector.load %arg3[%c9_249, %c0_250, %c0_251] : memref<10x32x128xf32, #tpu.memory_space<vmem>>, vector<1x32x128xf32>
    %1412 = vector.shape_cast %1411 : vector<1x32x128xf32> to vector<32x128xf32>
    %cst_252 = arith.constant 0.000000e+00 : f32
    %1413 = vector.broadcast %cst_252 : f32 to vector<2x32xf32>
    %cst_253 = arith.constant 0.000000e+00 : f32
    %1414 = vector.broadcast %cst_253 : f32 to vector<2x32xf32>
    %1415 = vector.extract_strided_slice %1410 {offsets = [0, 0], sizes = [2, 128], strides = [1, 1]} : vector<16x128xf32> to vector<2x128xf32>
    %cst_254 = arith.constant dense<0.000000e+00> : vector<2x128xf32>
    %1416 = tpu.matmul %1413, %1412, %cst_254 {dimension_numbers = #tpu.dot_dimension_numbers<[1], [0], [0], [1], [0, 0, 1, 1], [], []>} : vector<2x32xf32>, vector<32x128xf32>, vector<2x128xf32> -> vector<2x128xf32>
    %1417 = arith.addf %1415, %1416 : vector<2x128xf32>
    %1418 = arith.negf %1417 : vector<2x128xf32>
    %1419 = math.exp %1418 : vector<2x128xf32>
    %cst_255 = arith.constant 1.000000e+00 : f32
    %1420 = vector.broadcast %cst_255 : f32 to vector<2x128xf32>
    %1421 = arith.addf %1420, %1419 : vector<2x128xf32>
    %1422 = arith.divf %1420, %1421 : vector<2x128xf32>
    %1423 = vector.extract_strided_slice %1417 {offsets = [0, 64], sizes = [2, 32], strides = [1, 1]} : vector<2x128xf32> to vector<2x32xf32>
    %1424 = math.tanh %1423 : vector<2x32xf32>
    %1425 = vector.extract_strided_slice %1422 {offsets = [0, 0], sizes = [2, 32], strides = [1, 1]} : vector<2x128xf32> to vector<2x32xf32>
    %1426 = vector.extract_strided_slice %1422 {offsets = [0, 32], sizes = [2, 32], strides = [1, 1]} : vector<2x128xf32> to vector<2x32xf32>
    %1427 = vector.extract_strided_slice %1422 {offsets = [0, 96], sizes = [2, 32], strides = [1, 1]} : vector<2x128xf32> to vector<2x32xf32>
    %1428 = arith.mulf %1426, %1414 : vector<2x32xf32>
    %1429 = arith.mulf %1425, %1424 : vector<2x32xf32>
    %1430 = arith.addf %1428, %1429 : vector<2x32xf32>
    %1431 = math.tanh %1430 : vector<2x32xf32>
    %1432 = arith.mulf %1427, %1431 : vector<2x32xf32>
    %1433 = vector.extract_strided_slice %1410 {offsets = [2, 0], sizes = [2, 128], strides = [1, 1]} : vector<16x128xf32> to vector<2x128xf32>
    %cst_256 = arith.constant dense<0.000000e+00> : vector<2x128xf32>
    %1434 = tpu.matmul %1432, %1412, %cst_256 {dimension_numbers = #tpu.dot_dimension_numbers<[1], [0], [0], [1], [0, 0, 1, 1], [], []>} : vector<2x32xf32>, vector<32x128xf32>, vector<2x128xf32> -> vector<2x128xf32>
    %1435 = arith.addf %1433, %1434 : vector<2x128xf32>
    %1436 = arith.negf %1435 : vector<2x128xf32>
    %1437 = math.exp %1436 : vector<2x128xf32>
    %cst_257 = arith.constant 1.000000e+00 : f32
    %1438 = vector.broadcast %cst_257 : f32 to vector<2x128xf32>
    %1439 = arith.addf %1438, %1437 : vector<2x128xf32>
    %1440 = arith.divf %1438, %1439 : vector<2x128xf32>
    %1441 = vector.extract_strided_slice %1435 {offsets = [0, 64], sizes = [2, 32], strides = [1, 1]} : vector<2x128xf32> to vector<2x32xf32>
    %1442 = math.tanh %1441 : vector<2x32xf32>
    %1443 = vector.extract_strided_slice %1440 {offsets = [0, 0], sizes = [2, 32], strides = [1, 1]} : vector<2x128xf32> to vector<2x32xf32>
    %1444 = vector.extract_strided_slice %1440 {offsets = [0, 32], sizes = [2, 32], strides = [1, 1]} : vector<2x128xf32> to vector<2x32xf32>
    %1445 = vector.extract_strided_slice %1440 {offsets = [0, 96], sizes = [2, 32], strides = [1, 1]} : vector<2x128xf32> to vector<2x32xf32>
    %1446 = arith.mulf %1444, %1430 : vector<2x32xf32>
    %1447 = arith.mulf %1443, %1442 : vector<2x32xf32>
    %1448 = arith.addf %1446, %1447 : vector<2x32xf32>
    %1449 = math.tanh %1448 : vector<2x32xf32>
    %1450 = arith.mulf %1445, %1449 : vector<2x32xf32>
    %1451 = vector.extract_strided_slice %1410 {offsets = [4, 0], sizes = [2, 128], strides = [1, 1]} : vector<16x128xf32> to vector<2x128xf32>
    %cst_258 = arith.constant dense<0.000000e+00> : vector<2x128xf32>
    %1452 = tpu.matmul %1450, %1412, %cst_258 {dimension_numbers = #tpu.dot_dimension_numbers<[1], [0], [0], [1], [0, 0, 1, 1], [], []>} : vector<2x32xf32>, vector<32x128xf32>, vector<2x128xf32> -> vector<2x128xf32>
    %1453 = arith.addf %1451, %1452 : vector<2x128xf32>
    %1454 = arith.negf %1453 : vector<2x128xf32>
    %1455 = math.exp %1454 : vector<2x128xf32>
    %cst_259 = arith.constant 1.000000e+00 : f32
    %1456 = vector.broadcast %cst_259 : f32 to vector<2x128xf32>
    %1457 = arith.addf %1456, %1455 : vector<2x128xf32>
    %1458 = arith.divf %1456, %1457 : vector<2x128xf32>
    %1459 = vector.extract_strided_slice %1453 {offsets = [0, 64], sizes = [2, 32], strides = [1, 1]} : vector<2x128xf32> to vector<2x32xf32>
    %1460 = math.tanh %1459 : vector<2x32xf32>
    %1461 = vector.extract_strided_slice %1458 {offsets = [0, 0], sizes = [2, 32], strides = [1, 1]} : vector<2x128xf32> to vector<2x32xf32>
    %1462 = vector.extract_strided_slice %1458 {offsets = [0, 32], sizes = [2, 32], strides = [1, 1]} : vector<2x128xf32> to vector<2x32xf32>
    %1463 = vector.extract_strided_slice %1458 {offsets = [0, 96], sizes = [2, 32], strides = [1, 1]} : vector<2x128xf32> to vector<2x32xf32>
    %1464 = arith.mulf %1462, %1448 : vector<2x32xf32>
    %1465 = arith.mulf %1461, %1460 : vector<2x32xf32>
    %1466 = arith.addf %1464, %1465 : vector<2x32xf32>
    %1467 = math.tanh %1466 : vector<2x32xf32>
    %1468 = arith.mulf %1463, %1467 : vector<2x32xf32>
    %1469 = vector.extract_strided_slice %1410 {offsets = [6, 0], sizes = [2, 128], strides = [1, 1]} : vector<16x128xf32> to vector<2x128xf32>
    %cst_260 = arith.constant dense<0.000000e+00> : vector<2x128xf32>
    %1470 = tpu.matmul %1468, %1412, %cst_260 {dimension_numbers = #tpu.dot_dimension_numbers<[1], [0], [0], [1], [0, 0, 1, 1], [], []>} : vector<2x32xf32>, vector<32x128xf32>, vector<2x128xf32> -> vector<2x128xf32>
    %1471 = arith.addf %1469, %1470 : vector<2x128xf32>
    %1472 = arith.negf %1471 : vector<2x128xf32>
    %1473 = math.exp %1472 : vector<2x128xf32>
    %cst_261 = arith.constant 1.000000e+00 : f32
    %1474 = vector.broadcast %cst_261 : f32 to vector<2x128xf32>
    %1475 = arith.addf %1474, %1473 : vector<2x128xf32>
    %1476 = arith.divf %1474, %1475 : vector<2x128xf32>
    %1477 = vector.extract_strided_slice %1471 {offsets = [0, 64], sizes = [2, 32], strides = [1, 1]} : vector<2x128xf32> to vector<2x32xf32>
    %1478 = math.tanh %1477 : vector<2x32xf32>
    %1479 = vector.extract_strided_slice %1476 {offsets = [0, 0], sizes = [2, 32], strides = [1, 1]} : vector<2x128xf32> to vector<2x32xf32>
    %1480 = vector.extract_strided_slice %1476 {offsets = [0, 32], sizes = [2, 32], strides = [1, 1]} : vector<2x128xf32> to vector<2x32xf32>
    %1481 = vector.extract_strided_slice %1476 {offsets = [0, 96], sizes = [2, 32], strides = [1, 1]} : vector<2x128xf32> to vector<2x32xf32>
    %1482 = arith.mulf %1480, %1466 : vector<2x32xf32>
    %1483 = arith.mulf %1479, %1478 : vector<2x32xf32>
    %1484 = arith.addf %1482, %1483 : vector<2x32xf32>
    %1485 = math.tanh %1484 : vector<2x32xf32>
    %1486 = arith.mulf %1481, %1485 : vector<2x32xf32>
    %1487 = vector.extract_strided_slice %1410 {offsets = [8, 0], sizes = [2, 128], strides = [1, 1]} : vector<16x128xf32> to vector<2x128xf32>
    %cst_262 = arith.constant dense<0.000000e+00> : vector<2x128xf32>
    %1488 = tpu.matmul %1486, %1412, %cst_262 {dimension_numbers = #tpu.dot_dimension_numbers<[1], [0], [0], [1], [0, 0, 1, 1], [], []>} : vector<2x32xf32>, vector<32x128xf32>, vector<2x128xf32> -> vector<2x128xf32>
    %1489 = arith.addf %1487, %1488 : vector<2x128xf32>
    %1490 = arith.negf %1489 : vector<2x128xf32>
    %1491 = math.exp %1490 : vector<2x128xf32>
    %cst_263 = arith.constant 1.000000e+00 : f32
    %1492 = vector.broadcast %cst_263 : f32 to vector<2x128xf32>
    %1493 = arith.addf %1492, %1491 : vector<2x128xf32>
    %1494 = arith.divf %1492, %1493 : vector<2x128xf32>
    %1495 = vector.extract_strided_slice %1489 {offsets = [0, 64], sizes = [2, 32], strides = [1, 1]} : vector<2x128xf32> to vector<2x32xf32>
    %1496 = math.tanh %1495 : vector<2x32xf32>
    %1497 = vector.extract_strided_slice %1494 {offsets = [0, 0], sizes = [2, 32], strides = [1, 1]} : vector<2x128xf32> to vector<2x32xf32>
    %1498 = vector.extract_strided_slice %1494 {offsets = [0, 32], sizes = [2, 32], strides = [1, 1]} : vector<2x128xf32> to vector<2x32xf32>
    %1499 = vector.extract_strided_slice %1494 {offsets = [0, 96], sizes = [2, 32], strides = [1, 1]} : vector<2x128xf32> to vector<2x32xf32>
    %1500 = arith.mulf %1498, %1484 : vector<2x32xf32>
    %1501 = arith.mulf %1497, %1496 : vector<2x32xf32>
    %1502 = arith.addf %1500, %1501 : vector<2x32xf32>
    %1503 = math.tanh %1502 : vector<2x32xf32>
    %1504 = arith.mulf %1499, %1503 : vector<2x32xf32>
    %1505 = vector.extract_strided_slice %1410 {offsets = [10, 0], sizes = [2, 128], strides = [1, 1]} : vector<16x128xf32> to vector<2x128xf32>
    %cst_264 = arith.constant dense<0.000000e+00> : vector<2x128xf32>
    %1506 = tpu.matmul %1504, %1412, %cst_264 {dimension_numbers = #tpu.dot_dimension_numbers<[1], [0], [0], [1], [0, 0, 1, 1], [], []>} : vector<2x32xf32>, vector<32x128xf32>, vector<2x128xf32> -> vector<2x128xf32>
    %1507 = arith.addf %1505, %1506 : vector<2x128xf32>
    %1508 = arith.negf %1507 : vector<2x128xf32>
    %1509 = math.exp %1508 : vector<2x128xf32>
    %cst_265 = arith.constant 1.000000e+00 : f32
    %1510 = vector.broadcast %cst_265 : f32 to vector<2x128xf32>
    %1511 = arith.addf %1510, %1509 : vector<2x128xf32>
    %1512 = arith.divf %1510, %1511 : vector<2x128xf32>
    %1513 = vector.extract_strided_slice %1507 {offsets = [0, 64], sizes = [2, 32], strides = [1, 1]} : vector<2x128xf32> to vector<2x32xf32>
    %1514 = math.tanh %1513 : vector<2x32xf32>
    %1515 = vector.extract_strided_slice %1512 {offsets = [0, 0], sizes = [2, 32], strides = [1, 1]} : vector<2x128xf32> to vector<2x32xf32>
    %1516 = vector.extract_strided_slice %1512 {offsets = [0, 32], sizes = [2, 32], strides = [1, 1]} : vector<2x128xf32> to vector<2x32xf32>
    %1517 = vector.extract_strided_slice %1512 {offsets = [0, 96], sizes = [2, 32], strides = [1, 1]} : vector<2x128xf32> to vector<2x32xf32>
    %1518 = arith.mulf %1516, %1502 : vector<2x32xf32>
    %1519 = arith.mulf %1515, %1514 : vector<2x32xf32>
    %1520 = arith.addf %1518, %1519 : vector<2x32xf32>
    %1521 = math.tanh %1520 : vector<2x32xf32>
    %1522 = arith.mulf %1517, %1521 : vector<2x32xf32>
    %1523 = vector.extract_strided_slice %1410 {offsets = [12, 0], sizes = [2, 128], strides = [1, 1]} : vector<16x128xf32> to vector<2x128xf32>
    %cst_266 = arith.constant dense<0.000000e+00> : vector<2x128xf32>
    %1524 = tpu.matmul %1522, %1412, %cst_266 {dimension_numbers = #tpu.dot_dimension_numbers<[1], [0], [0], [1], [0, 0, 1, 1], [], []>} : vector<2x32xf32>, vector<32x128xf32>, vector<2x128xf32> -> vector<2x128xf32>
    %1525 = arith.addf %1523, %1524 : vector<2x128xf32>
    %1526 = arith.negf %1525 : vector<2x128xf32>
    %1527 = math.exp %1526 : vector<2x128xf32>
    %cst_267 = arith.constant 1.000000e+00 : f32
    %1528 = vector.broadcast %cst_267 : f32 to vector<2x128xf32>
    %1529 = arith.addf %1528, %1527 : vector<2x128xf32>
    %1530 = arith.divf %1528, %1529 : vector<2x128xf32>
    %1531 = vector.extract_strided_slice %1525 {offsets = [0, 64], sizes = [2, 32], strides = [1, 1]} : vector<2x128xf32> to vector<2x32xf32>
    %1532 = math.tanh %1531 : vector<2x32xf32>
    %1533 = vector.extract_strided_slice %1530 {offsets = [0, 0], sizes = [2, 32], strides = [1, 1]} : vector<2x128xf32> to vector<2x32xf32>
    %1534 = vector.extract_strided_slice %1530 {offsets = [0, 32], sizes = [2, 32], strides = [1, 1]} : vector<2x128xf32> to vector<2x32xf32>
    %1535 = vector.extract_strided_slice %1530 {offsets = [0, 96], sizes = [2, 32], strides = [1, 1]} : vector<2x128xf32> to vector<2x32xf32>
    %1536 = arith.mulf %1534, %1520 : vector<2x32xf32>
    %1537 = arith.mulf %1533, %1532 : vector<2x32xf32>
    %1538 = arith.addf %1536, %1537 : vector<2x32xf32>
    %1539 = math.tanh %1538 : vector<2x32xf32>
    %1540 = arith.mulf %1535, %1539 : vector<2x32xf32>
    %1541 = vector.extract_strided_slice %1410 {offsets = [14, 0], sizes = [2, 128], strides = [1, 1]} : vector<16x128xf32> to vector<2x128xf32>
    %cst_268 = arith.constant dense<0.000000e+00> : vector<2x128xf32>
    %1542 = tpu.matmul %1540, %1412, %cst_268 {dimension_numbers = #tpu.dot_dimension_numbers<[1], [0], [0], [1], [0, 0, 1, 1], [], []>} : vector<2x32xf32>, vector<32x128xf32>, vector<2x128xf32> -> vector<2x128xf32>
    %1543 = arith.addf %1541, %1542 : vector<2x128xf32>
    %1544 = arith.negf %1543 : vector<2x128xf32>
    %1545 = math.exp %1544 : vector<2x128xf32>
    %cst_269 = arith.constant 1.000000e+00 : f32
    %1546 = vector.broadcast %cst_269 : f32 to vector<2x128xf32>
    %1547 = arith.addf %1546, %1545 : vector<2x128xf32>
    %1548 = arith.divf %1546, %1547 : vector<2x128xf32>
    %1549 = vector.extract_strided_slice %1543 {offsets = [0, 64], sizes = [2, 32], strides = [1, 1]} : vector<2x128xf32> to vector<2x32xf32>
    %1550 = math.tanh %1549 : vector<2x32xf32>
    %1551 = vector.extract_strided_slice %1548 {offsets = [0, 0], sizes = [2, 32], strides = [1, 1]} : vector<2x128xf32> to vector<2x32xf32>
    %1552 = vector.extract_strided_slice %1548 {offsets = [0, 32], sizes = [2, 32], strides = [1, 1]} : vector<2x128xf32> to vector<2x32xf32>
    %1553 = vector.extract_strided_slice %1548 {offsets = [0, 96], sizes = [2, 32], strides = [1, 1]} : vector<2x128xf32> to vector<2x32xf32>
    %1554 = arith.mulf %1552, %1538 : vector<2x32xf32>
    %1555 = arith.mulf %1551, %1550 : vector<2x32xf32>
    %1556 = arith.addf %1554, %1555 : vector<2x32xf32>
    %1557 = math.tanh %1556 : vector<2x32xf32>
    %1558 = arith.mulf %1553, %1557 : vector<2x32xf32>
    %c0_270 = arith.constant 0 : index
    %c0_271 = arith.constant 0 : index
    %1559 = vector.load %arg5[%c0_270, %c0_271] : memref<32x64xf32, #tpu.memory_space<vmem>>, vector<32x64xf32>
    %cst_272 = arith.constant dense<0.000000e+00> : vector<2x64xf32>
    %1560 = tpu.matmul %1558, %1559, %cst_272 {dimension_numbers = #tpu.dot_dimension_numbers<[1], [0], [0], [1], [0, 0, 1, 1], [], []>} : vector<2x32xf32>, vector<32x64xf32>, vector<2x64xf32> -> vector<2x64xf32>
    %c0_273 = arith.constant 0 : index
    %c0_274 = arith.constant 0 : index
    %1561 = vector.load %arg6[%c0_273, %c0_274] : memref<1x64xf32, #tpu.memory_space<vmem>>, vector<1x64xf32>
    %1562 = vector.broadcast %1561 : vector<1x64xf32> to vector<2x64xf32>
    %1563 = arith.addf %1560, %1562 : vector<2x64xf32>
    %c0_275 = arith.constant 0 : index
    %c0_276 = arith.constant 0 : index
    %1564 = vector.load %arg7[%c0_275, %c0_276] : memref<64x8xf32, #tpu.memory_space<vmem>>, vector<64x8xf32>
    %cst_277 = arith.constant dense<0.000000e+00> : vector<2x8xf32>
    %1565 = tpu.matmul %1563, %1564, %cst_277 {dimension_numbers = #tpu.dot_dimension_numbers<[1], [0], [0], [1], [0, 0, 1, 1], [], []>} : vector<2x64xf32>, vector<64x8xf32>, vector<2x8xf32> -> vector<2x8xf32>
    %c0_278 = arith.constant 0 : index
    %c0_279 = arith.constant 0 : index
    %1566 = vector.load %arg8[%c0_278, %c0_279] : memref<1x8xf32, #tpu.memory_space<vmem>>, vector<1x8xf32>
    %1567 = vector.broadcast %1566 : vector<1x8xf32> to vector<2x8xf32>
    %1568 = arith.addf %1565, %1567 : vector<2x8xf32>
    %c0_280 = arith.constant 0 : index
    %c0_281 = arith.constant 0 : index
    %1569 = vector.load %arg9[%c0_280, %c0_281] : memref<2x8xf32, #tpu.memory_space<vmem>>, vector<2x8xf32>
    tpu.vector_store %arg9[%c0_280, %c0_281], %1568 {strides = array<i32>} : memref<2x8xf32, #tpu.memory_space<vmem>>, vector<2x8xf32>,
    return
  }
}

</mosaic_0001>

<bundles_post_ra>
// kernel: model_forward.1
= control target key start
LH: loop header
LB: loop body
LE: loop exit
PB: predicated region body
PF: predicated region fallthrough
CT: control target
= control target key end

     0   :  { %14 = vsyncpa [#allocation3], 0  ;;  %s14119_s0 = inlined_call_operand.vmem [shape: f32[16,16], index: 0, kind: input, shape index: {}]   ;;  %s14120_s1 = inlined_call_operand.vmem [shape: f32[16,128], index: 1, kind: input, shape index: {}]   ;;  %s14121_s2 = inlined_call_operand.hbm [shape: f32[9,32,128], index: 2, kind: input, shape index: {}]   ;;  %s14122_s3 = inlined_call_operand.hbm [shape: f32[10,32,128], index: 3, kind: input, shape index: {}]   ;;  %s14123_s4 = inlined_call_operand.vmem [shape: f32[10,1,128], index: 4, kind: input, shape index: {}]   ;;  %s14124_s5 = inlined_call_operand.vmem [shape: f32[32,64], index: 5, kind: input, shape index: {}]   ;;  %s14125_s6 = inlined_call_operand.vmem [shape: f32[1,64], index: 6, kind: input, shape index: {}]   ;;  %s14126_s7 = inlined_call_operand.vmem [shape: f32[64,8], index: 7, kind: input, shape index: {}]   ;;  %s14127_s8 = inlined_call_operand.vmem [shape: f32[1,8], index: 8, kind: input, shape index: {}]   ;;  %s14128_s9 = inlined_call_operand.hbm [shape: f32[2,8], index: 9, kind: output, shape index: {}]  }
   0x1   :  { %15 = vsyncpa [#allocation6], 0 }
   0x2   :  { %16 = vsyncpa [#allocation4], 0  ;;  %s12706_s30 = smov [#allocation2]   ;;  %s12634_s13 = scalar_lea.hbm %s14121_s2, 4608 }
   0x3   :  { %s26_s10 = sshll.u32 %s12706_s30, 4  ;;  %p12635_p0 = scmp.ne.s32.totalorder %s14121_s2, %s12634_s13  ;;  %s27_s10 = int_to_ptr.vmem [resolvable:$true] %s26_s10 }
   0x4   :  { %p12638_p1 = scmp.lt.u32.totalorder %s12634_s13, %s14121_s2 }
   0x6   :  { %p12640_p2 = pnand %p12638_p1, %p12635_p0 }
   0x8   :  { %12643 = shalt.err (!%p12640_p2)
}
   0x9   :  { %s12644_s18 = scalar_lea.vmem %s27_s10, 4608  ;;  %p12649_p4 = scmp.lt.s32.totalorder %s27_s10, %s27_s10 }
   0xa   :  { %p12645_p3 = scmp.ne.s32.totalorder %s27_s10, %s12644_s18  ;;  %p12650_p5 = scmp.lt.s32.totalorder %s12644_s18, %s12644_s18 }
   0xc   :  { %p12651_p6 = por %p12650_p5, %p12649_p4 }
   0xe   :  { %p12652_p7 = pnand %p12651_p6, %p12645_p3 }
  0x10   :  { %12655 = shalt.err (!%p12652_p7)
}
  0x11   :  { %s12707_s19 = smov 128   ;;  %s12708_s20 = smov 8  }
  0x12   :  { %32 = dma.hbm_to_vmem [thread:$0]  %s14121_s2, 4608, %s27_s10, [#allocation3], %s12707_s19, %s12707_s19, %s12708_s20  }
  0x13   :  { %s12709_s23 = smov [#allocation5]   ;;  %s12656_s27 = scalar_lea.hbm %s14122_s3, 5120 }
  0x14   :  { %s38_s24 = sshll.u32 %s12709_s23, 4  ;;  %p12657_p8 = scmp.ne.s32.totalorder %s14122_s3, %s12656_s27  ;;  %s39_s24 = int_to_ptr.vmem [resolvable:$true] %s38_s24 }
  0x15   :  { %p12660_p9 = scmp.lt.u32.totalorder %s12656_s27, %s14122_s3 }
  0x17   :  { %p12662_p10 = pnand %p12660_p9, %p12657_p8 }
  0x19   :  { %12665 = shalt.err (!%p12662_p10)
}
  0x1a   :  { %s12666_s12 = scalar_lea.vmem %s39_s24, 5120  ;;  %p12671_p12 = scmp.lt.s32.totalorder %s39_s24, %s39_s24 }
  0x1b   :  { %p12667_p11 = scmp.ne.s32.totalorder %s39_s24, %s12666_s12  ;;  %p12672_p13 = scmp.lt.s32.totalorder %s12666_s12, %s12666_s12 }
  0x1d   :  { %p12673_p0 = por %p12672_p13, %p12671_p12 }
  0x1f   :  { %p12674_p1 = pnand %p12673_p0, %p12667_p11 }
  0x21   :  { %12677 = shalt.err (!%p12674_p1)
}
  0x22   :  { %44 = dma.hbm_to_vmem [thread:$0]  %s14122_s3, 5120, %s39_s24, [#allocation6], %s12707_s19, %s12707_s19, %s12708_s20  }
  0x23   :  { %12700 = dma.done.wait [#allocation3], 4608  }
  0x24   :  { %12701 = vsyncadd [#allocation3], 4294962688 }
  0x25   :  { %12702 = dma.done.wait [#allocation6], 5120  }
  0x26   :  { %12703 = vsyncadd [#allocation6], 4294962176  ;;  %v12710_v0 = vmov 0.0|0.0   ;;  %vm12711_vm0 = vmmov 0   ;;  %v12712_v1 = vmov 0.0   ;;  %vm72_vm1 = vcmask 130048  }
  0x27   :  { %11426 = vmatprep.subr.bf16.mxu1 %v12710_v0  ;;  %10431 = vmatprep.mubr.msk.f32.mxu1 %vm12711_vm0, %v12712_v1  ;;  %v63_v2 = vld [vmem:[%s14120_s1] sm:$0xff]  ;;  %v64_v3 = vld [vmem:[%s14120_s1 + $0x8] sm:$0xff]  ;;  %v156_v10 = vld [vmem:[#allocation5 + $0x10] sm:$0xff]  ;;  %s12713_s20 = smov 64   ;;  %s12714_s21 = smov 32   ;;  %vm158_vm2 = vcmask 261120  }
  0x28   :  { %v61_v4 = vld [vmem:[%s14119_s0] sm:$0xff]  ;;  %v11410_v5 = vpack.c.bf16 %v64_v3, %v63_v2  ;;  %v155_v7 = vld [vmem:[#allocation5 + $0x8] sm:$0xff]  ;;  %v157_v11 = vld [vmem:[#allocation5 + $0x18] sm:$0xff]  ;;  %vm1001_vm3 = vcmask 1041408   ;;  %vm1003_vm4 = vcmask 1043456   ;;  %vm1005_vm5 = vcmask 1045504  }
  0x29   :  { %10398 = vmatprep.mubr.msk.f32.mxu0 %vm72_vm1, %v61_v4  ;;  %v154_v6 = vld [vmem:[#allocation5] sm:$0xff]  ;;  %v62_v9 = vld [vmem:[%s14119_s0 + $0x8] sm:$0xff]  ;;  %v12812_v12 = vpack.c.bf16 %v157_v11, %v156_v10  ;;  %vm9637_vm6 = vcmask 523264   ;;  %s12715_s17 = smov [#allocation7]   ;;  %vm9711_vm7 = vcmask 58368  }
  0x2a   :  { %v12803_v8 = vpack.c.bf16 %v155_v7, %v154_v6  ;;  %11411 = vmatprep.subr.bf16.mxu0 %v11410_v5  ;;  %v9729_v13 = vld [vmem:[%s14123_s4] ss:$0 sm:$0xff]  ;;  %s9719_s18 = sshll.u32 %s12715_s17, 4  ;;  %s9720_s18 = int_to_ptr.vmem [resolvable:$true] %s9719_s18 }
  0x2b   :  { %11413 = vmatpush3.bf16.msra.mxu0 %v11410_v5  ;;  %p12683_p3 = scmp.lt.s32.totalorder %s9720_s18, %s9720_s18 }
  0x2c   :  { %11428 = vmatpush3.bf16.msra.mxu1 %v12803_v8  ;;  %11414 = vmatprep.subr.bf16.mxu0 %v12710_v0 }
  0x2d   :  { %11429 = vmatprep.subr.bf16.mxu1 %v12710_v0 }
  0x2e   :  { %10399 = vmatmul.mubr.msk.f32.vlgmr.msra.gmra.mrb[0].mxu0 %vm72_vm1, %v62_v9 }
  0x2f   :  { %11416 = vmatpush3.bf16.msra.mxu0 %v12803_v8  ;;  %10409 = vmatprep.mubr.msk.f32.mxu0 %vm12711_vm0, %v12712_v1 }
  0x30   :  { %11417 = vmatprep.subr.bf16.mxu0 %v12710_v0  ;;  %11431 = vmatpush3.bf16.msra.mxu1 %v12812_v12 }
  0x31   :  { %11438 = vmatprep.subr.bf16.mxu1 %v12710_v0 }
  0x33   :  { %11419 = vmatpush3.bf16.msra.mxu0 %v12812_v12 }
  0x34   :  { %11420 = vmatprep.subr.bf16.mxu0 %v12710_v0 }
  0x36   :  { %10410 = vmatmul.mubr.f32.vlgmr.msra.gmra.mrb[2].mxu0 %v12712_v1 }
  0x37   :  { %11422 = vmatpush3.bf16.msra.mxu0 %v12803_v8  ;;  %10420 = vmatprep.mubr.msk.f32.mxu0 %vm12711_vm0, %v12712_v1 }
  0x38   :  { %11423 = vmatprep.subr.bf16.mxu0 %v12710_v0 }
  0x3b   :  { %11425 = vmatpush3.bf16.msra.mxu0 %v12812_v12 }
  0x3c   :  { %11432 = vmatprep.subr.bf16.mxu0 %v12710_v0 }
 0x101   :  { %v10400_v14 = vpop.f32.mrb[0].mxu0 }
 0x102   :  { %v12832_v15 = vadd.f32 %v10400_v14, %v9729_v13  ;;  %v145_v16 = vpop.f32.mrb[1].mxu0 }
 0x103   :  { %v12834_v17 = vadd.f32 %v9729_v13, %v145_v16 }
 0x109   :  { %v228_v18 = vpop.f32.mrb[2].mxu0 }
 0x10a   :  { %v232_v19 = vadd.f32 %v228_v18, %v12834_v17  ;;  %v10411_v20 = vpop.f32.mrb[3].mxu0 }
 0x10c   :  { %11994 = vtanh.f32 %v232_v19  ;;  %v9732_v22 = vmul.f32 -1.442695, %v232_v19 }
 0x10e   :  { %11996 = vpow2.f32 %v9732_v22 }
 0x116   :  { %v11995_v21 = vpop.eup %11994 }
 0x117   :  { %242 = vrot.lane.b32.xlu0 %v11995_v21, %s12713_s20 }
 0x118   :  { %v11997_v23 = vpop.eup %11996 }
 0x119   :  { %v236_v24 = vadd.f32 1.0, %v11997_v23 }
 0x11b   :  { %11998 = vrcp.f32 %v236_v24 }
 0x125   :  { %v11999_v25 = vpop.eup %11998 }
 0x126   :  { %v240_v28 = vmul.f32 0.0, %v11999_v25 }
 0x189   :  { %v243_v26 = vpop.permute.xlu0 %242 }
 0x18a   :  { %v245_v27 = vmul.f32 %v11999_v25, %v243_v26 }
 0x18c   :  { %247 = vrot.lane.b32.xlu0 %v245_v27, %s12714_s21 }
 0x1fe   :  { %v248_v29 = vpop.permute.xlu0 %247 }
 0x1ff   :  { %v250_v30 = vadd.f32 %v248_v29, %v240_v28 }
 0x201   :  { %12000 = vtanh.f32 %v250_v30  ;;  %v344_v46 = vrot.slane %v250_v30, 6 }
 0x20b   :  { %v12001_v31 = vpop.eup %12000 }
 0x20c   :  { %253 = vrot.lane.b32.xlu1 %v12001_v31, %s12713_s20 }
 0x27e   :  { %v254_v32 = vpop.permute.xlu1 %253 }
 0x27f   :  { %v12840_v33 = vmul.f32 %v11999_v25, %v254_v32 }
 0x281   :  { %258 = vrot.lane.b32.xlu1 %v12840_v33, %s12714_s21 }
 0x2f3   :  { %v259_v34 = vpop.permute.xlu1 %258 }
 0x2f4   :  { %10421 = vmatmul.mubr.msk.f32.vlgmr.msra.gmra.mrb[4].mxu0 %vm158_vm2, %v259_v34 }
 0x2f5   :  { %11434 = vmatpush3.bf16.msra.mxu0 %v12803_v8  ;;  %10442 = vmatprep.mubr.msk.f32.mxu0 %vm12711_vm0, %v12712_v1 }
 0x2f6   :  { %11435 = vmatprep.subr.bf16.mxu0 %v12710_v0 }
 0x2f9   :  { %11437 = vmatpush3.bf16.msra.mxu0 %v12812_v12 }
 0x2fa   :  { %11444 = vmatprep.subr.bf16.mxu0 %v12710_v0 }
 0x3c7   :  { %v328_v35 = vpop.f32.mrb[4].mxu0 }
 0x3c8   :  { %v333_v36 = vrot.slane %v328_v35, 6  ;;  %v10422_v37 = vpop.f32.mrb[5].mxu0 }
 0x3ca   :  { %v335_v38 = vadd.f32 %v333_v36, %v12834_v17 }
 0x3cc   :  { %12002 = vtanh.f32 %v335_v38  ;;  %v9734_v40 = vmul.f32 -1.442695, %v335_v38 }
 0x3ce   :  { %12004 = vpow2.f32 %v9734_v40 }
 0x3d6   :  { %v12003_v39 = vpop.eup %12002 }
 0x3d7   :  { %348 = vrot.lane.b32.xlu0 %v12003_v39, %s12713_s20 }
 0x3d8   :  { %v12005_v41 = vpop.eup %12004 }
 0x3d9   :  { %v339_v42 = vadd.f32 1.0, %v12005_v41 }
 0x3db   :  { %12006 = vrcp.f32 %v339_v42 }
 0x3e5   :  { %v12007_v43 = vpop.eup %12006 }
 0x3e6   :  { %v346_v47 = vmul.f32 %v12007_v43, %v344_v46 }
 0x449   :  { %v349_v44 = vpop.permute.xlu0 %348 }
 0x44a   :  { %v351_v45 = vmul.f32 %v12007_v43, %v349_v44 }
 0x44c   :  { %353 = vrot.lane.b32.xlu1 %v351_v45, %s12714_s21 }
 0x4be   :  { %v354_v48 = vpop.permute.xlu1 %353 }
 0x4bf   :  { %v356_v49 = vadd.f32 %v354_v48, %v346_v47 }
 0x4c1   :  { %12008 = vtanh.f32 %v356_v49  ;;  %v451_v4 = vrot.slane %v356_v49, 6 }
 0x4cb   :  { %v12009_v50 = vpop.eup %12008 }
 0x4cc   :  { %359 = vrot.lane.b32.xlu0 %v12009_v50, %s12713_s20 }
 0x53e   :  { %v360_v51 = vpop.permute.xlu0 %359 }
 0x53f   :  { %v362_v52 = vmul.f32 %v12007_v43, %v360_v51 }
 0x541   :  { %v364_v53 = vrot.slane %v362_v52, 2  ;;  %v1002_v13 = vsel %vm1001_vm3, %v12840_v33, %v362_v52 }
 0x543   :  { %365 = vrot.lane.b32.xlu1 %v364_v53, %s12714_s21 }
 0x5b5   :  { %v366_v54 = vpop.permute.xlu1 %365 }
 0x5b6   :  { %10432 = vmatmul.mubr.msk.f32.vlgmr.msra.gmra.mrb[0].mxu1 %vm158_vm2, %v366_v54 }
 0x5b7   :  { %11440 = vmatpush3.bf16.msra.mxu1 %v12803_v8  ;;  %10453 = vmatprep.mubr.msk.f32.mxu1 %vm12711_vm0, %v12712_v1 }
 0x5b8   :  { %11441 = vmatprep.subr.bf16.mxu1 %v12710_v0 }
 0x5bb   :  { %11443 = vmatpush3.bf16.msra.mxu1 %v12812_v12 }
 0x5bc   :  { %11450 = vmatprep.subr.bf16.mxu1 %v12710_v0 }
 0x689   :  { %v435_v55 = vpop.f32.mrb[0].mxu1 }
 0x68a   :  { %v440_v56 = vrot.slane %v435_v55, 4  ;;  %v10433_v57 = vpop.f32.mrb[1].mxu1 }
 0x68c   :  { %v442_v58 = vadd.f32 %v440_v56, %v12834_v17 }
 0x68e   :  { %12010 = vtanh.f32 %v442_v58  ;;  %v9736_v60 = vmul.f32 -1.442695, %v442_v58 }
 0x690   :  { %12012 = vpow2.f32 %v9736_v60 }
 0x698   :  { %v12011_v59 = vpop.eup %12010 }
 0x699   :  { %455 = vrot.lane.b32.xlu0 %v12011_v59, %s12713_s20 }
 0x69a   :  { %v12013_v61 = vpop.eup %12012 }
 0x69b   :  { %v446_v62 = vadd.f32 1.0, %v12013_v61 }
 0x69d   :  { %12014 = vrcp.f32 %v446_v62 }
 0x6a7   :  { %v12015_v63 = vpop.eup %12014 }
 0x6a8   :  { %v453_v5 = vmul.f32 %v12015_v63, %v451_v4 }
 0x70b   :  { %v456_v2 = vpop.permute.xlu0 %455 }
 0x70c   :  { %v458_v3 = vmul.f32 %v12015_v63, %v456_v2 }
 0x70e   :  { %460 = vrot.lane.b32.xlu1 %v458_v3, %s12714_s21 }
 0x780   :  { %v461_v6 = vpop.permute.xlu1 %460 }
 0x781   :  { %v463_v7 = vadd.f32 %v461_v6, %v453_v5 }
 0x783   :  { %12016 = vtanh.f32 %v463_v7  ;;  %v558_v30 = vrot.slane %v463_v7, 6 }
 0x78d   :  { %v12017_v9 = vpop.eup %12016 }
 0x78e   :  { %466 = vrot.lane.b32.xlu0 %v12017_v9, %s12713_s20 }
 0x800   :  { %v467_v10 = vpop.permute.xlu0 %466 }
 0x801   :  { %v469_v11 = vmul.f32 %v12015_v63, %v467_v10 }
 0x803   :  { %v471_v14 = vrot.slane %v469_v11, 4  ;;  %v1004_v16 = vsel %vm1003_vm4, %v1002_v13, %v469_v11 }
 0x805   :  { %472 = vrot.lane.b32.xlu1 %v471_v14, %s12714_s21 }
 0x877   :  { %v473_v18 = vpop.permute.xlu1 %472 }
 0x878   :  { %10443 = vmatmul.mubr.msk.f32.vlgmr.msra.gmra.mrb[6].mxu0 %vm158_vm2, %v473_v18 }
 0x879   :  { %11446 = vmatpush3.bf16.msra.mxu0 %v12803_v8  ;;  %10464 = vmatprep.mubr.msk.f32.mxu0 %vm12711_vm0, %v12712_v1 }
 0x87a   :  { %11447 = vmatprep.subr.bf16.mxu0 %v12710_v0 }
 0x87d   :  { %11449 = vmatpush3.bf16.msra.mxu0 %v12812_v12 }
 0x87e   :  { %11456 = vmatprep.subr.bf16.mxu0 %v12710_v0 }
 0x94b   :  { %v542_v19 = vpop.f32.mrb[6].mxu0 }
 0x94c   :  { %v547_v20 = vrot.slane %v542_v19, 2  ;;  %v10444_v21 = vpop.f32.mrb[7].mxu0 }
 0x94e   :  { %v549_v22 = vadd.f32 %v547_v20, %v12834_v17 }
 0x950   :  { %12018 = vtanh.f32 %v549_v22  ;;  %v9738_v24 = vmul.f32 -1.442695, %v549_v22 }
 0x952   :  { %12020 = vpow2.f32 %v9738_v24 }
 0x95a   :  { %v12019_v23 = vpop.eup %12018 }
 0x95b   :  { %562 = vrot.lane.b32.xlu0 %v12019_v23, %s12713_s20 }
 0x95c   :  { %v12021_v25 = vpop.eup %12020 }
 0x95d   :  { %v553_v26 = vadd.f32 1.0, %v12021_v25 }
 0x95f   :  { %12022 = vrcp.f32 %v553_v26 }
 0x969   :  { %v12023_v27 = vpop.eup %12022 }
 0x96a   :  { %v560_v31 = vmul.f32 %v12023_v27, %v558_v30 }
 0x9cd   :  { %v563_v28 = vpop.permute.xlu0 %562 }
 0x9ce   :  { %v565_v29 = vmul.f32 %v12023_v27, %v563_v28 }
 0x9d0   :  { %567 = vrot.lane.b32.xlu1 %v565_v29, %s12714_s21 }
 0xa42   :  { %v568_v32 = vpop.permute.xlu1 %567 }
 0xa43   :  { %v570_v33 = vadd.f32 %v568_v32, %v560_v31 }
 0xa45   :  { %12024 = vtanh.f32 %v570_v33  ;;  %v662_v49 = vrot.slane %v570_v33, 6 }
 0xa4f   :  { %v12025_v17 = vpop.eup %12024 }
 0xa50   :  { %573 = vrot.lane.b32.xlu0 %v12025_v17, %s12713_s20 }
 0xac2   :  { %v574_v34 = vpop.permute.xlu0 %573 }
 0xac3   :  { %v576_v35 = vmul.f32 %v12023_v27, %v574_v34 }
 0xac5   :  { %v578_v36 = vrot.slane %v576_v35, 6  ;;  %v12883_v37 = vsel %vm1005_vm5, %v1004_v16, %v576_v35 }
 0xac7   :  { %579 = vrot.lane.b32.xlu1 %v578_v36, %s12714_s21 }
 0xb39   :  { %v580_v38 = vpop.permute.xlu1 %579 }
 0xb3a   :  { %10454 = vmatmul.mubr.msk.f32.vlgmr.msra.gmra.mrb[2].mxu1 %vm158_vm2, %v580_v38 }
 0xb3b   :  { %11452 = vmatpush3.bf16.msra.mxu1 %v12803_v8  ;;  %10475 = vmatprep.mubr.msk.f32.mxu1 %vm12711_vm0, %v12712_v1 }
 0xb3c   :  { %11453 = vmatprep.subr.bf16.mxu1 %v12710_v0 }
 0xb3f   :  { %11455 = vmatpush3.bf16.msra.mxu1 %v12812_v12 }
 0xc0d   :  { %v649_v39 = vpop.f32.mrb[2].mxu1 }
 0xc0e   :  { %v653_v40 = vadd.f32 %v649_v39, %v12832_v15  ;;  %v10455_v41 = vpop.f32.mrb[3].mxu1 }
 0xc10   :  { %12026 = vtanh.f32 %v653_v40  ;;  %v9740_v43 = vmul.f32 -1.442695, %v653_v40 }
 0xc12   :  { %12028 = vpow2.f32 %v9740_v43 }
 0xc1a   :  { %v12027_v42 = vpop.eup %12026 }
 0xc1b   :  { %666 = vrot.lane.b32.xlu0 %v12027_v42, %s12713_s20 }
 0xc1c   :  { %v12029_v44 = vpop.eup %12028 }
 0xc1d   :  { %v657_v45 = vadd.f32 1.0, %v12029_v44 }
 0xc1f   :  { %12030 = vrcp.f32 %v657_v45 }
 0xc29   :  { %v12031_v46 = vpop.eup %12030 }
 0xc2a   :  { %v664_v50 = vmul.f32 %v12031_v46, %v662_v49 }
 0xc8d   :  { %v667_v47 = vpop.permute.xlu0 %666 }
 0xc8e   :  { %v669_v48 = vmul.f32 %v12031_v46, %v667_v47 }
 0xc90   :  { %671 = vrot.lane.b32.xlu1 %v669_v48, %s12714_s21 }
 0xd02   :  { %v672_v51 = vpop.permute.xlu1 %671 }
 0xd03   :  { %v674_v52 = vadd.f32 %v672_v51, %v664_v50 }
 0xd05   :  { %12032 = vtanh.f32 %v674_v52 }
 0xd0f   :  { %v12033_v53 = vpop.eup %12032 }
 0xd10   :  { %677 = vrot.lane.b32.xlu0 %v12033_v53, %s12713_s20 }
 0xd82   :  { %v678_v54 = vpop.permute.xlu0 %677 }
 0xd83   :  { %v12896_v55 = vmul.f32 %v12031_v46, %v678_v54  ;;  %v1010_v54 = vld [vmem:[#allocation2] sm:$0xff] }
 0xd85   :  { %682 = vrot.lane.b32.xlu1 %v12896_v55, %s12714_s21 }
 0xdf7   :  { %v683_v56 = vpop.permute.xlu1 %682 }
 0xdf8   :  { %10465 = vmatmul.mubr.msk.f32.vlgmr.msra.gmra.mrb[8].mxu0 %vm158_vm2, %v683_v56  ;;  %v1108_v56 = vld [vmem:[#allocation5 + $0x20] sm:$0xff] }
 0xdf9   :  { %11458 = vmatpush3.bf16.msra.mxu0 %v12803_v8  ;;  %10486 = vmatprep.mubr.msk.f32.mxu0 %vm12711_vm0, %v12712_v1 }
 0xdfa   :  { %11459 = vmatprep.subr.bf16.mxu0 %v12710_v0 }
 0xdfd   :  { %11461 = vmatpush3.bf16.msra.mxu0 %v12812_v12  ;;  %v768_v12 = vrot.slane %v674_v52, 6 }
 0xdfe   :  { %11470 = vmatprep.subr.bf16.mxu0 %v12710_v0 }
 0xecb   :  { %v752_v57 = vpop.f32.mrb[8].mxu0 }
 0xecc   :  { %v757_v58 = vrot.slane %v752_v57, 6  ;;  %v10466_v59 = vpop.f32.mrb[9].mxu0 }
 0xecd   :  { %v1012_v59 = vld [vmem:[#allocation2 + $0x10] sm:$0xff] }
 0xece   :  { %v759_v60 = vadd.f32 %v757_v58, %v12832_v15  ;;  %v1109_v58 = vld [vmem:[#allocation5 + $0x28] sm:$0xff] }
 0xed0   :  { %12034 = vtanh.f32 %v759_v60  ;;  %v9742_v62 = vmul.f32 -1.442695, %v759_v60  ;;  %v1013_v60 = vld [vmem:[#allocation2 + $0x18] sm:$0xff] }
 0xed2   :  { %12036 = vpow2.f32 %v9742_v62  ;;  %v11466_v62 = vpack.c.bf16 %v1013_v60, %v1012_v59 }
 0xeda   :  { %v12035_v61 = vpop.eup %12034 }
 0xedb   :  { %772 = vrot.lane.b32.xlu0 %v12035_v61, %s12713_s20  ;;  %v12930_v61 = vpack.c.bf16 %v1109_v58, %v1108_v56 }
 0xedc   :  { %v12037_v8 = vpop.eup %12036 }
 0xedd   :  { %v763_v63 = vadd.f32 1.0, %v12037_v8  ;;  %v1110_v8 = vld [vmem:[#allocation5 + $0x30] sm:$0xff] }
 0xedf   :  { %12038 = vrcp.f32 %v763_v63 }
 0xee9   :  { %v12039_v2 = vpop.eup %12038 }
 0xeea   :  { %v770_v5 = vmul.f32 %v12039_v2, %v768_v12 }
 0xf4d   :  { %v773_v3 = vpop.permute.xlu0 %772 }
 0xf4e   :  { %v775_v4 = vmul.f32 %v12039_v2, %v773_v3 }
 0xf50   :  { %777 = vrot.lane.b32.xlu1 %v775_v4, %s12714_s21 }
 0xfc2   :  { %v778_v6 = vpop.permute.xlu1 %777 }
 0xfc3   :  { %v780_v7 = vadd.f32 %v778_v6, %v770_v5 }
 0xfc5   :  { %12040 = vtanh.f32 %v780_v7  ;;  %v875_v28 = vrot.slane %v780_v7, 6 }
 0xfcf   :  { %v12041_v9 = vpop.eup %12040 }
 0xfd0   :  { %783 = vrot.lane.b32.xlu0 %v12041_v9, %s12713_s20  ;;  %v9748_v9 = vld [vmem:[%s14123_s4 + $0x1] ss:$0 sm:$0xff] }
0x1042   :  { %v784_v10 = vpop.permute.xlu0 %783 }
0x1043   :  { %v786_v11 = vmul.f32 %v12039_v2, %v784_v10 }
0x1045   :  { %v788_v13 = vrot.slane %v786_v11, 2  ;;  %v1007_v34 = vsel %vm1001_vm3, %v12896_v55, %v786_v11  ;;  %v1011_v55 = vld [vmem:[#allocation2 + $0x8] sm:$0xff] }
0x1046   :  { %v11462_v57 = vpack.c.bf16 %v1011_v55, %v1010_v54 }
0x1047   :  { %789 = vrot.lane.b32.xlu1 %v788_v13, %s12714_s21 }
0x1048   :  { %11463 = vmatprep.subr.bf16.mxu1 %v11462_v57 }
0x10b9   :  { %v790_v14 = vpop.permute.xlu1 %789 }
0x10ba   :  { %10476 = vmatmul.mubr.msk.f32.vlgmr.msra.gmra.mrb[4].mxu1 %vm158_vm2, %v790_v14 }
0x10bb   :  { %11465 = vmatpush3.bf16.msra.mxu1 %v11462_v57 }
0x10bc   :  { %11467 = vmatprep.subr.bf16.mxu1 %v11466_v62 }
0x10bf   :  { %11469 = vmatpush3.bf16.msra.mxu1 %v11466_v62 }
0x10c0   :  { %11476 = vmatprep.subr.bf16.mxu1 %v12710_v0 }
0x118d   :  { %v859_v16 = vpop.f32.mrb[4].mxu1 }
0x118e   :  { %v864_v18 = vrot.slane %v859_v16, 4  ;;  %v10477_v19 = vpop.f32.mrb[5].mxu1 }
0x1190   :  { %v866_v20 = vadd.f32 %v864_v18, %v12832_v15 }
0x1192   :  { %12042 = vtanh.f32 %v866_v20  ;;  %v9744_v22 = vmul.f32 -1.442695, %v866_v20 }
0x1194   :  { %12044 = vpow2.f32 %v9744_v22 }
0x119c   :  { %v12043_v21 = vpop.eup %12042 }
0x119d   :  { %879 = vrot.lane.b32.xlu0 %v12043_v21, %s12713_s20 }
0x119e   :  { %v12045_v23 = vpop.eup %12044 }
0x119f   :  { %v870_v24 = vadd.f32 1.0, %v12045_v23 }
0x11a1   :  { %12046 = vrcp.f32 %v870_v24 }
0x11ab   :  { %v12047_v25 = vpop.eup %12046 }
0x11ac   :  { %v877_v29 = vmul.f32 %v12047_v25, %v875_v28 }
0x120f   :  { %v880_v26 = vpop.permute.xlu0 %879 }
0x1210   :  { %v882_v27 = vmul.f32 %v12047_v25, %v880_v26 }
0x1212   :  { %884 = vrot.lane.b32.xlu1 %v882_v27, %s12714_s21 }
0x1284   :  { %v885_v30 = vpop.permute.xlu1 %884 }
0x1285   :  { %v887_v31 = vadd.f32 %v885_v30, %v877_v29 }
0x1287   :  { %12048 = vtanh.f32 %v887_v31  ;;  %v982_v50 = vrot.slane %v887_v31, 6 }
0x1291   :  { %v12049_v32 = vpop.eup %12048 }
0x1292   :  { %890 = vrot.lane.b32.xlu0 %v12049_v32, %s12713_s20 }
0x1304   :  { %v891_v33 = vpop.permute.xlu0 %890 }
0x1305   :  { %v893_v17 = vmul.f32 %v12047_v25, %v891_v33 }
0x1307   :  { %v895_v35 = vrot.slane %v893_v17, 4  ;;  %v1008_v36 = vsel %vm1003_vm4, %v1007_v34, %v893_v17 }
0x1309   :  { %896 = vrot.lane.b32.xlu1 %v895_v35, %s12714_s21 }
0x137b   :  { %v897_v38 = vpop.permute.xlu1 %896 }
0x137c   :  { %10487 = vmatmul.mubr.msk.f32.vlgmr.msra.gmra.mrb[10].mxu0 %vm158_vm2, %v897_v38 }
0x137d   :  { %10508 = vmatprep.mubr.msk.f32.mxu0 %vm12711_vm0, %v12712_v1  ;;  %11472 = vmatpush3.bf16.msra.mxu0 %v12930_v61 }
0x137e   :  { %11473 = vmatprep.subr.bf16.mxu0 %v12710_v0 }
0x144f   :  { %v966_v39 = vpop.f32.mrb[10].mxu0 }
0x1450   :  { %v971_v40 = vrot.slane %v966_v39, 2  ;;  %v10488_v41 = vpop.f32.mrb[11].mxu0 }
0x1452   :  { %v973_v42 = vadd.f32 %v971_v40, %v12832_v15 }
0x1454   :  { %12050 = vtanh.f32 %v973_v42  ;;  %v9746_v44 = vmul.f32 -1.442695, %v973_v42 }
0x1456   :  { %12052 = vpow2.f32 %v9746_v44 }
0x145e   :  { %v12051_v43 = vpop.eup %12050 }
0x145f   :  { %986 = vrot.lane.b32.xlu0 %v12051_v43, %s12713_s20 }
0x1460   :  { %v12053_v45 = vpop.eup %12052 }
0x1461   :  { %v977_v46 = vadd.f32 1.0, %v12053_v45 }
0x1463   :  { %12054 = vrcp.f32 %v977_v46 }
0x146d   :  { %v12055_v47 = vpop.eup %12054 }
0x146e   :  { %v984_v51 = vmul.f32 %v12055_v47, %v982_v50 }
0x14d1   :  { %v987_v48 = vpop.permute.xlu0 %986 }
0x14d2   :  { %v989_v49 = vmul.f32 %v12055_v47, %v987_v48 }
0x14d4   :  { %991 = vrot.lane.b32.xlu1 %v989_v49, %s12714_s21 }
0x14d8   :  { %1024 = vrot.lane.b32.xlu1 %v12883_v37, %s12714_s21  ;;  %v1111_v37 = vld [vmem:[#allocation5 + $0x38] sm:$0xff] }
0x14d9   :  { %v12933_v63 = vpack.c.bf16 %v1111_v37, %v1110_v8 }
0x14db   :  { %11475 = vmatpush3.bf16.msra.mxu0 %v12933_v63 }
0x14dc   :  { %11482 = vmatprep.subr.bf16.mxu0 %v12710_v0 }
0x14de   :  { %10509 = vmatmul.mubr.f32.vlgmr.msra.gmra.mrb[12].mxu0 %v12712_v1 }
0x14df   :  { %11484 = vmatpush3.bf16.msra.mxu0 %v12930_v61  ;;  %10530 = vmatprep.mubr.msk.f32.mxu0 %vm12711_vm0, %v12712_v1 }
0x14e0   :  { %11485 = vmatprep.subr.bf16.mxu0 %v12710_v0 }
0x14e3   :  { %11487 = vmatpush3.bf16.msra.mxu0 %v12933_v63 }
0x14e4   :  { %11494 = vmatprep.subr.bf16.mxu0 %v12710_v0 }
0x1546   :  { %v992_v15 = vpop.permute.xlu1 %991 }
0x1547   :  { %v994_v52 = vadd.f32 %v992_v15, %v984_v51 }
0x1549   :  { %12056 = vtanh.f32 %v994_v52 }
0x154a   :  { %v1025_v53 = vpop.permute.xlu1 %1024 }
0x154b   :  { %10497 = vmatprep.mubr.msk.f32.mxu1 %vm158_vm2, %v1025_v53 }
0x1553   :  { %v12057_v2 = vpop.eup %12056 }
0x1554   :  { %997 = vrot.lane.b32.xlu0 %v12057_v2, %s12713_s20 }
0x15b1   :  { %v1178_v6 = vpop.f32.mrb[12].mxu0 }
0x15b2   :  { %v10510_v7 = vpop.f32.mrb[13].mxu0 }
0x15c6   :  { %v998_v3 = vpop.permute.xlu0 %997 }
0x15c7   :  { %v1000_v4 = vmul.f32 %v12055_v47, %v998_v3 }
0x15c9   :  { %v1009_v12 = vsel %vm1005_vm5, %v1008_v36, %v1000_v4 }
0x15ca   :  { %1026 = vrot.lane.b32.xlu0 %v1009_v12, %s12714_s21 }
0x163c   :  { %v1027_v5 = vpop.permute.xlu0 %1026 }
0x163d   :  { %10498 = vmatmul.mubr.msk.f32.vlgmr.msra.gmra.mrb[6].mxu1 %vm158_vm2, %v1027_v5 }
0x163e   :  { %11478 = vmatpush3.bf16.msra.mxu1 %v12930_v61  ;;  %10519 = vmatprep.mubr.msk.f32.mxu1 %vm12711_vm0, %v12712_v1 }
0x163f   :  { %11479 = vmatprep.subr.bf16.mxu1 %v12710_v0 }
0x1642   :  { %11481 = vmatpush3.bf16.msra.mxu1 %v12933_v63 }
0x1643   :  { %11488 = vmatprep.subr.bf16.mxu1 %v12710_v0 }
0x1710   :  { %v10499_v10 = vpop.f32.mrb[6].mxu1 }
0x1711   :  { %v12959_v11 = vadd.f32 %v10499_v10, %v9748_v9  ;;  %v1098_v13 = vpop.f32.mrb[7].mxu1 }
0x1712   :  { %v12961_v14 = vadd.f32 %v9748_v9, %v1098_v13 }
0x1714   :  { %v1182_v16 = vadd.f32 %v1178_v6, %v12961_v14 }
0x1716   :  { %12058 = vtanh.f32 %v1182_v16  ;;  %v9751_v19 = vmul.f32 -1.442695, %v1182_v16 }
0x1718   :  { %12060 = vpow2.f32 %v9751_v19 }
0x1720   :  { %v12059_v18 = vpop.eup %12058 }
0x1721   :  { %1192 = vrot.lane.b32.xlu1 %v12059_v18, %s12713_s20 }
0x1722   :  { %v12061_v20 = vpop.eup %12060 }
0x1723   :  { %v1186_v21 = vadd.f32 1.0, %v12061_v20 }
0x1725   :  { %12062 = vrcp.f32 %v1186_v21 }
0x172f   :  { %v12063_v22 = vpop.eup %12062 }
0x1730   :  { %v1190_v25 = vmul.f32 0.0, %v12063_v22 }
0x1793   :  { %v1193_v23 = vpop.permute.xlu1 %1192 }
0x1794   :  { %v1195_v24 = vmul.f32 %v12063_v22, %v1193_v23 }
0x1796   :  { %1197 = vrot.lane.b32.xlu0 %v1195_v24, %s12714_s21 }
0x1808   :  { %v1198_v26 = vpop.permute.xlu0 %1197 }
0x1809   :  { %v1200_v27 = vadd.f32 %v1198_v26, %v1190_v25 }
0x180b   :  { %12064 = vtanh.f32 %v1200_v27  ;;  %v1294_v43 = vrot.slane %v1200_v27, 6 }
0x1815   :  { %v12065_v28 = vpop.eup %12064 }
0x1816   :  { %1203 = vrot.lane.b32.xlu1 %v12065_v28, %s12713_s20 }
0x1888   :  { %v1204_v29 = vpop.permute.xlu1 %1203 }
0x1889   :  { %v12967_v30 = vmul.f32 %v12063_v22, %v1204_v29 }
0x188b   :  { %1208 = vrot.lane.b32.xlu0 %v12967_v30, %s12714_s21 }
0x18fd   :  { %v1209_v31 = vpop.permute.xlu0 %1208 }
0x18fe   :  { %10520 = vmatmul.mubr.msk.f32.vlgmr.msra.gmra.mrb[8].mxu1 %vm158_vm2, %v1209_v31 }
0x18ff   :  { %11490 = vmatpush3.bf16.msra.mxu1 %v12930_v61  ;;  %10541 = vmatprep.mubr.msk.f32.mxu1 %vm12711_vm0, %v12712_v1 }
0x1900   :  { %11491 = vmatprep.subr.bf16.mxu1 %v12710_v0 }
0x1903   :  { %11493 = vmatpush3.bf16.msra.mxu1 %v12933_v63 }
0x1904   :  { %11500 = vmatprep.subr.bf16.mxu1 %v12710_v0 }
0x19d1   :  { %v1278_v32 = vpop.f32.mrb[8].mxu1 }
0x19d2   :  { %v1283_v33 = vrot.slane %v1278_v32, 6  ;;  %v10521_v17 = vpop.f32.mrb[9].mxu1 }
0x19d4   :  { %v1285_v34 = vadd.f32 %v1283_v33, %v12961_v14 }
0x19d6   :  { %12066 = vtanh.f32 %v1285_v34  ;;  %v9753_v36 = vmul.f32 -1.442695, %v1285_v34 }
0x19d8   :  { %12068 = vpow2.f32 %v9753_v36 }
0x19e0   :  { %v12067_v35 = vpop.eup %12066 }
0x19e1   :  { %1298 = vrot.lane.b32.xlu1 %v12067_v35, %s12713_s20 }
0x19e2   :  { %v12069_v38 = vpop.eup %12068 }
0x19e3   :  { %v1289_v39 = vadd.f32 1.0, %v12069_v38 }
0x19e5   :  { %12070 = vrcp.f32 %v1289_v39 }
0x19ef   :  { %v12071_v40 = vpop.eup %12070 }
0x19f0   :  { %v1296_v44 = vmul.f32 %v12071_v40, %v1294_v43 }
0x1a53   :  { %v1299_v41 = vpop.permute.xlu1 %1298 }
0x1a54   :  { %v1301_v42 = vmul.f32 %v12071_v40, %v1299_v41 }
0x1a56   :  { %1303 = vrot.lane.b32.xlu0 %v1301_v42, %s12714_s21 }
0x1ac8   :  { %v1304_v45 = vpop.permute.xlu0 %1303 }
0x1ac9   :  { %v1306_v46 = vadd.f32 %v1304_v45, %v1296_v44 }
0x1acb   :  { %12072 = vtanh.f32 %v1306_v46  ;;  %v1401_v8 = vrot.slane %v1306_v46, 6 }
0x1ad5   :  { %v12073_v47 = vpop.eup %12072 }
0x1ad6   :  { %1309 = vrot.lane.b32.xlu1 %v12073_v47, %s12713_s20 }
0x1b48   :  { %v1310_v48 = vpop.permute.xlu1 %1309 }
0x1b49   :  { %v1312_v49 = vmul.f32 %v12071_v40, %v1310_v48 }
0x1b4b   :  { %v1314_v50 = vrot.slane %v1312_v49, 2  ;;  %v1951_v6 = vsel %vm1001_vm3, %v12967_v30, %v1312_v49 }
0x1b4d   :  { %1315 = vrot.lane.b32.xlu0 %v1314_v50, %s12714_s21 }
0x1bbf   :  { %v1316_v51 = vpop.permute.xlu0 %1315 }
0x1bc0   :  { %10531 = vmatmul.mubr.msk.f32.vlgmr.msra.gmra.mrb[14].mxu0 %vm158_vm2, %v1316_v51 }
0x1bc1   :  { %11496 = vmatpush3.bf16.msra.mxu0 %v12930_v61  ;;  %10552 = vmatprep.mubr.msk.f32.mxu0 %vm12711_vm0, %v12712_v1 }
0x1bc2   :  { %11497 = vmatprep.subr.bf16.mxu0 %v12710_v0 }
0x1bc5   :  { %11499 = vmatpush3.bf16.msra.mxu0 %v12933_v63 }
0x1bc6   :  { %11506 = vmatprep.subr.bf16.mxu0 %v12710_v0 }
0x1c93   :  { %v1385_v15 = vpop.f32.mrb[14].mxu0 }
0x1c94   :  { %v1390_v52 = vrot.slane %v1385_v15, 4  ;;  %v10532_v53 = vpop.f32.mrb[15].mxu0 }
0x1c96   :  { %v1392_v54 = vadd.f32 %v1390_v52, %v12961_v14 }
0x1c98   :  { %12074 = vtanh.f32 %v1392_v54  ;;  %v9755_v56 = vmul.f32 -1.442695, %v1392_v54 }
0x1c9a   :  { %12076 = vpow2.f32 %v9755_v56 }
0x1ca2   :  { %v12075_v55 = vpop.eup %12074 }
0x1ca3   :  { %1405 = vrot.lane.b32.xlu1 %v12075_v55, %s12713_s20 }
0x1ca4   :  { %v12077_v57 = vpop.eup %12076 }
0x1ca5   :  { %v1396_v58 = vadd.f32 1.0, %v12077_v57 }
0x1ca7   :  { %12078 = vrcp.f32 %v1396_v58 }
0x1cb1   :  { %v12079_v59 = vpop.eup %12078 }
0x1cb2   :  { %v1403_v37 = vmul.f32 %v12079_v59, %v1401_v8 }
0x1d15   :  { %v1406_v60 = vpop.permute.xlu1 %1405 }
0x1d16   :  { %v1408_v62 = vmul.f32 %v12079_v59, %v1406_v60 }
0x1d18   :  { %1410 = vrot.lane.b32.xlu0 %v1408_v62, %s12714_s21 }
0x1d8a   :  { %v1411_v2 = vpop.permute.xlu0 %1410 }
0x1d8b   :  { %v1413_v3 = vadd.f32 %v1411_v2, %v1403_v37 }
0x1d8d   :  { %12080 = vtanh.f32 %v1413_v3  ;;  %v1508_v27 = vrot.slane %v1413_v3, 6 }
0x1d97   :  { %v12081_v4 = vpop.eup %12080 }
0x1d98   :  { %1416 = vrot.lane.b32.xlu1 %v12081_v4, %s12713_s20 }
0x1e0a   :  { %v1417_v12 = vpop.permute.xlu1 %1416 }
0x1e0b   :  { %v1419_v5 = vmul.f32 %v12079_v59, %v1417_v12 }
0x1e0d   :  { %v1421_v7 = vrot.slane %v1419_v5, 4  ;;  %v1952_v9 = vsel %vm1003_vm4, %v1951_v6, %v1419_v5 }
0x1e0f   :  { %1422 = vrot.lane.b32.xlu0 %v1421_v7, %s12714_s21 }
0x1e81   :  { %v1423_v10 = vpop.permute.xlu0 %1422 }
0x1e82   :  { %10542 = vmatmul.mubr.msk.f32.vlgmr.msra.gmra.mrb[10].mxu1 %vm158_vm2, %v1423_v10 }
0x1e83   :  { %11502 = vmatpush3.bf16.msra.mxu1 %v12930_v61  ;;  %10563 = vmatprep.mubr.msk.f32.mxu1 %vm12711_vm0, %v12712_v1 }
0x1e84   :  { %11503 = vmatprep.subr.bf16.mxu1 %v12710_v0 }
0x1e87   :  { %11505 = vmatpush3.bf16.msra.mxu1 %v12933_v63 }
0x1e88   :  { %11512 = vmatprep.subr.bf16.mxu1 %v12710_v0 }
0x1f55   :  { %v1492_v13 = vpop.f32.mrb[10].mxu1 }
0x1f56   :  { %v1497_v16 = vrot.slane %v1492_v13, 2  ;;  %v10543_v18 = vpop.f32.mrb[11].mxu1 }
0x1f58   :  { %v1499_v19 = vadd.f32 %v1497_v16, %v12961_v14 }
0x1f5a   :  { %12082 = vtanh.f32 %v1499_v19  ;;  %v9757_v21 = vmul.f32 -1.442695, %v1499_v19 }
0x1f5c   :  { %12084 = vpow2.f32 %v9757_v21 }
0x1f64   :  { %v12083_v20 = vpop.eup %12082 }
0x1f65   :  { %1512 = vrot.lane.b32.xlu1 %v12083_v20, %s12713_s20 }
0x1f66   :  { %v12085_v22 = vpop.eup %12084 }
0x1f67   :  { %v1503_v23 = vadd.f32 1.0, %v12085_v22 }
0x1f69   :  { %12086 = vrcp.f32 %v1503_v23 }
0x1f73   :  { %v12087_v24 = vpop.eup %12086 }
0x1f74   :  { %v1510_v28 = vmul.f32 %v12087_v24, %v1508_v27 }
0x1fd7   :  { %v1513_v25 = vpop.permute.xlu1 %1512 }
0x1fd8   :  { %v1515_v26 = vmul.f32 %v12087_v24, %v1513_v25 }
0x1fda   :  { %1517 = vrot.lane.b32.xlu0 %v1515_v26, %s12714_s21 }
0x204c   :  { %v1518_v29 = vpop.permute.xlu0 %1517 }
0x204d   :  { %v1520_v30 = vadd.f32 %v1518_v29, %v1510_v28 }
0x204f   :  { %12088 = vtanh.f32 %v1520_v30  ;;  %v1612_v46 = vrot.slane %v1520_v30, 6 }
0x2059   :  { %v12089_v14 = vpop.eup %12088 }
0x205a   :  { %1523 = vrot.lane.b32.xlu1 %v12089_v14, %s12713_s20 }
0x20cc   :  { %v1524_v31 = vpop.permute.xlu1 %1523 }
0x20cd   :  { %v1526_v32 = vmul.f32 %v12087_v24, %v1524_v31 }
0x20cf   :  { %v1528_v33 = vrot.slane %v1526_v32, 6  ;;  %v13010_v17 = vsel %vm1005_vm5, %v1952_v9, %v1526_v32 }
0x20d1   :  { %1529 = vrot.lane.b32.xlu0 %v1528_v33, %s12714_s21 }
0x2143   :  { %v1530_v34 = vpop.permute.xlu0 %1529 }
0x2144   :  { %10553 = vmatmul.mubr.msk.f32.vlgmr.msra.gmra.mrb[16].mxu0 %vm158_vm2, %v1530_v34 }
0x2145   :  { %11508 = vmatpush3.bf16.msra.mxu0 %v12930_v61  ;;  %10574 = vmatprep.mubr.msk.f32.mxu0 %vm12711_vm0, %v12712_v1 }
0x2146   :  { %11509 = vmatprep.subr.bf16.mxu0 %v12710_v0 }
0x2149   :  { %11511 = vmatpush3.bf16.msra.mxu0 %v12933_v63 }
0x2217   :  { %v1599_v35 = vpop.f32.mrb[16].mxu0 }
0x2218   :  { %v1603_v36 = vadd.f32 %v1599_v35, %v12959_v11  ;;  %v10554_v38 = vpop.f32.mrb[17].mxu0 }
0x221a   :  { %12090 = vtanh.f32 %v1603_v36  ;;  %v9759_v40 = vmul.f32 -1.442695, %v1603_v36 }
0x221c   :  { %12092 = vpow2.f32 %v9759_v40 }
0x2224   :  { %v12091_v39 = vpop.eup %12090 }
0x2225   :  { %1616 = vrot.lane.b32.xlu1 %v12091_v39, %s12713_s20 }
0x2226   :  { %v12093_v41 = vpop.eup %12092 }
0x2227   :  { %v1607_v42 = vadd.f32 1.0, %v12093_v41 }
0x2229   :  { %12094 = vrcp.f32 %v1607_v42 }
0x2233   :  { %v12095_v43 = vpop.eup %12094 }
0x2234   :  { %v1614_v47 = vmul.f32 %v12095_v43, %v1612_v46 }
0x2297   :  { %v1617_v44 = vpop.permute.xlu1 %1616 }
0x2298   :  { %v1619_v45 = vmul.f32 %v12095_v43, %v1617_v44 }
0x229a   :  { %1621 = vrot.lane.b32.xlu0 %v1619_v45, %s12714_s21 }
0x230c   :  { %v1622_v48 = vpop.permute.xlu0 %1621 }
0x230d   :  { %v1624_v49 = vadd.f32 %v1622_v48, %v1614_v47 }
0x230f   :  { %12096 = vtanh.f32 %v1624_v49 }
0x2319   :  { %v12097_v50 = vpop.eup %12096 }
0x231a   :  { %1627 = vrot.lane.b32.xlu1 %v12097_v50, %s12713_s20 }
0x238c   :  { %v1628_v51 = vpop.permute.xlu1 %1627 }
0x238d   :  { %v13023_v15 = vmul.f32 %v12095_v43, %v1628_v51  ;;  %v1958_v51 = vld [vmem:[#allocation2 + $0x20] sm:$0xff] }
0x238f   :  { %1632 = vrot.lane.b32.xlu0 %v13023_v15, %s12714_s21 }
0x2401   :  { %v1633_v52 = vpop.permute.xlu0 %1632 }
0x2402   :  { %10564 = vmatmul.mubr.msk.f32.vlgmr.msra.gmra.mrb[12].mxu1 %vm158_vm2, %v1633_v52  ;;  %v2056_v52 = vld [vmem:[#allocation5 + $0x40] sm:$0xff] }
0x2403   :  { %11514 = vmatpush3.bf16.msra.mxu1 %v12930_v61  ;;  %10585 = vmatprep.mubr.msk.f32.mxu1 %vm12711_vm0, %v12712_v1 }
0x2404   :  { %11515 = vmatprep.subr.bf16.mxu1 %v12710_v0 }
0x2407   :  { %11517 = vmatpush3.bf16.msra.mxu1 %v12933_v63  ;;  %v1718_v63 = vrot.slane %v1624_v49, 6 }
0x2408   :  { %11526 = vmatprep.subr.bf16.mxu1 %v12710_v0 }
0x24d5   :  { %v1702_v53 = vpop.f32.mrb[12].mxu1 }
0x24d6   :  { %v1707_v54 = vrot.slane %v1702_v53, 6  ;;  %v10565_v55 = vpop.f32.mrb[13].mxu1 }
0x24d7   :  { %v1960_v55 = vld [vmem:[#allocation2 + $0x30] sm:$0xff] }
0x24d8   :  { %v1709_v56 = vadd.f32 %v1707_v54, %v12959_v11  ;;  %v2057_v54 = vld [vmem:[#allocation5 + $0x48] sm:$0xff] }
0x24da   :  { %12098 = vtanh.f32 %v1709_v56  ;;  %v9761_v58 = vmul.f32 -1.442695, %v1709_v56  ;;  %v1961_v56 = vld [vmem:[#allocation2 + $0x38] sm:$0xff] }
0x24dc   :  { %12100 = vpow2.f32 %v9761_v58  ;;  %v11522_v58 = vpack.c.bf16 %v1961_v56, %v1960_v55 }
0x24e4   :  { %v12099_v57 = vpop.eup %12098 }
0x24e5   :  { %1722 = vrot.lane.b32.xlu1 %v12099_v57, %s12713_s20  ;;  %v13057_v57 = vpack.c.bf16 %v2057_v54, %v2056_v52 }
0x24e6   :  { %v12101_v61 = vpop.eup %12100 }
0x24e7   :  { %v1713_v59 = vadd.f32 1.0, %v12101_v61  ;;  %v2058_v61 = vld [vmem:[#allocation5 + $0x50] sm:$0xff] }
0x24e9   :  { %12102 = vrcp.f32 %v1713_v59 }
0x24f3   :  { %v12103_v60 = vpop.eup %12102 }
0x24f4   :  { %v1720_v37 = vmul.f32 %v12103_v60, %v1718_v63 }
0x2557   :  { %v1723_v62 = vpop.permute.xlu1 %1722 }
0x2558   :  { %v1725_v8 = vmul.f32 %v12103_v60, %v1723_v62 }
0x255a   :  { %1727 = vrot.lane.b32.xlu0 %v1725_v8, %s12714_s21 }
0x25cc   :  { %v1728_v2 = vpop.permute.xlu0 %1727 }
0x25cd   :  { %v1730_v3 = vadd.f32 %v1728_v2, %v1720_v37 }
0x25cf   :  { %12104 = vtanh.f32 %v1730_v3  ;;  %v1825_v25 = vrot.slane %v1730_v3, 6 }
0x25d9   :  { %v12105_v4 = vpop.eup %12104 }
0x25da   :  { %1733 = vrot.lane.b32.xlu1 %v12105_v4, %s12713_s20  ;;  %v9767_v4 = vld [vmem:[%s14123_s4 + $0x2] ss:$0 sm:$0xff] }
0x264c   :  { %v1734_v12 = vpop.permute.xlu1 %1733 }
0x264d   :  { %v1736_v5 = vmul.f32 %v12103_v60, %v1734_v12 }
0x264f   :  { %v1738_v6 = vrot.slane %v1736_v5, 2  ;;  %v1954_v31 = vsel %vm1001_vm3, %v13023_v15, %v1736_v5  ;;  %v1959_v15 = vld [vmem:[#allocation2 + $0x28] sm:$0xff] }
0x2650   :  { %v11518_v53 = vpack.c.bf16 %v1959_v15, %v1958_v51 }
0x2651   :  { %1739 = vrot.lane.b32.xlu0 %v1738_v6, %s12714_s21 }
0x2652   :  { %11519 = vmatprep.subr.bf16.mxu0 %v11518_v53 }
0x26c3   :  { %v1740_v7 = vpop.permute.xlu0 %1739 }
0x26c4   :  { %10575 = vmatmul.mubr.msk.f32.vlgmr.msra.gmra.mrb[18].mxu0 %vm158_vm2, %v1740_v7 }
0x26c5   :  { %11521 = vmatpush3.bf16.msra.mxu0 %v11518_v53 }
0x26c6   :  { %11523 = vmatprep.subr.bf16.mxu0 %v11522_v58 }
0x26c9   :  { %11525 = vmatpush3.bf16.msra.mxu0 %v11522_v58 }
0x26ca   :  { %11532 = vmatprep.subr.bf16.mxu0 %v12710_v0 }
0x2797   :  { %v1809_v9 = vpop.f32.mrb[18].mxu0 }
0x2798   :  { %v1814_v10 = vrot.slane %v1809_v9, 4  ;;  %v10576_v13 = vpop.f32.mrb[19].mxu0 }
0x279a   :  { %v1816_v16 = vadd.f32 %v1814_v10, %v12959_v11 }
0x279c   :  { %12106 = vtanh.f32 %v1816_v16  ;;  %v9763_v19 = vmul.f32 -1.442695, %v1816_v16 }
0x279e   :  { %12108 = vpow2.f32 %v9763_v19 }
0x27a6   :  { %v12107_v18 = vpop.eup %12106 }
0x27a7   :  { %1829 = vrot.lane.b32.xlu1 %v12107_v18, %s12713_s20 }
0x27a8   :  { %v12109_v20 = vpop.eup %12108 }
0x27a9   :  { %v1820_v21 = vadd.f32 1.0, %v12109_v20 }
0x27ab   :  { %12110 = vrcp.f32 %v1820_v21 }
0x27b5   :  { %v12111_v22 = vpop.eup %12110 }
0x27b6   :  { %v1827_v26 = vmul.f32 %v12111_v22, %v1825_v25 }
0x2819   :  { %v1830_v23 = vpop.permute.xlu1 %1829 }
0x281a   :  { %v1832_v24 = vmul.f32 %v12111_v22, %v1830_v23 }
0x281c   :  { %1834 = vrot.lane.b32.xlu0 %v1832_v24, %s12714_s21 }
0x288e   :  { %v1835_v27 = vpop.permute.xlu0 %1834 }
0x288f   :  { %v1837_v28 = vadd.f32 %v1835_v27, %v1827_v26 }
0x2891   :  { %12112 = vtanh.f32 %v1837_v28  ;;  %v1932_v47 = vrot.slane %v1837_v28, 6 }
0x289b   :  { %v12113_v29 = vpop.eup %12112 }
0x289c   :  { %1840 = vrot.lane.b32.xlu1 %v12113_v29, %s12713_s20 }
0x290e   :  { %v1841_v30 = vpop.permute.xlu1 %1840 }
0x290f   :  { %v1843_v14 = vmul.f32 %v12111_v22, %v1841_v30 }
0x2911   :  { %v1845_v32 = vrot.slane %v1843_v14, 4  ;;  %v1955_v33 = vsel %vm1003_vm4, %v1954_v31, %v1843_v14 }
0x2913   :  { %1846 = vrot.lane.b32.xlu0 %v1845_v32, %s12714_s21 }
0x2985   :  { %v1847_v34 = vpop.permute.xlu0 %1846 }
0x2986   :  { %10586 = vmatmul.mubr.msk.f32.vlgmr.msra.gmra.mrb[14].mxu1 %vm158_vm2, %v1847_v34 }
0x2987   :  { %10607 = vmatprep.mubr.msk.f32.mxu1 %vm12711_vm0, %v12712_v1  ;;  %11528 = vmatpush3.bf16.msra.mxu1 %v13057_v57 }
0x2988   :  { %11529 = vmatprep.subr.bf16.mxu1 %v12710_v0 }
0x2a59   :  { %v1916_v35 = vpop.f32.mrb[14].mxu1 }
0x2a5a   :  { %v1921_v36 = vrot.slane %v1916_v35, 2  ;;  %v10587_v38 = vpop.f32.mrb[15].mxu1 }
0x2a5c   :  { %v1923_v39 = vadd.f32 %v1921_v36, %v12959_v11 }
0x2a5e   :  { %12114 = vtanh.f32 %v1923_v39  ;;  %v9765_v41 = vmul.f32 -1.442695, %v1923_v39 }
0x2a60   :  { %12116 = vpow2.f32 %v9765_v41 }
0x2a68   :  { %v12115_v40 = vpop.eup %12114 }
0x2a69   :  { %1936 = vrot.lane.b32.xlu1 %v12115_v40, %s12713_s20 }
0x2a6a   :  { %v12117_v42 = vpop.eup %12116 }
0x2a6b   :  { %v1927_v43 = vadd.f32 1.0, %v12117_v42 }
0x2a6d   :  { %12118 = vrcp.f32 %v1927_v43 }
0x2a77   :  { %v12119_v44 = vpop.eup %12118 }
0x2a78   :  { %v1934_v48 = vmul.f32 %v12119_v44, %v1932_v47 }
0x2adb   :  { %v1937_v45 = vpop.permute.xlu1 %1936 }
0x2adc   :  { %v1939_v46 = vmul.f32 %v12119_v44, %v1937_v45 }
0x2ade   :  { %1941 = vrot.lane.b32.xlu0 %v1939_v46, %s12714_s21 }
0x2ae2   :  { %1972 = vrot.lane.b32.xlu0 %v13010_v17, %s12714_s21  ;;  %v2059_v17 = vld [vmem:[#allocation5 + $0x58] sm:$0xff] }
0x2ae3   :  { %v13060_v59 = vpack.c.bf16 %v2059_v17, %v2058_v61 }
0x2ae5   :  { %11531 = vmatpush3.bf16.msra.mxu1 %v13060_v59 }
0x2ae6   :  { %11538 = vmatprep.subr.bf16.mxu1 %v12710_v0 }
0x2ae8   :  { %10608 = vmatmul.mubr.f32.vlgmr.msra.gmra.mrb[16].mxu1 %v12712_v1 }
0x2ae9   :  { %11540 = vmatpush3.bf16.msra.mxu1 %v13057_v57  ;;  %10629 = vmatprep.mubr.msk.f32.mxu1 %vm12711_vm0, %v12712_v1 }
0x2aea   :  { %11541 = vmatprep.subr.bf16.mxu1 %v12710_v0 }
0x2aed   :  { %11543 = vmatpush3.bf16.msra.mxu1 %v13060_v59 }
0x2aee   :  { %11550 = vmatprep.subr.bf16.mxu1 %v12710_v0 }
0x2b50   :  { %v1942_v11 = vpop.permute.xlu0 %1941 }
0x2b51   :  { %v1944_v49 = vadd.f32 %v1942_v11, %v1934_v48 }
0x2b53   :  { %12120 = vtanh.f32 %v1944_v49 }
0x2b54   :  { %v1973_v50 = vpop.permute.xlu0 %1972 }
0x2b55   :  { %10596 = vmatprep.mubr.msk.f32.mxu0 %vm158_vm2, %v1973_v50 }
0x2b5d   :  { %v12121_v60 = vpop.eup %12120 }
0x2b5e   :  { %1947 = vrot.lane.b32.xlu1 %v12121_v60, %s12713_s20 }
0x2bbb   :  { %v2126_v2 = vpop.f32.mrb[16].mxu1 }
0x2bbc   :  { %v10609_v3 = vpop.f32.mrb[17].mxu1 }
0x2bd0   :  { %v1948_v62 = vpop.permute.xlu1 %1947 }
0x2bd1   :  { %v1950_v8 = vmul.f32 %v12119_v44, %v1948_v62 }
0x2bd3   :  { %v1956_v63 = vsel %vm1005_vm5, %v1955_v33, %v1950_v8 }
0x2bd4   :  { %1974 = vrot.lane.b32.xlu1 %v1956_v63, %s12714_s21 }
0x2c46   :  { %v1975_v37 = vpop.permute.xlu1 %1974 }
0x2c47   :  { %10597 = vmatmul.mubr.msk.f32.vlgmr.msra.gmra.mrb[20].mxu0 %vm158_vm2, %v1975_v37 }
0x2c48   :  { %11534 = vmatpush3.bf16.msra.mxu0 %v13057_v57  ;;  %10618 = vmatprep.mubr.msk.f32.mxu0 %vm12711_vm0, %v12712_v1 }
0x2c49   :  { %11535 = vmatprep.subr.bf16.mxu0 %v12710_v0 }
0x2c4c   :  { %11537 = vmatpush3.bf16.msra.mxu0 %v13060_v59 }
0x2c4d   :  { %11544 = vmatprep.subr.bf16.mxu0 %v12710_v0 }
0x2d1a   :  { %v10598_v12 = vpop.f32.mrb[20].mxu0 }
0x2d1b   :  { %v13086_v5 = vadd.f32 %v10598_v12, %v9767_v4  ;;  %v2046_v6 = vpop.f32.mrb[21].mxu0 }
0x2d1c   :  { %v13088_v7 = vadd.f32 %v9767_v4, %v2046_v6 }
0x2d1e   :  { %v2130_v9 = vadd.f32 %v2126_v2, %v13088_v7 }
0x2d20   :  { %12122 = vtanh.f32 %v2130_v9  ;;  %v9770_v13 = vmul.f32 -1.442695, %v2130_v9 }
0x2d22   :  { %12124 = vpow2.f32 %v9770_v13 }
0x2d2a   :  { %v12123_v10 = vpop.eup %12122 }
0x2d2b   :  { %2140 = vrot.lane.b32.xlu0 %v12123_v10, %s12713_s20 }
0x2d2c   :  { %v12125_v16 = vpop.eup %12124 }
0x2d2d   :  { %v2134_v18 = vadd.f32 1.0, %v12125_v16 }
0x2d2f   :  { %12126 = vrcp.f32 %v2134_v18 }
0x2d39   :  { %v12127_v19 = vpop.eup %12126 }
0x2d3a   :  { %v2138_v22 = vmul.f32 0.0, %v12127_v19 }
0x2d9d   :  { %v2141_v20 = vpop.permute.xlu0 %2140 }
0x2d9e   :  { %v2143_v21 = vmul.f32 %v12127_v19, %v2141_v20 }
0x2da0   :  { %2145 = vrot.lane.b32.xlu1 %v2143_v21, %s12714_s21 }
0x2e12   :  { %v2146_v23 = vpop.permute.xlu1 %2145 }
0x2e13   :  { %v2148_v24 = vadd.f32 %v2146_v23, %v2138_v22 }
0x2e15   :  { %12128 = vtanh.f32 %v2148_v24  ;;  %v2242_v40 = vrot.slane %v2148_v24, 6 }
0x2e1f   :  { %v12129_v25 = vpop.eup %12128 }
0x2e20   :  { %2151 = vrot.lane.b32.xlu0 %v12129_v25, %s12713_s20 }
0x2e92   :  { %v2152_v26 = vpop.permute.xlu0 %2151 }
0x2e93   :  { %v13094_v27 = vmul.f32 %v12127_v19, %v2152_v26 }
0x2e95   :  { %2156 = vrot.lane.b32.xlu1 %v13094_v27, %s12714_s21 }
0x2f07   :  { %v2157_v28 = vpop.permute.xlu1 %2156 }
0x2f08   :  { %10619 = vmatmul.mubr.msk.f32.vlgmr.msra.gmra.mrb[22].mxu0 %vm158_vm2, %v2157_v28 }
0x2f09   :  { %11546 = vmatpush3.bf16.msra.mxu0 %v13057_v57  ;;  %10640 = vmatprep.mubr.msk.f32.mxu0 %vm12711_vm0, %v12712_v1 }
0x2f0a   :  { %11547 = vmatprep.subr.bf16.mxu0 %v12710_v0 }
0x2f0d   :  { %11549 = vmatpush3.bf16.msra.mxu0 %v13060_v59 }
0x2f0e   :  { %11556 = vmatprep.subr.bf16.mxu0 %v12710_v0 }
0x2fdb   :  { %v2226_v29 = vpop.f32.mrb[22].mxu0 }
0x2fdc   :  { %v2231_v30 = vrot.slane %v2226_v29, 6  ;;  %v10620_v14 = vpop.f32.mrb[23].mxu0 }
0x2fde   :  { %v2233_v31 = vadd.f32 %v2231_v30, %v13088_v7 }
0x2fe0   :  { %12130 = vtanh.f32 %v2233_v31  ;;  %v9772_v33 = vmul.f32 -1.442695, %v2233_v31 }
0x2fe2   :  { %12132 = vpow2.f32 %v9772_v33 }
0x2fea   :  { %v12131_v32 = vpop.eup %12130 }
0x2feb   :  { %2246 = vrot.lane.b32.xlu0 %v12131_v32, %s12713_s20 }
0x2fec   :  { %v12133_v34 = vpop.eup %12132 }
0x2fed   :  { %v2237_v35 = vadd.f32 1.0, %v12133_v34 }
0x2fef   :  { %12134 = vrcp.f32 %v2237_v35 }
0x2ff9   :  { %v12135_v36 = vpop.eup %12134 }
0x2ffa   :  { %v2244_v41 = vmul.f32 %v12135_v36, %v2242_v40 }
0x305d   :  { %v2247_v38 = vpop.permute.xlu0 %2246 }
0x305e   :  { %v2249_v39 = vmul.f32 %v12135_v36, %v2247_v38 }
0x3060   :  { %2251 = vrot.lane.b32.xlu1 %v2249_v39, %s12714_s21 }
0x30d2   :  { %v2252_v42 = vpop.permute.xlu1 %2251 }
0x30d3   :  { %v2254_v43 = vadd.f32 %v2252_v42, %v2244_v41 }
0x30d5   :  { %12136 = vtanh.f32 %v2254_v43  ;;  %v2349_v61 = vrot.slane %v2254_v43, 6 }
0x30df   :  { %v12137_v44 = vpop.eup %12136 }
0x30e0   :  { %2257 = vrot.lane.b32.xlu0 %v12137_v44, %s12713_s20 }
0x3152   :  { %v2258_v45 = vpop.permute.xlu0 %2257 }
0x3153   :  { %v2260_v46 = vmul.f32 %v12135_v36, %v2258_v45 }
0x3155   :  { %v2262_v47 = vrot.slane %v2260_v46, 2  ;;  %v2899_v2 = vsel %vm1001_vm3, %v13094_v27, %v2260_v46 }
0x3157   :  { %2263 = vrot.lane.b32.xlu1 %v2262_v47, %s12714_s21 }
0x31c9   :  { %v2264_v48 = vpop.permute.xlu1 %2263 }
0x31ca   :  { %10630 = vmatmul.mubr.msk.f32.vlgmr.msra.gmra.mrb[18].mxu1 %vm158_vm2, %v2264_v48 }
0x31cb   :  { %11552 = vmatpush3.bf16.msra.mxu1 %v13057_v57  ;;  %10651 = vmatprep.mubr.msk.f32.mxu1 %vm12711_vm0, %v12712_v1 }
0x31cc   :  { %11553 = vmatprep.subr.bf16.mxu1 %v12710_v0 }
0x31cf   :  { %11555 = vmatpush3.bf16.msra.mxu1 %v13060_v59 }
0x31d0   :  { %11562 = vmatprep.subr.bf16.mxu1 %v12710_v0 }
0x329d   :  { %v2333_v11 = vpop.f32.mrb[18].mxu1 }
0x329e   :  { %v2338_v49 = vrot.slane %v2333_v11, 4  ;;  %v10631_v50 = vpop.f32.mrb[19].mxu1 }
0x32a0   :  { %v2340_v51 = vadd.f32 %v2338_v49, %v13088_v7 }
0x32a2   :  { %12138 = vtanh.f32 %v2340_v51  ;;  %v9774_v52 = vmul.f32 -1.442695, %v2340_v51 }
0x32a4   :  { %12140 = vpow2.f32 %v9774_v52 }
0x32ac   :  { %v12139_v15 = vpop.eup %12138 }
0x32ad   :  { %2353 = vrot.lane.b32.xlu0 %v12139_v15, %s12713_s20 }
0x32ae   :  { %v12141_v53 = vpop.eup %12140 }
0x32af   :  { %v2344_v54 = vadd.f32 1.0, %v12141_v53 }
0x32b1   :  { %12142 = vrcp.f32 %v2344_v54 }
0x32bb   :  { %v12143_v55 = vpop.eup %12142 }
0x32bc   :  { %v2351_v17 = vmul.f32 %v12143_v55, %v2349_v61 }
0x331f   :  { %v2354_v56 = vpop.permute.xlu0 %2353 }
0x3320   :  { %v2356_v58 = vmul.f32 %v12143_v55, %v2354_v56 }
0x3322   :  { %2358 = vrot.lane.b32.xlu1 %v2356_v58, %s12714_s21 }
0x3394   :  { %v2359_v60 = vpop.permute.xlu1 %2358 }
0x3395   :  { %v2361_v62 = vadd.f32 %v2359_v60, %v2351_v17 }
0x3397   :  { %12144 = vtanh.f32 %v2361_v62  ;;  %v2456_v24 = vrot.slane %v2361_v62, 6 }
0x33a1   :  { %v12145_v8 = vpop.eup %12144 }
0x33a2   :  { %2364 = vrot.lane.b32.xlu0 %v12145_v8, %s12713_s20 }
0x3414   :  { %v2365_v63 = vpop.permute.xlu0 %2364 }
0x3415   :  { %v2367_v37 = vmul.f32 %v12143_v55, %v2365_v63 }
0x3417   :  { %v2369_v3 = vrot.slane %v2367_v37, 4  ;;  %v2900_v4 = vsel %vm1003_vm4, %v2899_v2, %v2367_v37 }
0x3419   :  { %2370 = vrot.lane.b32.xlu1 %v2369_v3, %s12714_s21 }
0x348b   :  { %v2371_v12 = vpop.permute.xlu1 %2370 }
0x348c   :  { %10641 = vmatmul.mubr.msk.f32.vlgmr.msra.gmra.mrb[24].mxu0 %vm158_vm2, %v2371_v12 }
0x348d   :  { %11558 = vmatpush3.bf16.msra.mxu0 %v13057_v57  ;;  %10662 = vmatprep.mubr.msk.f32.mxu0 %vm12711_vm0, %v12712_v1 }
0x348e   :  { %11559 = vmatprep.subr.bf16.mxu0 %v12710_v0 }
0x3491   :  { %11561 = vmatpush3.bf16.msra.mxu0 %v13060_v59 }
0x3492   :  { %11568 = vmatprep.subr.bf16.mxu0 %v12710_v0 }
0x355f   :  { %v2440_v6 = vpop.f32.mrb[24].mxu0 }
0x3560   :  { %v2445_v9 = vrot.slane %v2440_v6, 2  ;;  %v10642_v10 = vpop.f32.mrb[25].mxu0 }
0x3562   :  { %v2447_v13 = vadd.f32 %v2445_v9, %v13088_v7 }
0x3564   :  { %12146 = vtanh.f32 %v2447_v13  ;;  %v9776_v18 = vmul.f32 -1.442695, %v2447_v13 }
0x3566   :  { %12148 = vpow2.f32 %v9776_v18 }
0x356e   :  { %v12147_v16 = vpop.eup %12146 }
0x356f   :  { %2460 = vrot.lane.b32.xlu0 %v12147_v16, %s12713_s20 }
0x3570   :  { %v12149_v19 = vpop.eup %12148 }
0x3571   :  { %v2451_v20 = vadd.f32 1.0, %v12149_v19 }
0x3573   :  { %12150 = vrcp.f32 %v2451_v20 }
0x357d   :  { %v12151_v21 = vpop.eup %12150 }
0x357e   :  { %v2458_v25 = vmul.f32 %v12151_v21, %v2456_v24 }
0x35e1   :  { %v2461_v22 = vpop.permute.xlu0 %2460 }
0x35e2   :  { %v2463_v23 = vmul.f32 %v12151_v21, %v2461_v22 }
0x35e4   :  { %2465 = vrot.lane.b32.xlu1 %v2463_v23, %s12714_s21 }
0x3656   :  { %v2466_v26 = vpop.permute.xlu1 %2465 }
0x3657   :  { %v2468_v27 = vadd.f32 %v2466_v26, %v2458_v25 }
0x3659   :  { %12152 = vtanh.f32 %v2468_v27  ;;  %v2560_v43 = vrot.slane %v2468_v27, 6 }
0x3663   :  { %v12153_v7 = vpop.eup %12152 }
0x3664   :  { %2471 = vrot.lane.b32.xlu0 %v12153_v7, %s12713_s20 }
0x36d6   :  { %v2472_v28 = vpop.permute.xlu0 %2471 }
0x36d7   :  { %v2474_v29 = vmul.f32 %v12151_v21, %v2472_v28 }
0x36d9   :  { %v2476_v30 = vrot.slane %v2474_v29, 6  ;;  %v13137_v14 = vsel %vm1005_vm5, %v2900_v4, %v2474_v29 }
0x36db   :  { %2477 = vrot.lane.b32.xlu1 %v2476_v30, %s12714_s21 }
0x374d   :  { %v2478_v31 = vpop.permute.xlu1 %2477 }
0x374e   :  { %10652 = vmatmul.mubr.msk.f32.vlgmr.msra.gmra.mrb[20].mxu1 %vm158_vm2, %v2478_v31 }
0x374f   :  { %11564 = vmatpush3.bf16.msra.mxu1 %v13057_v57  ;;  %10673 = vmatprep.mubr.msk.f32.mxu1 %vm12711_vm0, %v12712_v1 }
0x3750   :  { %11565 = vmatprep.subr.bf16.mxu1 %v12710_v0 }
0x3753   :  { %11567 = vmatpush3.bf16.msra.mxu1 %v13060_v59 }
0x3821   :  { %v2547_v32 = vpop.f32.mrb[20].mxu1 }
0x3822   :  { %v2551_v33 = vadd.f32 %v2547_v32, %v13086_v5  ;;  %v10653_v34 = vpop.f32.mrb[21].mxu1 }
0x3824   :  { %12154 = vtanh.f32 %v2551_v33  ;;  %v9778_v36 = vmul.f32 -1.442695, %v2551_v33 }
0x3826   :  { %12156 = vpow2.f32 %v9778_v36 }
0x382e   :  { %v12155_v35 = vpop.eup %12154 }
0x382f   :  { %2564 = vrot.lane.b32.xlu0 %v12155_v35, %s12713_s20 }
0x3830   :  { %v12157_v38 = vpop.eup %12156 }
0x3831   :  { %v2555_v39 = vadd.f32 1.0, %v12157_v38 }
0x3833   :  { %12158 = vrcp.f32 %v2555_v39 }
0x383d   :  { %v12159_v40 = vpop.eup %12158 }
0x383e   :  { %v2562_v44 = vmul.f32 %v12159_v40, %v2560_v43 }
0x38a1   :  { %v2565_v41 = vpop.permute.xlu0 %2564 }
0x38a2   :  { %v2567_v42 = vmul.f32 %v12159_v40, %v2565_v41 }
0x38a4   :  { %2569 = vrot.lane.b32.xlu1 %v2567_v42, %s12714_s21 }
0x3916   :  { %v2570_v45 = vpop.permute.xlu1 %2569 }
0x3917   :  { %v2572_v46 = vadd.f32 %v2570_v45, %v2562_v44 }
0x3919   :  { %12160 = vtanh.f32 %v2572_v46 }
0x3923   :  { %v12161_v47 = vpop.eup %12160 }
0x3924   :  { %2575 = vrot.lane.b32.xlu0 %v12161_v47, %s12713_s20 }
0x3996   :  { %v2576_v48 = vpop.permute.xlu0 %2575 }
0x3997   :  { %v13150_v11 = vmul.f32 %v12159_v40, %v2576_v48  ;;  %v2906_v48 = vld [vmem:[#allocation2 + $0x40] sm:$0xff] }
0x3999   :  { %2580 = vrot.lane.b32.xlu1 %v13150_v11, %s12714_s21 }
0x3a0b   :  { %v2581_v49 = vpop.permute.xlu1 %2580 }
0x3a0c   :  { %10663 = vmatmul.mubr.msk.f32.vlgmr.msra.gmra.mrb[26].mxu0 %vm158_vm2, %v2581_v49  ;;  %v3004_v49 = vld [vmem:[#allocation5 + $0x60] sm:$0xff] }
0x3a0d   :  { %11570 = vmatpush3.bf16.msra.mxu0 %v13057_v57  ;;  %10684 = vmatprep.mubr.msk.f32.mxu0 %vm12711_vm0, %v12712_v1 }
0x3a0e   :  { %11571 = vmatprep.subr.bf16.mxu0 %v12710_v0 }
0x3a11   :  { %11573 = vmatpush3.bf16.msra.mxu0 %v13060_v59  ;;  %v2666_v59 = vrot.slane %v2572_v46, 6 }
0x3a12   :  { %11582 = vmatprep.subr.bf16.mxu0 %v12710_v0 }
0x3adf   :  { %v2650_v50 = vpop.f32.mrb[26].mxu0 }
0x3ae0   :  { %v2655_v51 = vrot.slane %v2650_v50, 6  ;;  %v10664_v15 = vpop.f32.mrb[27].mxu0 }
0x3ae1   :  { %v2908_v15 = vld [vmem:[#allocation2 + $0x50] sm:$0xff] }
0x3ae2   :  { %v2657_v52 = vadd.f32 %v2655_v51, %v13086_v5  ;;  %v3005_v51 = vld [vmem:[#allocation5 + $0x68] sm:$0xff] }
0x3ae4   :  { %12162 = vtanh.f32 %v2657_v52  ;;  %v9780_v54 = vmul.f32 -1.442695, %v2657_v52  ;;  %v2909_v52 = vld [vmem:[#allocation2 + $0x58] sm:$0xff] }
0x3ae6   :  { %12164 = vpow2.f32 %v9780_v54  ;;  %v11578_v54 = vpack.c.bf16 %v2909_v52, %v2908_v15 }
0x3aee   :  { %v12163_v53 = vpop.eup %12162 }
0x3aef   :  { %2670 = vrot.lane.b32.xlu0 %v12163_v53, %s12713_s20  ;;  %v13184_v53 = vpack.c.bf16 %v3005_v51, %v3004_v49 }
0x3af0   :  { %v12165_v57 = vpop.eup %12164 }
0x3af1   :  { %v2661_v55 = vadd.f32 1.0, %v12165_v57  ;;  %v3006_v57 = vld [vmem:[#allocation5 + $0x70] sm:$0xff] }
0x3af3   :  { %12166 = vrcp.f32 %v2661_v55 }
0x3afd   :  { %v12167_v56 = vpop.eup %12166 }
0x3afe   :  { %v2668_v17 = vmul.f32 %v12167_v56, %v2666_v59 }
0x3b61   :  { %v2671_v58 = vpop.permute.xlu0 %2670 }
0x3b62   :  { %v2673_v61 = vmul.f32 %v12167_v56, %v2671_v58 }
0x3b64   :  { %2675 = vrot.lane.b32.xlu1 %v2673_v61, %s12714_s21 }
0x3bd6   :  { %v2676_v60 = vpop.permute.xlu1 %2675 }
0x3bd7   :  { %v2678_v62 = vadd.f32 %v2676_v60, %v2668_v17 }
0x3bd9   :  { %12168 = vtanh.f32 %v2678_v62  ;;  %v2773_v22 = vrot.slane %v2678_v62, 6 }
0x3be3   :  { %v12169_v8 = vpop.eup %12168 }
0x3be4   :  { %2681 = vrot.lane.b32.xlu0 %v12169_v8, %s12713_s20  ;;  %v9786_v8 = vld [vmem:[%s14123_s4 + $0x3] ss:$0 sm:$0xff] }
0x3c56   :  { %v2682_v63 = vpop.permute.xlu0 %2681 }
0x3c57   :  { %v2684_v37 = vmul.f32 %v12167_v56, %v2682_v63 }
0x3c59   :  { %v2686_v2 = vrot.slane %v2684_v37, 2  ;;  %v2902_v28 = vsel %vm1001_vm3, %v13150_v11, %v2684_v37  ;;  %v2907_v11 = vld [vmem:[#allocation2 + $0x48] sm:$0xff] }
0x3c5a   :  { %v11574_v50 = vpack.c.bf16 %v2907_v11, %v2906_v48 }
0x3c5b   :  { %2687 = vrot.lane.b32.xlu1 %v2686_v2, %s12714_s21 }
0x3c5c   :  { %11575 = vmatprep.subr.bf16.mxu1 %v11574_v50 }
0x3ccd   :  { %v2688_v3 = vpop.permute.xlu1 %2687 }
0x3cce   :  { %10674 = vmatmul.mubr.msk.f32.vlgmr.msra.gmra.mrb[22].mxu1 %vm158_vm2, %v2688_v3 }
0x3ccf   :  { %11577 = vmatpush3.bf16.msra.mxu1 %v11574_v50 }
0x3cd0   :  { %11579 = vmatprep.subr.bf16.mxu1 %v11578_v54 }
0x3cd3   :  { %11581 = vmatpush3.bf16.msra.mxu1 %v11578_v54 }
0x3cd4   :  { %11588 = vmatprep.subr.bf16.mxu1 %v12710_v0 }
0x3da1   :  { %v2757_v4 = vpop.f32.mrb[22].mxu1 }
0x3da2   :  { %v2762_v12 = vrot.slane %v2757_v4, 4  ;;  %v10675_v6 = vpop.f32.mrb[23].mxu1 }
0x3da4   :  { %v2764_v9 = vadd.f32 %v2762_v12, %v13086_v5 }
0x3da6   :  { %12170 = vtanh.f32 %v2764_v9  ;;  %v9782_v13 = vmul.f32 -1.442695, %v2764_v9 }
0x3da8   :  { %12172 = vpow2.f32 %v9782_v13 }
0x3db0   :  { %v12171_v10 = vpop.eup %12170 }
0x3db1   :  { %2777 = vrot.lane.b32.xlu0 %v12171_v10, %s12713_s20 }
0x3db2   :  { %v12173_v16 = vpop.eup %12172 }
0x3db3   :  { %v2768_v18 = vadd.f32 1.0, %v12173_v16 }
0x3db5   :  { %12174 = vrcp.f32 %v2768_v18 }
0x3dbf   :  { %v12175_v19 = vpop.eup %12174 }
0x3dc0   :  { %v2775_v23 = vmul.f32 %v12175_v19, %v2773_v22 }
0x3e23   :  { %v2778_v20 = vpop.permute.xlu0 %2777 }
0x3e24   :  { %v2780_v21 = vmul.f32 %v12175_v19, %v2778_v20 }
0x3e26   :  { %2782 = vrot.lane.b32.xlu1 %v2780_v21, %s12714_s21 }
0x3e98   :  { %v2783_v24 = vpop.permute.xlu1 %2782 }
0x3e99   :  { %v2785_v25 = vadd.f32 %v2783_v24, %v2775_v23 }
0x3e9b   :  { %12176 = vtanh.f32 %v2785_v25  ;;  %v2880_v44 = vrot.slane %v2785_v25, 6 }
0x3ea5   :  { %v12177_v26 = vpop.eup %12176 }
0x3ea6   :  { %2788 = vrot.lane.b32.xlu0 %v12177_v26, %s12713_s20 }
0x3f18   :  { %v2789_v27 = vpop.permute.xlu0 %2788 }
0x3f19   :  { %v2791_v7 = vmul.f32 %v12175_v19, %v2789_v27 }
0x3f1b   :  { %v2793_v29 = vrot.slane %v2791_v7, 4  ;;  %v2903_v30 = vsel %vm1003_vm4, %v2902_v28, %v2791_v7 }
0x3f1d   :  { %2794 = vrot.lane.b32.xlu1 %v2793_v29, %s12714_s21 }
0x3f8f   :  { %v2795_v31 = vpop.permute.xlu1 %2794 }
0x3f90   :  { %10685 = vmatmul.mubr.msk.f32.vlgmr.msra.gmra.mrb[28].mxu0 %vm158_vm2, %v2795_v31 }
0x3f91   :  { %10706 = vmatprep.mubr.msk.f32.mxu0 %vm12711_vm0, %v12712_v1  ;;  %11584 = vmatpush3.bf16.msra.mxu0 %v13184_v53 }
0x3f92   :  { %11585 = vmatprep.subr.bf16.mxu0 %v12710_v0 }
0x4063   :  { %v2864_v32 = vpop.f32.mrb[28].mxu0 }
0x4064   :  { %v2869_v33 = vrot.slane %v2864_v32, 2  ;;  %v10686_v34 = vpop.f32.mrb[29].mxu0 }
0x4066   :  { %v2871_v35 = vadd.f32 %v2869_v33, %v13086_v5 }
0x4068   :  { %12178 = vtanh.f32 %v2871_v35  ;;  %v9784_v38 = vmul.f32 -1.442695, %v2871_v35 }
0x406a   :  { %12180 = vpow2.f32 %v9784_v38 }
0x4072   :  { %v12179_v36 = vpop.eup %12178 }
0x4073   :  { %2884 = vrot.lane.b32.xlu0 %v12179_v36, %s12713_s20 }
0x4074   :  { %v12181_v39 = vpop.eup %12180 }
0x4075   :  { %v2875_v40 = vadd.f32 1.0, %v12181_v39 }
0x4077   :  { %12182 = vrcp.f32 %v2875_v40 }
0x4081   :  { %v12183_v41 = vpop.eup %12182 }
0x4082   :  { %v2882_v45 = vmul.f32 %v12183_v41, %v2880_v44 }
0x40e5   :  { %v2885_v42 = vpop.permute.xlu0 %2884 }
0x40e6   :  { %v2887_v43 = vmul.f32 %v12183_v41, %v2885_v42 }
0x40e8   :  { %2889 = vrot.lane.b32.xlu1 %v2887_v43, %s12714_s21 }
0x40ec   :  { %2920 = vrot.lane.b32.xlu1 %v13137_v14, %s12714_s21  ;;  %v3007_v14 = vld [vmem:[#allocation5 + $0x78] sm:$0xff] }
0x40ed   :  { %v13187_v55 = vpack.c.bf16 %v3007_v14, %v3006_v57 }
0x40ef   :  { %11587 = vmatpush3.bf16.msra.mxu0 %v13187_v55 }
0x40f0   :  { %11594 = vmatprep.subr.bf16.mxu0 %v12710_v0 }
0x40f2   :  { %10707 = vmatmul.mubr.f32.vlgmr.msra.gmra.mrb[30].mxu0 %v12712_v1 }
0x40f3   :  { %11596 = vmatpush3.bf16.msra.mxu0 %v13184_v53  ;;  %10728 = vmatprep.mubr.msk.f32.mxu0 %vm12711_vm0, %v12712_v1 }
0x40f4   :  { %11597 = vmatprep.subr.bf16.mxu0 %v12710_v0 }
0x40f7   :  { %11599 = vmatpush3.bf16.msra.mxu0 %v13187_v55 }
0x40f8   :  { %11606 = vmatprep.subr.bf16.mxu0 %v12710_v0 }
0x415a   :  { %v2890_v5 = vpop.permute.xlu1 %2889 }
0x415b   :  { %v2892_v46 = vadd.f32 %v2890_v5, %v2882_v45 }
0x415d   :  { %12184 = vtanh.f32 %v2892_v46 }
0x415e   :  { %v2921_v47 = vpop.permute.xlu1 %2920 }
0x415f   :  { %10695 = vmatprep.mubr.msk.f32.mxu1 %vm158_vm2, %v2921_v47 }
0x4167   :  { %v12185_v56 = vpop.eup %12184 }
0x4168   :  { %2895 = vrot.lane.b32.xlu0 %v12185_v56, %s12713_s20 }
0x41c5   :  { %v3074_v60 = vpop.f32.mrb[30].mxu0 }
0x41c6   :  { %v10708_v62 = vpop.f32.mrb[31].mxu0 }
0x41da   :  { %v2896_v58 = vpop.permute.xlu0 %2895 }
0x41db   :  { %v2898_v61 = vmul.f32 %v12183_v41, %v2896_v58 }
0x41dd   :  { %v2904_v59 = vsel %vm1005_vm5, %v2903_v30, %v2898_v61 }
0x41de   :  { %2922 = vrot.lane.b32.xlu0 %v2904_v59, %s12714_s21 }
0x4250   :  { %v2923_v17 = vpop.permute.xlu0 %2922 }
0x4251   :  { %10696 = vmatmul.mubr.msk.f32.vlgmr.msra.gmra.mrb[24].mxu1 %vm158_vm2, %v2923_v17 }
0x4252   :  { %11590 = vmatpush3.bf16.msra.mxu1 %v13184_v53  ;;  %10717 = vmatprep.mubr.msk.f32.mxu1 %vm12711_vm0, %v12712_v1 }
0x4253   :  { %11591 = vmatprep.subr.bf16.mxu1 %v12710_v0 }
0x4256   :  { %11593 = vmatpush3.bf16.msra.mxu1 %v13187_v55 }
0x4257   :  { %11600 = vmatprep.subr.bf16.mxu1 %v12710_v0 }
0x4324   :  { %v10697_v63 = vpop.f32.mrb[24].mxu1 }
0x4325   :  { %v13213_v37 = vadd.f32 %v10697_v63, %v9786_v8  ;;  %v2994_v2 = vpop.f32.mrb[25].mxu1 }
0x4326   :  { %v13215_v3 = vadd.f32 %v9786_v8, %v2994_v2 }
0x4328   :  { %v3078_v4 = vadd.f32 %v3074_v60, %v13215_v3 }
0x432a   :  { %12186 = vtanh.f32 %v3078_v4  ;;  %v9789_v6 = vmul.f32 -1.442695, %v3078_v4 }
0x432c   :  { %12188 = vpow2.f32 %v9789_v6 }
0x4334   :  { %v12187_v12 = vpop.eup %12186 }
0x4335   :  { %3088 = vrot.lane.b32.xlu1 %v12187_v12, %s12713_s20 }
0x4336   :  { %v12189_v9 = vpop.eup %12188 }
0x4337   :  { %v3082_v10 = vadd.f32 1.0, %v12189_v9 }
0x4339   :  { %12190 = vrcp.f32 %v3082_v10 }
0x4343   :  { %v12191_v13 = vpop.eup %12190 }
0x4344   :  { %v3086_v19 = vmul.f32 0.0, %v12191_v13 }
0x43a7   :  { %v3089_v16 = vpop.permute.xlu1 %3088 }
0x43a8   :  { %v3091_v18 = vmul.f32 %v12191_v13, %v3089_v16 }
0x43aa   :  { %3093 = vrot.lane.b32.xlu0 %v3091_v18, %s12714_s21 }
0x441c   :  { %v3094_v20 = vpop.permute.xlu0 %3093 }
0x441d   :  { %v3096_v21 = vadd.f32 %v3094_v20, %v3086_v19 }
0x441f   :  { %12192 = vtanh.f32 %v3096_v21  ;;  %v3190_v36 = vrot.slane %v3096_v21, 6 }
0x4429   :  { %v12193_v22 = vpop.eup %12192 }
0x442a   :  { %3099 = vrot.lane.b32.xlu1 %v12193_v22, %s12713_s20 }
0x449c   :  { %v3100_v23 = vpop.permute.xlu1 %3099 }
0x449d   :  { %v13221_v24 = vmul.f32 %v12191_v13, %v3100_v23 }
0x449f   :  { %3104 = vrot.lane.b32.xlu0 %v13221_v24, %s12714_s21 }
0x4511   :  { %v3105_v25 = vpop.permute.xlu0 %3104 }
0x4512   :  { %10718 = vmatmul.mubr.msk.f32.vlgmr.msra.gmra.mrb[26].mxu1 %vm158_vm2, %v3105_v25 }
0x4513   :  { %11602 = vmatpush3.bf16.msra.mxu1 %v13184_v53  ;;  %10739 = vmatprep.mubr.msk.f32.mxu1 %vm12711_vm0, %v12712_v1 }
0x4514   :  { %11603 = vmatprep.subr.bf16.mxu1 %v12710_v0 }
0x4517   :  { %11605 = vmatpush3.bf16.msra.mxu1 %v13187_v55 }
0x4518   :  { %11612 = vmatprep.subr.bf16.mxu1 %v12710_v0 }
0x45e5   :  { %v3174_v26 = vpop.f32.mrb[26].mxu1 }
0x45e6   :  { %v3179_v27 = vrot.slane %v3174_v26, 6  ;;  %v10719_v7 = vpop.f32.mrb[27].mxu1 }
0x45e8   :  { %v3181_v28 = vadd.f32 %v3179_v27, %v13215_v3 }
0x45ea   :  { %12194 = vtanh.f32 %v3181_v28  ;;  %v9791_v30 = vmul.f32 -1.442695, %v3181_v28 }
0x45ec   :  { %12196 = vpow2.f32 %v9791_v30 }
0x45f4   :  { %v12195_v29 = vpop.eup %12194 }
0x45f5   :  { %3194 = vrot.lane.b32.xlu1 %v12195_v29, %s12713_s20 }
0x45f6   :  { %v12197_v31 = vpop.eup %12196 }
0x45f7   :  { %v3185_v32 = vadd.f32 1.0, %v12197_v31 }
0x45f9   :  { %12198 = vrcp.f32 %v3185_v32 }
0x4603   :  { %v12199_v33 = vpop.eup %12198 }
0x4604   :  { %v3192_v38 = vmul.f32 %v12199_v33, %v3190_v36 }
0x4667   :  { %v3195_v34 = vpop.permute.xlu1 %3194 }
0x4668   :  { %v3197_v35 = vmul.f32 %v12199_v33, %v3195_v34 }
0x466a   :  { %3199 = vrot.lane.b32.xlu0 %v3197_v35, %s12714_s21 }
0x46dc   :  { %v3200_v39 = vpop.permute.xlu0 %3199 }
0x46dd   :  { %v3202_v40 = vadd.f32 %v3200_v39, %v3192_v38 }
0x46df   :  { %12200 = vtanh.f32 %v3202_v40  ;;  %v3297_v57 = vrot.slane %v3202_v40, 6 }
0x46e9   :  { %v12201_v41 = vpop.eup %12200 }
0x46ea   :  { %3205 = vrot.lane.b32.xlu1 %v12201_v41, %s12713_s20 }
0x475c   :  { %v3206_v42 = vpop.permute.xlu1 %3205 }
0x475d   :  { %v3208_v43 = vmul.f32 %v12199_v33, %v3206_v42 }
0x475f   :  { %v3210_v44 = vrot.slane %v3208_v43, 2  ;;  %v3847_v60 = vsel %vm1001_vm3, %v13221_v24, %v3208_v43 }
0x4761   :  { %3211 = vrot.lane.b32.xlu0 %v3210_v44, %s12714_s21 }
0x47d3   :  { %v3212_v45 = vpop.permute.xlu0 %3211 }
0x47d4   :  { %10729 = vmatmul.mubr.msk.f32.vlgmr.msra.gmra.mrb[32].mxu0 %vm158_vm2, %v3212_v45 }
0x47d5   :  { %11608 = vmatpush3.bf16.msra.mxu0 %v13184_v53  ;;  %10750 = vmatprep.mubr.msk.f32.mxu0 %vm12711_vm0, %v12712_v1 }
0x47d6   :  { %11609 = vmatprep.subr.bf16.mxu0 %v12710_v0 }
0x47d9   :  { %11611 = vmatpush3.bf16.msra.mxu0 %v13187_v55 }
0x47da   :  { %11618 = vmatprep.subr.bf16.mxu0 %v12710_v0 }
0x48a7   :  { %v3281_v5 = vpop.f32.mrb[32].mxu0 }
0x48a8   :  { %v3286_v46 = vrot.slane %v3281_v5, 4  ;;  %v10730_v47 = vpop.f32.mrb[33].mxu0 }
0x48aa   :  { %v3288_v48 = vadd.f32 %v3286_v46, %v13215_v3 }
0x48ac   :  { %12202 = vtanh.f32 %v3288_v48  ;;  %v9793_v49 = vmul.f32 -1.442695, %v3288_v48 }
0x48ae   :  { %12204 = vpow2.f32 %v9793_v49 }
0x48b6   :  { %v12203_v11 = vpop.eup %12202 }
0x48b7   :  { %3301 = vrot.lane.b32.xlu1 %v12203_v11, %s12713_s20 }
0x48b8   :  { %v12205_v50 = vpop.eup %12204 }
0x48b9   :  { %v3292_v51 = vadd.f32 1.0, %v12205_v50 }
0x48bb   :  { %12206 = vrcp.f32 %v3292_v51 }
0x48c5   :  { %v12207_v15 = vpop.eup %12206 }
0x48c6   :  { %v3299_v14 = vmul.f32 %v12207_v15, %v3297_v57 }
0x4929   :  { %v3302_v52 = vpop.permute.xlu1 %3301 }
0x492a   :  { %v3304_v54 = vmul.f32 %v12207_v15, %v3302_v52 }
0x492c   :  { %3306 = vrot.lane.b32.xlu0 %v3304_v54, %s12714_s21 }
0x499e   :  { %v3307_v56 = vpop.permute.xlu0 %3306 }
0x499f   :  { %v3309_v58 = vadd.f32 %v3307_v56, %v3299_v14 }
0x49a1   :  { %12208 = vtanh.f32 %v3309_v58  ;;  %v3404_v21 = vrot.slane %v3309_v58, 6 }
0x49ab   :  { %v12209_v61 = vpop.eup %12208 }
0x49ac   :  { %3312 = vrot.lane.b32.xlu1 %v12209_v61, %s12713_s20 }
0x4a1e   :  { %v3313_v59 = vpop.permute.xlu1 %3312 }
0x4a1f   :  { %v3315_v17 = vmul.f32 %v12207_v15, %v3313_v59 }
0x4a21   :  { %v3317_v62 = vrot.slane %v3315_v17, 4  ;;  %v3848_v8 = vsel %vm1003_vm4, %v3847_v60, %v3315_v17 }
0x4a23   :  { %3318 = vrot.lane.b32.xlu0 %v3317_v62, %s12714_s21 }
0x4a95   :  { %v3319_v63 = vpop.permute.xlu0 %3318 }
0x4a96   :  { %10740 = vmatmul.mubr.msk.f32.vlgmr.msra.gmra.mrb[28].mxu1 %vm158_vm2, %v3319_v63 }
0x4a97   :  { %11614 = vmatpush3.bf16.msra.mxu1 %v13184_v53  ;;  %10761 = vmatprep.mubr.msk.f32.mxu1 %vm12711_vm0, %v12712_v1 }
0x4a98   :  { %11615 = vmatprep.subr.bf16.mxu1 %v12710_v0 }
0x4a9b   :  { %11617 = vmatpush3.bf16.msra.mxu1 %v13187_v55 }
0x4a9c   :  { %11624 = vmatprep.subr.bf16.mxu1 %v12710_v0 }
0x4b69   :  { %v3388_v2 = vpop.f32.mrb[28].mxu1 }
0x4b6a   :  { %v3393_v4 = vrot.slane %v3388_v2, 2  ;;  %v10741_v12 = vpop.f32.mrb[29].mxu1 }
0x4b6c   :  { %v3395_v6 = vadd.f32 %v3393_v4, %v13215_v3 }
0x4b6e   :  { %12210 = vtanh.f32 %v3395_v6  ;;  %v9795_v10 = vmul.f32 -1.442695, %v3395_v6 }
0x4b70   :  { %12212 = vpow2.f32 %v9795_v10 }
0x4b78   :  { %v12211_v9 = vpop.eup %12210 }
0x4b79   :  { %3408 = vrot.lane.b32.xlu1 %v12211_v9, %s12713_s20 }
0x4b7a   :  { %v12213_v13 = vpop.eup %12212 }
0x4b7b   :  { %v3399_v16 = vadd.f32 1.0, %v12213_v13 }
0x4b7d   :  { %12214 = vrcp.f32 %v3399_v16 }
0x4b87   :  { %v12215_v18 = vpop.eup %12214 }
0x4b88   :  { %v3406_v22 = vmul.f32 %v12215_v18, %v3404_v21 }
0x4beb   :  { %v3409_v19 = vpop.permute.xlu1 %3408 }
0x4bec   :  { %v3411_v20 = vmul.f32 %v12215_v18, %v3409_v19 }
0x4bee   :  { %3413 = vrot.lane.b32.xlu0 %v3411_v20, %s12714_s21 }
0x4c60   :  { %v3414_v23 = vpop.permute.xlu0 %3413 }
0x4c61   :  { %v3416_v24 = vadd.f32 %v3414_v23, %v3406_v22 }
0x4c63   :  { %12216 = vtanh.f32 %v3416_v24  ;;  %v3508_v40 = vrot.slane %v3416_v24, 6 }
0x4c6d   :  { %v12217_v3 = vpop.eup %12216 }
0x4c6e   :  { %3419 = vrot.lane.b32.xlu1 %v12217_v3, %s12713_s20 }
0x4ce0   :  { %v3420_v25 = vpop.permute.xlu1 %3419 }
0x4ce1   :  { %v3422_v26 = vmul.f32 %v12215_v18, %v3420_v25 }
0x4ce3   :  { %v3424_v27 = vrot.slane %v3422_v26, 6  ;;  %v13264_v7 = vsel %vm1005_vm5, %v3848_v8, %v3422_v26 }
0x4ce5   :  { %3425 = vrot.lane.b32.xlu0 %v3424_v27, %s12714_s21 }
0x4d57   :  { %v3426_v28 = vpop.permute.xlu0 %3425 }
0x4d58   :  { %10751 = vmatmul.mubr.msk.f32.vlgmr.msra.gmra.mrb[34].mxu0 %vm158_vm2, %v3426_v28 }
0x4d59   :  { %11620 = vmatpush3.bf16.msra.mxu0 %v13184_v53  ;;  %10772 = vmatprep.mubr.msk.f32.mxu0 %vm12711_vm0, %v12712_v1 }
0x4d5a   :  { %11621 = vmatprep.subr.bf16.mxu0 %v12710_v0 }
0x4d5d   :  { %11623 = vmatpush3.bf16.msra.mxu0 %v13187_v55 }
0x4e2b   :  { %v3495_v29 = vpop.f32.mrb[34].mxu0 }
0x4e2c   :  { %v3499_v30 = vadd.f32 %v3495_v29, %v13213_v37  ;;  %v10752_v31 = vpop.f32.mrb[35].mxu0 }
0x4e2e   :  { %12218 = vtanh.f32 %v3499_v30  ;;  %v9797_v33 = vmul.f32 -1.442695, %v3499_v30 }
0x4e30   :  { %12220 = vpow2.f32 %v9797_v33 }
0x4e38   :  { %v12219_v32 = vpop.eup %12218 }
0x4e39   :  { %3512 = vrot.lane.b32.xlu1 %v12219_v32, %s12713_s20 }
0x4e3a   :  { %v12221_v34 = vpop.eup %12220 }
0x4e3b   :  { %v3503_v35 = vadd.f32 1.0, %v12221_v34 }
0x4e3d   :  { %12222 = vrcp.f32 %v3503_v35 }
0x4e47   :  { %v12223_v36 = vpop.eup %12222 }
0x4e48   :  { %v3510_v41 = vmul.f32 %v12223_v36, %v3508_v40 }
0x4eab   :  { %v3513_v38 = vpop.permute.xlu1 %3512 }
0x4eac   :  { %v3515_v39 = vmul.f32 %v12223_v36, %v3513_v38 }
0x4eae   :  { %3517 = vrot.lane.b32.xlu0 %v3515_v39, %s12714_s21 }
0x4f20   :  { %v3518_v42 = vpop.permute.xlu0 %3517 }
0x4f21   :  { %v3520_v43 = vadd.f32 %v3518_v42, %v3510_v41 }
0x4f23   :  { %12224 = vtanh.f32 %v3520_v43 }
0x4f2d   :  { %v12225_v44 = vpop.eup %12224 }
0x4f2e   :  { %3523 = vrot.lane.b32.xlu1 %v12225_v44, %s12713_s20 }
0x4fa0   :  { %v3524_v45 = vpop.permute.xlu1 %3523 }
0x4fa1   :  { %v13277_v5 = vmul.f32 %v12223_v36, %v3524_v45  ;;  %v3854_v45 = vld [vmem:[#allocation2 + $0x60] sm:$0xff] }
0x4fa3   :  { %3528 = vrot.lane.b32.xlu0 %v13277_v5, %s12714_s21 }
0x5015   :  { %v3529_v46 = vpop.permute.xlu0 %3528 }
0x5016   :  { %10762 = vmatmul.mubr.msk.f32.vlgmr.msra.gmra.mrb[30].mxu1 %vm158_vm2, %v3529_v46  ;;  %v3952_v46 = vld [vmem:[#allocation5 + $0x80] sm:$0xff] }
0x5017   :  { %11626 = vmatpush3.bf16.msra.mxu1 %v13184_v53  ;;  %10783 = vmatprep.mubr.msk.f32.mxu1 %vm12711_vm0, %v12712_v1 }
0x5018   :  { %11627 = vmatprep.subr.bf16.mxu1 %v12710_v0 }
0x501b   :  { %11629 = vmatpush3.bf16.msra.mxu1 %v13187_v55  ;;  %v3614_v55 = vrot.slane %v3520_v43, 6 }
0x501c   :  { %11638 = vmatprep.subr.bf16.mxu1 %v12710_v0 }
0x50e9   :  { %v3598_v47 = vpop.f32.mrb[30].mxu1 }
0x50ea   :  { %v3603_v48 = vrot.slane %v3598_v47, 6  ;;  %v10763_v11 = vpop.f32.mrb[31].mxu1 }
0x50eb   :  { %v3856_v11 = vld [vmem:[#allocation2 + $0x70] sm:$0xff] }
0x50ec   :  { %v3605_v49 = vadd.f32 %v3603_v48, %v13213_v37  ;;  %v3953_v48 = vld [vmem:[#allocation5 + $0x88] sm:$0xff] }
0x50ee   :  { %12226 = vtanh.f32 %v3605_v49  ;;  %v9799_v51 = vmul.f32 -1.442695, %v3605_v49  ;;  %v3857_v49 = vld [vmem:[#allocation2 + $0x78] sm:$0xff] }
0x50f0   :  { %12228 = vpow2.f32 %v9799_v51  ;;  %v11634_v51 = vpack.c.bf16 %v3857_v49, %v3856_v11 }
0x50f8   :  { %v12227_v50 = vpop.eup %12226 }
0x50f9   :  { %3618 = vrot.lane.b32.xlu1 %v12227_v50, %s12713_s20  ;;  %v13311_v50 = vpack.c.bf16 %v3953_v48, %v3952_v46 }
0x50fa   :  { %v12229_v53 = vpop.eup %12228 }
0x50fb   :  { %v3609_v15 = vadd.f32 1.0, %v12229_v53  ;;  %v3954_v53 = vld [vmem:[#allocation5 + $0x90] sm:$0xff] }
0x50fd   :  { %12230 = vrcp.f32 %v3609_v15 }
0x5107   :  { %v12231_v52 = vpop.eup %12230 }
0x5108   :  { %v3616_v14 = vmul.f32 %v12231_v52, %v3614_v55 }
0x516b   :  { %v3619_v54 = vpop.permute.xlu1 %3618 }
0x516c   :  { %v3621_v57 = vmul.f32 %v12231_v52, %v3619_v54 }
0x516e   :  { %3623 = vrot.lane.b32.xlu0 %v3621_v57, %s12714_s21 }
0x51e0   :  { %v3624_v56 = vpop.permute.xlu0 %3623 }
0x51e1   :  { %v3626_v58 = vadd.f32 %v3624_v56, %v3616_v14 }
0x51e3   :  { %12232 = vtanh.f32 %v3626_v58  ;;  %v3721_v19 = vrot.slane %v3626_v58, 6 }
0x51ed   :  { %v12233_v61 = vpop.eup %12232 }
0x51ee   :  { %3629 = vrot.lane.b32.xlu1 %v12233_v61, %s12713_s20  ;;  %v9805_v61 = vld [vmem:[%s14123_s4 + $0x4] ss:$0 sm:$0xff] }
0x5260   :  { %v3630_v59 = vpop.permute.xlu1 %3629 }
0x5261   :  { %v3632_v17 = vmul.f32 %v12231_v52, %v3630_v59 }
0x5263   :  { %v3634_v60 = vrot.slane %v3632_v17, 2  ;;  %v3850_v25 = vsel %vm1001_vm3, %v13277_v5, %v3632_v17  ;;  %v3855_v5 = vld [vmem:[#allocation2 + $0x68] sm:$0xff] }
0x5264   :  { %v11630_v47 = vpack.c.bf16 %v3855_v5, %v3854_v45 }
0x5265   :  { %3635 = vrot.lane.b32.xlu0 %v3634_v60, %s12714_s21 }
0x5266   :  { %11631 = vmatprep.subr.bf16.mxu0 %v11630_v47 }
0x52d7   :  { %v3636_v62 = vpop.permute.xlu0 %3635 }
0x52d8   :  { %10773 = vmatmul.mubr.msk.f32.vlgmr.msra.gmra.mrb[36].mxu0 %vm158_vm2, %v3636_v62 }
0x52d9   :  { %11633 = vmatpush3.bf16.msra.mxu0 %v11630_v47 }
0x52da   :  { %11635 = vmatprep.subr.bf16.mxu0 %v11634_v51 }
0x52dd   :  { %11637 = vmatpush3.bf16.msra.mxu0 %v11634_v51 }
0x52de   :  { %11644 = vmatprep.subr.bf16.mxu0 %v12710_v0 }
0x53ab   :  { %v3705_v8 = vpop.f32.mrb[36].mxu0 }
0x53ac   :  { %v3710_v63 = vrot.slane %v3705_v8, 4  ;;  %v10774_v2 = vpop.f32.mrb[37].mxu0 }
0x53ae   :  { %v3712_v4 = vadd.f32 %v3710_v63, %v13213_v37 }
0x53b0   :  { %12234 = vtanh.f32 %v3712_v4  ;;  %v9801_v6 = vmul.f32 -1.442695, %v3712_v4 }
0x53b2   :  { %12236 = vpow2.f32 %v9801_v6 }
0x53ba   :  { %v12235_v12 = vpop.eup %12234 }
0x53bb   :  { %3725 = vrot.lane.b32.xlu1 %v12235_v12, %s12713_s20 }
0x53bc   :  { %v12237_v9 = vpop.eup %12236 }
0x53bd   :  { %v3716_v10 = vadd.f32 1.0, %v12237_v9 }
0x53bf   :  { %12238 = vrcp.f32 %v3716_v10 }
0x53c9   :  { %v12239_v13 = vpop.eup %12238 }
0x53ca   :  { %v3723_v20 = vmul.f32 %v12239_v13, %v3721_v19 }
0x542d   :  { %v3726_v16 = vpop.permute.xlu1 %3725 }
0x542e   :  { %v3728_v18 = vmul.f32 %v12239_v13, %v3726_v16 }
0x5430   :  { %3730 = vrot.lane.b32.xlu0 %v3728_v18, %s12714_s21 }
0x54a2   :  { %v3731_v21 = vpop.permute.xlu0 %3730 }
0x54a3   :  { %v3733_v22 = vadd.f32 %v3731_v21, %v3723_v20 }
0x54a5   :  { %12240 = vtanh.f32 %v3733_v22  ;;  %v3828_v41 = vrot.slane %v3733_v22, 6 }
0x54af   :  { %v12241_v23 = vpop.eup %12240 }
0x54b0   :  { %3736 = vrot.lane.b32.xlu1 %v12241_v23, %s12713_s20 }
0x5522   :  { %v3737_v24 = vpop.permute.xlu1 %3736 }
0x5523   :  { %v3739_v3 = vmul.f32 %v12239_v13, %v3737_v24 }
0x5525   :  { %v3741_v26 = vrot.slane %v3739_v3, 4  ;;  %v3851_v27 = vsel %vm1003_vm4, %v3850_v25, %v3739_v3 }
0x5527   :  { %3742 = vrot.lane.b32.xlu0 %v3741_v26, %s12714_s21 }
0x5599   :  { %v3743_v28 = vpop.permute.xlu0 %3742 }
0x559a   :  { %10784 = vmatmul.mubr.msk.f32.vlgmr.msra.gmra.mrb[32].mxu1 %vm158_vm2, %v3743_v28 }
0x559b   :  { %10805 = vmatprep.mubr.msk.f32.mxu1 %vm12711_vm0, %v12712_v1  ;;  %11640 = vmatpush3.bf16.msra.mxu1 %v13311_v50 }
0x559c   :  { %11641 = vmatprep.subr.bf16.mxu1 %v12710_v0 }
0x566d   :  { %v3812_v29 = vpop.f32.mrb[32].mxu1 }
0x566e   :  { %v3817_v30 = vrot.slane %v3812_v29, 2  ;;  %v10785_v31 = vpop.f32.mrb[33].mxu1 }
0x5670   :  { %v3819_v32 = vadd.f32 %v3817_v30, %v13213_v37 }
0x5672   :  { %12242 = vtanh.f32 %v3819_v32  ;;  %v9803_v34 = vmul.f32 -1.442695, %v3819_v32 }
0x5674   :  { %12244 = vpow2.f32 %v9803_v34 }
0x567c   :  { %v12243_v33 = vpop.eup %12242 }
0x567d   :  { %3832 = vrot.lane.b32.xlu1 %v12243_v33, %s12713_s20 }
0x567e   :  { %v12245_v35 = vpop.eup %12244 }
0x567f   :  { %v3823_v36 = vadd.f32 1.0, %v12245_v35 }
0x5681   :  { %12246 = vrcp.f32 %v3823_v36 }
0x568b   :  { %v12247_v38 = vpop.eup %12246 }
0x568c   :  { %v3830_v42 = vmul.f32 %v12247_v38, %v3828_v41 }
0x56ef   :  { %v3833_v39 = vpop.permute.xlu1 %3832 }
0x56f0   :  { %v3835_v40 = vmul.f32 %v12247_v38, %v3833_v39 }
0x56f2   :  { %3837 = vrot.lane.b32.xlu0 %v3835_v40, %s12714_s21 }
0x56f6   :  { %3868 = vrot.lane.b32.xlu0 %v13264_v7, %s12714_s21  ;;  %v3955_v7 = vld [vmem:[#allocation5 + $0x98] sm:$0xff] }
0x56f7   :  { %v13314_v15 = vpack.c.bf16 %v3955_v7, %v3954_v53 }
0x56f9   :  { %11643 = vmatpush3.bf16.msra.mxu1 %v13314_v15 }
0x56fa   :  { %11650 = vmatprep.subr.bf16.mxu1 %v12710_v0 }
0x56fc   :  { %10806 = vmatmul.mubr.f32.vlgmr.msra.gmra.mrb[34].mxu1 %v12712_v1 }
0x56fd   :  { %11652 = vmatpush3.bf16.msra.mxu1 %v13311_v50  ;;  %10827 = vmatprep.mubr.msk.f32.mxu1 %vm12711_vm0, %v12712_v1 }
0x56fe   :  { %11653 = vmatprep.subr.bf16.mxu1 %v12710_v0 }
0x5701   :  { %11655 = vmatpush3.bf16.msra.mxu1 %v13314_v15 }
0x5702   :  { %11662 = vmatprep.subr.bf16.mxu1 %v12710_v0 }
0x5764   :  { %v3838_v37 = vpop.permute.xlu0 %3837 }
0x5765   :  { %v3840_v43 = vadd.f32 %v3838_v37, %v3830_v42 }
0x5767   :  { %12248 = vtanh.f32 %v3840_v43 }
0x5768   :  { %v3869_v44 = vpop.permute.xlu0 %3868 }
0x5769   :  { %10794 = vmatprep.mubr.msk.f32.mxu0 %vm158_vm2, %v3869_v44 }
0x5771   :  { %v12249_v52 = vpop.eup %12248 }
0x5772   :  { %3843 = vrot.lane.b32.xlu1 %v12249_v52, %s12713_s20 }
0x57cf   :  { %v4022_v56 = vpop.f32.mrb[34].mxu1 }
0x57d0   :  { %v10807_v58 = vpop.f32.mrb[35].mxu1 }
0x57e4   :  { %v3844_v54 = vpop.permute.xlu1 %3843 }
0x57e5   :  { %v3846_v57 = vmul.f32 %v12247_v38, %v3844_v54 }
0x57e7   :  { %v3852_v55 = vsel %vm1005_vm5, %v3851_v27, %v3846_v57 }
0x57e8   :  { %3870 = vrot.lane.b32.xlu1 %v3852_v55, %s12714_s21 }
0x585a   :  { %v3871_v14 = vpop.permute.xlu1 %3870 }
0x585b   :  { %10795 = vmatmul.mubr.msk.f32.vlgmr.msra.gmra.mrb[38].mxu0 %vm158_vm2, %v3871_v14 }
0x585c   :  { %11646 = vmatpush3.bf16.msra.mxu0 %v13311_v50  ;;  %10816 = vmatprep.mubr.msk.f32.mxu0 %vm12711_vm0, %v12712_v1 }
0x585d   :  { %11647 = vmatprep.subr.bf16.mxu0 %v12710_v0 }
0x5860   :  { %11649 = vmatpush3.bf16.msra.mxu0 %v13314_v15 }
0x5861   :  { %11656 = vmatprep.subr.bf16.mxu0 %v12710_v0 }
0x592e   :  { %v10796_v59 = vpop.f32.mrb[38].mxu0 }
0x592f   :  { %v13340_v17 = vadd.f32 %v10796_v59, %v9805_v61  ;;  %v3942_v60 = vpop.f32.mrb[39].mxu0 }
0x5930   :  { %v13342_v62 = vadd.f32 %v9805_v61, %v3942_v60 }
0x5932   :  { %v4026_v8 = vadd.f32 %v4022_v56, %v13342_v62 }
0x5934   :  { %12250 = vtanh.f32 %v4026_v8  ;;  %v9808_v2 = vmul.f32 -1.442695, %v4026_v8 }
0x5936   :  { %12252 = vpow2.f32 %v9808_v2 }
0x593e   :  { %v12251_v63 = vpop.eup %12250 }
0x593f   :  { %4036 = vrot.lane.b32.xlu0 %v12251_v63, %s12713_s20 }
0x5940   :  { %v12253_v4 = vpop.eup %12252 }
0x5941   :  { %v4030_v12 = vadd.f32 1.0, %v12253_v4 }
0x5943   :  { %12254 = vrcp.f32 %v4030_v12 }
0x594d   :  { %v12255_v6 = vpop.eup %12254 }
0x594e   :  { %v4034_v13 = vmul.f32 0.0, %v12255_v6 }
0x59b1   :  { %v4037_v9 = vpop.permute.xlu0 %4036 }
0x59b2   :  { %v4039_v10 = vmul.f32 %v12255_v6, %v4037_v9 }
0x59b4   :  { %4041 = vrot.lane.b32.xlu1 %v4039_v10, %s12714_s21 }
0x5a26   :  { %v4042_v16 = vpop.permute.xlu1 %4041 }
0x5a27   :  { %v4044_v18 = vadd.f32 %v4042_v16, %v4034_v13 }
0x5a29   :  { %12256 = vtanh.f32 %v4044_v18  ;;  %v4138_v33 = vrot.slane %v4044_v18, 6 }
0x5a33   :  { %v12257_v19 = vpop.eup %12256 }
0x5a34   :  { %4047 = vrot.lane.b32.xlu0 %v12257_v19, %s12713_s20 }
0x5aa6   :  { %v4048_v20 = vpop.permute.xlu0 %4047 }
0x5aa7   :  { %v13348_v21 = vmul.f32 %v12255_v6, %v4048_v20 }
0x5aa9   :  { %4052 = vrot.lane.b32.xlu1 %v13348_v21, %s12714_s21 }
0x5b1b   :  { %v4053_v22 = vpop.permute.xlu1 %4052 }
0x5b1c   :  { %10817 = vmatmul.mubr.msk.f32.vlgmr.msra.gmra.mrb[40].mxu0 %vm158_vm2, %v4053_v22 }
0x5b1d   :  { %11658 = vmatpush3.bf16.msra.mxu0 %v13311_v50  ;;  %10838 = vmatprep.mubr.msk.f32.mxu0 %vm12711_vm0, %v12712_v1 }
0x5b1e   :  { %11659 = vmatprep.subr.bf16.mxu0 %v12710_v0 }
0x5b21   :  { %11661 = vmatpush3.bf16.msra.mxu0 %v13314_v15 }
0x5b22   :  { %11668 = vmatprep.subr.bf16.mxu0 %v12710_v0 }
0x5bef   :  { %v4122_v23 = vpop.f32.mrb[40].mxu0 }
0x5bf0   :  { %v4127_v24 = vrot.slane %v4122_v23, 6  ;;  %v10818_v3 = vpop.f32.mrb[41].mxu0 }
0x5bf2   :  { %v4129_v25 = vadd.f32 %v4127_v24, %v13342_v62 }
0x5bf4   :  { %12258 = vtanh.f32 %v4129_v25  ;;  %v9810_v27 = vmul.f32 -1.442695, %v4129_v25 }
0x5bf6   :  { %12260 = vpow2.f32 %v9810_v27 }
0x5bfe   :  { %v12259_v26 = vpop.eup %12258 }
0x5bff   :  { %4142 = vrot.lane.b32.xlu0 %v12259_v26, %s12713_s20 }
0x5c00   :  { %v12261_v28 = vpop.eup %12260 }
0x5c01   :  { %v4133_v29 = vadd.f32 1.0, %v12261_v28 }
0x5c03   :  { %12262 = vrcp.f32 %v4133_v29 }
0x5c0d   :  { %v12263_v30 = vpop.eup %12262 }
0x5c0e   :  { %v4140_v34 = vmul.f32 %v12263_v30, %v4138_v33 }
0x5c71   :  { %v4143_v31 = vpop.permute.xlu0 %4142 }
0x5c72   :  { %v4145_v32 = vmul.f32 %v12263_v30, %v4143_v31 }
0x5c74   :  { %4147 = vrot.lane.b32.xlu1 %v4145_v32, %s12714_s21 }
0x5ce6   :  { %v4148_v35 = vpop.permute.xlu1 %4147 }
0x5ce7   :  { %v4150_v36 = vadd.f32 %v4148_v35, %v4140_v34 }
0x5ce9   :  { %12264 = vtanh.f32 %v4150_v36  ;;  %v4245_v53 = vrot.slane %v4150_v36, 6 }
0x5cf3   :  { %v12265_v38 = vpop.eup %12264 }
0x5cf4   :  { %4153 = vrot.lane.b32.xlu0 %v12265_v38, %s12713_s20 }
0x5d66   :  { %v4154_v39 = vpop.permute.xlu0 %4153 }
0x5d67   :  { %v4156_v40 = vmul.f32 %v12263_v30, %v4154_v39 }
0x5d69   :  { %v4158_v41 = vrot.slane %v4156_v40, 2  ;;  %v4795_v56 = vsel %vm1001_vm3, %v13348_v21, %v4156_v40 }
0x5d6b   :  { %4159 = vrot.lane.b32.xlu1 %v4158_v41, %s12714_s21 }
0x5ddd   :  { %v4160_v42 = vpop.permute.xlu1 %4159 }
0x5dde   :  { %10828 = vmatmul.mubr.msk.f32.vlgmr.msra.gmra.mrb[36].mxu1 %vm158_vm2, %v4160_v42 }
0x5ddf   :  { %11664 = vmatpush3.bf16.msra.mxu1 %v13311_v50  ;;  %10849 = vmatprep.mubr.msk.f32.mxu1 %vm12711_vm0, %v12712_v1 }
0x5de0   :  { %11665 = vmatprep.subr.bf16.mxu1 %v12710_v0 }
0x5de3   :  { %11667 = vmatpush3.bf16.msra.mxu1 %v13314_v15 }
0x5de4   :  { %11674 = vmatprep.subr.bf16.mxu1 %v12710_v0 }
0x5eb1   :  { %v4229_v37 = vpop.f32.mrb[36].mxu1 }
0x5eb2   :  { %v4234_v43 = vrot.slane %v4229_v37, 4  ;;  %v10829_v44 = vpop.f32.mrb[37].mxu1 }
0x5eb4   :  { %v4236_v45 = vadd.f32 %v4234_v43, %v13342_v62 }
0x5eb6   :  { %12266 = vtanh.f32 %v4236_v45  ;;  %v9812_v46 = vmul.f32 -1.442695, %v4236_v45 }
0x5eb8   :  { %12268 = vpow2.f32 %v9812_v46 }
0x5ec0   :  { %v12267_v5 = vpop.eup %12266 }
0x5ec1   :  { %4249 = vrot.lane.b32.xlu0 %v12267_v5, %s12713_s20 }
0x5ec2   :  { %v12269_v47 = vpop.eup %12268 }
0x5ec3   :  { %v4240_v48 = vadd.f32 1.0, %v12269_v47 }
0x5ec5   :  { %12270 = vrcp.f32 %v4240_v48 }
0x5ecf   :  { %v12271_v11 = vpop.eup %12270 }
0x5ed0   :  { %v4247_v7 = vmul.f32 %v12271_v11, %v4245_v53 }
0x5f33   :  { %v4250_v49 = vpop.permute.xlu0 %4249 }
0x5f34   :  { %v4252_v51 = vmul.f32 %v12271_v11, %v4250_v49 }
0x5f36   :  { %4254 = vrot.lane.b32.xlu1 %v4252_v51, %s12714_s21 }
0x5fa8   :  { %v4255_v52 = vpop.permute.xlu1 %4254 }
0x5fa9   :  { %v4257_v54 = vadd.f32 %v4255_v52, %v4247_v7 }
0x5fab   :  { %12272 = vtanh.f32 %v4257_v54  ;;  %v4352_v18 = vrot.slane %v4257_v54, 6 }
0x5fb5   :  { %v12273_v57 = vpop.eup %12272 }
0x5fb6   :  { %4260 = vrot.lane.b32.xlu0 %v12273_v57, %s12713_s20 }
0x6028   :  { %v4261_v55 = vpop.permute.xlu0 %4260 }
0x6029   :  { %v4263_v14 = vmul.f32 %v12271_v11, %v4261_v55 }
0x602b   :  { %v4265_v58 = vrot.slane %v4263_v14, 4  ;;  %v4796_v61 = vsel %vm1003_vm4, %v4795_v56, %v4263_v14 }
0x602d   :  { %4266 = vrot.lane.b32.xlu1 %v4265_v58, %s12714_s21 }
0x609f   :  { %v4267_v59 = vpop.permute.xlu1 %4266 }
0x60a0   :  { %10839 = vmatmul.mubr.msk.f32.vlgmr.msra.gmra.mrb[42].mxu0 %vm158_vm2, %v4267_v59 }
0x60a1   :  { %11670 = vmatpush3.bf16.msra.mxu0 %v13311_v50  ;;  %10860 = vmatprep.mubr.msk.f32.mxu0 %vm12711_vm0, %v12712_v1 }
0x60a2   :  { %11671 = vmatprep.subr.bf16.mxu0 %v12710_v0 }
0x60a5   :  { %11673 = vmatpush3.bf16.msra.mxu0 %v13314_v15 }
0x60a6   :  { %11680 = vmatprep.subr.bf16.mxu0 %v12710_v0 }
0x6173   :  { %v4336_v60 = vpop.f32.mrb[42].mxu0 }
0x6174   :  { %v4341_v8 = vrot.slane %v4336_v60, 2  ;;  %v10840_v63 = vpop.f32.mrb[43].mxu0 }
0x6176   :  { %v4343_v2 = vadd.f32 %v4341_v8, %v13342_v62 }
0x6178   :  { %12274 = vtanh.f32 %v4343_v2  ;;  %v9814_v12 = vmul.f32 -1.442695, %v4343_v2 }
0x617a   :  { %12276 = vpow2.f32 %v9814_v12 }
0x6182   :  { %v12275_v4 = vpop.eup %12274 }
0x6183   :  { %4356 = vrot.lane.b32.xlu0 %v12275_v4, %s12713_s20 }
0x6184   :  { %v12277_v6 = vpop.eup %12276 }
0x6185   :  { %v4347_v9 = vadd.f32 1.0, %v12277_v6 }
0x6187   :  { %12278 = vrcp.f32 %v4347_v9 }
0x6191   :  { %v12279_v10 = vpop.eup %12278 }
0x6192   :  { %v4354_v19 = vmul.f32 %v12279_v10, %v4352_v18 }
0x61f5   :  { %v4357_v13 = vpop.permute.xlu0 %4356 }
0x61f6   :  { %v4359_v16 = vmul.f32 %v12279_v10, %v4357_v13 }
0x61f8   :  { %4361 = vrot.lane.b32.xlu1 %v4359_v16, %s12714_s21 }
0x626a   :  { %v4362_v20 = vpop.permute.xlu1 %4361 }
0x626b   :  { %v4364_v21 = vadd.f32 %v4362_v20, %v4354_v19 }
0x626d   :  { %12280 = vtanh.f32 %v4364_v21  ;;  %v4456_v36 = vrot.slane %v4364_v21, 6 }
0x6277   :  { %v12281_v62 = vpop.eup %12280 }
0x6278   :  { %4367 = vrot.lane.b32.xlu0 %v12281_v62, %s12713_s20 }
0x62ea   :  { %v4368_v22 = vpop.permute.xlu0 %4367 }
0x62eb   :  { %v4370_v23 = vmul.f32 %v12279_v10, %v4368_v22 }
0x62ed   :  { %v4372_v24 = vrot.slane %v4370_v23, 6  ;;  %v13391_v3 = vsel %vm1005_vm5, %v4796_v61, %v4370_v23 }
0x62ef   :  { %4373 = vrot.lane.b32.xlu1 %v4372_v24, %s12714_s21 }
0x6361   :  { %v4374_v25 = vpop.permute.xlu1 %4373 }
0x6362   :  { %10850 = vmatmul.mubr.msk.f32.vlgmr.msra.gmra.mrb[38].mxu1 %vm158_vm2, %v4374_v25 }
0x6363   :  { %11676 = vmatpush3.bf16.msra.mxu1 %v13311_v50  ;;  %10871 = vmatprep.mubr.msk.f32.mxu1 %vm12711_vm0, %v12712_v1 }
0x6364   :  { %11677 = vmatprep.subr.bf16.mxu1 %v12710_v0 }
0x6367   :  { %11679 = vmatpush3.bf16.msra.mxu1 %v13314_v15 }
0x6435   :  { %v4443_v26 = vpop.f32.mrb[38].mxu1 }
0x6436   :  { %v4447_v27 = vadd.f32 %v4443_v26, %v13340_v17  ;;  %v10851_v28 = vpop.f32.mrb[39].mxu1 }
0x6438   :  { %12282 = vtanh.f32 %v4447_v27  ;;  %v9816_v30 = vmul.f32 -1.442695, %v4447_v27 }
0x643a   :  { %12284 = vpow2.f32 %v9816_v30 }
0x6442   :  { %v12283_v29 = vpop.eup %12282 }
0x6443   :  { %4460 = vrot.lane.b32.xlu0 %v12283_v29, %s12713_s20 }
0x6444   :  { %v12285_v31 = vpop.eup %12284 }
0x6445   :  { %v4451_v32 = vadd.f32 1.0, %v12285_v31 }
0x6447   :  { %12286 = vrcp.f32 %v4451_v32 }
0x6451   :  { %v12287_v33 = vpop.eup %12286 }
0x6452   :  { %v4458_v38 = vmul.f32 %v12287_v33, %v4456_v36 }
0x64b5   :  { %v4461_v34 = vpop.permute.xlu0 %4460 }
0x64b6   :  { %v4463_v35 = vmul.f32 %v12287_v33, %v4461_v34 }
0x64b8   :  { %4465 = vrot.lane.b32.xlu1 %v4463_v35, %s12714_s21 }
0x652a   :  { %v4466_v39 = vpop.permute.xlu1 %4465 }
0x652b   :  { %v4468_v40 = vadd.f32 %v4466_v39, %v4458_v38 }
0x652d   :  { %12288 = vtanh.f32 %v4468_v40 }
0x6537   :  { %v12289_v41 = vpop.eup %12288 }
0x6538   :  { %4471 = vrot.lane.b32.xlu0 %v12289_v41, %s12713_s20 }
0x65aa   :  { %v4472_v42 = vpop.permute.xlu0 %4471 }
0x65ab   :  { %v13404_v37 = vmul.f32 %v12287_v33, %v4472_v42  ;;  %v4802_v42 = vld [vmem:[#allocation2 + $0x80] sm:$0xff] }
0x65ad   :  { %4476 = vrot.lane.b32.xlu1 %v13404_v37, %s12714_s21 }
0x661f   :  { %v4477_v43 = vpop.permute.xlu1 %4476 }
0x6620   :  { %10861 = vmatmul.mubr.msk.f32.vlgmr.msra.gmra.mrb[44].mxu0 %vm158_vm2, %v4477_v43  ;;  %v4900_v43 = vld [vmem:[#allocation5 + $0xa0] sm:$0xff] }
0x6621   :  { %11682 = vmatpush3.bf16.msra.mxu0 %v13311_v50  ;;  %10882 = vmatprep.mubr.msk.f32.mxu0 %vm12711_vm0, %v12712_v1 }
0x6622   :  { %11683 = vmatprep.subr.bf16.mxu0 %v12710_v0 }
0x6625   :  { %11685 = vmatpush3.bf16.msra.mxu0 %v13314_v15  ;;  %v4562_v15 = vrot.slane %v4468_v40, 6 }
0x6626   :  { %11694 = vmatprep.subr.bf16.mxu0 %v12710_v0 }
0x66f3   :  { %v4546_v44 = vpop.f32.mrb[44].mxu0 }
0x66f4   :  { %v4551_v45 = vrot.slane %v4546_v44, 6  ;;  %v10862_v5 = vpop.f32.mrb[45].mxu0 }
0x66f5   :  { %v4804_v5 = vld [vmem:[#allocation2 + $0x90] sm:$0xff] }
0x66f6   :  { %v4553_v46 = vadd.f32 %v4551_v45, %v13340_v17  ;;  %v4901_v45 = vld [vmem:[#allocation5 + $0xa8] sm:$0xff] }
0x66f8   :  { %12290 = vtanh.f32 %v4553_v46  ;;  %v9818_v48 = vmul.f32 -1.442695, %v4553_v46  ;;  %v4805_v46 = vld [vmem:[#allocation2 + $0x98] sm:$0xff] }
0x66fa   :  { %12292 = vpow2.f32 %v9818_v48  ;;  %v11690_v48 = vpack.c.bf16 %v4805_v46, %v4804_v5 }
0x6702   :  { %v12291_v47 = vpop.eup %12290 }
0x6703   :  { %4566 = vrot.lane.b32.xlu0 %v12291_v47, %s12713_s20  ;;  %v13438_v47 = vpack.c.bf16 %v4901_v45, %v4900_v43 }
0x6704   :  { %v12293_v50 = vpop.eup %12292 }
0x6705   :  { %v4557_v11 = vadd.f32 1.0, %v12293_v50  ;;  %v4902_v50 = vld [vmem:[#allocation5 + $0xb0] sm:$0xff] }
0x6707   :  { %12294 = vrcp.f32 %v4557_v11 }
0x6711   :  { %v12295_v49 = vpop.eup %12294 }
0x6712   :  { %v4564_v7 = vmul.f32 %v12295_v49, %v4562_v15 }
0x6775   :  { %v4567_v51 = vpop.permute.xlu0 %4566 }
0x6776   :  { %v4569_v53 = vmul.f32 %v12295_v49, %v4567_v51 }
0x6778   :  { %4571 = vrot.lane.b32.xlu1 %v4569_v53, %s12714_s21 }
0x67ea   :  { %v4572_v52 = vpop.permute.xlu1 %4571 }
0x67eb   :  { %v4574_v54 = vadd.f32 %v4572_v52, %v4564_v7 }
0x67ed   :  { %12296 = vtanh.f32 %v4574_v54  ;;  %v4669_v13 = vrot.slane %v4574_v54, 6 }
0x67f7   :  { %v12297_v57 = vpop.eup %12296 }
0x67f8   :  { %4577 = vrot.lane.b32.xlu0 %v12297_v57, %s12713_s20  ;;  %v9824_v57 = vld [vmem:[%s14123_s4 + $0x5] ss:$0 sm:$0xff] }
0x686a   :  { %v4578_v55 = vpop.permute.xlu0 %4577 }
0x686b   :  { %v4580_v14 = vmul.f32 %v12295_v49, %v4578_v55 }
0x686d   :  { %v4582_v56 = vrot.slane %v4580_v14, 2  ;;  %v4798_v22 = vsel %vm1001_vm3, %v13404_v37, %v4580_v14  ;;  %v4803_v37 = vld [vmem:[#allocation2 + $0x88] sm:$0xff] }
0x686e   :  { %v11686_v44 = vpack.c.bf16 %v4803_v37, %v4802_v42 }
0x686f   :  { %4583 = vrot.lane.b32.xlu1 %v4582_v56, %s12714_s21 }
0x6870   :  { %11687 = vmatprep.subr.bf16.mxu1 %v11686_v44 }
0x68e1   :  { %v4584_v58 = vpop.permute.xlu1 %4583 }
0x68e2   :  { %10872 = vmatmul.mubr.msk.f32.vlgmr.msra.gmra.mrb[40].mxu1 %vm158_vm2, %v4584_v58 }
0x68e3   :  { %11689 = vmatpush3.bf16.msra.mxu1 %v11686_v44 }
0x68e4   :  { %11691 = vmatprep.subr.bf16.mxu1 %v11690_v48 }
0x68e7   :  { %11693 = vmatpush3.bf16.msra.mxu1 %v11690_v48 }
0x68e8   :  { %11700 = vmatprep.subr.bf16.mxu1 %v12710_v0 }
0x69b5   :  { %v4653_v61 = vpop.f32.mrb[40].mxu1 }
0x69b6   :  { %v4658_v59 = vrot.slane %v4653_v61, 4  ;;  %v10873_v60 = vpop.f32.mrb[41].mxu1 }
0x69b8   :  { %v4660_v8 = vadd.f32 %v4658_v59, %v13340_v17 }
0x69ba   :  { %12298 = vtanh.f32 %v4660_v8  ;;  %v9820_v2 = vmul.f32 -1.442695, %v4660_v8 }
0x69bc   :  { %12300 = vpow2.f32 %v9820_v2 }
0x69c4   :  { %v12299_v63 = vpop.eup %12298 }
0x69c5   :  { %4673 = vrot.lane.b32.xlu0 %v12299_v63, %s12713_s20 }
0x69c6   :  { %v12301_v4 = vpop.eup %12300 }
0x69c7   :  { %v4664_v12 = vadd.f32 1.0, %v12301_v4 }
0x69c9   :  { %12302 = vrcp.f32 %v4664_v12 }
0x69d3   :  { %v12303_v6 = vpop.eup %12302 }
0x69d4   :  { %v4671_v16 = vmul.f32 %v12303_v6, %v4669_v13 }
0x6a37   :  { %v4674_v9 = vpop.permute.xlu0 %4673 }
0x6a38   :  { %v4676_v10 = vmul.f32 %v12303_v6, %v4674_v9 }
0x6a3a   :  { %4678 = vrot.lane.b32.xlu1 %v4676_v10, %s12714_s21 }
0x6aac   :  { %v4679_v18 = vpop.permute.xlu1 %4678 }
0x6aad   :  { %v4681_v19 = vadd.f32 %v4679_v18, %v4671_v16 }
0x6aaf   :  { %12304 = vtanh.f32 %v4681_v19  ;;  %v4776_v38 = vrot.slane %v4681_v19, 6 }
0x6ab9   :  { %v12305_v20 = vpop.eup %12304 }
0x6aba   :  { %4684 = vrot.lane.b32.xlu0 %v12305_v20, %s12713_s20 }
0x6b2c   :  { %v4685_v21 = vpop.permute.xlu0 %4684 }
0x6b2d   :  { %v4687_v62 = vmul.f32 %v12303_v6, %v4685_v21 }
0x6b2f   :  { %v4689_v23 = vrot.slane %v4687_v62, 4  ;;  %v4799_v24 = vsel %vm1003_vm4, %v4798_v22, %v4687_v62 }
0x6b31   :  { %4690 = vrot.lane.b32.xlu1 %v4689_v23, %s12714_s21 }
0x6ba3   :  { %v4691_v25 = vpop.permute.xlu1 %4690 }
0x6ba4   :  { %10883 = vmatmul.mubr.msk.f32.vlgmr.msra.gmra.mrb[46].mxu0 %vm158_vm2, %v4691_v25 }
0x6ba5   :  { %10904 = vmatprep.mubr.msk.f32.mxu0 %vm12711_vm0, %v12712_v1  ;;  %11696 = vmatpush3.bf16.msra.mxu0 %v13438_v47 }
0x6ba6   :  { %11697 = vmatprep.subr.bf16.mxu0 %v12710_v0 }
0x6c77   :  { %v4760_v26 = vpop.f32.mrb[46].mxu0 }
0x6c78   :  { %v4765_v27 = vrot.slane %v4760_v26, 2  ;;  %v10884_v28 = vpop.f32.mrb[47].mxu0 }
0x6c7a   :  { %v4767_v29 = vadd.f32 %v4765_v27, %v13340_v17 }
0x6c7c   :  { %12306 = vtanh.f32 %v4767_v29  ;;  %v9822_v31 = vmul.f32 -1.442695, %v4767_v29 }
0x6c7e   :  { %12308 = vpow2.f32 %v9822_v31 }
0x6c86   :  { %v12307_v30 = vpop.eup %12306 }
0x6c87   :  { %4780 = vrot.lane.b32.xlu0 %v12307_v30, %s12713_s20 }
0x6c88   :  { %v12309_v32 = vpop.eup %12308 }
0x6c89   :  { %v4771_v33 = vadd.f32 1.0, %v12309_v32 }
0x6c8b   :  { %12310 = vrcp.f32 %v4771_v33 }
0x6c95   :  { %v12311_v34 = vpop.eup %12310 }
0x6c96   :  { %v4778_v39 = vmul.f32 %v12311_v34, %v4776_v38 }
0x6cf9   :  { %v4781_v35 = vpop.permute.xlu0 %4780 }
0x6cfa   :  { %v4783_v36 = vmul.f32 %v12311_v34, %v4781_v35 }
0x6cfc   :  { %4785 = vrot.lane.b32.xlu1 %v4783_v36, %s12714_s21 }
0x6d00   :  { %4816 = vrot.lane.b32.xlu1 %v13391_v3, %s12714_s21  ;;  %v4903_v3 = vld [vmem:[#allocation5 + $0xb8] sm:$0xff] }
0x6d01   :  { %v13441_v11 = vpack.c.bf16 %v4903_v3, %v4902_v50 }
0x6d03   :  { %11699 = vmatpush3.bf16.msra.mxu0 %v13441_v11 }
0x6d04   :  { %11706 = vmatprep.subr.bf16.mxu0 %v12710_v0 }
0x6d06   :  { %10905 = vmatmul.mubr.f32.vlgmr.msra.gmra.mrb[48].mxu0 %v12712_v1 }
0x6d07   :  { %11708 = vmatpush3.bf16.msra.mxu0 %v13438_v47  ;;  %10926 = vmatprep.mubr.msk.f32.mxu0 %vm12711_vm0, %v12712_v1 }
0x6d08   :  { %11709 = vmatprep.subr.bf16.mxu0 %v12710_v0 }
0x6d0b   :  { %11711 = vmatpush3.bf16.msra.mxu0 %v13441_v11 }
0x6d0c   :  { %11718 = vmatprep.subr.bf16.mxu0 %v12710_v0 }
0x6d6e   :  { %v4786_v17 = vpop.permute.xlu1 %4785 }
0x6d6f   :  { %v4788_v40 = vadd.f32 %v4786_v17, %v4778_v39 }
0x6d71   :  { %12312 = vtanh.f32 %v4788_v40 }
0x6d72   :  { %v4817_v41 = vpop.permute.xlu1 %4816 }
0x6d73   :  { %10893 = vmatprep.mubr.msk.f32.mxu1 %vm158_vm2, %v4817_v41 }
0x6d7b   :  { %v12313_v49 = vpop.eup %12312 }
0x6d7c   :  { %4791 = vrot.lane.b32.xlu0 %v12313_v49, %s12713_s20 }
0x6dd9   :  { %v4970_v52 = vpop.f32.mrb[48].mxu0 }
0x6dda   :  { %v10906_v54 = vpop.f32.mrb[49].mxu0 }
0x6dee   :  { %v4792_v51 = vpop.permute.xlu0 %4791 }
0x6def   :  { %v4794_v53 = vmul.f32 %v12311_v34, %v4792_v51 }
0x6df1   :  { %v4800_v15 = vsel %vm1005_vm5, %v4799_v24, %v4794_v53 }
0x6df2   :  { %4818 = vrot.lane.b32.xlu0 %v4800_v15, %s12714_s21 }
0x6e64   :  { %v4819_v7 = vpop.permute.xlu0 %4818 }
0x6e65   :  { %10894 = vmatmul.mubr.msk.f32.vlgmr.msra.gmra.mrb[42].mxu1 %vm158_vm2, %v4819_v7 }
0x6e66   :  { %11702 = vmatpush3.bf16.msra.mxu1 %v13438_v47  ;;  %10915 = vmatprep.mubr.msk.f32.mxu1 %vm12711_vm0, %v12712_v1 }
0x6e67   :  { %11703 = vmatprep.subr.bf16.mxu1 %v12710_v0 }
0x6e6a   :  { %11705 = vmatpush3.bf16.msra.mxu1 %v13441_v11 }
0x6e6b   :  { %11712 = vmatprep.subr.bf16.mxu1 %v12710_v0 }
0x6f38   :  { %v10895_v55 = vpop.f32.mrb[42].mxu1 }
0x6f39   :  { %v13467_v14 = vadd.f32 %v10895_v55, %v9824_v57  ;;  %v4890_v56 = vpop.f32.mrb[43].mxu1 }
0x6f3a   :  { %v13469_v58 = vadd.f32 %v9824_v57, %v4890_v56 }
0x6f3c   :  { %v4974_v61 = vadd.f32 %v4970_v52, %v13469_v58 }
0x6f3e   :  { %12314 = vtanh.f32 %v4974_v61  ;;  %v9827_v60 = vmul.f32 -1.442695, %v4974_v61 }
0x6f40   :  { %12316 = vpow2.f32 %v9827_v60 }
0x6f48   :  { %v12315_v59 = vpop.eup %12314 }
0x6f49   :  { %4984 = vrot.lane.b32.xlu1 %v12315_v59, %s12713_s20 }
0x6f4a   :  { %v12317_v8 = vpop.eup %12316 }
0x6f4b   :  { %v4978_v63 = vadd.f32 1.0, %v12317_v8 }
0x6f4d   :  { %12318 = vrcp.f32 %v4978_v63 }
0x6f57   :  { %v12319_v2 = vpop.eup %12318 }
0x6f58   :  { %v4982_v6 = vmul.f32 0.0, %v12319_v2 }
0x6fbb   :  { %v4985_v4 = vpop.permute.xlu1 %4984 }
0x6fbc   :  { %v4987_v12 = vmul.f32 %v12319_v2, %v4985_v4 }
0x6fbe   :  { %4989 = vrot.lane.b32.xlu0 %v4987_v12, %s12714_s21 }
0x7030   :  { %v4990_v9 = vpop.permute.xlu0 %4989 }
0x7031   :  { %v4992_v10 = vadd.f32 %v4990_v9, %v4982_v6 }
0x7033   :  { %12320 = vtanh.f32 %v4992_v10  ;;  %v5086_v30 = vrot.slane %v4992_v10, 6 }
0x703d   :  { %v12321_v13 = vpop.eup %12320 }
0x703e   :  { %4995 = vrot.lane.b32.xlu1 %v12321_v13, %s12713_s20 }
0x70b0   :  { %v4996_v16 = vpop.permute.xlu1 %4995 }
0x70b1   :  { %v13475_v18 = vmul.f32 %v12319_v2, %v4996_v16 }
0x70b3   :  { %5000 = vrot.lane.b32.xlu0 %v13475_v18, %s12714_s21 }
0x7125   :  { %v5001_v19 = vpop.permute.xlu0 %5000 }
0x7126   :  { %10916 = vmatmul.mubr.msk.f32.vlgmr.msra.gmra.mrb[44].mxu1 %vm158_vm2, %v5001_v19 }
0x7127   :  { %11714 = vmatpush3.bf16.msra.mxu1 %v13438_v47  ;;  %10937 = vmatprep.mubr.msk.f32.mxu1 %vm12711_vm0, %v12712_v1 }
0x7128   :  { %11715 = vmatprep.subr.bf16.mxu1 %v12710_v0 }
0x712b   :  { %11717 = vmatpush3.bf16.msra.mxu1 %v13441_v11 }
0x712c   :  { %11724 = vmatprep.subr.bf16.mxu1 %v12710_v0 }
0x71f9   :  { %v5070_v20 = vpop.f32.mrb[44].mxu1 }
0x71fa   :  { %v5075_v21 = vrot.slane %v5070_v20, 6  ;;  %v10917_v62 = vpop.f32.mrb[45].mxu1 }
0x71fc   :  { %v5077_v22 = vadd.f32 %v5075_v21, %v13469_v58 }
0x71fe   :  { %12322 = vtanh.f32 %v5077_v22  ;;  %v9829_v24 = vmul.f32 -1.442695, %v5077_v22 }
0x7200   :  { %12324 = vpow2.f32 %v9829_v24 }
0x7208   :  { %v12323_v23 = vpop.eup %12322 }
0x7209   :  { %5090 = vrot.lane.b32.xlu1 %v12323_v23, %s12713_s20 }
0x720a   :  { %v12325_v25 = vpop.eup %12324 }
0x720b   :  { %v5081_v26 = vadd.f32 1.0, %v12325_v25 }
0x720d   :  { %12326 = vrcp.f32 %v5081_v26 }
0x7217   :  { %v12327_v27 = vpop.eup %12326 }
0x7218   :  { %v5088_v31 = vmul.f32 %v12327_v27, %v5086_v30 }
0x727b   :  { %v5091_v28 = vpop.permute.xlu1 %5090 }
0x727c   :  { %v5093_v29 = vmul.f32 %v12327_v27, %v5091_v28 }
0x727e   :  { %5095 = vrot.lane.b32.xlu0 %v5093_v29, %s12714_s21 }
0x72f0   :  { %v5096_v32 = vpop.permute.xlu0 %5095 }
0x72f1   :  { %v5098_v33 = vadd.f32 %v5096_v32, %v5088_v31 }
0x72f3   :  { %12328 = vtanh.f32 %v5098_v33  ;;  %v5193_v50 = vrot.slane %v5098_v33, 6 }
0x72fd   :  { %v12329_v34 = vpop.eup %12328 }
0x72fe   :  { %5101 = vrot.lane.b32.xlu1 %v12329_v34, %s12713_s20 }
0x7370   :  { %v5102_v35 = vpop.permute.xlu1 %5101 }
0x7371   :  { %v5104_v36 = vmul.f32 %v12327_v27, %v5102_v35 }
0x7373   :  { %v5106_v38 = vrot.slane %v5104_v36, 2  ;;  %v5743_v52 = vsel %vm1001_vm3, %v13475_v18, %v5104_v36 }
0x7375   :  { %5107 = vrot.lane.b32.xlu0 %v5106_v38, %s12714_s21 }
0x73e7   :  { %v5108_v39 = vpop.permute.xlu0 %5107 }
0x73e8   :  { %10927 = vmatmul.mubr.msk.f32.vlgmr.msra.gmra.mrb[50].mxu0 %vm158_vm2, %v5108_v39 }
0x73e9   :  { %11720 = vmatpush3.bf16.msra.mxu0 %v13438_v47  ;;  %10948 = vmatprep.mubr.msk.f32.mxu0 %vm12711_vm0, %v12712_v1 }
0x73ea   :  { %11721 = vmatprep.subr.bf16.mxu0 %v12710_v0 }
0x73ed   :  { %11723 = vmatpush3.bf16.msra.mxu0 %v13441_v11 }
0x73ee   :  { %11730 = vmatprep.subr.bf16.mxu0 %v12710_v0 }
0x74bb   :  { %v5177_v17 = vpop.f32.mrb[50].mxu0 }
0x74bc   :  { %v5182_v40 = vrot.slane %v5177_v17, 4  ;;  %v10928_v41 = vpop.f32.mrb[51].mxu0 }
0x74be   :  { %v5184_v42 = vadd.f32 %v5182_v40, %v13469_v58 }
0x74c0   :  { %12330 = vtanh.f32 %v5184_v42  ;;  %v9831_v43 = vmul.f32 -1.442695, %v5184_v42 }
0x74c2   :  { %12332 = vpow2.f32 %v9831_v43 }
0x74ca   :  { %v12331_v37 = vpop.eup %12330 }
0x74cb   :  { %5197 = vrot.lane.b32.xlu1 %v12331_v37, %s12713_s20 }
0x74cc   :  { %v12333_v44 = vpop.eup %12332 }
0x74cd   :  { %v5188_v45 = vadd.f32 1.0, %v12333_v44 }
0x74cf   :  { %12334 = vrcp.f32 %v5188_v45 }
0x74d9   :  { %v12335_v5 = vpop.eup %12334 }
0x74da   :  { %v5195_v3 = vmul.f32 %v12335_v5, %v5193_v50 }
0x753d   :  { %v5198_v46 = vpop.permute.xlu1 %5197 }
0x753e   :  { %v5200_v48 = vmul.f32 %v12335_v5, %v5198_v46 }
0x7540   :  { %5202 = vrot.lane.b32.xlu0 %v5200_v48, %s12714_s21 }
0x75b2   :  { %v5203_v49 = vpop.permute.xlu0 %5202 }
0x75b3   :  { %v5205_v51 = vadd.f32 %v5203_v49, %v5195_v3 }
0x75b5   :  { %12336 = vtanh.f32 %v5205_v51  ;;  %v5300_v10 = vrot.slane %v5205_v51, 6 }
0x75bf   :  { %v12337_v53 = vpop.eup %12336 }
0x75c0   :  { %5208 = vrot.lane.b32.xlu1 %v12337_v53, %s12713_s20 }
0x7632   :  { %v5209_v15 = vpop.permute.xlu1 %5208 }
0x7633   :  { %v5211_v7 = vmul.f32 %v12335_v5, %v5209_v15 }
0x7635   :  { %v5213_v54 = vrot.slane %v5211_v7, 4  ;;  %v5744_v57 = vsel %vm1003_vm4, %v5743_v52, %v5211_v7 }
0x7637   :  { %5214 = vrot.lane.b32.xlu0 %v5213_v54, %s12714_s21 }
0x76a9   :  { %v5215_v55 = vpop.permute.xlu0 %5214 }
0x76aa   :  { %10938 = vmatmul.mubr.msk.f32.vlgmr.msra.gmra.mrb[46].mxu1 %vm158_vm2, %v5215_v55 }
0x76ab   :  { %11726 = vmatpush3.bf16.msra.mxu1 %v13438_v47  ;;  %10959 = vmatprep.mubr.msk.f32.mxu1 %vm12711_vm0, %v12712_v1 }
0x76ac   :  { %11727 = vmatprep.subr.bf16.mxu1 %v12710_v0 }
0x76af   :  { %11729 = vmatpush3.bf16.msra.mxu1 %v13441_v11 }
0x76b0   :  { %11736 = vmatprep.subr.bf16.mxu1 %v12710_v0 }
0x777d   :  { %v5284_v56 = vpop.f32.mrb[46].mxu1 }
0x777e   :  { %v5289_v61 = vrot.slane %v5284_v56, 2  ;;  %v10939_v59 = vpop.f32.mrb[47].mxu1 }
0x7780   :  { %v5291_v60 = vadd.f32 %v5289_v61, %v13469_v58 }
0x7782   :  { %12338 = vtanh.f32 %v5291_v60  ;;  %v9833_v63 = vmul.f32 -1.442695, %v5291_v60 }
0x7784   :  { %12340 = vpow2.f32 %v9833_v63 }
0x778c   :  { %v12339_v8 = vpop.eup %12338 }
0x778d   :  { %5304 = vrot.lane.b32.xlu1 %v12339_v8, %s12713_s20 }
0x778e   :  { %v12341_v2 = vpop.eup %12340 }
0x778f   :  { %v5295_v4 = vadd.f32 1.0, %v12341_v2 }
0x7791   :  { %12342 = vrcp.f32 %v5295_v4 }
0x779b   :  { %v12343_v12 = vpop.eup %12342 }
0x779c   :  { %v5302_v13 = vmul.f32 %v12343_v12, %v5300_v10 }
0x77ff   :  { %v5305_v6 = vpop.permute.xlu1 %5304 }
0x7800   :  { %v5307_v9 = vmul.f32 %v12343_v12, %v5305_v6 }
0x7802   :  { %5309 = vrot.lane.b32.xlu0 %v5307_v9, %s12714_s21 }
0x7874   :  { %v5310_v16 = vpop.permute.xlu0 %5309 }
0x7875   :  { %v5312_v18 = vadd.f32 %v5310_v16, %v5302_v13 }
0x7877   :  { %12344 = vtanh.f32 %v5312_v18  ;;  %v5404_v33 = vrot.slane %v5312_v18, 6 }
0x7881   :  { %v12345_v58 = vpop.eup %12344 }
0x7882   :  { %5315 = vrot.lane.b32.xlu1 %v12345_v58, %s12713_s20 }
0x78f4   :  { %v5316_v19 = vpop.permute.xlu1 %5315 }
0x78f5   :  { %v5318_v20 = vmul.f32 %v12343_v12, %v5316_v19 }
0x78f7   :  { %v5320_v21 = vrot.slane %v5318_v20, 6  ;;  %v13518_v62 = vsel %vm1005_vm5, %v5744_v57, %v5318_v20 }
0x78f9   :  { %5321 = vrot.lane.b32.xlu0 %v5320_v21, %s12714_s21 }
0x796b   :  { %v5322_v22 = vpop.permute.xlu0 %5321 }
0x796c   :  { %10949 = vmatmul.mubr.msk.f32.vlgmr.msra.gmra.mrb[52].mxu0 %vm158_vm2, %v5322_v22 }
0x796d   :  { %11732 = vmatpush3.bf16.msra.mxu0 %v13438_v47  ;;  %10970 = vmatprep.mubr.msk.f32.mxu0 %vm12711_vm0, %v12712_v1 }
0x796e   :  { %11733 = vmatprep.subr.bf16.mxu0 %v12710_v0 }
0x7971   :  { %11735 = vmatpush3.bf16.msra.mxu0 %v13441_v11 }
0x7a3f   :  { %v5391_v23 = vpop.f32.mrb[52].mxu0 }
0x7a40   :  { %v5395_v24 = vadd.f32 %v5391_v23, %v13467_v14  ;;  %v10950_v25 = vpop.f32.mrb[53].mxu0 }
0x7a42   :  { %12346 = vtanh.f32 %v5395_v24  ;;  %v9835_v27 = vmul.f32 -1.442695, %v5395_v24 }
0x7a44   :  { %12348 = vpow2.f32 %v9835_v27 }
0x7a4c   :  { %v12347_v26 = vpop.eup %12346 }
0x7a4d   :  { %5408 = vrot.lane.b32.xlu1 %v12347_v26, %s12713_s20 }
0x7a4e   :  { %v12349_v28 = vpop.eup %12348 }
0x7a4f   :  { %v5399_v29 = vadd.f32 1.0, %v12349_v28 }
0x7a51   :  { %12350 = vrcp.f32 %v5399_v29 }
0x7a5b   :  { %v12351_v30 = vpop.eup %12350 }
0x7a5c   :  { %v5406_v34 = vmul.f32 %v12351_v30, %v5404_v33 }
0x7abf   :  { %v5409_v31 = vpop.permute.xlu1 %5408 }
0x7ac0   :  { %v5411_v32 = vmul.f32 %v12351_v30, %v5409_v31 }
0x7ac2   :  { %5413 = vrot.lane.b32.xlu0 %v5411_v32, %s12714_s21 }
0x7b34   :  { %v5414_v35 = vpop.permute.xlu0 %5413 }
0x7b35   :  { %v5416_v36 = vadd.f32 %v5414_v35, %v5406_v34 }
0x7b37   :  { %12352 = vtanh.f32 %v5416_v36 }
0x7b41   :  { %v12353_v38 = vpop.eup %12352 }
0x7b42   :  { %5419 = vrot.lane.b32.xlu1 %v12353_v38, %s12713_s20 }
0x7bb4   :  { %v5420_v39 = vpop.permute.xlu1 %5419 }
0x7bb5   :  { %v13531_v17 = vmul.f32 %v12351_v30, %v5420_v39  ;;  %v5750_v39 = vld [vmem:[#allocation2 + $0xa0] sm:$0xff] }
0x7bb7   :  { %5424 = vrot.lane.b32.xlu0 %v13531_v17, %s12714_s21 }
0x7c29   :  { %v5425_v40 = vpop.permute.xlu0 %5424 }
0x7c2a   :  { %10960 = vmatmul.mubr.msk.f32.vlgmr.msra.gmra.mrb[48].mxu1 %vm158_vm2, %v5425_v40  ;;  %v5848_v40 = vld [vmem:[#allocation5 + $0xc0] sm:$0xff] }
0x7c2b   :  { %11738 = vmatpush3.bf16.msra.mxu1 %v13438_v47  ;;  %10981 = vmatprep.mubr.msk.f32.mxu1 %vm12711_vm0, %v12712_v1 }
0x7c2c   :  { %11739 = vmatprep.subr.bf16.mxu1 %v12710_v0 }
0x7c2f   :  { %11741 = vmatpush3.bf16.msra.mxu1 %v13441_v11  ;;  %v5510_v11 = vrot.slane %v5416_v36, 6 }
0x7c30   :  { %11750 = vmatprep.subr.bf16.mxu1 %v12710_v0 }
0x7cfd   :  { %v5494_v41 = vpop.f32.mrb[48].mxu1 }
0x7cfe   :  { %v5499_v42 = vrot.slane %v5494_v41, 6  ;;  %v10961_v37 = vpop.f32.mrb[49].mxu1 }
0x7cff   :  { %v5752_v37 = vld [vmem:[#allocation2 + $0xb0] sm:$0xff] }
0x7d00   :  { %v5501_v43 = vadd.f32 %v5499_v42, %v13467_v14  ;;  %v5849_v42 = vld [vmem:[#allocation5 + $0xc8] sm:$0xff] }
0x7d02   :  { %12354 = vtanh.f32 %v5501_v43  ;;  %v9837_v45 = vmul.f32 -1.442695, %v5501_v43  ;;  %v5753_v43 = vld [vmem:[#allocation2 + $0xb8] sm:$0xff] }
0x7d04   :  { %12356 = vpow2.f32 %v9837_v45  ;;  %v11746_v45 = vpack.c.bf16 %v5753_v43, %v5752_v37 }
0x7d0c   :  { %v12355_v44 = vpop.eup %12354 }
0x7d0d   :  { %5514 = vrot.lane.b32.xlu1 %v12355_v44, %s12713_s20  ;;  %v13565_v44 = vpack.c.bf16 %v5849_v42, %v5848_v40 }
0x7d0e   :  { %v12357_v47 = vpop.eup %12356 }
0x7d0f   :  { %v5505_v5 = vadd.f32 1.0, %v12357_v47  ;;  %v5850_v47 = vld [vmem:[#allocation5 + $0xd0] sm:$0xff] }
0x7d11   :  { %12358 = vrcp.f32 %v5505_v5 }
0x7d1b   :  { %v12359_v46 = vpop.eup %12358 }
0x7d1c   :  { %v5512_v3 = vmul.f32 %v12359_v46, %v5510_v11 }
0x7d7f   :  { %v5515_v48 = vpop.permute.xlu1 %5514 }
0x7d80   :  { %v5517_v50 = vmul.f32 %v12359_v46, %v5515_v48 }
0x7d82   :  { %5519 = vrot.lane.b32.xlu0 %v5517_v50, %s12714_s21 }
0x7df4   :  { %v5520_v49 = vpop.permute.xlu0 %5519 }
0x7df5   :  { %v5522_v51 = vadd.f32 %v5520_v49, %v5512_v3 }
0x7df7   :  { %12360 = vtanh.f32 %v5522_v51  ;;  %v5617_v6 = vrot.slane %v5522_v51, 6 }
0x7e01   :  { %v12361_v53 = vpop.eup %12360 }
0x7e02   :  { %5525 = vrot.lane.b32.xlu1 %v12361_v53, %s12713_s20  ;;  %v9843_v53 = vld [vmem:[%s14123_s4 + $0x6] ss:$0 sm:$0xff] }
0x7e74   :  { %v5526_v15 = vpop.permute.xlu1 %5525 }
0x7e75   :  { %v5528_v7 = vmul.f32 %v12359_v46, %v5526_v15 }
0x7e77   :  { %v5530_v52 = vrot.slane %v5528_v7, 2  ;;  %v5746_v19 = vsel %vm1001_vm3, %v13531_v17, %v5528_v7  ;;  %v5751_v17 = vld [vmem:[#allocation2 + $0xa8] sm:$0xff] }
0x7e78   :  { %v11742_v41 = vpack.c.bf16 %v5751_v17, %v5750_v39 }
0x7e79   :  { %5531 = vrot.lane.b32.xlu0 %v5530_v52, %s12714_s21 }
0x7e7a   :  { %11743 = vmatprep.subr.bf16.mxu0 %v11742_v41 }
0x7eeb   :  { %v5532_v54 = vpop.permute.xlu0 %5531 }
0x7eec   :  { %10971 = vmatmul.mubr.msk.f32.vlgmr.msra.gmra.mrb[54].mxu0 %vm158_vm2, %v5532_v54 }
0x7eed   :  { %11745 = vmatpush3.bf16.msra.mxu0 %v11742_v41 }
0x7eee   :  { %11747 = vmatprep.subr.bf16.mxu0 %v11746_v45 }
0x7ef1   :  { %11749 = vmatpush3.bf16.msra.mxu0 %v11746_v45 }
0x7ef2   :  { %11756 = vmatprep.subr.bf16.mxu0 %v12710_v0 }
0x7fbf   :  { %v5601_v57 = vpop.f32.mrb[54].mxu0 }
0x7fc0   :  { %v5606_v55 = vrot.slane %v5601_v57, 4  ;;  %v10972_v56 = vpop.f32.mrb[55].mxu0 }
0x7fc2   :  { %v5608_v61 = vadd.f32 %v5606_v55, %v13467_v14 }
0x7fc4   :  { %12362 = vtanh.f32 %v5608_v61  ;;  %v9839_v60 = vmul.f32 -1.442695, %v5608_v61 }
0x7fc6   :  { %12364 = vpow2.f32 %v9839_v60 }
0x7fce   :  { %v12363_v59 = vpop.eup %12362 }
0x7fcf   :  { %5621 = vrot.lane.b32.xlu1 %v12363_v59, %s12713_s20 }
0x7fd0   :  { %v12365_v8 = vpop.eup %12364 }
0x7fd1   :  { %v5612_v63 = vadd.f32 1.0, %v12365_v8 }
0x7fd3   :  { %12366 = vrcp.f32 %v5612_v63 }
0x7fdd   :  { %v12367_v2 = vpop.eup %12366 }
0x7fde   :  { %v5619_v9 = vmul.f32 %v12367_v2, %v5617_v6 }
0x8041   :  { %v5622_v4 = vpop.permute.xlu1 %5621 }
0x8042   :  { %v5624_v12 = vmul.f32 %v12367_v2, %v5622_v4 }
0x8044   :  { %5626 = vrot.lane.b32.xlu0 %v5624_v12, %s12714_s21 }
0x80b6   :  { %v5627_v10 = vpop.permute.xlu0 %5626 }
0x80b7   :  { %v5629_v13 = vadd.f32 %v5627_v10, %v5619_v9 }
0x80b9   :  { %12368 = vtanh.f32 %v5629_v13  ;;  %v5724_v34 = vrot.slane %v5629_v13, 6 }
0x80c3   :  { %v12369_v16 = vpop.eup %12368 }
0x80c4   :  { %5632 = vrot.lane.b32.xlu1 %v12369_v16, %s12713_s20 }
0x8136   :  { %v5633_v18 = vpop.permute.xlu1 %5632 }
0x8137   :  { %v5635_v58 = vmul.f32 %v12367_v2, %v5633_v18 }
0x8139   :  { %v5637_v20 = vrot.slane %v5635_v58, 4  ;;  %v5747_v21 = vsel %vm1003_vm4, %v5746_v19, %v5635_v58 }
0x813b   :  { %5638 = vrot.lane.b32.xlu0 %v5637_v20, %s12714_s21 }
0x81ad   :  { %v5639_v22 = vpop.permute.xlu0 %5638 }
0x81ae   :  { %10982 = vmatmul.mubr.msk.f32.vlgmr.msra.gmra.mrb[50].mxu1 %vm158_vm2, %v5639_v22 }
0x81af   :  { %11003 = vmatprep.mubr.msk.f32.mxu1 %vm12711_vm0, %v12712_v1  ;;  %11752 = vmatpush3.bf16.msra.mxu1 %v13565_v44 }
0x81b0   :  { %11753 = vmatprep.subr.bf16.mxu1 %v12710_v0 }
0x8281   :  { %v5708_v23 = vpop.f32.mrb[50].mxu1 }
0x8282   :  { %v5713_v24 = vrot.slane %v5708_v23, 2  ;;  %v10983_v25 = vpop.f32.mrb[51].mxu1 }
0x8284   :  { %v5715_v26 = vadd.f32 %v5713_v24, %v13467_v14 }
0x8286   :  { %12370 = vtanh.f32 %v5715_v26  ;;  %v9841_v28 = vmul.f32 -1.442695, %v5715_v26 }
0x8288   :  { %12372 = vpow2.f32 %v9841_v28 }
0x8290   :  { %v12371_v27 = vpop.eup %12370 }
0x8291   :  { %5728 = vrot.lane.b32.xlu1 %v12371_v27, %s12713_s20 }
0x8292   :  { %v12373_v29 = vpop.eup %12372 }
0x8293   :  { %v5719_v30 = vadd.f32 1.0, %v12373_v29 }
0x8295   :  { %12374 = vrcp.f32 %v5719_v30 }
0x829f   :  { %v12375_v31 = vpop.eup %12374 }
0x82a0   :  { %v5726_v35 = vmul.f32 %v12375_v31, %v5724_v34 }
0x8303   :  { %v5729_v32 = vpop.permute.xlu1 %5728 }
0x8304   :  { %v5731_v33 = vmul.f32 %v12375_v31, %v5729_v32 }
0x8306   :  { %5733 = vrot.lane.b32.xlu0 %v5731_v33, %s12714_s21 }
0x830a   :  { %5764 = vrot.lane.b32.xlu0 %v13518_v62, %s12714_s21  ;;  %v5851_v62 = vld [vmem:[#allocation5 + $0xd8] sm:$0xff] }
0x830b   :  { %v13568_v5 = vpack.c.bf16 %v5851_v62, %v5850_v47 }
0x830d   :  { %11755 = vmatpush3.bf16.msra.mxu1 %v13568_v5 }
0x830e   :  { %11762 = vmatprep.subr.bf16.mxu1 %v12710_v0 }
0x8310   :  { %11004 = vmatmul.mubr.f32.vlgmr.msra.gmra.mrb[52].mxu1 %v12712_v1 }
0x8311   :  { %11764 = vmatpush3.bf16.msra.mxu1 %v13565_v44  ;;  %11025 = vmatprep.mubr.msk.f32.mxu1 %vm12711_vm0, %v12712_v1 }
0x8312   :  { %11765 = vmatprep.subr.bf16.mxu1 %v12710_v0 }
0x8315   :  { %11767 = vmatpush3.bf16.msra.mxu1 %v13568_v5 }
0x8316   :  { %11774 = vmatprep.subr.bf16.mxu1 %v12710_v0 }
0x8378   :  { %v5734_v14 = vpop.permute.xlu0 %5733 }
0x8379   :  { %v5736_v36 = vadd.f32 %v5734_v14, %v5726_v35 }
0x837b   :  { %12376 = vtanh.f32 %v5736_v36 }
0x837c   :  { %v5765_v38 = vpop.permute.xlu0 %5764 }
0x837d   :  { %10992 = vmatprep.mubr.msk.f32.mxu0 %vm158_vm2, %v5765_v38 }
0x8385   :  { %v12377_v46 = vpop.eup %12376 }
0x8386   :  { %5739 = vrot.lane.b32.xlu1 %v12377_v46, %s12713_s20 }
0x83e3   :  { %v5918_v49 = vpop.f32.mrb[52].mxu1 }
0x83e4   :  { %v11005_v51 = vpop.f32.mrb[53].mxu1 }
0x83f8   :  { %v5740_v48 = vpop.permute.xlu1 %5739 }
0x83f9   :  { %v5742_v50 = vmul.f32 %v12375_v31, %v5740_v48 }
0x83fb   :  { %v5748_v11 = vsel %vm1005_vm5, %v5747_v21, %v5742_v50 }
0x83fc   :  { %5766 = vrot.lane.b32.xlu1 %v5748_v11, %s12714_s21 }
0x846e   :  { %v5767_v3 = vpop.permute.xlu1 %5766 }
0x846f   :  { %10993 = vmatmul.mubr.msk.f32.vlgmr.msra.gmra.mrb[56].mxu0 %vm158_vm2, %v5767_v3 }
0x8470   :  { %11758 = vmatpush3.bf16.msra.mxu0 %v13565_v44  ;;  %11014 = vmatprep.mubr.msk.f32.mxu0 %vm12711_vm0, %v12712_v1 }
0x8471   :  { %11759 = vmatprep.subr.bf16.mxu0 %v12710_v0 }
0x8474   :  { %11761 = vmatpush3.bf16.msra.mxu0 %v13568_v5 }
0x8475   :  { %11768 = vmatprep.subr.bf16.mxu0 %v12710_v0 }
0x8542   :  { %v10994_v15 = vpop.f32.mrb[56].mxu0 }
0x8543   :  { %v13594_v7 = vadd.f32 %v10994_v15, %v9843_v53  ;;  %v5838_v52 = vpop.f32.mrb[57].mxu0 }
0x8544   :  { %v13596_v54 = vadd.f32 %v9843_v53, %v5838_v52 }
0x8546   :  { %v5922_v57 = vadd.f32 %v5918_v49, %v13596_v54 }
0x8548   :  { %12378 = vtanh.f32 %v5922_v57  ;;  %v9846_v56 = vmul.f32 -1.442695, %v5922_v57 }
0x854a   :  { %12380 = vpow2.f32 %v9846_v56 }
0x8552   :  { %v12379_v55 = vpop.eup %12378 }
0x8553   :  { %5932 = vrot.lane.b32.xlu0 %v12379_v55, %s12713_s20 }
0x8554   :  { %v12381_v61 = vpop.eup %12380 }
0x8555   :  { %v5926_v59 = vadd.f32 1.0, %v12381_v61 }
0x8557   :  { %12382 = vrcp.f32 %v5926_v59 }
0x8561   :  { %v12383_v60 = vpop.eup %12382 }
0x8562   :  { %v5930_v2 = vmul.f32 0.0, %v12383_v60 }
0x85c5   :  { %v5933_v8 = vpop.permute.xlu0 %5932 }
0x85c6   :  { %v5935_v63 = vmul.f32 %v12383_v60, %v5933_v8 }
0x85c8   :  { %5937 = vrot.lane.b32.xlu1 %v5935_v63, %s12714_s21 }
0x863a   :  { %v5938_v4 = vpop.permute.xlu1 %5937 }
0x863b   :  { %v5940_v12 = vadd.f32 %v5938_v4, %v5930_v2 }
0x863d   :  { %12384 = vtanh.f32 %v5940_v12  ;;  %v6034_v27 = vrot.slane %v5940_v12, 6 }
0x8647   :  { %v12385_v6 = vpop.eup %12384 }
0x8648   :  { %5943 = vrot.lane.b32.xlu0 %v12385_v6, %s12713_s20 }
0x86ba   :  { %v5944_v9 = vpop.permute.xlu0 %5943 }
0x86bb   :  { %v13602_v10 = vmul.f32 %v12383_v60, %v5944_v9 }
0x86bd   :  { %5948 = vrot.lane.b32.xlu1 %v13602_v10, %s12714_s21 }
0x872f   :  { %v5949_v13 = vpop.permute.xlu1 %5948 }
0x8730   :  { %11015 = vmatmul.mubr.msk.f32.vlgmr.msra.gmra.mrb[58].mxu0 %vm158_vm2, %v5949_v13 }
0x8731   :  { %11770 = vmatpush3.bf16.msra.mxu0 %v13565_v44  ;;  %11036 = vmatprep.mubr.msk.f32.mxu0 %vm12711_vm0, %v12712_v1 }
0x8732   :  { %11771 = vmatprep.subr.bf16.mxu0 %v12710_v0 }
0x8735   :  { %11773 = vmatpush3.bf16.msra.mxu0 %v13568_v5 }
0x8736   :  { %11780 = vmatprep.subr.bf16.mxu0 %v12710_v0 }
0x8803   :  { %v6018_v16 = vpop.f32.mrb[58].mxu0 }
0x8804   :  { %v6023_v18 = vrot.slane %v6018_v16, 6  ;;  %v11016_v58 = vpop.f32.mrb[59].mxu0 }
0x8806   :  { %v6025_v19 = vadd.f32 %v6023_v18, %v13596_v54 }
0x8808   :  { %12386 = vtanh.f32 %v6025_v19  ;;  %v9848_v21 = vmul.f32 -1.442695, %v6025_v19 }
0x880a   :  { %12388 = vpow2.f32 %v9848_v21 }
0x8812   :  { %v12387_v20 = vpop.eup %12386 }
0x8813   :  { %6038 = vrot.lane.b32.xlu0 %v12387_v20, %s12713_s20 }
0x8814   :  { %v12389_v22 = vpop.eup %12388 }
0x8815   :  { %v6029_v23 = vadd.f32 1.0, %v12389_v22 }
0x8817   :  { %12390 = vrcp.f32 %v6029_v23 }
0x8821   :  { %v12391_v24 = vpop.eup %12390 }
0x8822   :  { %v6036_v28 = vmul.f32 %v12391_v24, %v6034_v27 }
0x8885   :  { %v6039_v25 = vpop.permute.xlu0 %6038 }
0x8886   :  { %v6041_v26 = vmul.f32 %v12391_v24, %v6039_v25 }
0x8888   :  { %6043 = vrot.lane.b32.xlu1 %v6041_v26, %s12714_s21 }
0x88fa   :  { %v6044_v29 = vpop.permute.xlu1 %6043 }
0x88fb   :  { %v6046_v30 = vadd.f32 %v6044_v29, %v6036_v28 }
0x88fd   :  { %12392 = vtanh.f32 %v6046_v30  ;;  %v6141_v47 = vrot.slane %v6046_v30, 6 }
0x8907   :  { %v12393_v31 = vpop.eup %12392 }
0x8908   :  { %6049 = vrot.lane.b32.xlu0 %v12393_v31, %s12713_s20 }
0x897a   :  { %v6050_v32 = vpop.permute.xlu0 %6049 }
0x897b   :  { %v6052_v33 = vmul.f32 %v12391_v24, %v6050_v32 }
0x897d   :  { %v6054_v34 = vrot.slane %v6052_v33, 2  ;;  %v6691_v49 = vsel %vm1001_vm3, %v13602_v10, %v6052_v33 }
0x897f   :  { %6055 = vrot.lane.b32.xlu1 %v6054_v34, %s12714_s21 }
0x89f1   :  { %v6056_v35 = vpop.permute.xlu1 %6055 }
0x89f2   :  { %11026 = vmatmul.mubr.msk.f32.vlgmr.msra.gmra.mrb[54].mxu1 %vm158_vm2, %v6056_v35 }
0x89f3   :  { %11776 = vmatpush3.bf16.msra.mxu1 %v13565_v44  ;;  %11047 = vmatprep.mubr.msk.f32.mxu1 %vm12711_vm0, %v12712_v1 }
0x89f4   :  { %11777 = vmatprep.subr.bf16.mxu1 %v12710_v0 }
0x89f7   :  { %11779 = vmatpush3.bf16.msra.mxu1 %v13568_v5 }
0x89f8   :  { %11786 = vmatprep.subr.bf16.mxu1 %v12710_v0 }
0x8ac5   :  { %v6125_v14 = vpop.f32.mrb[54].mxu1 }
0x8ac6   :  { %v6130_v36 = vrot.slane %v6125_v14, 4  ;;  %v11027_v38 = vpop.f32.mrb[55].mxu1 }
0x8ac8   :  { %v6132_v39 = vadd.f32 %v6130_v36, %v13596_v54 }
0x8aca   :  { %12394 = vtanh.f32 %v6132_v39  ;;  %v9850_v40 = vmul.f32 -1.442695, %v6132_v39 }
0x8acc   :  { %12396 = vpow2.f32 %v9850_v40 }
0x8ad4   :  { %v12395_v17 = vpop.eup %12394 }
0x8ad5   :  { %6145 = vrot.lane.b32.xlu0 %v12395_v17, %s12713_s20 }
0x8ad6   :  { %v12397_v41 = vpop.eup %12396 }
0x8ad7   :  { %v6136_v42 = vadd.f32 1.0, %v12397_v41 }
0x8ad9   :  { %12398 = vrcp.f32 %v6136_v42 }
0x8ae3   :  { %v12399_v37 = vpop.eup %12398 }
0x8ae4   :  { %v6143_v62 = vmul.f32 %v12399_v37, %v6141_v47 }
0x8b47   :  { %v6146_v43 = vpop.permute.xlu0 %6145 }
0x8b48   :  { %v6148_v45 = vmul.f32 %v12399_v37, %v6146_v43 }
0x8b4a   :  { %6150 = vrot.lane.b32.xlu1 %v6148_v45, %s12714_s21 }
0x8bbc   :  { %v6151_v46 = vpop.permute.xlu1 %6150 }
0x8bbd   :  { %v6153_v48 = vadd.f32 %v6151_v46, %v6143_v62 }
0x8bbf   :  { %12400 = vtanh.f32 %v6153_v48  ;;  %v6248_v12 = vrot.slane %v6153_v48, 6 }
0x8bc9   :  { %v12401_v50 = vpop.eup %12400 }
0x8bca   :  { %6156 = vrot.lane.b32.xlu0 %v12401_v50, %s12713_s20 }
0x8c3c   :  { %v6157_v11 = vpop.permute.xlu0 %6156 }
0x8c3d   :  { %v6159_v3 = vmul.f32 %v12399_v37, %v6157_v11 }
0x8c3f   :  { %v6161_v51 = vrot.slane %v6159_v3, 4  ;;  %v6692_v53 = vsel %vm1003_vm4, %v6691_v49, %v6159_v3 }
0x8c41   :  { %6162 = vrot.lane.b32.xlu1 %v6161_v51, %s12714_s21 }
0x8cb3   :  { %v6163_v15 = vpop.permute.xlu1 %6162 }
0x8cb4   :  { %11037 = vmatmul.mubr.msk.f32.vlgmr.msra.gmra.mrb[60].mxu0 %vm158_vm2, %v6163_v15 }
0x8cb5   :  { %11782 = vmatpush3.bf16.msra.mxu0 %v13565_v44  ;;  %11058 = vmatprep.mubr.msk.f32.mxu0 %vm12711_vm0, %v12712_v1 }
0x8cb6   :  { %11783 = vmatprep.subr.bf16.mxu0 %v12710_v0 }
0x8cb9   :  { %11785 = vmatpush3.bf16.msra.mxu0 %v13568_v5 }
0x8cba   :  { %11792 = vmatprep.subr.bf16.mxu0 %v12710_v0 }
0x8d87   :  { %v6232_v52 = vpop.f32.mrb[60].mxu0 }
0x8d88   :  { %v6237_v57 = vrot.slane %v6232_v52, 2  ;;  %v11038_v55 = vpop.f32.mrb[61].mxu0 }
0x8d8a   :  { %v6239_v56 = vadd.f32 %v6237_v57, %v13596_v54 }
0x8d8c   :  { %12402 = vtanh.f32 %v6239_v56  ;;  %v9852_v59 = vmul.f32 -1.442695, %v6239_v56 }
0x8d8e   :  { %12404 = vpow2.f32 %v9852_v59 }
0x8d96   :  { %v12403_v61 = vpop.eup %12402 }
0x8d97   :  { %6252 = vrot.lane.b32.xlu0 %v12403_v61, %s12713_s20 }
0x8d98   :  { %v12405_v60 = vpop.eup %12404 }
0x8d99   :  { %v6243_v8 = vadd.f32 1.0, %v12405_v60 }
0x8d9b   :  { %12406 = vrcp.f32 %v6243_v8 }
0x8da5   :  { %v12407_v63 = vpop.eup %12406 }
0x8da6   :  { %v6250_v6 = vmul.f32 %v12407_v63, %v6248_v12 }
0x8e09   :  { %v6253_v2 = vpop.permute.xlu0 %6252 }
0x8e0a   :  { %v6255_v4 = vmul.f32 %v12407_v63, %v6253_v2 }
0x8e0c   :  { %6257 = vrot.lane.b32.xlu1 %v6255_v4, %s12714_s21 }
0x8e7e   :  { %v6258_v9 = vpop.permute.xlu1 %6257 }
0x8e7f   :  { %v6260_v10 = vadd.f32 %v6258_v9, %v6250_v6 }
0x8e81   :  { %12408 = vtanh.f32 %v6260_v10  ;;  %v6352_v30 = vrot.slane %v6260_v10, 6 }
0x8e8b   :  { %v12409_v54 = vpop.eup %12408 }
0x8e8c   :  { %6263 = vrot.lane.b32.xlu0 %v12409_v54, %s12713_s20 }
0x8efe   :  { %v6264_v13 = vpop.permute.xlu0 %6263 }
0x8eff   :  { %v6266_v16 = vmul.f32 %v12407_v63, %v6264_v13 }
0x8f01   :  { %v6268_v18 = vrot.slane %v6266_v16, 6  ;;  %v13645_v58 = vsel %vm1005_vm5, %v6692_v53, %v6266_v16 }
0x8f03   :  { %6269 = vrot.lane.b32.xlu1 %v6268_v18, %s12714_s21 }
0x8f75   :  { %v6270_v19 = vpop.permute.xlu1 %6269 }
0x8f76   :  { %11048 = vmatmul.mubr.msk.f32.vlgmr.msra.gmra.mrb[56].mxu1 %vm158_vm2, %v6270_v19 }
0x8f77   :  { %11788 = vmatpush3.bf16.msra.mxu1 %v13565_v44  ;;  %11069 = vmatprep.mubr.msk.f32.mxu1 %vm12711_vm0, %v12712_v1 }
0x8f78   :  { %11789 = vmatprep.subr.bf16.mxu1 %v12710_v0 }
0x8f7b   :  { %11791 = vmatpush3.bf16.msra.mxu1 %v13568_v5 }
0x9049   :  { %v6339_v20 = vpop.f32.mrb[56].mxu1 }
0x904a   :  { %v6343_v21 = vadd.f32 %v6339_v20, %v13594_v7  ;;  %v11049_v22 = vpop.f32.mrb[57].mxu1 }
0x904c   :  { %12410 = vtanh.f32 %v6343_v21  ;;  %v9854_v24 = vmul.f32 -1.442695, %v6343_v21 }
0x904e   :  { %12412 = vpow2.f32 %v9854_v24 }
0x9056   :  { %v12411_v23 = vpop.eup %12410 }
0x9057   :  { %6356 = vrot.lane.b32.xlu0 %v12411_v23, %s12713_s20 }
0x9058   :  { %v12413_v25 = vpop.eup %12412 }
0x9059   :  { %v6347_v26 = vadd.f32 1.0, %v12413_v25 }
0x905b   :  { %12414 = vrcp.f32 %v6347_v26 }
0x9065   :  { %v12415_v27 = vpop.eup %12414 }
0x9066   :  { %v6354_v31 = vmul.f32 %v12415_v27, %v6352_v30 }
0x90c9   :  { %v6357_v28 = vpop.permute.xlu0 %6356 }
0x90ca   :  { %v6359_v29 = vmul.f32 %v12415_v27, %v6357_v28 }
0x90cc   :  { %6361 = vrot.lane.b32.xlu1 %v6359_v29, %s12714_s21 }
0x913e   :  { %v6362_v32 = vpop.permute.xlu1 %6361 }
0x913f   :  { %v6364_v33 = vadd.f32 %v6362_v32, %v6354_v31 }
0x9141   :  { %12416 = vtanh.f32 %v6364_v33 }
0x914b   :  { %v12417_v34 = vpop.eup %12416 }
0x914c   :  { %6367 = vrot.lane.b32.xlu0 %v12417_v34, %s12713_s20 }
0x91be   :  { %v6368_v35 = vpop.permute.xlu0 %6367 }
0x91bf   :  { %v13658_v14 = vmul.f32 %v12415_v27, %v6368_v35  ;;  %v6698_v35 = vld [vmem:[#allocation2 + $0xc0] sm:$0xff] }
0x91c1   :  { %6372 = vrot.lane.b32.xlu1 %v13658_v14, %s12714_s21 }
0x9233   :  { %v6373_v36 = vpop.permute.xlu1 %6372 }
0x9234   :  { %11059 = vmatmul.mubr.msk.f32.vlgmr.msra.gmra.mrb[62].mxu0 %vm158_vm2, %v6373_v36  ;;  %v6796_v36 = vld [vmem:[#allocation5 + $0xe0] sm:$0xff] }
0x9235   :  { %11794 = vmatpush3.bf16.msra.mxu0 %v13565_v44  ;;  %11080 = vmatprep.mubr.msk.f32.mxu0 %vm12711_vm0, %v12712_v1 }
0x9236   :  { %11795 = vmatprep.subr.bf16.mxu0 %v12710_v0 }
0x9239   :  { %11797 = vmatpush3.bf16.msra.mxu0 %v13568_v5  ;;  %v6458_v5 = vrot.slane %v6364_v33, 6 }
0x923a   :  { %11806 = vmatprep.subr.bf16.mxu0 %v12710_v0 }
0x9307   :  { %v6442_v38 = vpop.f32.mrb[62].mxu0 }
0x9308   :  { %v6447_v39 = vrot.slane %v6442_v38, 6  ;;  %v11060_v17 = vpop.f32.mrb[63].mxu0 }
0x9309   :  { %v6700_v17 = vld [vmem:[#allocation2 + $0xd0] sm:$0xff] }
0x930a   :  { %v6449_v40 = vadd.f32 %v6447_v39, %v13594_v7  ;;  %v6797_v39 = vld [vmem:[#allocation5 + $0xe8] sm:$0xff] }
0x930c   :  { %12418 = vtanh.f32 %v6449_v40  ;;  %v9856_v42 = vmul.f32 -1.442695, %v6449_v40  ;;  %v6701_v40 = vld [vmem:[#allocation2 + $0xd8] sm:$0xff] }
0x930e   :  { %12420 = vpow2.f32 %v9856_v42  ;;  %v11802_v42 = vpack.c.bf16 %v6701_v40, %v6700_v17 }
0x9316   :  { %v12419_v41 = vpop.eup %12418 }
0x9317   :  { %6462 = vrot.lane.b32.xlu0 %v12419_v41, %s12713_s20  ;;  %v13692_v41 = vpack.c.bf16 %v6797_v39, %v6796_v36 }
0x9318   :  { %v12421_v44 = vpop.eup %12420 }
0x9319   :  { %v6453_v37 = vadd.f32 1.0, %v12421_v44  ;;  %v6798_v44 = vld [vmem:[#allocation5 + $0xf0] sm:$0xff] }
0x931b   :  { %12422 = vrcp.f32 %v6453_v37 }
0x9325   :  { %v12423_v43 = vpop.eup %12422 }
0x9326   :  { %v6460_v62 = vmul.f32 %v12423_v43, %v6458_v5 }
0x9389   :  { %v6463_v45 = vpop.permute.xlu0 %6462 }
0x938a   :  { %v6465_v47 = vmul.f32 %v12423_v43, %v6463_v45 }
0x938c   :  { %6467 = vrot.lane.b32.xlu1 %v6465_v47, %s12714_s21 }
0x93fe   :  { %v6468_v46 = vpop.permute.xlu1 %6467 }
0x93ff   :  { %v6470_v48 = vadd.f32 %v6468_v46, %v6460_v62 }
0x9401   :  { %12424 = vtanh.f32 %v6470_v48  ;;  %v6565_v2 = vrot.slane %v6470_v48, 6 }
0x940b   :  { %v12425_v50 = vpop.eup %12424 }
0x940c   :  { %6473 = vrot.lane.b32.xlu0 %v12425_v50, %s12713_s20  ;;  %v9862_v50 = vld [vmem:[%s14123_s4 + $0x7] ss:$0 sm:$0xff] }
0x947e   :  { %v6474_v11 = vpop.permute.xlu0 %6473 }
0x947f   :  { %v6476_v3 = vmul.f32 %v12423_v43, %v6474_v11 }
0x9481   :  { %v6478_v49 = vrot.slane %v6476_v3, 2  ;;  %v6694_v13 = vsel %vm1001_vm3, %v13658_v14, %v6476_v3  ;;  %v6699_v14 = vld [vmem:[#allocation2 + $0xc8] sm:$0xff] }
0x9482   :  { %v11798_v38 = vpack.c.bf16 %v6699_v14, %v6698_v35 }
0x9483   :  { %6479 = vrot.lane.b32.xlu1 %v6478_v49, %s12714_s21 }
0x9484   :  { %11799 = vmatprep.subr.bf16.mxu1 %v11798_v38 }
0x94f5   :  { %v6480_v51 = vpop.permute.xlu1 %6479 }
0x94f6   :  { %11070 = vmatmul.mubr.msk.f32.vlgmr.msra.gmra.mrb[58].mxu1 %vm158_vm2, %v6480_v51 }
0x94f7   :  { %11801 = vmatpush3.bf16.msra.mxu1 %v11798_v38 }
0x94f8   :  { %11803 = vmatprep.subr.bf16.mxu1 %v11802_v42 }
0x94fb   :  { %11805 = vmatpush3.bf16.msra.mxu1 %v11802_v42 }
0x94fc   :  { %11812 = vmatprep.subr.bf16.mxu1 %v12710_v0 }
0x95c9   :  { %v6549_v53 = vpop.f32.mrb[58].mxu1 }
0x95ca   :  { %v6554_v15 = vrot.slane %v6549_v53, 4  ;;  %v11071_v52 = vpop.f32.mrb[59].mxu1 }
0x95cc   :  { %v6556_v57 = vadd.f32 %v6554_v15, %v13594_v7 }
0x95ce   :  { %12426 = vtanh.f32 %v6556_v57  ;;  %v9858_v56 = vmul.f32 -1.442695, %v6556_v57 }
0x95d0   :  { %12428 = vpow2.f32 %v9858_v56 }
0x95d8   :  { %v12427_v55 = vpop.eup %12426 }
0x95d9   :  { %6569 = vrot.lane.b32.xlu0 %v12427_v55, %s12713_s20 }
0x95da   :  { %v12429_v61 = vpop.eup %12428 }
0x95db   :  { %v6560_v59 = vadd.f32 1.0, %v12429_v61 }
0x95dd   :  { %12430 = vrcp.f32 %v6560_v59 }
0x95e7   :  { %v12431_v60 = vpop.eup %12430 }
0x95e8   :  { %v6567_v4 = vmul.f32 %v12431_v60, %v6565_v2 }
0x964b   :  { %v6570_v8 = vpop.permute.xlu0 %6569 }
0x964c   :  { %v6572_v63 = vmul.f32 %v12431_v60, %v6570_v8 }
0x964e   :  { %6574 = vrot.lane.b32.xlu1 %v6572_v63, %s12714_s21 }
0x96c0   :  { %v6575_v12 = vpop.permute.xlu1 %6574 }
0x96c1   :  { %v6577_v6 = vadd.f32 %v6575_v12, %v6567_v4 }
0x96c3   :  { %12432 = vtanh.f32 %v6577_v6  ;;  %v6672_v31 = vrot.slane %v6577_v6, 6 }
0x96cd   :  { %v12433_v9 = vpop.eup %12432 }
0x96ce   :  { %6580 = vrot.lane.b32.xlu0 %v12433_v9, %s12713_s20 }
0x9740   :  { %v6581_v10 = vpop.permute.xlu0 %6580 }
0x9741   :  { %v6583_v54 = vmul.f32 %v12431_v60, %v6581_v10 }
0x9743   :  { %v6585_v16 = vrot.slane %v6583_v54, 4  ;;  %v6695_v18 = vsel %vm1003_vm4, %v6694_v13, %v6583_v54 }
0x9745   :  { %6586 = vrot.lane.b32.xlu1 %v6585_v16, %s12714_s21 }
0x97b7   :  { %v6587_v19 = vpop.permute.xlu1 %6586 }
0x97b8   :  { %11081 = vmatmul.mubr.msk.f32.vlgmr.msra.gmra.mrb[64].mxu0 %vm158_vm2, %v6587_v19 }
0x97b9   :  { %11102 = vmatprep.mubr.msk.f32.mxu0 %vm12711_vm0, %v12712_v1  ;;  %11808 = vmatpush3.bf16.msra.mxu0 %v13692_v41 }
0x97ba   :  { %11809 = vmatprep.subr.bf16.mxu0 %v12710_v0 }
0x988b   :  { %v6656_v20 = vpop.f32.mrb[64].mxu0 }
0x988c   :  { %v6661_v21 = vrot.slane %v6656_v20, 2  ;;  %v11082_v22 = vpop.f32.mrb[65].mxu0 }
0x988e   :  { %v6663_v23 = vadd.f32 %v6661_v21, %v13594_v7 }
0x9890   :  { %12434 = vtanh.f32 %v6663_v23  ;;  %v9860_v25 = vmul.f32 -1.442695, %v6663_v23 }
0x9892   :  { %12436 = vpow2.f32 %v9860_v25 }
0x989a   :  { %v12435_v24 = vpop.eup %12434 }
0x989b   :  { %6676 = vrot.lane.b32.xlu0 %v12435_v24, %s12713_s20 }
0x989c   :  { %v12437_v26 = vpop.eup %12436 }
0x989d   :  { %v6667_v27 = vadd.f32 1.0, %v12437_v26 }
0x989f   :  { %12438 = vrcp.f32 %v6667_v27 }
0x98a9   :  { %v12439_v28 = vpop.eup %12438 }
0x98aa   :  { %v6674_v32 = vmul.f32 %v12439_v28, %v6672_v31 }
0x990d   :  { %v6677_v29 = vpop.permute.xlu0 %6676 }
0x990e   :  { %v6679_v30 = vmul.f32 %v12439_v28, %v6677_v29 }
0x9910   :  { %6681 = vrot.lane.b32.xlu1 %v6679_v30, %s12714_s21 }
0x9914   :  { %6712 = vrot.lane.b32.xlu1 %v13645_v58, %s12714_s21  ;;  %v6799_v58 = vld [vmem:[#allocation5 + $0xf8] sm:$0xff] }
0x9915   :  { %v13695_v37 = vpack.c.bf16 %v6799_v58, %v6798_v44 }
0x9917   :  { %11811 = vmatpush3.bf16.msra.mxu0 %v13695_v37 }
0x9918   :  { %11818 = vmatprep.subr.bf16.mxu0 %v12710_v0 }
0x991a   :  { %11103 = vmatmul.mubr.f32.vlgmr.msra.gmra.mrb[66].mxu0 %v12712_v1 }
0x991b   :  { %11820 = vmatpush3.bf16.msra.mxu0 %v13692_v41  ;;  %11124 = vmatprep.mubr.msk.f32.mxu0 %vm12711_vm0, %v12712_v1 }
0x991c   :  { %11821 = vmatprep.subr.bf16.mxu0 %v12710_v0 }
0x991f   :  { %11823 = vmatpush3.bf16.msra.mxu0 %v13695_v37 }
0x9920   :  { %11830 = vmatprep.subr.bf16.mxu0 %v12710_v0 }
0x9982   :  { %v6682_v7 = vpop.permute.xlu1 %6681 }
0x9983   :  { %v6684_v33 = vadd.f32 %v6682_v7, %v6674_v32 }
0x9985   :  { %12440 = vtanh.f32 %v6684_v33 }
0x9986   :  { %v6713_v34 = vpop.permute.xlu1 %6712 }
0x9987   :  { %11091 = vmatprep.mubr.msk.f32.mxu1 %vm158_vm2, %v6713_v34 }
0x998f   :  { %v12441_v43 = vpop.eup %12440 }
0x9990   :  { %6687 = vrot.lane.b32.xlu0 %v12441_v43, %s12713_s20 }
0x99ed   :  { %v6866_v46 = vpop.f32.mrb[66].mxu0 }
0x99ee   :  { %v11104_v48 = vpop.f32.mrb[67].mxu0 }
0x9a02   :  { %v6688_v45 = vpop.permute.xlu0 %6687 }
0x9a03   :  { %v6690_v47 = vmul.f32 %v12439_v28, %v6688_v45 }
0x9a05   :  { %v6696_v5 = vsel %vm1005_vm5, %v6695_v18, %v6690_v47 }
0x9a06   :  { %6714 = vrot.lane.b32.xlu0 %v6696_v5, %s12714_s21 }
0x9a78   :  { %v6715_v62 = vpop.permute.xlu0 %6714 }
0x9a79   :  { %11092 = vmatmul.mubr.msk.f32.vlgmr.msra.gmra.mrb[60].mxu1 %vm158_vm2, %v6715_v62 }
0x9a7a   :  { %11814 = vmatpush3.bf16.msra.mxu1 %v13692_v41  ;;  %11113 = vmatprep.mubr.msk.f32.mxu1 %vm12711_vm0, %v12712_v1 }
0x9a7b   :  { %11815 = vmatprep.subr.bf16.mxu1 %v12710_v0 }
0x9a7e   :  { %11817 = vmatpush3.bf16.msra.mxu1 %v13695_v37 }
0x9a7f   :  { %11824 = vmatprep.subr.bf16.mxu1 %v12710_v0 }
0x9b4c   :  { %v11093_v11 = vpop.f32.mrb[60].mxu1 }
0x9b4d   :  { %v13721_v3 = vadd.f32 %v11093_v11, %v9862_v50  ;;  %v6786_v49 = vpop.f32.mrb[61].mxu1 }
0x9b4e   :  { %v13723_v51 = vadd.f32 %v9862_v50, %v6786_v49 }
0x9b50   :  { %v6870_v53 = vadd.f32 %v6866_v46, %v13723_v51 }
0x9b52   :  { %12442 = vtanh.f32 %v6870_v53  ;;  %v9865_v52 = vmul.f32 -1.442695, %v6870_v53 }
0x9b54   :  { %12444 = vpow2.f32 %v9865_v52 }
0x9b5c   :  { %v12443_v15 = vpop.eup %12442 }
0x9b5d   :  { %6880 = vrot.lane.b32.xlu1 %v12443_v15, %s12713_s20 }
0x9b5e   :  { %v12445_v57 = vpop.eup %12444 }
0x9b5f   :  { %v6874_v55 = vadd.f32 1.0, %v12445_v57 }
0x9b61   :  { %12446 = vrcp.f32 %v6874_v55 }
0x9b6b   :  { %v12447_v56 = vpop.eup %12446 }
0x9b6c   :  { %v6878_v60 = vmul.f32 0.0, %v12447_v56 }
0x9bcf   :  { %v6881_v61 = vpop.permute.xlu1 %6880 }
0x9bd0   :  { %v6883_v59 = vmul.f32 %v12447_v56, %v6881_v61 }
0x9bd2   :  { %6885 = vrot.lane.b32.xlu0 %v6883_v59, %s12714_s21 }
0x9c44   :  { %v6886_v8 = vpop.permute.xlu0 %6885 }
0x9c45   :  { %v6888_v63 = vadd.f32 %v6886_v8, %v6878_v60 }
0x9c47   :  { %12448 = vtanh.f32 %v6888_v63  ;;  %v6982_v24 = vrot.slane %v6888_v63, 6 }
0x9c51   :  { %v12449_v2 = vpop.eup %12448 }
0x9c52   :  { %6891 = vrot.lane.b32.xlu1 %v12449_v2, %s12713_s20 }
0x9cc4   :  { %v6892_v4 = vpop.permute.xlu1 %6891 }
0x9cc5   :  { %v13729_v12 = vmul.f32 %v12447_v56, %v6892_v4 }
0x9cc7   :  { %6896 = vrot.lane.b32.xlu0 %v13729_v12, %s12714_s21 }
0x9d39   :  { %v6897_v6 = vpop.permute.xlu0 %6896 }
0x9d3a   :  { %11114 = vmatmul.mubr.msk.f32.vlgmr.msra.gmra.mrb[62].mxu1 %vm158_vm2, %v6897_v6 }
0x9d3b   :  { %11826 = vmatpush3.bf16.msra.mxu1 %v13692_v41  ;;  %11135 = vmatprep.mubr.msk.f32.mxu1 %vm12711_vm0, %v12712_v1 }
0x9d3c   :  { %11827 = vmatprep.subr.bf16.mxu1 %v12710_v0 }
0x9d3f   :  { %11829 = vmatpush3.bf16.msra.mxu1 %v13695_v37 }
0x9d40   :  { %11836 = vmatprep.subr.bf16.mxu1 %v12710_v0 }
0x9e0d   :  { %v6966_v9 = vpop.f32.mrb[62].mxu1 }
0x9e0e   :  { %v6971_v10 = vrot.slane %v6966_v9, 6  ;;  %v11115_v54 = vpop.f32.mrb[63].mxu1 }
0x9e10   :  { %v6973_v13 = vadd.f32 %v6971_v10, %v13723_v51 }
0x9e12   :  { %12450 = vtanh.f32 %v6973_v13  ;;  %v9867_v18 = vmul.f32 -1.442695, %v6973_v13 }
0x9e14   :  { %12452 = vpow2.f32 %v9867_v18 }
0x9e1c   :  { %v12451_v16 = vpop.eup %12450 }
0x9e1d   :  { %6986 = vrot.lane.b32.xlu1 %v12451_v16, %s12713_s20 }
0x9e1e   :  { %v12453_v19 = vpop.eup %12452 }
0x9e1f   :  { %v6977_v20 = vadd.f32 1.0, %v12453_v19 }
0x9e21   :  { %12454 = vrcp.f32 %v6977_v20 }
0x9e2b   :  { %v12455_v21 = vpop.eup %12454 }
0x9e2c   :  { %v6984_v25 = vmul.f32 %v12455_v21, %v6982_v24 }
0x9e8f   :  { %v6987_v22 = vpop.permute.xlu1 %6986 }
0x9e90   :  { %v6989_v23 = vmul.f32 %v12455_v21, %v6987_v22 }
0x9e92   :  { %6991 = vrot.lane.b32.xlu0 %v6989_v23, %s12714_s21 }
0x9f04   :  { %v6992_v26 = vpop.permute.xlu0 %6991 }
0x9f05   :  { %v6994_v27 = vadd.f32 %v6992_v26, %v6984_v25 }
0x9f07   :  { %12456 = vtanh.f32 %v6994_v27  ;;  %v7089_v44 = vrot.slane %v6994_v27, 6 }
0x9f11   :  { %v12457_v28 = vpop.eup %12456 }
0x9f12   :  { %6997 = vrot.lane.b32.xlu1 %v12457_v28, %s12713_s20 }
0x9f84   :  { %v6998_v29 = vpop.permute.xlu1 %6997 }
0x9f85   :  { %v7000_v30 = vmul.f32 %v12455_v21, %v6998_v29 }
0x9f87   :  { %v7002_v31 = vrot.slane %v7000_v30, 2  ;;  %v7639_v46 = vsel %vm1001_vm3, %v13729_v12, %v7000_v30 }
0x9f89   :  { %7003 = vrot.lane.b32.xlu0 %v7002_v31, %s12714_s21 }
0x9ffb   :  { %v7004_v32 = vpop.permute.xlu0 %7003 }
0x9ffc   :  { %11125 = vmatmul.mubr.msk.f32.vlgmr.msra.gmra.mrb[68].mxu0 %vm158_vm2, %v7004_v32 }
0x9ffd   :  { %11832 = vmatpush3.bf16.msra.mxu0 %v13692_v41  ;;  %11146 = vmatprep.mubr.msk.f32.mxu0 %vm12711_vm0, %v12712_v1 }
0x9ffe   :  { %11833 = vmatprep.subr.bf16.mxu0 %v12710_v0 }
0xa001   :  { %11835 = vmatpush3.bf16.msra.mxu0 %v13695_v37 }
0xa002   :  { %11842 = vmatprep.subr.bf16.mxu0 %v12710_v0 }
0xa0cf   :  { %v7073_v7 = vpop.f32.mrb[68].mxu0 }
0xa0d0   :  { %v7078_v33 = vrot.slane %v7073_v7, 4  ;;  %v11126_v34 = vpop.f32.mrb[69].mxu0 }
0xa0d2   :  { %v7080_v35 = vadd.f32 %v7078_v33, %v13723_v51 }
0xa0d4   :  { %12458 = vtanh.f32 %v7080_v35  ;;  %v9869_v36 = vmul.f32 -1.442695, %v7080_v35 }
0xa0d6   :  { %12460 = vpow2.f32 %v9869_v36 }
0xa0de   :  { %v12459_v14 = vpop.eup %12458 }
0xa0df   :  { %7093 = vrot.lane.b32.xlu1 %v12459_v14, %s12713_s20 }
0xa0e0   :  { %v12461_v38 = vpop.eup %12460 }
0xa0e1   :  { %v7084_v39 = vadd.f32 1.0, %v12461_v38 }
0xa0e3   :  { %12462 = vrcp.f32 %v7084_v39 }
0xa0ed   :  { %v12463_v17 = vpop.eup %12462 }
0xa0ee   :  { %v7091_v58 = vmul.f32 %v12463_v17, %v7089_v44 }
0xa151   :  { %v7094_v40 = vpop.permute.xlu1 %7093 }
0xa152   :  { %v7096_v42 = vmul.f32 %v12463_v17, %v7094_v40 }
0xa154   :  { %7098 = vrot.lane.b32.xlu0 %v7096_v42, %s12714_s21 }
0xa1c6   :  { %v7099_v43 = vpop.permute.xlu0 %7098 }
0xa1c7   :  { %v7101_v45 = vadd.f32 %v7099_v43, %v7091_v58 }
0xa1c9   :  { %12464 = vtanh.f32 %v7101_v45  ;;  %v7196_v63 = vrot.slane %v7101_v45, 6 }
0xa1d3   :  { %v12465_v47 = vpop.eup %12464 }
0xa1d4   :  { %7104 = vrot.lane.b32.xlu1 %v12465_v47, %s12713_s20 }
0xa246   :  { %v7105_v5 = vpop.permute.xlu1 %7104 }
0xa247   :  { %v7107_v62 = vmul.f32 %v12463_v17, %v7105_v5 }
0xa249   :  { %v7109_v48 = vrot.slane %v7107_v62, 4  ;;  %v7640_v50 = vsel %vm1003_vm4, %v7639_v46, %v7107_v62 }
0xa24b   :  { %7110 = vrot.lane.b32.xlu0 %v7109_v48, %s12714_s21 }
0xa2bd   :  { %v7111_v11 = vpop.permute.xlu0 %7110 }
0xa2be   :  { %11136 = vmatmul.mubr.msk.f32.vlgmr.msra.gmra.mrb[64].mxu1 %vm158_vm2, %v7111_v11 }
0xa2bf   :  { %11838 = vmatpush3.bf16.msra.mxu1 %v13692_v41  ;;  %11157 = vmatprep.mubr.msk.f32.mxu1 %vm12711_vm0, %v12712_v1 }
0xa2c0   :  { %11839 = vmatprep.subr.bf16.mxu1 %v12710_v0 }
0xa2c3   :  { %11841 = vmatpush3.bf16.msra.mxu1 %v13695_v37 }
0xa2c4   :  { %11848 = vmatprep.subr.bf16.mxu1 %v12710_v0 }
0xa391   :  { %v7180_v49 = vpop.f32.mrb[64].mxu1 }
0xa392   :  { %v7185_v53 = vrot.slane %v7180_v49, 2  ;;  %v11137_v15 = vpop.f32.mrb[65].mxu1 }
0xa394   :  { %v7187_v52 = vadd.f32 %v7185_v53, %v13723_v51 }
0xa396   :  { %12466 = vtanh.f32 %v7187_v52  ;;  %v9871_v55 = vmul.f32 -1.442695, %v7187_v52 }
0xa398   :  { %12468 = vpow2.f32 %v9871_v55 }
0xa3a0   :  { %v12467_v57 = vpop.eup %12466 }
0xa3a1   :  { %7200 = vrot.lane.b32.xlu1 %v12467_v57, %s12713_s20 }
0xa3a2   :  { %v12469_v56 = vpop.eup %12468 }
0xa3a3   :  { %v7191_v61 = vadd.f32 1.0, %v12469_v56 }
0xa3a5   :  { %12470 = vrcp.f32 %v7191_v61 }
0xa3af   :  { %v12471_v59 = vpop.eup %12470 }
0xa3b0   :  { %v7198_v2 = vmul.f32 %v12471_v59, %v7196_v63 }
0xa413   :  { %v7201_v60 = vpop.permute.xlu1 %7200 }
0xa414   :  { %v7203_v8 = vmul.f32 %v12471_v59, %v7201_v60 }
0xa416   :  { %7205 = vrot.lane.b32.xlu0 %v7203_v8, %s12714_s21 }
0xa488   :  { %v7206_v4 = vpop.permute.xlu0 %7205 }
0xa489   :  { %v7208_v12 = vadd.f32 %v7206_v4, %v7198_v2 }
0xa48b   :  { %12472 = vtanh.f32 %v7208_v12  ;;  %v7300_v27 = vrot.slane %v7208_v12, 6 }
0xa495   :  { %v12473_v51 = vpop.eup %12472 }
0xa496   :  { %7211 = vrot.lane.b32.xlu1 %v12473_v51, %s12713_s20 }
0xa508   :  { %v7212_v6 = vpop.permute.xlu1 %7211 }
0xa509   :  { %v7214_v9 = vmul.f32 %v12471_v59, %v7212_v6 }
0xa50b   :  { %v7216_v10 = vrot.slane %v7214_v9, 6  ;;  %v13772_v54 = vsel %vm1005_vm5, %v7640_v50, %v7214_v9 }
0xa50d   :  { %7217 = vrot.lane.b32.xlu0 %v7216_v10, %s12714_s21 }
0xa57f   :  { %v7218_v13 = vpop.permute.xlu0 %7217 }
0xa580   :  { %11147 = vmatmul.mubr.msk.f32.vlgmr.msra.gmra.mrb[70].mxu0 %vm158_vm2, %v7218_v13 }
0xa581   :  { %11844 = vmatpush3.bf16.msra.mxu0 %v13692_v41  ;;  %11168 = vmatprep.mubr.msk.f32.mxu0 %vm12711_vm0, %v12712_v1 }
0xa582   :  { %11845 = vmatprep.subr.bf16.mxu0 %v12710_v0 }
0xa585   :  { %11847 = vmatpush3.bf16.msra.mxu0 %v13695_v37 }
0xa653   :  { %v7287_v16 = vpop.f32.mrb[70].mxu0 }
0xa654   :  { %v7291_v18 = vadd.f32 %v7287_v16, %v13721_v3  ;;  %v11148_v19 = vpop.f32.mrb[71].mxu0 }
0xa656   :  { %12474 = vtanh.f32 %v7291_v18  ;;  %v9873_v21 = vmul.f32 -1.442695, %v7291_v18 }
0xa658   :  { %12476 = vpow2.f32 %v9873_v21 }
0xa660   :  { %v12475_v20 = vpop.eup %12474 }
0xa661   :  { %7304 = vrot.lane.b32.xlu1 %v12475_v20, %s12713_s20 }
0xa662   :  { %v12477_v22 = vpop.eup %12476 }
0xa663   :  { %v7295_v23 = vadd.f32 1.0, %v12477_v22 }
0xa665   :  { %12478 = vrcp.f32 %v7295_v23 }
0xa66f   :  { %v12479_v24 = vpop.eup %12478 }
0xa670   :  { %v7302_v28 = vmul.f32 %v12479_v24, %v7300_v27 }
0xa6d3   :  { %v7305_v25 = vpop.permute.xlu1 %7304 }
0xa6d4   :  { %v7307_v26 = vmul.f32 %v12479_v24, %v7305_v25 }
0xa6d6   :  { %7309 = vrot.lane.b32.xlu0 %v7307_v26, %s12714_s21 }
0xa748   :  { %v7310_v29 = vpop.permute.xlu0 %7309 }
0xa749   :  { %v7312_v30 = vadd.f32 %v7310_v29, %v7302_v28 }
0xa74b   :  { %12480 = vtanh.f32 %v7312_v30 }
0xa755   :  { %v12481_v31 = vpop.eup %12480 }
0xa756   :  { %7315 = vrot.lane.b32.xlu1 %v12481_v31, %s12713_s20 }
0xa7c8   :  { %v7316_v32 = vpop.permute.xlu1 %7315 }
0xa7c9   :  { %v13785_v7 = vmul.f32 %v12479_v24, %v7316_v32  ;;  %v7646_v32 = vld [vmem:[#allocation2 + $0xe0] sm:$0xff] }
0xa7cb   :  { %7320 = vrot.lane.b32.xlu0 %v13785_v7, %s12714_s21 }
0xa83d   :  { %v7321_v33 = vpop.permute.xlu0 %7320 }
0xa83e   :  { %11158 = vmatmul.mubr.msk.f32.vlgmr.msra.gmra.mrb[66].mxu1 %vm158_vm2, %v7321_v33  ;;  %v7744_v33 = vld [vmem:[#allocation5 + $0x100] sm:$0xff] }
0xa83f   :  { %11850 = vmatpush3.bf16.msra.mxu1 %v13692_v41  ;;  %11179 = vmatprep.mubr.msk.f32.mxu1 %vm12711_vm0, %v12712_v1 }
0xa840   :  { %11851 = vmatprep.subr.bf16.mxu1 %v12710_v0 }
0xa843   :  { %11853 = vmatpush3.bf16.msra.mxu1 %v13695_v37  ;;  %v7406_v37 = vrot.slane %v7312_v30, 6 }
0xa844   :  { %11862 = vmatprep.subr.bf16.mxu1 %v12710_v0 }
0xa911   :  { %v7390_v34 = vpop.f32.mrb[66].mxu1 }
0xa912   :  { %v7395_v35 = vrot.slane %v7390_v34, 6  ;;  %v11159_v14 = vpop.f32.mrb[67].mxu1 }
0xa913   :  { %v7648_v14 = vld [vmem:[#allocation2 + $0xf0] sm:$0xff] }
0xa914   :  { %v7397_v36 = vadd.f32 %v7395_v35, %v13721_v3  ;;  %v7745_v35 = vld [vmem:[#allocation5 + $0x108] sm:$0xff] }
0xa916   :  { %12482 = vtanh.f32 %v7397_v36  ;;  %v9875_v39 = vmul.f32 -1.442695, %v7397_v36  ;;  %v7649_v36 = vld [vmem:[#allocation2 + $0xf8] sm:$0xff] }
0xa918   :  { %12484 = vpow2.f32 %v9875_v39  ;;  %v11858_v39 = vpack.c.bf16 %v7649_v36, %v7648_v14 }
0xa920   :  { %v12483_v38 = vpop.eup %12482 }
0xa921   :  { %7410 = vrot.lane.b32.xlu1 %v12483_v38, %s12713_s20  ;;  %v13819_v38 = vpack.c.bf16 %v7745_v35, %v7744_v33 }
0xa922   :  { %v12485_v41 = vpop.eup %12484 }
0xa923   :  { %v7401_v17 = vadd.f32 1.0, %v12485_v41  ;;  %v7746_v41 = vld [vmem:[#allocation5 + $0x110] sm:$0xff] }
0xa925   :  { %12486 = vrcp.f32 %v7401_v17 }
0xa92f   :  { %v12487_v40 = vpop.eup %12486 }
0xa930   :  { %v7408_v58 = vmul.f32 %v12487_v40, %v7406_v37 }
0xa993   :  { %v7411_v42 = vpop.permute.xlu1 %7410 }
0xa994   :  { %v7413_v44 = vmul.f32 %v12487_v40, %v7411_v42 }
0xa996   :  { %7415 = vrot.lane.b32.xlu0 %v7413_v44, %s12714_s21 }
0xaa08   :  { %v7416_v43 = vpop.permute.xlu0 %7415 }
0xaa09   :  { %v7418_v45 = vadd.f32 %v7416_v43, %v7408_v58 }
0xaa0b   :  { %12488 = vtanh.f32 %v7418_v45  ;;  %v7513_v60 = vrot.slane %v7418_v45, 6 }
0xaa15   :  { %v12489_v47 = vpop.eup %12488 }
0xaa16   :  { %7421 = vrot.lane.b32.xlu1 %v12489_v47, %s12713_s20  ;;  %v9881_v47 = vld [vmem:[%s14123_s4 + $0x8] ss:$0 sm:$0xff] }
0xaa88   :  { %v7422_v5 = vpop.permute.xlu1 %7421 }
0xaa89   :  { %v7424_v62 = vmul.f32 %v12487_v40, %v7422_v5 }
0xaa8b   :  { %v7426_v46 = vrot.slane %v7424_v62, 2  ;;  %v7642_v6 = vsel %vm1001_vm3, %v13785_v7, %v7424_v62  ;;  %v7647_v7 = vld [vmem:[#allocation2 + $0xe8] sm:$0xff] }
0xaa8c   :  { %v11854_v34 = vpack.c.bf16 %v7647_v7, %v7646_v32 }
0xaa8d   :  { %7427 = vrot.lane.b32.xlu0 %v7426_v46, %s12714_s21 }
0xaa8e   :  { %11855 = vmatprep.subr.bf16.mxu0 %v11854_v34 }
0xaaff   :  { %v7428_v48 = vpop.permute.xlu0 %7427 }
0xab00   :  { %11169 = vmatmul.mubr.msk.f32.vlgmr.msra.gmra.mrb[72].mxu0 %vm158_vm2, %v7428_v48 }
0xab01   :  { %11857 = vmatpush3.bf16.msra.mxu0 %v11854_v34 }
0xab02   :  { %11859 = vmatprep.subr.bf16.mxu0 %v11858_v39 }
0xab05   :  { %11861 = vmatpush3.bf16.msra.mxu0 %v11858_v39 }
0xab06   :  { %11868 = vmatprep.subr.bf16.mxu0 %v12710_v0 }
0xabd3   :  { %v7497_v50 = vpop.f32.mrb[72].mxu0 }
0xabd4   :  { %v7502_v11 = vrot.slane %v7497_v50, 4  ;;  %v11170_v49 = vpop.f32.mrb[73].mxu0 }
0xabd6   :  { %v7504_v53 = vadd.f32 %v7502_v11, %v13721_v3 }
0xabd8   :  { %12490 = vtanh.f32 %v7504_v53  ;;  %v9877_v52 = vmul.f32 -1.442695, %v7504_v53 }
0xabda   :  { %12492 = vpow2.f32 %v9877_v52 }
0xabe2   :  { %v12491_v15 = vpop.eup %12490 }
0xabe3   :  { %7517 = vrot.lane.b32.xlu1 %v12491_v15, %s12713_s20 }
0xabe4   :  { %v12493_v57 = vpop.eup %12492 }
0xabe5   :  { %v7508_v55 = vadd.f32 1.0, %v12493_v57 }
0xabe7   :  { %12494 = vrcp.f32 %v7508_v55 }
0xabf1   :  { %v12495_v56 = vpop.eup %12494 }
0xabf2   :  { %v7515_v8 = vmul.f32 %v12495_v56, %v7513_v60 }
0xac55   :  { %v7518_v61 = vpop.permute.xlu1 %7517 }
0xac56   :  { %v7520_v59 = vmul.f32 %v12495_v56, %v7518_v61 }
0xac58   :  { %7522 = vrot.lane.b32.xlu0 %v7520_v59, %s12714_s21 }
0xacca   :  { %v7523_v63 = vpop.permute.xlu0 %7522 }
0xaccb   :  { %v7525_v2 = vadd.f32 %v7523_v63, %v7515_v8 }
0xaccd   :  { %12496 = vtanh.f32 %v7525_v2  ;;  %v7620_v28 = vrot.slane %v7525_v2, 6 }
0xacd7   :  { %v12497_v4 = vpop.eup %12496 }
0xacd8   :  { %7528 = vrot.lane.b32.xlu1 %v12497_v4, %s12713_s20 }
0xad4a   :  { %v7529_v12 = vpop.permute.xlu1 %7528 }
0xad4b   :  { %v7531_v51 = vmul.f32 %v12495_v56, %v7529_v12 }
0xad4d   :  { %v7533_v9 = vrot.slane %v7531_v51, 4  ;;  %v7643_v10 = vsel %vm1003_vm4, %v7642_v6, %v7531_v51 }
0xad4f   :  { %7534 = vrot.lane.b32.xlu0 %v7533_v9, %s12714_s21 }
0xadc1   :  { %v7535_v13 = vpop.permute.xlu0 %7534 }
0xadc2   :  { %11180 = vmatmul.mubr.msk.f32.vlgmr.msra.gmra.mrb[68].mxu1 %vm158_vm2, %v7535_v13 }
0xadc3   :  { %11201 = vmatprep.mubr.msk.f32.mxu1 %vm12711_vm0, %v12712_v1  ;;  %11864 = vmatpush3.bf16.msra.mxu1 %v13819_v38 }
0xadc4   :  { %11865 = vmatprep.subr.bf16.mxu1 %v12710_v0 }
0xae95   :  { %v7604_v16 = vpop.f32.mrb[68].mxu1 }
0xae96   :  { %v7609_v18 = vrot.slane %v7604_v16, 2  ;;  %v11181_v19 = vpop.f32.mrb[69].mxu1 }
0xae98   :  { %v7611_v20 = vadd.f32 %v7609_v18, %v13721_v3 }
0xae9a   :  { %12498 = vtanh.f32 %v7611_v20  ;;  %v9879_v22 = vmul.f32 -1.442695, %v7611_v20 }
0xae9c   :  { %12500 = vpow2.f32 %v9879_v22 }
0xaea4   :  { %v12499_v21 = vpop.eup %12498 }
0xaea5   :  { %7624 = vrot.lane.b32.xlu1 %v12499_v21, %s12713_s20 }
0xaea6   :  { %v12501_v23 = vpop.eup %12500 }
0xaea7   :  { %v7615_v24 = vadd.f32 1.0, %v12501_v23 }
0xaea9   :  { %12502 = vrcp.f32 %v7615_v24 }
0xaeb3   :  { %v12503_v25 = vpop.eup %12502 }
0xaeb4   :  { %v7622_v29 = vmul.f32 %v12503_v25, %v7620_v28 }
0xaf17   :  { %v7625_v26 = vpop.permute.xlu1 %7624 }
0xaf18   :  { %v7627_v27 = vmul.f32 %v12503_v25, %v7625_v26 }
0xaf1a   :  { %7629 = vrot.lane.b32.xlu0 %v7627_v27, %s12714_s21 }
0xaf1e   :  { %7660 = vrot.lane.b32.xlu0 %v13772_v54, %s12714_s21  ;;  %v7747_v54 = vld [vmem:[#allocation5 + $0x118] sm:$0xff] }
0xaf1f   :  { %v13822_v17 = vpack.c.bf16 %v7747_v54, %v7746_v41 }
0xaf21   :  { %11867 = vmatpush3.bf16.msra.mxu1 %v13822_v17 }
0xaf22   :  { %11874 = vmatprep.subr.bf16.mxu1 %v12710_v0 }
0xaf24   :  { %11202 = vmatmul.mubr.f32.vlgmr.msra.gmra.mrb[70].mxu1 %v12712_v1 }
0xaf25   :  { %11876 = vmatpush3.bf16.msra.mxu1 %v13819_v38  ;;  %11223 = vmatprep.mubr.msk.f32.mxu1 %vm12711_vm0, %v12712_v1 }
0xaf26   :  { %11877 = vmatprep.subr.bf16.mxu1 %v12710_v0 }
0xaf29   :  { %11879 = vmatpush3.bf16.msra.mxu1 %v13822_v17 }
0xaf2a   :  { %11886 = vmatprep.subr.bf16.mxu1 %v12710_v0 }
0xaf8c   :  { %v7630_v3 = vpop.permute.xlu0 %7629 }
0xaf8d   :  { %v7632_v30 = vadd.f32 %v7630_v3, %v7622_v29 }
0xaf8f   :  { %12504 = vtanh.f32 %v7632_v30 }
0xaf90   :  { %v7661_v31 = vpop.permute.xlu0 %7660 }
0xaf91   :  { %11190 = vmatprep.mubr.msk.f32.mxu0 %vm158_vm2, %v7661_v31 }
0xaf99   :  { %v12505_v40 = vpop.eup %12504 }
0xaf9a   :  { %7635 = vrot.lane.b32.xlu1 %v12505_v40, %s12713_s20 }
0xaff7   :  { %v7814_v43 = vpop.f32.mrb[70].mxu1 }
0xaff8   :  { %v11203_v45 = vpop.f32.mrb[71].mxu1 }
0xb00c   :  { %v7636_v42 = vpop.permute.xlu1 %7635 }
0xb00d   :  { %v7638_v44 = vmul.f32 %v12503_v25, %v7636_v42 }
0xb00f   :  { %v7644_v37 = vsel %vm1005_vm5, %v7643_v10, %v7638_v44 }
0xb010   :  { %7662 = vrot.lane.b32.xlu1 %v7644_v37, %s12714_s21 }
0xb082   :  { %v7663_v58 = vpop.permute.xlu1 %7662 }
0xb083   :  { %11191 = vmatmul.mubr.msk.f32.vlgmr.msra.gmra.mrb[74].mxu0 %vm158_vm2, %v7663_v58 }
0xb084   :  { %11870 = vmatpush3.bf16.msra.mxu0 %v13819_v38  ;;  %11212 = vmatprep.mubr.msk.f32.mxu0 %vm12711_vm0, %v12712_v1 }
0xb085   :  { %11871 = vmatprep.subr.bf16.mxu0 %v12710_v0 }
0xb088   :  { %11873 = vmatpush3.bf16.msra.mxu0 %v13822_v17 }
0xb089   :  { %11880 = vmatprep.subr.bf16.mxu0 %v12710_v0 }
0xb156   :  { %v11192_v5 = vpop.f32.mrb[74].mxu0 }
0xb157   :  { %v13848_v62 = vadd.f32 %v11192_v5, %v9881_v47  ;;  %v7734_v46 = vpop.f32.mrb[75].mxu0 }
0xb158   :  { %v13850_v48 = vadd.f32 %v9881_v47, %v7734_v46 }
0xb15a   :  { %v7818_v50 = vadd.f32 %v7814_v43, %v13850_v48 }
0xb15c   :  { %12506 = vtanh.f32 %v7818_v50  ;;  %v9884_v49 = vmul.f32 -1.442695, %v7818_v50 }
0xb15e   :  { %12508 = vpow2.f32 %v9884_v49 }
0xb166   :  { %v12507_v11 = vpop.eup %12506 }
0xb167   :  { %7828 = vrot.lane.b32.xlu0 %v12507_v11, %s12713_s20 }
0xb168   :  { %v12509_v53 = vpop.eup %12508 }
0xb169   :  { %v7822_v15 = vadd.f32 1.0, %v12509_v53 }
0xb16b   :  { %12510 = vrcp.f32 %v7822_v15 }
0xb175   :  { %v12511_v52 = vpop.eup %12510 }
0xb176   :  { %v7826_v56 = vmul.f32 0.0, %v12511_v52 }
0xb1d9   :  { %v7829_v57 = vpop.permute.xlu0 %7828 }
0xb1da   :  { %v7831_v55 = vmul.f32 %v12511_v52, %v7829_v57 }
0xb1dc   :  { %7833 = vrot.lane.b32.xlu1 %v7831_v55, %s12714_s21 }
0xb24e   :  { %v7834_v61 = vpop.permute.xlu1 %7833 }
0xb24f   :  { %v7836_v59 = vadd.f32 %v7834_v61, %v7826_v56 }
0xb251   :  { %12512 = vtanh.f32 %v7836_v59  ;;  %v7930_v21 = vrot.slane %v7836_v59, 6 }
0xb25b   :  { %v12513_v60 = vpop.eup %12512 }
0xb25c   :  { %7839 = vrot.lane.b32.xlu0 %v12513_v60, %s12713_s20 }
0xb2ce   :  { %v7840_v8 = vpop.permute.xlu0 %7839 }
0xb2cf   :  { %v13856_v63 = vmul.f32 %v12511_v52, %v7840_v8 }
0xb2d1   :  { %7844 = vrot.lane.b32.xlu1 %v13856_v63, %s12714_s21 }
0xb343   :  { %v7845_v2 = vpop.permute.xlu1 %7844 }
0xb344   :  { %11213 = vmatmul.mubr.msk.f32.vlgmr.msra.gmra.mrb[76].mxu0 %vm158_vm2, %v7845_v2 }
0xb345   :  { %11882 = vmatpush3.bf16.msra.mxu0 %v13819_v38  ;;  %11234 = vmatprep.mubr.msk.f32.mxu0 %vm12711_vm0, %v12712_v1 }
0xb346   :  { %11883 = vmatprep.subr.bf16.mxu0 %v12710_v0 }
0xb349   :  { %11885 = vmatpush3.bf16.msra.mxu0 %v13822_v17 }
0xb34a   :  { %11892 = vmatprep.subr.bf16.mxu0 %v12710_v0 }
0xb417   :  { %v7914_v4 = vpop.f32.mrb[76].mxu0 }
0xb418   :  { %v7919_v12 = vrot.slane %v7914_v4, 6  ;;  %v11214_v51 = vpop.f32.mrb[77].mxu0 }
0xb41a   :  { %v7921_v6 = vadd.f32 %v7919_v12, %v13850_v48 }
0xb41c   :  { %12514 = vtanh.f32 %v7921_v6  ;;  %v9886_v10 = vmul.f32 -1.442695, %v7921_v6 }
0xb41e   :  { %12516 = vpow2.f32 %v9886_v10 }
0xb426   :  { %v12515_v9 = vpop.eup %12514 }
0xb427   :  { %7934 = vrot.lane.b32.xlu0 %v12515_v9, %s12713_s20 }
0xb428   :  { %v12517_v13 = vpop.eup %12516 }
0xb429   :  { %v7925_v16 = vadd.f32 1.0, %v12517_v13 }
0xb42b   :  { %12518 = vrcp.f32 %v7925_v16 }
0xb435   :  { %v12519_v18 = vpop.eup %12518 }
0xb436   :  { %v7932_v22 = vmul.f32 %v12519_v18, %v7930_v21 }
0xb499   :  { %v7935_v19 = vpop.permute.xlu0 %7934 }
0xb49a   :  { %v7937_v20 = vmul.f32 %v12519_v18, %v7935_v19 }
0xb49c   :  { %7939 = vrot.lane.b32.xlu1 %v7937_v20, %s12714_s21 }
0xb50e   :  { %v7940_v23 = vpop.permute.xlu1 %7939 }
0xb50f   :  { %v7942_v24 = vadd.f32 %v7940_v23, %v7932_v22 }
0xb511   :  { %12520 = vtanh.f32 %v7942_v24  ;;  %v8037_v41 = vrot.slane %v7942_v24, 6 }
0xb51b   :  { %v12521_v25 = vpop.eup %12520 }
0xb51c   :  { %7945 = vrot.lane.b32.xlu0 %v12521_v25, %s12713_s20 }
0xb58e   :  { %v7946_v26 = vpop.permute.xlu0 %7945 }
0xb58f   :  { %v7948_v27 = vmul.f32 %v12519_v18, %v7946_v26 }
0xb591   :  { %v7950_v28 = vrot.slane %v7948_v27, 2  ;;  %v8587_v43 = vsel %vm1001_vm3, %v13856_v63, %v7948_v27 }
0xb593   :  { %7951 = vrot.lane.b32.xlu1 %v7950_v28, %s12714_s21 }
0xb605   :  { %v7952_v29 = vpop.permute.xlu1 %7951 }
0xb606   :  { %11224 = vmatmul.mubr.msk.f32.vlgmr.msra.gmra.mrb[72].mxu1 %vm158_vm2, %v7952_v29 }
0xb607   :  { %11888 = vmatpush3.bf16.msra.mxu1 %v13819_v38  ;;  %11245 = vmatprep.mubr.msk.f32.mxu1 %vm12711_vm0, %v12712_v1 }
0xb608   :  { %11889 = vmatprep.subr.bf16.mxu1 %v12710_v0 }
0xb60b   :  { %11891 = vmatpush3.bf16.msra.mxu1 %v13822_v17 }
0xb60c   :  { %11898 = vmatprep.subr.bf16.mxu1 %v12710_v0 }
0xb6d9   :  { %v8021_v3 = vpop.f32.mrb[72].mxu1 }
0xb6da   :  { %v8026_v30 = vrot.slane %v8021_v3, 4  ;;  %v11225_v31 = vpop.f32.mrb[73].mxu1 }
0xb6dc   :  { %v8028_v32 = vadd.f32 %v8026_v30, %v13850_v48 }
0xb6de   :  { %12522 = vtanh.f32 %v8028_v32  ;;  %v9888_v33 = vmul.f32 -1.442695, %v8028_v32 }
0xb6e0   :  { %12524 = vpow2.f32 %v9888_v33 }
0xb6e8   :  { %v12523_v7 = vpop.eup %12522 }
0xb6e9   :  { %8041 = vrot.lane.b32.xlu0 %v12523_v7, %s12713_s20 }
0xb6ea   :  { %v12525_v34 = vpop.eup %12524 }
0xb6eb   :  { %v8032_v35 = vadd.f32 1.0, %v12525_v34 }
0xb6ed   :  { %12526 = vrcp.f32 %v8032_v35 }
0xb6f7   :  { %v12527_v14 = vpop.eup %12526 }
0xb6f8   :  { %v8039_v54 = vmul.f32 %v12527_v14, %v8037_v41 }
0xb75b   :  { %v8042_v36 = vpop.permute.xlu0 %8041 }
0xb75c   :  { %v8044_v39 = vmul.f32 %v12527_v14, %v8042_v36 }
0xb75e   :  { %8046 = vrot.lane.b32.xlu1 %v8044_v39, %s12714_s21 }
0xb7d0   :  { %v8047_v40 = vpop.permute.xlu1 %8046 }
0xb7d1   :  { %v8049_v42 = vadd.f32 %v8047_v40, %v8039_v54 }
0xb7d3   :  { %12528 = vtanh.f32 %v8049_v42  ;;  %v8144_v59 = vrot.slane %v8049_v42, 6 }
0xb7dd   :  { %v12529_v44 = vpop.eup %12528 }
0xb7de   :  { %8052 = vrot.lane.b32.xlu0 %v12529_v44, %s12713_s20 }
0xb850   :  { %v8053_v37 = vpop.permute.xlu0 %8052 }
0xb851   :  { %v8055_v58 = vmul.f32 %v12527_v14, %v8053_v37 }
0xb853   :  { %v8057_v45 = vrot.slane %v8055_v58, 4  ;;  %v8588_v47 = vsel %vm1003_vm4, %v8587_v43, %v8055_v58 }
0xb855   :  { %8058 = vrot.lane.b32.xlu1 %v8057_v45, %s12714_s21 }
0xb8c7   :  { %v8059_v5 = vpop.permute.xlu1 %8058 }
0xb8c8   :  { %11235 = vmatmul.mubr.msk.f32.vlgmr.msra.gmra.mrb[78].mxu0 %vm158_vm2, %v8059_v5 }
0xb8c9   :  { %11894 = vmatpush3.bf16.msra.mxu0 %v13819_v38  ;;  %11256 = vmatprep.mubr.msk.f32.mxu0 %vm12711_vm0, %v12712_v1 }
0xb8ca   :  { %11895 = vmatprep.subr.bf16.mxu0 %v12710_v0 }
0xb8cd   :  { %11897 = vmatpush3.bf16.msra.mxu0 %v13822_v17 }
0xb8ce   :  { %11904 = vmatprep.subr.bf16.mxu0 %v12710_v0 }
0xb99b   :  { %v8128_v46 = vpop.f32.mrb[78].mxu0 }
0xb99c   :  { %v8133_v50 = vrot.slane %v8128_v46, 2  ;;  %v11236_v11 = vpop.f32.mrb[79].mxu0 }
0xb99e   :  { %v8135_v49 = vadd.f32 %v8133_v50, %v13850_v48 }
0xb9a0   :  { %12530 = vtanh.f32 %v8135_v49  ;;  %v9890_v15 = vmul.f32 -1.442695, %v8135_v49 }
0xb9a2   :  { %12532 = vpow2.f32 %v9890_v15 }
0xb9aa   :  { %v12531_v53 = vpop.eup %12530 }
0xb9ab   :  { %8148 = vrot.lane.b32.xlu0 %v12531_v53, %s12713_s20 }
0xb9ac   :  { %v12533_v52 = vpop.eup %12532 }
0xb9ad   :  { %v8139_v57 = vadd.f32 1.0, %v12533_v52 }
0xb9af   :  { %12534 = vrcp.f32 %v8139_v57 }
0xb9b9   :  { %v12535_v55 = vpop.eup %12534 }
0xb9ba   :  { %v8146_v60 = vmul.f32 %v12535_v55, %v8144_v59 }
0xba1d   :  { %v8149_v56 = vpop.permute.xlu0 %8148 }
0xba1e   :  { %v8151_v61 = vmul.f32 %v12535_v55, %v8149_v56 }
0xba20   :  { %8153 = vrot.lane.b32.xlu1 %v8151_v61, %s12714_s21 }
0xba92   :  { %v8154_v8 = vpop.permute.xlu1 %8153 }
0xba93   :  { %v8156_v63 = vadd.f32 %v8154_v8, %v8146_v60 }
0xba95   :  { %12536 = vtanh.f32 %v8156_v63  ;;  %v8248_v24 = vrot.slane %v8156_v63, 6 }
0xba9f   :  { %v12537_v48 = vpop.eup %12536 }
0xbaa0   :  { %8159 = vrot.lane.b32.xlu0 %v12537_v48, %s12713_s20 }
0xbb12   :  { %v8160_v2 = vpop.permute.xlu0 %8159 }
0xbb13   :  { %v8162_v4 = vmul.f32 %v12535_v55, %v8160_v2 }
0xbb15   :  { %v8164_v12 = vrot.slane %v8162_v4, 6  ;;  %v13899_v51 = vsel %vm1005_vm5, %v8588_v47, %v8162_v4 }
0xbb17   :  { %8165 = vrot.lane.b32.xlu1 %v8164_v12, %s12714_s21 }
0xbb89   :  { %v8166_v6 = vpop.permute.xlu1 %8165 }
0xbb8a   :  { %11246 = vmatmul.mubr.msk.f32.vlgmr.msra.gmra.mrb[74].mxu1 %vm158_vm2, %v8166_v6 }
0xbb8b   :  { %11900 = vmatpush3.bf16.msra.mxu1 %v13819_v38  ;;  %11267 = vmatprep.mubr.msk.f32.mxu1 %vm12711_vm0, %v12712_v1 }
0xbb8c   :  { %11901 = vmatprep.subr.bf16.mxu1 %v12710_v0 }
0xbb8f   :  { %11903 = vmatpush3.bf16.msra.mxu1 %v13822_v17 }
0xbc5d   :  { %v8235_v9 = vpop.f32.mrb[74].mxu1 }
0xbc5e   :  { %v8239_v10 = vadd.f32 %v8235_v9, %v13848_v62  ;;  %v11247_v13 = vpop.f32.mrb[75].mxu1 }
0xbc60   :  { %12538 = vtanh.f32 %v8239_v10  ;;  %v9892_v18 = vmul.f32 -1.442695, %v8239_v10 }
0xbc62   :  { %12540 = vpow2.f32 %v9892_v18 }
0xbc6a   :  { %v12539_v16 = vpop.eup %12538 }
0xbc6b   :  { %8252 = vrot.lane.b32.xlu0 %v12539_v16, %s12713_s20 }
0xbc6c   :  { %v12541_v19 = vpop.eup %12540 }
0xbc6d   :  { %v8243_v20 = vadd.f32 1.0, %v12541_v19 }
0xbc6f   :  { %12542 = vrcp.f32 %v8243_v20 }
0xbc79   :  { %v12543_v21 = vpop.eup %12542 }
0xbc7a   :  { %v8250_v25 = vmul.f32 %v12543_v21, %v8248_v24 }
0xbcdd   :  { %v8253_v22 = vpop.permute.xlu0 %8252 }
0xbcde   :  { %v8255_v23 = vmul.f32 %v12543_v21, %v8253_v22 }
0xbce0   :  { %8257 = vrot.lane.b32.xlu1 %v8255_v23, %s12714_s21 }
0xbd52   :  { %v8258_v26 = vpop.permute.xlu1 %8257 }
0xbd53   :  { %v8260_v27 = vadd.f32 %v8258_v26, %v8250_v25 }
0xbd55   :  { %12544 = vtanh.f32 %v8260_v27 }
0xbd5f   :  { %v12545_v28 = vpop.eup %12544 }
0xbd60   :  { %8263 = vrot.lane.b32.xlu0 %v12545_v28, %s12713_s20 }
0xbdd2   :  { %v8264_v29 = vpop.permute.xlu0 %8263 }
0xbdd3   :  { %v13912_v3 = vmul.f32 %v12543_v21, %v8264_v29  ;;  %v8594_v29 = vld [vmem:[#allocation2 + $0x100] sm:$0xff] }
0xbdd5   :  { %8268 = vrot.lane.b32.xlu1 %v13912_v3, %s12714_s21 }
0xbe47   :  { %v8269_v30 = vpop.permute.xlu1 %8268 }
0xbe48   :  { %11257 = vmatmul.mubr.msk.f32.vlgmr.msra.gmra.mrb[80].mxu0 %vm158_vm2, %v8269_v30  ;;  %v8692_v30 = vld [vmem:[#allocation5 + $0x120] sm:$0xff] }
0xbe49   :  { %11906 = vmatpush3.bf16.msra.mxu0 %v13819_v38  ;;  %11278 = vmatprep.mubr.msk.f32.mxu0 %vm12711_vm0, %v12712_v1 }
0xbe4a   :  { %11907 = vmatprep.subr.bf16.mxu0 %v12710_v0 }
0xbe4d   :  { %11909 = vmatpush3.bf16.msra.mxu0 %v13822_v17  ;;  %v8354_v17 = vrot.slane %v8260_v27, 6 }
0xbe4e   :  { %11918 = vmatprep.subr.bf16.mxu0 %v12710_v0 }
0xbf1b   :  { %v8338_v31 = vpop.f32.mrb[80].mxu0 }
0xbf1c   :  { %v8343_v32 = vrot.slane %v8338_v31, 6  ;;  %v11258_v7 = vpop.f32.mrb[81].mxu0 }
0xbf1d   :  { %v8596_v7 = vld [vmem:[#allocation2 + $0x110] sm:$0xff] }
0xbf1e   :  { %v8345_v33 = vadd.f32 %v8343_v32, %v13848_v62  ;;  %v8693_v32 = vld [vmem:[#allocation5 + $0x128] sm:$0xff] }
0xbf20   :  { %12546 = vtanh.f32 %v8345_v33  ;;  %v9894_v35 = vmul.f32 -1.442695, %v8345_v33  ;;  %v8597_v33 = vld [vmem:[#allocation2 + $0x118] sm:$0xff] }
0xbf22   :  { %12548 = vpow2.f32 %v9894_v35  ;;  %v11914_v35 = vpack.c.bf16 %v8597_v33, %v8596_v7 }
0xbf2a   :  { %v12547_v34 = vpop.eup %12546 }
0xbf2b   :  { %8358 = vrot.lane.b32.xlu0 %v12547_v34, %s12713_s20  ;;  %v13946_v34 = vpack.c.bf16 %v8693_v32, %v8692_v30 }
0xbf2c   :  { %v12549_v38 = vpop.eup %12548 }
0xbf2d   :  { %v8349_v14 = vadd.f32 1.0, %v12549_v38  ;;  %v8694_v38 = vld [vmem:[#allocation5 + $0x130] sm:$0xff] }
0xbf2f   :  { %12550 = vrcp.f32 %v8349_v14 }
0xbf39   :  { %v12551_v36 = vpop.eup %12550 }
0xbf3a   :  { %v8356_v54 = vmul.f32 %v12551_v36, %v8354_v17 }
0xbf9d   :  { %v8359_v39 = vpop.permute.xlu0 %8358 }
0xbf9e   :  { %v8361_v41 = vmul.f32 %v12551_v36, %v8359_v39 }
0xbfa0   :  { %8363 = vrot.lane.b32.xlu1 %v8361_v41, %s12714_s21 }
0xc012   :  { %v8364_v40 = vpop.permute.xlu1 %8363 }
0xc013   :  { %v8366_v42 = vadd.f32 %v8364_v40, %v8356_v54 }
0xc015   :  { %12552 = vtanh.f32 %v8366_v42  ;;  %v8461_v56 = vrot.slane %v8366_v42, 6 }
0xc01f   :  { %v12553_v44 = vpop.eup %12552 }
0xc020   :  { %8369 = vrot.lane.b32.xlu0 %v12553_v44, %s12713_s20  ;;  %v9900_v44 = vld [vmem:[%s14123_s4 + $0x9] ss:$0 sm:$0xff] }
0xc092   :  { %v8370_v37 = vpop.permute.xlu0 %8369 }
0xc093   :  { %v8372_v58 = vmul.f32 %v12551_v36, %v8370_v37 }
0xc095   :  { %v8374_v43 = vrot.slane %v8372_v58, 2  ;;  %v8590_v2 = vsel %vm1001_vm3, %v13912_v3, %v8372_v58  ;;  %v8595_v3 = vld [vmem:[#allocation2 + $0x108] sm:$0xff] }
0xc096   :  { %v11910_v31 = vpack.c.bf16 %v8595_v3, %v8594_v29 }
0xc097   :  { %8375 = vrot.lane.b32.xlu1 %v8374_v43, %s12714_s21 }
0xc098   :  { %11911 = vmatprep.subr.bf16.mxu1 %v11910_v31 }
0xc109   :  { %v8376_v45 = vpop.permute.xlu1 %8375 }
0xc10a   :  { %11268 = vmatmul.mubr.msk.f32.vlgmr.msra.gmra.mrb[76].mxu1 %vm158_vm2, %v8376_v45 }
0xc10b   :  { %11913 = vmatpush3.bf16.msra.mxu1 %v11910_v31 }
0xc10c   :  { %11915 = vmatprep.subr.bf16.mxu1 %v11914_v35 }
0xc10f   :  { %11917 = vmatpush3.bf16.msra.mxu1 %v11914_v35 }
0xc110   :  { %11924 = vmatprep.subr.bf16.mxu1 %v12710_v0 }
0xc1dd   :  { %v8445_v47 = vpop.f32.mrb[76].mxu1 }
0xc1de   :  { %v8450_v5 = vrot.slane %v8445_v47, 4  ;;  %v11269_v46 = vpop.f32.mrb[77].mxu1 }
0xc1e0   :  { %v8452_v50 = vadd.f32 %v8450_v5, %v13848_v62 }
0xc1e2   :  { %12554 = vtanh.f32 %v8452_v50  ;;  %v9896_v49 = vmul.f32 -1.442695, %v8452_v50 }
0xc1e4   :  { %12556 = vpow2.f32 %v9896_v49 }
0xc1ec   :  { %v12555_v11 = vpop.eup %12554 }
0xc1ed   :  { %8465 = vrot.lane.b32.xlu0 %v12555_v11, %s12713_s20 }
0xc1ee   :  { %v12557_v53 = vpop.eup %12556 }
0xc1ef   :  { %v8456_v15 = vadd.f32 1.0, %v12557_v53 }
0xc1f1   :  { %12558 = vrcp.f32 %v8456_v15 }
0xc1fb   :  { %v12559_v52 = vpop.eup %12558 }
0xc1fc   :  { %v8463_v61 = vmul.f32 %v12559_v52, %v8461_v56 }
0xc25f   :  { %v8466_v57 = vpop.permute.xlu0 %8465 }
0xc260   :  { %v8468_v55 = vmul.f32 %v12559_v52, %v8466_v57 }
0xc262   :  { %8470 = vrot.lane.b32.xlu1 %v8468_v55, %s12714_s21 }
0xc2d4   :  { %v8471_v59 = vpop.permute.xlu1 %8470 }
0xc2d5   :  { %v8473_v60 = vadd.f32 %v8471_v59, %v8463_v61 }
0xc2d7   :  { %12560 = vtanh.f32 %v8473_v60  ;;  %v8568_v25 = vrot.slane %v8473_v60, 6 }
0xc2e1   :  { %v12561_v8 = vpop.eup %12560 }
0xc2e2   :  { %8476 = vrot.lane.b32.xlu0 %v12561_v8, %s12713_s20 }
0xc354   :  { %v8477_v63 = vpop.permute.xlu0 %8476 }
0xc355   :  { %v8479_v48 = vmul.f32 %v12559_v52, %v8477_v63 }
0xc357   :  { %v8481_v4 = vrot.slane %v8479_v48, 4  ;;  %v8591_v12 = vsel %vm1003_vm4, %v8590_v2, %v8479_v48 }
0xc359   :  { %8482 = vrot.lane.b32.xlu1 %v8481_v4, %s12714_s21 }
0xc3cb   :  { %v8483_v6 = vpop.permute.xlu1 %8482 }
0xc3cc   :  { %11279 = vmatmul.mubr.msk.f32.vlgmr.msra.gmra.mrb[82].mxu0 %vm158_vm2, %v8483_v6 }
0xc3cd   :  { %11300 = vmatprep.mubr.msk.f32.mxu0 %vm12711_vm0, %v12712_v1  ;;  %11920 = vmatpush3.bf16.msra.mxu0 %v13946_v34 }
0xc3ce   :  { %11921 = vmatprep.subr.bf16.mxu0 %v12710_v0 }
0xc49f   :  { %v8552_v9 = vpop.f32.mrb[82].mxu0 }
0xc4a0   :  { %v8557_v10 = vrot.slane %v8552_v9, 2  ;;  %v11280_v13 = vpop.f32.mrb[83].mxu0 }
0xc4a2   :  { %v8559_v16 = vadd.f32 %v8557_v10, %v13848_v62 }
0xc4a4   :  { %12562 = vtanh.f32 %v8559_v16  ;;  %v9898_v19 = vmul.f32 -1.442695, %v8559_v16 }
0xc4a6   :  { %12564 = vpow2.f32 %v9898_v19 }
0xc4ae   :  { %v12563_v18 = vpop.eup %12562 }
0xc4af   :  { %8572 = vrot.lane.b32.xlu0 %v12563_v18, %s12713_s20 }
0xc4b0   :  { %v12565_v20 = vpop.eup %12564 }
0xc4b1   :  { %v8563_v21 = vadd.f32 1.0, %v12565_v20 }
0xc4b3   :  { %12566 = vrcp.f32 %v8563_v21 }
0xc4bd   :  { %v12567_v22 = vpop.eup %12566 }
0xc4be   :  { %v8570_v26 = vmul.f32 %v12567_v22, %v8568_v25 }
0xc521   :  { %v8573_v23 = vpop.permute.xlu0 %8572 }
0xc522   :  { %v8575_v24 = vmul.f32 %v12567_v22, %v8573_v23 }
0xc524   :  { %8577 = vrot.lane.b32.xlu1 %v8575_v24, %s12714_s21 }
0xc528   :  { %8608 = vrot.lane.b32.xlu1 %v13899_v51, %s12714_s21  ;;  %v8695_v51 = vld [vmem:[#allocation5 + $0x138] sm:$0xff] }
0xc529   :  { %v13949_v14 = vpack.c.bf16 %v8695_v51, %v8694_v38 }
0xc52b   :  { %11923 = vmatpush3.bf16.msra.mxu0 %v13949_v14 }
0xc52c   :  { %11930 = vmatprep.subr.bf16.mxu0 %v12710_v0 }
0xc52e   :  { %11301 = vmatmul.mubr.f32.vlgmr.msra.gmra.mrb[84].mxu0 %v12712_v1 }
0xc52f   :  { %11932 = vmatpush3.bf16.msra.mxu0 %v13946_v34  ;;  %11322 = vmatprep.mubr.msk.f32.mxu0 %vm12711_vm0, %v12712_v1 }
0xc530   :  { %11933 = vmatprep.subr.bf16.mxu0 %v12710_v0 }
0xc533   :  { %11935 = vmatpush3.bf16.msra.mxu0 %v13949_v14 }
0xc534   :  { %11942 = vmatprep.subr.bf16.mxu0 %v12710_v0 }
0xc596   :  { %v8578_v62 = vpop.permute.xlu1 %8577 }
0xc597   :  { %v8580_v27 = vadd.f32 %v8578_v62, %v8570_v26 }
0xc599   :  { %12568 = vtanh.f32 %v8580_v27 }
0xc59a   :  { %v8609_v28 = vpop.permute.xlu1 %8608 }
0xc59b   :  { %11289 = vmatprep.mubr.msk.f32.mxu1 %vm158_vm2, %v8609_v28 }
0xc5a3   :  { %v12569_v36 = vpop.eup %12568 }
0xc5a4   :  { %8583 = vrot.lane.b32.xlu0 %v12569_v36, %s12713_s20 }
0xc601   :  { %v8762_v40 = vpop.f32.mrb[84].mxu0 }
0xc602   :  { %v11302_v42 = vpop.f32.mrb[85].mxu0 }
0xc616   :  { %v8584_v39 = vpop.permute.xlu0 %8583 }
0xc617   :  { %v8586_v41 = vmul.f32 %v12567_v22, %v8584_v39 }
0xc619   :  { %v8592_v17 = vsel %vm1005_vm5, %v8591_v12, %v8586_v41 }
0xc61a   :  { %8610 = vrot.lane.b32.xlu0 %v8592_v17, %s12714_s21 }
0xc68c   :  { %v8611_v54 = vpop.permute.xlu0 %8610 }
0xc68d   :  { %11290 = vmatmul.mubr.msk.f32.vlgmr.msra.gmra.mrb[78].mxu1 %vm158_vm2, %v8611_v54 }
0xc68e   :  { %11926 = vmatpush3.bf16.msra.mxu1 %v13946_v34  ;;  %11311 = vmatprep.mubr.msk.f32.mxu1 %vm12711_vm0, %v12712_v1 }
0xc68f   :  { %11927 = vmatprep.subr.bf16.mxu1 %v12710_v0 }
0xc692   :  { %11929 = vmatpush3.bf16.msra.mxu1 %v13949_v14 }
0xc693   :  { %11936 = vmatprep.subr.bf16.mxu1 %v12710_v0 }
0xc760   :  { %v11291_v37 = vpop.f32.mrb[78].mxu1 }
0xc761   :  { %v13975_v58 = vadd.f32 %v11291_v37, %v9900_v44  ;;  %v8682_v43 = vpop.f32.mrb[79].mxu1 }
0xc762   :  { %v13977_v45 = vadd.f32 %v9900_v44, %v8682_v43 }
0xc764   :  { %v8766_v47 = vadd.f32 %v8762_v40, %v13977_v45 }
0xc766   :  { %12570 = vtanh.f32 %v8766_v47  ;;  %v9903_v46 = vmul.f32 -1.442695, %v8766_v47 }
0xc768   :  { %12572 = vpow2.f32 %v9903_v46 }
0xc770   :  { %v12571_v5 = vpop.eup %12570 }
0xc771   :  { %8776 = vrot.lane.b32.xlu1 %v12571_v5, %s12713_s20 }
0xc772   :  { %v12573_v50 = vpop.eup %12572 }
0xc773   :  { %v8770_v11 = vadd.f32 1.0, %v12573_v50 }
0xc775   :  { %12574 = vrcp.f32 %v8770_v11 }
0xc77f   :  { %v12575_v49 = vpop.eup %12574 }
0xc780   :  { %v8774_v52 = vmul.f32 0.0, %v12575_v49 }
0xc7e3   :  { %v8777_v53 = vpop.permute.xlu1 %8776 }
0xc7e4   :  { %v8779_v15 = vmul.f32 %v12575_v49, %v8777_v53 }
0xc7e6   :  { %8781 = vrot.lane.b32.xlu0 %v8779_v15, %s12714_s21 }
0xc858   :  { %v8782_v57 = vpop.permute.xlu0 %8781 }
0xc859   :  { %v8784_v55 = vadd.f32 %v8782_v57, %v8774_v52 }
0xc85b   :  { %12576 = vtanh.f32 %v8784_v55  ;;  %v8878_v18 = vrot.slane %v8784_v55, 6 }
0xc865   :  { %v12577_v56 = vpop.eup %12576 }
0xc866   :  { %8787 = vrot.lane.b32.xlu1 %v12577_v56, %s12713_s20 }
0xc8d8   :  { %v8788_v61 = vpop.permute.xlu1 %8787 }
0xc8d9   :  { %v8790_v59 = vmul.f32 %v12575_v49, %v8788_v61 }
0xc8db   :  { %8792 = vrot.lane.b32.xlu0 %v8790_v59, %s12714_s21 }
0xc94d   :  { %v8793_v60 = vpop.permute.xlu0 %8792 }
0xc94e   :  { %11312 = vmatmul.mubr.msk.f32.vlgmr.msra.gmra.mrb[80].mxu1 %vm158_vm2, %v8793_v60 }
0xc94f   :  { %11938 = vmatpush3.bf16.msra.mxu1 %v13946_v34  ;;  %11333 = vmatprep.mubr.msk.f32.mxu1 %vm12711_vm0, %v12712_v1 }
0xc950   :  { %11939 = vmatprep.subr.bf16.mxu1 %v12710_v0 }
0xc953   :  { %11941 = vmatpush3.bf16.msra.mxu1 %v13949_v14 }
0xc954   :  { %11948 = vmatprep.subr.bf16.mxu1 %v12710_v0 }
0xca21   :  { %v8862_v8 = vpop.f32.mrb[80].mxu1 }
0xca22   :  { %v8867_v63 = vrot.slane %v8862_v8, 6  ;;  %v11313_v48 = vpop.f32.mrb[81].mxu1 }
0xca24   :  { %v8869_v2 = vadd.f32 %v8867_v63, %v13977_v45 }
0xca26   :  { %12578 = vtanh.f32 %v8869_v2  ;;  %v9905_v12 = vmul.f32 -1.442695, %v8869_v2 }
0xca28   :  { %12580 = vpow2.f32 %v9905_v12 }
0xca30   :  { %v12579_v4 = vpop.eup %12578 }
0xca31   :  { %8882 = vrot.lane.b32.xlu1 %v12579_v4, %s12713_s20 }
0xca32   :  { %v12581_v6 = vpop.eup %12580 }
0xca33   :  { %v8873_v9 = vadd.f32 1.0, %v12581_v6 }
0xca35   :  { %12582 = vrcp.f32 %v8873_v9 }
0xca3f   :  { %v12583_v10 = vpop.eup %12582 }
0xca40   :  { %v8880_v19 = vmul.f32 %v12583_v10, %v8878_v18 }
0xcaa3   :  { %v8883_v13 = vpop.permute.xlu1 %8882 }
0xcaa4   :  { %v8885_v16 = vmul.f32 %v12583_v10, %v8883_v13 }
0xcaa6   :  { %8887 = vrot.lane.b32.xlu0 %v8885_v16, %s12714_s21 }
0xcb18   :  { %v8888_v20 = vpop.permute.xlu0 %8887 }
0xcb19   :  { %v8890_v21 = vadd.f32 %v8888_v20, %v8880_v19 }
0xcb1b   :  { %12584 = vtanh.f32 %v8890_v21  ;;  %v8985_v38 = vrot.slane %v8890_v21, 6 }
0xcb25   :  { %v12585_v22 = vpop.eup %12584 }
0xcb26   :  { %8893 = vrot.lane.b32.xlu1 %v12585_v22, %s12713_s20 }
0xcb98   :  { %v8894_v23 = vpop.permute.xlu1 %8893 }
0xcb99   :  { %v8896_v24 = vmul.f32 %v12583_v10, %v8894_v23 }
0xcb9b   :  { %v8898_v25 = vrot.slane %v8896_v24, 2 }
0xcb9d   :  { %8899 = vrot.lane.b32.xlu0 %v8898_v25, %s12714_s21 }
0xcc0f   :  { %v8900_v26 = vpop.permute.xlu0 %8899 }
0xcc10   :  { %11323 = vmatmul.mubr.msk.f32.vlgmr.msra.gmra.mrb[86].mxu0 %vm158_vm2, %v8900_v26 }
0xcc11   :  { %11944 = vmatpush3.bf16.msra.mxu0 %v13946_v34  ;;  %11344 = vmatprep.mubr.msk.f32.mxu0 %vm12711_vm0, %v12712_v1 }
0xcc12   :  { %11945 = vmatprep.subr.bf16.mxu0 %v12710_v0 }
0xcc15   :  { %11947 = vmatpush3.bf16.msra.mxu0 %v13949_v14 }
0xcc16   :  { %11954 = vmatprep.subr.bf16.mxu0 %v12710_v0 }
0xcce3   :  { %v8969_v62 = vpop.f32.mrb[86].mxu0 }
0xcce4   :  { %v8974_v27 = vrot.slane %v8969_v62, 4  ;;  %v11324_v28 = vpop.f32.mrb[87].mxu0 }
0xcce6   :  { %v8976_v29 = vadd.f32 %v8974_v27, %v13977_v45 }
0xcce8   :  { %12586 = vtanh.f32 %v8976_v29  ;;  %v9907_v30 = vmul.f32 -1.442695, %v8976_v29 }
0xccea   :  { %12588 = vpow2.f32 %v9907_v30 }
0xccf2   :  { %v12587_v3 = vpop.eup %12586 }
0xccf3   :  { %8989 = vrot.lane.b32.xlu1 %v12587_v3, %s12713_s20 }
0xccf4   :  { %v12589_v31 = vpop.eup %12588 }
0xccf5   :  { %v8980_v32 = vadd.f32 1.0, %v12589_v31 }
0xccf7   :  { %12590 = vrcp.f32 %v8980_v32 }
0xcd01   :  { %v12591_v7 = vpop.eup %12590 }
0xcd02   :  { %v8987_v51 = vmul.f32 %v12591_v7, %v8985_v38 }
0xcd65   :  { %v8990_v33 = vpop.permute.xlu1 %8989 }
0xcd66   :  { %v8992_v35 = vmul.f32 %v12591_v7, %v8990_v33 }
0xcd68   :  { %8994 = vrot.lane.b32.xlu0 %v8992_v35, %s12714_s21 }
0xcdda   :  { %v8995_v36 = vpop.permute.xlu0 %8994 }
0xcddb   :  { %v8997_v39 = vadd.f32 %v8995_v36, %v8987_v51 }
0xcddd   :  { %12592 = vtanh.f32 %v8997_v39  ;;  %v9092_v52 = vrot.slane %v8997_v39, 6 }
0xcde7   :  { %v12593_v41 = vpop.eup %12592 }
0xcde8   :  { %9000 = vrot.lane.b32.xlu1 %v12593_v41, %s12713_s20 }
0xce5a   :  { %v9001_v17 = vpop.permute.xlu1 %9000 }
0xce5b   :  { %v9003_v54 = vmul.f32 %v12591_v7, %v9001_v17 }
0xce5d   :  { %v9005_v40 = vrot.slane %v9003_v54, 4 }
0xce5f   :  { %9006 = vrot.lane.b32.xlu0 %v9005_v40, %s12714_s21 }
0xced1   :  { %v9007_v42 = vpop.permute.xlu0 %9006 }
0xced2   :  { %11334 = vmatmul.mubr.msk.f32.vlgmr.msra.gmra.mrb[82].mxu1 %vm158_vm2, %v9007_v42 }
0xced3   :  { %11950 = vmatpush3.bf16.msra.mxu1 %v13946_v34  ;;  %11355 = vmatprep.mubr.msk.f32.mxu1 %vm12711_vm0, %v12712_v1 }
0xced4   :  { %11951 = vmatprep.subr.bf16.mxu1 %v12710_v0 }
0xced7   :  { %11953 = vmatpush3.bf16.msra.mxu1 %v13949_v14 }
0xced8   :  { %11960 = vmatprep.subr.bf16.mxu1 %v12710_v0 }
0xcfa5   :  { %v9076_v44 = vpop.f32.mrb[82].mxu1 }
0xcfa6   :  { %v9081_v37 = vrot.slane %v9076_v44, 2  ;;  %v11335_v43 = vpop.f32.mrb[83].mxu1 }
0xcfa8   :  { %v9083_v47 = vadd.f32 %v9081_v37, %v13977_v45 }
0xcfaa   :  { %12594 = vtanh.f32 %v9083_v47  ;;  %v9909_v46 = vmul.f32 -1.442695, %v9083_v47 }
0xcfac   :  { %12596 = vpow2.f32 %v9909_v46 }
0xcfb4   :  { %v12595_v5 = vpop.eup %12594 }
0xcfb5   :  { %9096 = vrot.lane.b32.xlu1 %v12595_v5, %s12713_s20 }
0xcfb6   :  { %v12597_v50 = vpop.eup %12596 }
0xcfb7   :  { %v9087_v11 = vadd.f32 1.0, %v12597_v50 }
0xcfb9   :  { %12598 = vrcp.f32 %v9087_v11 }
0xcfc3   :  { %v12599_v49 = vpop.eup %12598 }
0xcfc4   :  { %v9094_v57 = vmul.f32 %v12599_v49, %v9092_v52 }
0xd027   :  { %v9097_v53 = vpop.permute.xlu1 %9096 }
0xd028   :  { %v9099_v15 = vmul.f32 %v12599_v49, %v9097_v53 }
0xd02a   :  { %9101 = vrot.lane.b32.xlu0 %v9099_v15, %s12714_s21 }
0xd09c   :  { %v9102_v55 = vpop.permute.xlu0 %9101 }
0xd09d   :  { %v9104_v56 = vadd.f32 %v9102_v55, %v9094_v57 }
0xd09f   :  { %12600 = vtanh.f32 %v9104_v56  ;;  %v9196_v18 = vrot.slane %v9104_v56, 6 }
0xd0a9   :  { %v12601_v45 = vpop.eup %12600 }
0xd0aa   :  { %9107 = vrot.lane.b32.xlu1 %v12601_v45, %s12713_s20 }
0xd11c   :  { %v9108_v61 = vpop.permute.xlu1 %9107 }
0xd11d   :  { %v9110_v59 = vmul.f32 %v12599_v49, %v9108_v61 }
0xd11f   :  { %v9112_v60 = vrot.slane %v9110_v59, 6 }
0xd121   :  { %9113 = vrot.lane.b32.xlu0 %v9112_v60, %s12714_s21 }
0xd193   :  { %v9114_v8 = vpop.permute.xlu0 %9113 }
0xd194   :  { %11345 = vmatmul.mubr.msk.f32.vlgmr.msra.gmra.mrb[88].mxu0 %vm158_vm2, %v9114_v8 }
0xd195   :  { %11956 = vmatpush3.bf16.msra.mxu0 %v13946_v34  ;;  %11366 = vmatprep.mubr.msk.f32.mxu0 %vm12711_vm0, %v12712_v1 }
0xd196   :  { %11957 = vmatprep.subr.bf16.mxu0 %v12710_v0 }
0xd199   :  { %11959 = vmatpush3.bf16.msra.mxu0 %v13949_v14 }
0xd19a   :  { %11966 = vmatprep.subr.bf16.mxu0 %v12710_v0 }
0xd267   :  { %v9183_v63 = vpop.f32.mrb[88].mxu0 }
0xd268   :  { %v9187_v48 = vadd.f32 %v9183_v63, %v13975_v58  ;;  %v11346_v2 = vpop.f32.mrb[89].mxu0 }
0xd26a   :  { %12602 = vtanh.f32 %v9187_v48  ;;  %v9911_v12 = vmul.f32 -1.442695, %v9187_v48 }
0xd26c   :  { %12604 = vpow2.f32 %v9911_v12 }
0xd274   :  { %v12603_v4 = vpop.eup %12602 }
0xd275   :  { %9200 = vrot.lane.b32.xlu1 %v12603_v4, %s12713_s20 }
0xd276   :  { %v12605_v6 = vpop.eup %12604 }
0xd277   :  { %v9191_v9 = vadd.f32 1.0, %v12605_v6 }
0xd279   :  { %12606 = vrcp.f32 %v9191_v9 }
0xd283   :  { %v12607_v10 = vpop.eup %12606 }
0xd284   :  { %v9198_v19 = vmul.f32 %v12607_v10, %v9196_v18 }
0xd2e7   :  { %v9201_v13 = vpop.permute.xlu1 %9200 }
0xd2e8   :  { %v9203_v16 = vmul.f32 %v12607_v10, %v9201_v13 }
0xd2ea   :  { %9205 = vrot.lane.b32.xlu0 %v9203_v16, %s12714_s21 }
0xd35c   :  { %v9206_v20 = vpop.permute.xlu0 %9205 }
0xd35d   :  { %v9208_v21 = vadd.f32 %v9206_v20, %v9198_v19  ;;  %v9536_v19 = vld [vmem:[%s14124_s5 + $0x8] sm:$0xff]  ;;  %v9537_v20 = vld [vmem:[%s14124_s5 + $0x10] sm:$0xff] }
0xd35f   :  { %12608 = vtanh.f32 %v9208_v21 }
0xd369   :  { %v12609_v22 = vpop.eup %12608 }
0xd36a   :  { %9211 = vrot.lane.b32.xlu1 %v12609_v22, %s12713_s20  ;;  %v9538_v22 = vld [vmem:[%s14124_s5 + $0x18] sm:$0xff] }
0xd3dc   :  { %v9212_v23 = vpop.permute.xlu1 %9211 }
0xd3dd   :  { %v9214_v24 = vmul.f32 %v12607_v10, %v9212_v23  ;;  %v11970_v23 = vpack.c.bf16 %v9538_v22, %v9537_v20 }
0xd3df   :  { %9216 = vrot.lane.b32.xlu0 %v9214_v24, %s12714_s21 }
0xd451   :  { %v9217_v25 = vpop.permute.xlu0 %9216 }
0xd452   :  { %11356 = vmatmul.mubr.msk.f32.vlgmr.msra.gmra.mrb[84].mxu1 %vm158_vm2, %v9217_v25  ;;  %v9622_v25 = vld [vmem:[%s14126_s7] sm:$0xff] }
0xd453   :  { %11962 = vmatpush3.bf16.msra.mxu1 %v13946_v34  ;;  %11377 = vmatprep.mubr.msk.f32.mxu1 %vm12711_vm0, %v12712_v1 }
0xd454   :  { %11963 = vmatprep.subr.bf16.mxu1 %v12710_v0 }
0xd457   :  { %11965 = vmatpush3.bf16.msra.mxu1 %v13949_v14  ;;  %v9302_v14 = vrot.slane %v9208_v21, 6 }
0xd458   :  { %11972 = vmatprep.subr.bf16.mxu1 %v12710_v0 }
0xd525   :  { %v9286_v26 = vpop.f32.mrb[84].mxu1 }
0xd526   :  { %v9291_v62 = vrot.slane %v9286_v26, 6  ;;  %v11357_v27 = vpop.f32.mrb[85].mxu1  ;;  %v9623_v26 = vld [vmem:[%s14126_s7 + $0x8] sm:$0xff] }
0xd527   :  { %v11973_v27 = vpack.c.bf16 %v9623_v26, %v9622_v25 }
0xd528   :  { %v9293_v28 = vadd.f32 %v9291_v62, %v13975_v58  ;;  %v9624_v62 = vld [vmem:[%s14126_s7 + $0x10] sm:$0xff] }
0xd52a   :  { %12610 = vtanh.f32 %v9293_v28  ;;  %v9913_v3 = vmul.f32 -1.442695, %v9293_v28  ;;  %v9625_v28 = vld [vmem:[%s14126_s7 + $0x18] sm:$0xff] }
0xd52c   :  { %12612 = vpow2.f32 %v9913_v3  ;;  %v9626_v3 = vld [vmem:[%s14126_s7 + $0x20] sm:$0xff] }
0xd534   :  { %v12611_v29 = vpop.eup %12610 }
0xd535   :  { %9306 = vrot.lane.b32.xlu1 %v12611_v29, %s12713_s20  ;;  %v11976_v29 = vpack.c.bf16 %v9625_v28, %v9624_v62 }
0xd536   :  { %v12613_v34 = vpop.eup %12612 }
0xd537   :  { %v9297_v30 = vadd.f32 1.0, %v12613_v34  ;;  %v9627_v34 = vld [vmem:[%s14126_s7 + $0x28] sm:$0xff] }
0xd539   :  { %12614 = vrcp.f32 %v9297_v30  ;;  %v11979_v30 = vpack.c.bf16 %v9627_v34, %v9626_v3 }
0xd543   :  { %v12615_v31 = vpop.eup %12614 }
0xd544   :  { %v9304_v33 = vmul.f32 %v12615_v31, %v9302_v14 }
0xd5a7   :  { %v9307_v32 = vpop.permute.xlu1 %9306 }
0xd5a8   :  { %v9309_v7 = vmul.f32 %v12615_v31, %v9307_v32 }
0xd5aa   :  { %9311 = vrot.lane.b32.xlu0 %v9309_v7, %s12714_s21 }
0xd61c   :  { %v9312_v35 = vpop.permute.xlu0 %9311 }
0xd61d   :  { %v9314_v38 = vadd.f32 %v9312_v35, %v9304_v33  ;;  %v9628_v33 = vld [vmem:[%s14126_s7 + $0x30] sm:$0xff]  ;;  %v9629_v35 = vld [vmem:[%s14126_s7 + $0x38] sm:$0xff]  ;;  %s12678_s7 = scalar_lea.vmem %s9720_s18, 32 }
0xd61e   :  { %p12679_p2 = scmp.ne.s32.totalorder %s9720_s18, %s12678_s7  ;;  %p12684_p4 = scmp.lt.s32.totalorder %s12678_s7, %s12678_s7 }
0xd61f   :  { %12616 = vtanh.f32 %v9314_v38  ;;  %v9409_v49 = vrot.slane %v9314_v38, 6  ;;  %v11982_v38 = vpack.c.bf16 %v9629_v35, %v9628_v33 }
0xd620   :  { %p12685_p5 = por %p12684_p4, %p12683_p3 }
0xd622   :  { %p12686_p6 = pnand %p12685_p5, %p12679_p2 }
0xd629   :  { %v12617_v51 = vpop.eup %12616 }
0xd62a   :  { %9317 = vrot.lane.b32.xlu1 %v12617_v51, %s12713_s20  ;;  %v9918_v51 = vld [vmem:[%s14125_s6] ss:$0 sm:$0xff] }
0xd69c   :  { %v9318_v36 = vpop.permute.xlu1 %9317 }
0xd69d   :  { %v9320_v39 = vmul.f32 %v12615_v31, %v9318_v36 }
0xd69f   :  { %v9322_v41 = vrot.slane %v9320_v39, 2 }
0xd6a1   :  { %9323 = vrot.lane.b32.xlu0 %v9322_v41, %s12714_s21  ;;  %v9920_v41 = vld [vmem:[%s14127_s8] ss:$0 sm:$0xff] }
0xd713   :  { %v9324_v17 = vpop.permute.xlu0 %9323 }
0xd714   :  { %11367 = vmatmul.mubr.msk.f32.vlgmr.msra.gmra.mrb[90].mxu0 %vm158_vm2, %v9324_v17 }
0xd715   :  { %11388 = vmatprep.mubr.msk.f32.mxu0 %vm12711_vm0, %v12712_v1 }
0xd7e7   :  { %v9393_v54 = vpop.f32.mrb[90].mxu0 }
0xd7e8   :  { %v9398_v40 = vrot.slane %v9393_v54, 4  ;;  %v11368_v42 = vpop.f32.mrb[91].mxu0 }
0xd7ea   :  { %v9400_v44 = vadd.f32 %v9398_v40, %v13975_v58 }
0xd7ec   :  { %12618 = vtanh.f32 %v9400_v44  ;;  %v9915_v43 = vmul.f32 -1.442695, %v9400_v44 }
0xd7ee   :  { %12620 = vpow2.f32 %v9915_v43 }
0xd7f6   :  { %v12619_v37 = vpop.eup %12618 }
0xd7f7   :  { %9413 = vrot.lane.b32.xlu1 %v12619_v37, %s12713_s20 }
0xd7f8   :  { %v12621_v47 = vpop.eup %12620 }
0xd7f9   :  { %v9404_v5 = vadd.f32 1.0, %v12621_v47 }
0xd7fb   :  { %12622 = vrcp.f32 %v9404_v5 }
0xd805   :  { %v12623_v46 = vpop.eup %12622 }
0xd806   :  { %v9411_v53 = vmul.f32 %v12623_v46, %v9409_v49 }
0xd869   :  { %v9414_v50 = vpop.permute.xlu1 %9413 }
0xd86a   :  { %v9416_v11 = vmul.f32 %v12623_v46, %v9414_v50 }
0xd86c   :  { %9418 = vrot.lane.b32.xlu0 %v9416_v11, %s12714_s21 }
0xd8de   :  { %v9419_v15 = vpop.permute.xlu0 %9418 }
0xd8df   :  { %v9421_v52 = vadd.f32 %v9419_v15, %v9411_v53 }
0xd8e1   :  { %12624 = vtanh.f32 %v9421_v52 }
0xd8eb   :  { %v12625_v57 = vpop.eup %12624 }
0xd8ec   :  { %9424 = vrot.lane.b32.xlu1 %v12625_v57, %s12713_s20 }
0xd95e   :  { %v9425_v55 = vpop.permute.xlu1 %9424 }
0xd95f   :  { %v9427_v56 = vmul.f32 %v12623_v46, %v9425_v55 }
0xd961   :  { %v9429_v45 = vrot.slane %v9427_v56, 4 }
0xd963   :  { %9430 = vrot.lane.b32.xlu0 %v9429_v45, %s12714_s21 }
0xd9d5   :  { %v9431_v61 = vpop.permute.xlu0 %9430 }
0xd9d6   :  { %11378 = vmatmul.mubr.msk.f32.vlgmr.msra.gmra.mrb[86].mxu1 %vm158_vm2, %v9431_v61 }
0xd9d7   :  { %11407 = vmatprep.mubr.msk.f32.mxu1 %vm12711_vm0, %v12712_v1  ;;  %v9516_v1 = vrot.slane %v9421_v52, 6  ;;  %11974 = vmatpush3.bf16.msra.mxu1 %v11973_v27 }
0xd9d8   :  { %11975 = vmatprep.subr.bf16.mxu1 %v12710_v0 }
0xd9db   :  { %11977 = vmatpush3.bf16.msra.mxu1 %v11976_v29 }
0xd9dc   :  { %11978 = vmatprep.subr.bf16.mxu1 %v12710_v0 }
0xd9df   :  { %11980 = vmatpush3.bf16.msra.mxu1 %v11979_v30 }
0xd9e0   :  { %11981 = vmatprep.subr.bf16.mxu1 %v12710_v0 }
0xd9e3   :  { %11983 = vmatpush3.bf16.msra.mxu1 %v11982_v38 }
0xdaa9   :  { %v9500_v59 = vpop.f32.mrb[86].mxu1 }
0xdaaa   :  { %v9505_v60 = vrot.slane %v9500_v59, 2  ;;  %v11379_v8 = vpop.f32.mrb[87].mxu1 }
0xdaac   :  { %v9507_v63 = vadd.f32 %v9505_v60, %v13975_v58  ;;  %v9535_v58 = vld [vmem:[%s14124_s5] sm:$0xff] }
0xdaad   :  { %v11967_v21 = vpack.c.bf16 %v9536_v19, %v9535_v58 }
0xdaae   :  { %12626 = vtanh.f32 %v9507_v63  ;;  %v9917_v2 = vmul.f32 -1.442695, %v9507_v63 }
0xdaaf   :  { %11968 = vmatpush3.bf16.msra.mxu0 %v11967_v21 }
0xdab0   :  { %12628 = vpow2.f32 %v9917_v2  ;;  %11969 = vmatprep.subr.bf16.mxu0 %v12710_v0 }
0xdab3   :  { %11971 = vmatpush3.bf16.msra.mxu0 %v11970_v23 }
0xdab8   :  { %v12627_v48 = vpop.eup %12626 }
0xdab9   :  { %9520 = vrot.lane.b32.xlu1 %v12627_v48, %s12713_s20 }
0xdaba   :  { %v12629_v4 = vpop.eup %12628 }
0xdabb   :  { %v9511_v12 = vadd.f32 1.0, %v12629_v4 }
0xdabd   :  { %12630 = vrcp.f32 %v9511_v12 }
0xdac7   :  { %v12631_v6 = vpop.eup %12630 }
0xdac8   :  { %v9518_v13 = vmul.f32 %v12631_v6, %v9516_v1 }
0xdb2b   :  { %v9521_v9 = vpop.permute.xlu1 %9520 }
0xdb2c   :  { %v9523_v10 = vmul.f32 %v12631_v6, %v9521_v9 }
0xdb2e   :  { %9525 = vrot.lane.b32.xlu0 %v9523_v10, %s12714_s21 }
0xdba0   :  { %v9526_v16 = vpop.permute.xlu0 %9525 }
0xdba1   :  { %v9528_v18 = vadd.f32 %v9526_v16, %v9518_v13 }
0xdba3   :  { %12632 = vtanh.f32 %v9528_v18 }
0xdbad   :  { %v12633_v24 = vpop.eup %12632 }
0xdbae   :  { %9531 = vrot.lane.b32.xlu1 %v12633_v24, %s12713_s20 }
0xdc20   :  { %v9532_v31 = vpop.permute.xlu1 %9531 }
0xdc21   :  { %v9534_v32 = vmul.f32 %v12631_v6, %v9532_v31 }
0xdc23   :  { %v9547_v7 = vrot.slane %v9534_v32, 6 }
0xdc25   :  { %9548 = vrot.lane.b32.xlu0 %v9547_v7, %s12714_s21 }
0xdc97   :  { %v9549_v14 = vpop.permute.xlu0 %9548 }
0xdc98   :  { %11389 = vmatmul.mubr.msk.f32.vlgmr.msra.gmra.mrb[92].mxu0 %vm158_vm2, %v9549_v14 }
0xdd6b   :  { %v9618_v0 = vpop.f32.mrb[92].mxu0 }
0xdd6c   :  { %v9619_v36 = vadd.f32 %v9918_v51, %v9618_v0  ;;  %v11390_v39 = vpop.f32.mrb[93].mxu0 }
0xdd6e   :  { %11408 = vmatmul.mubr.msk.f32.vlgmr.msra.gmra.mrb[88].mxu1 %vm9637_vm6, %v9619_v36 }
0xde41   :  { %v9707_v17 = vpop.f32.mrb[88].mxu1 }
0xde42   :  { %v9708_v54 = vadd.f32 %v9920_v41, %v9707_v17  ;;  %v11409_v40 = vpop.f32.mrb[89].mxu1 }
0xde44   :  { %9712 = vst.msk [vmem:[#allocation7] sm:$0x3] %vm9711_vm7, %v9708_v54 }
0xde45   :  { %12689 = shalt.err (!%p12686_p6)
}
0xde46   :  { %s12690_s0 = scalar_lea.hbm %s14128_s9, 32 }
0xde47   :  { %p12691_p7 = scmp.ne.s32.totalorder %s14128_s9, %s12690_s0  ;;  %p12694_p8 = scmp.lt.u32.totalorder %s12690_s0, %s14128_s9 }
0xde49   :  { %p12696_p9 = pnand %p12694_p8, %p12691_p7 }
0xde4b   :  { %12699 = shalt.err (!%p12696_p9)
}
0xde4c   :  { %9722 = dma.vmem_to_hbm [thread:$0]  %s9720_s18, 32, %s14128_s9, [#allocation4]  }
0xde4d   :  { %12704 = dma.done.wait [#allocation4], 32  }
0xde4e   :  { %12705 = vsyncadd [#allocation4], 4294967264 }
0xde4f   :  { %9726 = vsyncpa [#allocation3], 1 }
0xde50   :  { %9727 = vsyncpa [#allocation6], 1 }
0xde51   :  { %9728 = vsyncpa [#allocation4], 1 }

</bundles_post_ra>
